<compile_context>
chip_gen: v7x
topology: tpu7x:2x2x1
jax: 0.10.0
libtpu: 0.0.40
codegen_flags: <defaults>
</compile_context>

<pallas_src>
import numpy as np
import jax
import jax.numpy as jnp
from jax import lax
from jax.experimental import pallas as pl
from jax.experimental.pallas import tpu as pltpu


def _vspec():
    return pl.BlockSpec(memory_space=pltpu.MemorySpace.VMEM)


def _sspec():
    return pl.BlockSpec(memory_space=pltpu.MemorySpace.SMEM)


# ---------------------------------------------------------------------------
# In-kernel helpers (all planes transposed: (W, H), H on the 128-lane axis)
# ---------------------------------------------------------------------------
def _fused_max_argmax(x, k, wv, hv):
    """Stride-1 kxk window max with fused first-max argmax.

    Returns (m, a_di, a_dj): window max and in-window (H, W) offsets of the first
    maximum in PyTorch's window iteration order (H offset major, strict '>').
    """
    m = jnp.full((wv, hv), -jnp.inf, jnp.float32)
    a_di = jnp.zeros((wv, hv), jnp.float32)
    a_dj = jnp.zeros((wv, hv), jnp.float32)
    for di in range(k):                       # H offset (lane axis)   - outer
        xs = x[:, di:di + hv]                 # hoisted lane-axis shift
        for dj in range(k):                   # W offset (sublane axis) - inner
            cand = xs[dj:dj + wv, :]
            upd = cand > m                    # strict '>' keeps the first max
            m = jnp.where(upd, cand, m)
            a_di = jnp.where(upd, float(di), a_di)
            a_dj = jnp.where(upd, float(dj), a_dj)
    return m, a_di, a_dj


def _pad2d(x, pw, ph):
    """Zero-pad a small (W, H) plane by pw sublanes / ph lanes on each side."""
    wd, hd = x.shape
    z = jnp.zeros((wd, ph), x.dtype)
    x = jnp.concatenate([z, x, z], axis=1)
    z2 = jnp.zeros((pw, hd + 2 * ph), x.dtype)
    return jnp.concatenate([z2, x, z2], axis=0)


# ---------------------------------------------------------------------------
# Fused forward kernel
# ---------------------------------------------------------------------------
def _autoenc_kernel(x_ref, t1_ref, t2_ref, bscat_ref, ps_ref, rsel1_ref,
                    csel1_ref, csel2_ref, c2w_ref, t1w_ref, scal_ref,
                    encw_ref, llwt_ref, llb_ref, out_ref, desc_ref):
    f32 = jnp.float32

    # ---- conv1 as banded-Toeplitz matmuls on the MXU: (39,200) -> (36,256) ----
    # out = sum_dj x[dj:dj+36, :] @ T1[dj]   (all H-axis taps folded into T1)
    h1 = jnp.dot(x_ref[0:36, :], t1_ref[0], preferred_element_type=f32)
    for dj in range(1, 4):
        h1 = h1 + jnp.dot(x_ref[dj:dj + 36, :], t1_ref[dj],
                          preferred_element_type=f32)
    h1 = h1 + scal_ref[0]                    # conv1 bias; cols >= 195 never used

    # ---- pool1: MaxPool2d(5, 4) with indices (fused max/argmax) ----
    m1, adi1, adj1 = _fused_max_argmax(h1, 5, 32, 252)
    s1 = jnp.concatenate([m1, adi1, adj1], axis=0)                   # (96, 252)
    p1 = jnp.dot(rsel1_ref[...], s1, preferred_element_type=f32)     # (24, 252)
    p1 = jnp.dot(p1, csel1_ref[...], preferred_element_type=f32)     # (24, 48)
    v1 = p1[0:8, :]                          # pooled values              (8, 48)
    dhp1 = p1[8:16, :]                       # in-window H offsets 0..4 (exact)
    dwp1 = p1[16:24, :]                      # in-window W offsets 0..4 (exact)

    # ---- conv2 + relu on the VPU (tiny): (8,48) -> (7,45) ----
    h2 = jnp.zeros((7, 45), f32)
    for di in range(4):
        xs = v1[:, di:di + 45]
        for dj in range(2):
            h2 = h2 + c2w_ref[di * 2 + dj] * xs[dj:dj + 7, :]
    h2 = jnp.maximum(h2 + scal_ref[1], 0.0)

    # ---- pool2: MaxPool2d(4, 8) with indices ----
    m2, adi2, adj2 = _fused_max_argmax(h2, 4, 4, 42)
    s2 = jnp.concatenate([m2[0:1, :], adi2[0:1, :], adj2[0:1, :]], axis=0)
    p2 = jnp.dot(s2, csel2_ref[...], preferred_element_type=f32)     # (3, 6)
    v2 = p2[0:1, :]                          # pooled values (1, 6) == view(1, 6)
    dh2 = p2[1:2, :]                         # in-window H offsets 0..3
    dw2 = p2[2:3, :]                         # in-window W offsets 0..3

    # ---- encoder Linear(6->2), descriptor, ll Linear(2->6) on the VPU ----
    encw = encw_ref[...]
    e0 = jnp.sum(v2 * encw[0:1, :], axis=1, keepdims=True) + scal_ref[4]
    e1 = jnp.sum(v2 * encw[1:2, :], axis=1, keepdims=True) + scal_ref[5]
    lane = lax.broadcasted_iota(jnp.int32, (1, 128), 1)
    desc_ref[...] = jnp.where(lane == 0, e0, jnp.where(lane == 1, e1, 0.0))
    llwt = llwt_ref[...]                                             # ll.weight.T
    ll_out = e0 * llwt[0:1, :] + e1 * llwt[1:2, :] + llb_ref[...]    # (1, 6)

    # ---- t_pool1: MaxUnpool2d(4, 8) -> (7, 45); windows are disjoint ----
    wpl = lax.broadcasted_iota(jnp.int32, (7, 45), 0).astype(f32)
    hpl = lax.broadcasted_iota(jnp.int32, (7, 45), 1).astype(f32)
    u1 = jnp.zeros((7, 45), f32)
    for j in range(6):
        hit = (wpl == dw2[0:1, j:j + 1]) & (hpl == float(8 * j) + dh2[0:1, j:j + 1])
        u1 = u1 + jnp.where(hit, ll_out[0:1, j:j + 1], 0.0)

    # ---- t_conv1 + relu (tiny, VPU): zero-pad + flipped-kernel taps ----
    up = _pad2d(u1, 1, 3)                    # (9, 51)
    d1 = jnp.zeros((8, 48), f32)
    for di in range(4):
        xs = up[:, di:di + 48]
        for dj in range(2):
            d1 = d1 + t1w_ref[di * 2 + dj] * xs[dj:dj + 8, :]
    d1 = jnp.maximum(d1 + scal_ref[2], 0.0)

    # ---- t_pool2 collision mask (pool1 windows overlap: k=5 > s=4) ----------
    # PyTorch overwrites in row-major pooled order; zero every element whose
    # target cell is re-claimed by a later pooled element, then a sum-scatter is
    # exact.  Targets packed into one exact integer code (base 16 keeps the
    # (dw, dh) components separable under the +-4 window shifts).
    code = 16.0 * dwp1 + dhp1
    ci = lax.broadcasted_iota(jnp.int32, (8, 48), 0)
    code_o1 = jnp.concatenate(               # code of neighbour (c, o+1)
        [code[:, 1:], jnp.full((8, 1), -1000.0, f32)], axis=1)
    nbrs = (                                 # later claimants, delta = 64*dc + 4*do
        (pltpu.roll(code, 7, axis=0), ci < 7, 64.0),       # (c+1, o  )
        (pltpu.roll(code_o1, 1, axis=0), ci > 0, -60.0),   # (c-1, o+1)
        (code_o1, None, 4.0),                              # (c  , o+1)
        (pltpu.roll(code_o1, 7, axis=0), ci < 7, 68.0),    # (c+1, o+1)
    )
    lose = None
    for nb, valid, delta in nbrs:
        hit = nb == code - delta
        if valid is not None:
            hit = hit & valid
        lose = hit if lose is None else (lose | hit)
    dvals = jnp.where(lose, 0.0, d1)

    # ---- t_pool2 scatter + t_conv2 + sigmoid, all on the MXU ----------------
    # Gbig[8*dw + c, 48*d + o] = dvals[c, o]  iff  (dwp1, dhp1)[c, o] == (dw, d)
    col_blocks = []
    for d in range(5):
        rows = [jnp.where((dwp1 == float(dw)) & (dhp1 == float(d)), dvals, 0.0)
                for dw in range(5)]
        col_blocks.append(jnp.concatenate(rows, axis=0))             # (40, 48)
    gbig = jnp.concatenate(col_blocks, axis=1)                       # (40, 240)

    y = jnp.dot(gbig, bscat_ref[...], preferred_element_type=f32)    # (40, 256)
    # PS places target rows (4c + dw) AND pre-applies the 4 sublane taps of
    # t_conv2 (its W-direction zero padding folded in) -> 4 aligned row blocks.
    ust = jnp.dot(ps_ref[...], y, preferred_element_type=f32)        # (160, 256)
    z = jnp.dot(ust[0:40, :], t2_ref[0], preferred_element_type=f32)
    for dj in range(1, 4):
        z = z + jnp.dot(ust[40 * dj:40 * dj + 40, :], t2_ref[dj],
                        preferred_element_type=f32)
    z = z + scal_ref[3]
    out_ref[...] = 0.5 * (jnp.tanh(0.5 * z) + 1.0)   # stable sigmoid on the EUP


_fused = pl.pallas_call(
    _autoenc_kernel,
    out_shape=(jax.ShapeDtypeStruct((40, 256), jnp.float32),   # lane-dense out plane
               jax.ShapeDtypeStruct((1, 128), jnp.float32)),   # lane-dense descriptor
    in_specs=[_vspec()] * 8 + [_sspec()] * 3 + [_vspec()] * 3,
    out_specs=(_vspec(), _vspec()),
)


# ---------------------------------------------------------------------------
# Constant (weight-dependent and 0/1 selection) matrices, built once at init
# ---------------------------------------------------------------------------
def _build_constants(conv1_w, t2_w_flipped):
    c1 = np.asarray(conv1_w, np.float32)                  # (6, 4)
    wf2 = np.asarray(t2_w_flipped, np.float32)            # (6, 4), already flipped

    # conv1: out = sum_dj x[dj:dj+36, :] @ T1[dj]; T1[dj][hin,hout] = c1[hin-hout,dj]
    t1 = np.zeros((4, 200, 256), np.float32)
    for dj in range(4):
        for hout in range(195):
            for di in range(6):
                t1[dj, hout + di, hout] = c1[di, dj]

    # t_conv2 with its (5, 3) zero padding folded in:
    # out = sum_dj U[dj] @ T2[dj]; T2[dj][hin, hout] = wf2[hin - hout + 5, dj]
    t2 = np.zeros((4, 256, 256), np.float32)
    for dj in range(4):
        for hout in range(200):
            for di in range(6):
                hin = hout + di - 5
                if 0 <= hin < 195:
                    t2[dj, hin, hout] = wf2[di, dj]

    # unpool2 lane scatter: B[48*d + o, 4*o + d] = 1
    bscat = np.zeros((240, 256), np.float32)
    for d in range(5):
        for o in range(48):
            bscat[48 * d + o, 4 * o + d] = 1.0

    # unpool2 row placement fused with the 4 sublane taps of t_conv2:
    # PS[40*dj + w, 8*dw + c] = 1  iff  w + dj - 3 == 4*c + dw   (w <= 38)
    ps = np.zeros((160, 40), np.float32)
    for dj in range(4):
        for w in range(39):
            v = w + dj - 3
            if 0 <= v <= 35:
                for dw in range(5):
                    c4 = v - dw
                    if c4 >= 0 and c4 % 4 == 0 and c4 // 4 <= 7:
                        ps[40 * dj + w, 8 * dw + c4 // 4] = 1.0

    # pool1 fused subsample: rows 0,4,..,28 of [m; a_di; a_dj] then cols 0,4,..,188
    rsel1 = np.zeros((24, 96), np.float32)
    for blk in range(3):
        for i in range(8):
            rsel1[8 * blk + i, 32 * blk + 4 * i] = 1.0
    csel1 = np.zeros((252, 48), np.float32)
    for j in range(48):
        csel1[4 * j, j] = 1.0

    # pool2 column subsample: cols 0,8,..,40
    csel2 = np.zeros((42, 6), np.float32)
    for j in range(6):
        csel2[8 * j, j] = 1.0

    return t1, t2, bscat, ps, rsel1, csel1, csel2


# ---------------------------------------------------------------------------
# Parameters (PyTorch-like uniform init), packed into kernel-ready form once
# ---------------------------------------------------------------------------
def init_params(key):
    ks = jax.random.split(key, 12)

    def u(k, shape, fan_in):
        bound = float(fan_in) ** -0.5
        return jax.random.uniform(k, shape, jnp.float32, -bound, bound)

    conv1_w, conv1_b = u(ks[0], (6, 4), 24), u(ks[1], (), 24)
    conv2_w, conv2_b = u(ks[2], (4, 2), 8), u(ks[3], (), 8)
    enc_w, enc_b = u(ks[4], (2, 6), 6), u(ks[5], (2,), 6)
    ll_w, ll_b = u(ks[6], (6, 2), 2), u(ks[7], (6,), 2)
    t1_w, t1_b = u(ks[8], (4, 2), 8), u(ks[9], (), 8)
    t2_w, t2_b = u(ks[10], (6, 4), 24), u(ks[11], (), 24)

    t1c, t2c, bscat, ps, rsel1, csel1, csel2 = _build_constants(
        np.asarray(conv1_w), np.asarray(t2_w)[::-1, ::-1])

    return {
        "t1": jnp.asarray(t1c),
        "t2": jnp.asarray(t2c),
        "bscat": jnp.asarray(bscat),
        "ps": jnp.asarray(ps),
        "rsel1": jnp.asarray(rsel1),
        "csel1": jnp.asarray(csel1),
        "csel2": jnp.asarray(csel2),
        "c2w": conv2_w.reshape(-1),                       # (8,)  SMEM
        "t1w": t1_w[::-1, ::-1].reshape(-1),              # (8,)  SMEM, pre-flipped
        "scal": jnp.stack(                                # (6,)  SMEM
            [conv1_b, conv2_b, t1_b, t2_b, enc_b[0], enc_b[1]]),
        "encw": enc_w,                                    # (2, 6)
        "llwT": ll_w.T,                                   # (2, 6)
        "llb": ll_b.reshape(1, 6),                        # (1, 6)
    }


@jax.jit
def conv_autoencoder_forward(x_nchw, params):
    x_t = jnp.transpose(x_nchw[0, 0])                     # (39, 200): H on lanes
    out_t, desc = _fused(
        x_t, params["t1"], params["t2"], params["bscat"], params["ps"],
        params["rsel1"], params["csel1"], params["csel2"],
        params["c2w"], params["t1w"], params["scal"],
        params["encw"], params["llwT"], params["llb"])
    out = jnp.transpose(out_t[:39, :200])[None, None]     # (1, 1, 200, 39)
    return out, desc[:, :2]


if __name__ == "__main__":
    key = jax.random.PRNGKey(0)
    kx, kp = jax.random.split(key)
    # The module's hardcoded view(x.size(0), 6) pins the input to (1, 1, 200, 39).
    x = jax.random.normal(kx, (1, 1, 200, 39), dtype=jnp.float32)
    params = init_params(kp)

    out, descriptor = conv_autoencoder_forward(x, params)
    out = jax.block_until_ready(out)
    descriptor = jax.block_until_ready(descriptor)

    assert out.shape == (1, 1, 200, 39) and out.dtype == jnp.float32
    assert descriptor.shape == (1, 2)
    assert bool(jnp.all(jnp.isfinite(out)))
    assert bool(jnp.all((out >= 0.0) & (out <= 1.0)))
    assert bool(jnp.all(jnp.isfinite(descriptor)))
    print("KERNEL_OK")
</pallas_src>

<mosaic_0001>
module attributes {stable_mosaic.version = 11 : i64} {
  func.func @_autoenc_kernel(%arg0: memref<39x200xf32, #tpu.memory_space<vmem>>, %arg1: memref<4x200x256xf32, #tpu.memory_space<vmem>>, %arg2: memref<4x256x256xf32, #tpu.memory_space<vmem>>, %arg3: memref<240x256xf32, #tpu.memory_space<vmem>>, %arg4: memref<160x40xf32, #tpu.memory_space<vmem>>, %arg5: memref<24x96xf32, #tpu.memory_space<vmem>>, %arg6: memref<252x48xf32, #tpu.memory_space<vmem>>, %arg7: memref<42x6xf32, #tpu.memory_space<vmem>>, %arg8: memref<8xf32, #tpu.memory_space<smem>>, %arg9: memref<8xf32, #tpu.memory_space<smem>>, %arg10: memref<6xf32, #tpu.memory_space<smem>>, %arg11: memref<2x6xf32, #tpu.memory_space<vmem>>, %arg12: memref<2x6xf32, #tpu.memory_space<vmem>>, %arg13: memref<1x6xf32, #tpu.memory_space<vmem>>, %arg14: memref<40x256xf32, #tpu.memory_space<vmem>>, %arg15: memref<1x128xf32, #tpu.memory_space<vmem>>) attributes {dimension_semantics = [], scalar_prefetch = 0 : i64, scratch_operands = 0 : i64, tpu.core_type = #tpu.core_type<tc>} {
    %c0 = arith.constant 0 : index
    %c0_0 = arith.constant 0 : index
    %0 = vector.load %arg0[%c0, %c0_0] : memref<39x200xf32, #tpu.memory_space<vmem>>, vector<36x200xf32>
    %c0_1 = arith.constant 0 : index
    %c0_2 = arith.constant 0 : index
    %c0_3 = arith.constant 0 : index
    %1 = vector.load %arg1[%c0_1, %c0_2, %c0_3] : memref<4x200x256xf32, #tpu.memory_space<vmem>>, vector<1x200x256xf32>
    %2 = vector.shape_cast %1 : vector<1x200x256xf32> to vector<200x256xf32>
    %cst = arith.constant dense<0.000000e+00> : vector<36x256xf32>
    %3 = tpu.matmul %0, %2, %cst {dimension_numbers = #tpu.dot_dimension_numbers<[1], [0], [0], [1], [0, 0, 1, 1], [], []>} : vector<36x200xf32>, vector<200x256xf32>, vector<36x256xf32> -> vector<36x256xf32>
    %c1 = arith.constant 1 : index
    %c0_4 = arith.constant 0 : index
    %4 = vector.load %arg0[%c1, %c0_4] : memref<39x200xf32, #tpu.memory_space<vmem>>, vector<36x200xf32>
    %c1_5 = arith.constant 1 : index
    %c0_6 = arith.constant 0 : index
    %c0_7 = arith.constant 0 : index
    %5 = vector.load %arg1[%c1_5, %c0_6, %c0_7] : memref<4x200x256xf32, #tpu.memory_space<vmem>>, vector<1x200x256xf32>
    %6 = vector.shape_cast %5 : vector<1x200x256xf32> to vector<200x256xf32>
    %cst_8 = arith.constant dense<0.000000e+00> : vector<36x256xf32>
    %7 = tpu.matmul %4, %6, %cst_8 {dimension_numbers = #tpu.dot_dimension_numbers<[1], [0], [0], [1], [0, 0, 1, 1], [], []>} : vector<36x200xf32>, vector<200x256xf32>, vector<36x256xf32> -> vector<36x256xf32>
    %8 = arith.addf %3, %7 : vector<36x256xf32>
    %c2 = arith.constant 2 : index
    %c0_9 = arith.constant 0 : index
    %9 = vector.load %arg0[%c2, %c0_9] : memref<39x200xf32, #tpu.memory_space<vmem>>, vector<36x200xf32>
    %c2_10 = arith.constant 2 : index
    %c0_11 = arith.constant 0 : index
    %c0_12 = arith.constant 0 : index
    %10 = vector.load %arg1[%c2_10, %c0_11, %c0_12] : memref<4x200x256xf32, #tpu.memory_space<vmem>>, vector<1x200x256xf32>
    %11 = vector.shape_cast %10 : vector<1x200x256xf32> to vector<200x256xf32>
    %cst_13 = arith.constant dense<0.000000e+00> : vector<36x256xf32>
    %12 = tpu.matmul %9, %11, %cst_13 {dimension_numbers = #tpu.dot_dimension_numbers<[1], [0], [0], [1], [0, 0, 1, 1], [], []>} : vector<36x200xf32>, vector<200x256xf32>, vector<36x256xf32> -> vector<36x256xf32>
    %13 = arith.addf %8, %12 : vector<36x256xf32>
    %c3 = arith.constant 3 : index
    %c0_14 = arith.constant 0 : index
    %14 = vector.load %arg0[%c3, %c0_14] : memref<39x200xf32, #tpu.memory_space<vmem>>, vector<36x200xf32>
    %c3_15 = arith.constant 3 : index
    %c0_16 = arith.constant 0 : index
    %c0_17 = arith.constant 0 : index
    %15 = vector.load %arg1[%c3_15, %c0_16, %c0_17] : memref<4x200x256xf32, #tpu.memory_space<vmem>>, vector<1x200x256xf32>
    %16 = vector.shape_cast %15 : vector<1x200x256xf32> to vector<200x256xf32>
    %cst_18 = arith.constant dense<0.000000e+00> : vector<36x256xf32>
    %17 = tpu.matmul %14, %16, %cst_18 {dimension_numbers = #tpu.dot_dimension_numbers<[1], [0], [0], [1], [0, 0, 1, 1], [], []>} : vector<36x200xf32>, vector<200x256xf32>, vector<36x256xf32> -> vector<36x256xf32>
    %18 = arith.addf %13, %17 : vector<36x256xf32>
    %c0_19 = arith.constant 0 : index
    %19 = memref.load %arg10[%c0_19] : memref<6xf32, #tpu.memory_space<smem>>
    %20 = vector.broadcast %19 : f32 to vector<36x256xf32>
    %21 = arith.addf %18, %20 : vector<36x256xf32>
    %cst_20 = arith.constant 0xFF800000 : f32
    %22 = vector.broadcast %cst_20 : f32 to vector<32x252xf32>
    %cst_21 = arith.constant 0.000000e+00 : f32
    %23 = vector.broadcast %cst_21 : f32 to vector<32x252xf32>
    %cst_22 = arith.constant 0.000000e+00 : f32
    %24 = vector.broadcast %cst_22 : f32 to vector<32x252xf32>
    %25 = vector.extract_strided_slice %21 {offsets = [0, 0], sizes = [36, 252], strides = [1, 1]} : vector<36x256xf32> to vector<36x252xf32>
    %26 = vector.extract_strided_slice %25 {offsets = [0, 0], sizes = [32, 252], strides = [1, 1]} : vector<36x252xf32> to vector<32x252xf32>
    %27 = arith.cmpf ogt, %26, %22 : vector<32x252xf32>
    %28 = arith.select %27, %26, %22 : vector<32x252xi1>, vector<32x252xf32>
    %cst_23 = arith.constant 0.000000e+00 : f32
    %29 = vector.broadcast %cst_23 : f32 to vector<32x252xf32>
    %30 = arith.select %27, %29, %23 : vector<32x252xi1>, vector<32x252xf32>
    %cst_24 = arith.constant 0.000000e+00 : f32
    %31 = vector.broadcast %cst_24 : f32 to vector<32x252xf32>
    %32 = arith.select %27, %31, %24 : vector<32x252xi1>, vector<32x252xf32>
    %33 = vector.extract_strided_slice %25 {offsets = [1, 0], sizes = [32, 252], strides = [1, 1]} : vector<36x252xf32> to vector<32x252xf32>
    %34 = arith.cmpf ogt, %33, %28 : vector<32x252xf32>
    %35 = arith.select %34, %33, %28 : vector<32x252xi1>, vector<32x252xf32>
    %cst_25 = arith.constant 0.000000e+00 : f32
    %36 = vector.broadcast %cst_25 : f32 to vector<32x252xf32>
    %37 = arith.select %34, %36, %30 : vector<32x252xi1>, vector<32x252xf32>
    %cst_26 = arith.constant 1.000000e+00 : f32
    %38 = vector.broadcast %cst_26 : f32 to vector<32x252xf32>
    %39 = arith.select %34, %38, %32 : vector<32x252xi1>, vector<32x252xf32>
    %40 = vector.extract_strided_slice %25 {offsets = [2, 0], sizes = [32, 252], strides = [1, 1]} : vector<36x252xf32> to vector<32x252xf32>
    %41 = arith.cmpf ogt, %40, %35 : vector<32x252xf32>
    %42 = arith.select %41, %40, %35 : vector<32x252xi1>, vector<32x252xf32>
    %cst_27 = arith.constant 0.000000e+00 : f32
    %43 = vector.broadcast %cst_27 : f32 to vector<32x252xf32>
    %44 = arith.select %41, %43, %37 : vector<32x252xi1>, vector<32x252xf32>
    %cst_28 = arith.constant 2.000000e+00 : f32
    %45 = vector.broadcast %cst_28 : f32 to vector<32x252xf32>
    %46 = arith.select %41, %45, %39 : vector<32x252xi1>, vector<32x252xf32>
    %47 = vector.extract_strided_slice %25 {offsets = [3, 0], sizes = [32, 252], strides = [1, 1]} : vector<36x252xf32> to vector<32x252xf32>
    %48 = arith.cmpf ogt, %47, %42 : vector<32x252xf32>
    %49 = arith.select %48, %47, %42 : vector<32x252xi1>, vector<32x252xf32>
    %cst_29 = arith.constant 0.000000e+00 : f32
    %50 = vector.broadcast %cst_29 : f32 to vector<32x252xf32>
    %51 = arith.select %48, %50, %44 : vector<32x252xi1>, vector<32x252xf32>
    %cst_30 = arith.constant 3.000000e+00 : f32
    %52 = vector.broadcast %cst_30 : f32 to vector<32x252xf32>
    %53 = arith.select %48, %52, %46 : vector<32x252xi1>, vector<32x252xf32>
    %54 = vector.extract_strided_slice %25 {offsets = [4, 0], sizes = [32, 252], strides = [1, 1]} : vector<36x252xf32> to vector<32x252xf32>
    %55 = arith.cmpf ogt, %54, %49 : vector<32x252xf32>
    %56 = arith.select %55, %54, %49 : vector<32x252xi1>, vector<32x252xf32>
    %cst_31 = arith.constant 0.000000e+00 : f32
    %57 = vector.broadcast %cst_31 : f32 to vector<32x252xf32>
    %58 = arith.select %55, %57, %51 : vector<32x252xi1>, vector<32x252xf32>
    %cst_32 = arith.constant 4.000000e+00 : f32
    %59 = vector.broadcast %cst_32 : f32 to vector<32x252xf32>
    %60 = arith.select %55, %59, %53 : vector<32x252xi1>, vector<32x252xf32>
    %61 = vector.extract_strided_slice %21 {offsets = [0, 1], sizes = [36, 252], strides = [1, 1]} : vector<36x256xf32> to vector<36x252xf32>
    %62 = vector.extract_strided_slice %61 {offsets = [0, 0], sizes = [32, 252], strides = [1, 1]} : vector<36x252xf32> to vector<32x252xf32>
    %63 = arith.cmpf ogt, %62, %56 : vector<32x252xf32>
    %64 = arith.select %63, %62, %56 : vector<32x252xi1>, vector<32x252xf32>
    %cst_33 = arith.constant 1.000000e+00 : f32
    %65 = vector.broadcast %cst_33 : f32 to vector<32x252xf32>
    %66 = arith.select %63, %65, %58 : vector<32x252xi1>, vector<32x252xf32>
    %cst_34 = arith.constant 0.000000e+00 : f32
    %67 = vector.broadcast %cst_34 : f32 to vector<32x252xf32>
    %68 = arith.select %63, %67, %60 : vector<32x252xi1>, vector<32x252xf32>
    %69 = vector.extract_strided_slice %61 {offsets = [1, 0], sizes = [32, 252], strides = [1, 1]} : vector<36x252xf32> to vector<32x252xf32>
    %70 = arith.cmpf ogt, %69, %64 : vector<32x252xf32>
    %71 = arith.select %70, %69, %64 : vector<32x252xi1>, vector<32x252xf32>
    %cst_35 = arith.constant 1.000000e+00 : f32
    %72 = vector.broadcast %cst_35 : f32 to vector<32x252xf32>
    %73 = arith.select %70, %72, %66 : vector<32x252xi1>, vector<32x252xf32>
    %cst_36 = arith.constant 1.000000e+00 : f32
    %74 = vector.broadcast %cst_36 : f32 to vector<32x252xf32>
    %75 = arith.select %70, %74, %68 : vector<32x252xi1>, vector<32x252xf32>
    %76 = vector.extract_strided_slice %61 {offsets = [2, 0], sizes = [32, 252], strides = [1, 1]} : vector<36x252xf32> to vector<32x252xf32>
    %77 = arith.cmpf ogt, %76, %71 : vector<32x252xf32>
    %78 = arith.select %77, %76, %71 : vector<32x252xi1>, vector<32x252xf32>
    %cst_37 = arith.constant 1.000000e+00 : f32
    %79 = vector.broadcast %cst_37 : f32 to vector<32x252xf32>
    %80 = arith.select %77, %79, %73 : vector<32x252xi1>, vector<32x252xf32>
    %cst_38 = arith.constant 2.000000e+00 : f32
    %81 = vector.broadcast %cst_38 : f32 to vector<32x252xf32>
    %82 = arith.select %77, %81, %75 : vector<32x252xi1>, vector<32x252xf32>
    %83 = vector.extract_strided_slice %61 {offsets = [3, 0], sizes = [32, 252], strides = [1, 1]} : vector<36x252xf32> to vector<32x252xf32>
    %84 = arith.cmpf ogt, %83, %78 : vector<32x252xf32>
    %85 = arith.select %84, %83, %78 : vector<32x252xi1>, vector<32x252xf32>
    %cst_39 = arith.constant 1.000000e+00 : f32
    %86 = vector.broadcast %cst_39 : f32 to vector<32x252xf32>
    %87 = arith.select %84, %86, %80 : vector<32x252xi1>, vector<32x252xf32>
    %cst_40 = arith.constant 3.000000e+00 : f32
    %88 = vector.broadcast %cst_40 : f32 to vector<32x252xf32>
    %89 = arith.select %84, %88, %82 : vector<32x252xi1>, vector<32x252xf32>
    %90 = vector.extract_strided_slice %61 {offsets = [4, 0], sizes = [32, 252], strides = [1, 1]} : vector<36x252xf32> to vector<32x252xf32>
    %91 = arith.cmpf ogt, %90, %85 : vector<32x252xf32>
    %92 = arith.select %91, %90, %85 : vector<32x252xi1>, vector<32x252xf32>
    %cst_41 = arith.constant 1.000000e+00 : f32
    %93 = vector.broadcast %cst_41 : f32 to vector<32x252xf32>
    %94 = arith.select %91, %93, %87 : vector<32x252xi1>, vector<32x252xf32>
    %cst_42 = arith.constant 4.000000e+00 : f32
    %95 = vector.broadcast %cst_42 : f32 to vector<32x252xf32>
    %96 = arith.select %91, %95, %89 : vector<32x252xi1>, vector<32x252xf32>
    %97 = vector.extract_strided_slice %21 {offsets = [0, 2], sizes = [36, 252], strides = [1, 1]} : vector<36x256xf32> to vector<36x252xf32>
    %98 = vector.extract_strided_slice %97 {offsets = [0, 0], sizes = [32, 252], strides = [1, 1]} : vector<36x252xf32> to vector<32x252xf32>
    %99 = arith.cmpf ogt, %98, %92 : vector<32x252xf32>
    %100 = arith.select %99, %98, %92 : vector<32x252xi1>, vector<32x252xf32>
    %cst_43 = arith.constant 2.000000e+00 : f32
    %101 = vector.broadcast %cst_43 : f32 to vector<32x252xf32>
    %102 = arith.select %99, %101, %94 : vector<32x252xi1>, vector<32x252xf32>
    %cst_44 = arith.constant 0.000000e+00 : f32
    %103 = vector.broadcast %cst_44 : f32 to vector<32x252xf32>
    %104 = arith.select %99, %103, %96 : vector<32x252xi1>, vector<32x252xf32>
    %105 = vector.extract_strided_slice %97 {offsets = [1, 0], sizes = [32, 252], strides = [1, 1]} : vector<36x252xf32> to vector<32x252xf32>
    %106 = arith.cmpf ogt, %105, %100 : vector<32x252xf32>
    %107 = arith.select %106, %105, %100 : vector<32x252xi1>, vector<32x252xf32>
    %cst_45 = arith.constant 2.000000e+00 : f32
    %108 = vector.broadcast %cst_45 : f32 to vector<32x252xf32>
    %109 = arith.select %106, %108, %102 : vector<32x252xi1>, vector<32x252xf32>
    %cst_46 = arith.constant 1.000000e+00 : f32
    %110 = vector.broadcast %cst_46 : f32 to vector<32x252xf32>
    %111 = arith.select %106, %110, %104 : vector<32x252xi1>, vector<32x252xf32>
    %112 = vector.extract_strided_slice %97 {offsets = [2, 0], sizes = [32, 252], strides = [1, 1]} : vector<36x252xf32> to vector<32x252xf32>
    %113 = arith.cmpf ogt, %112, %107 : vector<32x252xf32>
    %114 = arith.select %113, %112, %107 : vector<32x252xi1>, vector<32x252xf32>
    %cst_47 = arith.constant 2.000000e+00 : f32
    %115 = vector.broadcast %cst_47 : f32 to vector<32x252xf32>
    %116 = arith.select %113, %115, %109 : vector<32x252xi1>, vector<32x252xf32>
    %cst_48 = arith.constant 2.000000e+00 : f32
    %117 = vector.broadcast %cst_48 : f32 to vector<32x252xf32>
    %118 = arith.select %113, %117, %111 : vector<32x252xi1>, vector<32x252xf32>
    %119 = vector.extract_strided_slice %97 {offsets = [3, 0], sizes = [32, 252], strides = [1, 1]} : vector<36x252xf32> to vector<32x252xf32>
    %120 = arith.cmpf ogt, %119, %114 : vector<32x252xf32>
    %121 = arith.select %120, %119, %114 : vector<32x252xi1>, vector<32x252xf32>
    %cst_49 = arith.constant 2.000000e+00 : f32
    %122 = vector.broadcast %cst_49 : f32 to vector<32x252xf32>
    %123 = arith.select %120, %122, %116 : vector<32x252xi1>, vector<32x252xf32>
    %cst_50 = arith.constant 3.000000e+00 : f32
    %124 = vector.broadcast %cst_50 : f32 to vector<32x252xf32>
    %125 = arith.select %120, %124, %118 : vector<32x252xi1>, vector<32x252xf32>
    %126 = vector.extract_strided_slice %97 {offsets = [4, 0], sizes = [32, 252], strides = [1, 1]} : vector<36x252xf32> to vector<32x252xf32>
    %127 = arith.cmpf ogt, %126, %121 : vector<32x252xf32>
    %128 = arith.select %127, %126, %121 : vector<32x252xi1>, vector<32x252xf32>
    %cst_51 = arith.constant 2.000000e+00 : f32
    %129 = vector.broadcast %cst_51 : f32 to vector<32x252xf32>
    %130 = arith.select %127, %129, %123 : vector<32x252xi1>, vector<32x252xf32>
    %cst_52 = arith.constant 4.000000e+00 : f32
    %131 = vector.broadcast %cst_52 : f32 to vector<32x252xf32>
    %132 = arith.select %127, %131, %125 : vector<32x252xi1>, vector<32x252xf32>
    %133 = vector.extract_strided_slice %21 {offsets = [0, 3], sizes = [36, 252], strides = [1, 1]} : vector<36x256xf32> to vector<36x252xf32>
    %134 = vector.extract_strided_slice %133 {offsets = [0, 0], sizes = [32, 252], strides = [1, 1]} : vector<36x252xf32> to vector<32x252xf32>
    %135 = arith.cmpf ogt, %134, %128 : vector<32x252xf32>
    %136 = arith.select %135, %134, %128 : vector<32x252xi1>, vector<32x252xf32>
    %cst_53 = arith.constant 3.000000e+00 : f32
    %137 = vector.broadcast %cst_53 : f32 to vector<32x252xf32>
    %138 = arith.select %135, %137, %130 : vector<32x252xi1>, vector<32x252xf32>
    %cst_54 = arith.constant 0.000000e+00 : f32
    %139 = vector.broadcast %cst_54 : f32 to vector<32x252xf32>
    %140 = arith.select %135, %139, %132 : vector<32x252xi1>, vector<32x252xf32>
    %141 = vector.extract_strided_slice %133 {offsets = [1, 0], sizes = [32, 252], strides = [1, 1]} : vector<36x252xf32> to vector<32x252xf32>
    %142 = arith.cmpf ogt, %141, %136 : vector<32x252xf32>
    %143 = arith.select %142, %141, %136 : vector<32x252xi1>, vector<32x252xf32>
    %cst_55 = arith.constant 3.000000e+00 : f32
    %144 = vector.broadcast %cst_55 : f32 to vector<32x252xf32>
    %145 = arith.select %142, %144, %138 : vector<32x252xi1>, vector<32x252xf32>
    %cst_56 = arith.constant 1.000000e+00 : f32
    %146 = vector.broadcast %cst_56 : f32 to vector<32x252xf32>
    %147 = arith.select %142, %146, %140 : vector<32x252xi1>, vector<32x252xf32>
    %148 = vector.extract_strided_slice %133 {offsets = [2, 0], sizes = [32, 252], strides = [1, 1]} : vector<36x252xf32> to vector<32x252xf32>
    %149 = arith.cmpf ogt, %148, %143 : vector<32x252xf32>
    %150 = arith.select %149, %148, %143 : vector<32x252xi1>, vector<32x252xf32>
    %cst_57 = arith.constant 3.000000e+00 : f32
    %151 = vector.broadcast %cst_57 : f32 to vector<32x252xf32>
    %152 = arith.select %149, %151, %145 : vector<32x252xi1>, vector<32x252xf32>
    %cst_58 = arith.constant 2.000000e+00 : f32
    %153 = vector.broadcast %cst_58 : f32 to vector<32x252xf32>
    %154 = arith.select %149, %153, %147 : vector<32x252xi1>, vector<32x252xf32>
    %155 = vector.extract_strided_slice %133 {offsets = [3, 0], sizes = [32, 252], strides = [1, 1]} : vector<36x252xf32> to vector<32x252xf32>
    %156 = arith.cmpf ogt, %155, %150 : vector<32x252xf32>
    %157 = arith.select %156, %155, %150 : vector<32x252xi1>, vector<32x252xf32>
    %cst_59 = arith.constant 3.000000e+00 : f32
    %158 = vector.broadcast %cst_59 : f32 to vector<32x252xf32>
    %159 = arith.select %156, %158, %152 : vector<32x252xi1>, vector<32x252xf32>
    %cst_60 = arith.constant 3.000000e+00 : f32
    %160 = vector.broadcast %cst_60 : f32 to vector<32x252xf32>
    %161 = arith.select %156, %160, %154 : vector<32x252xi1>, vector<32x252xf32>
    %162 = vector.extract_strided_slice %133 {offsets = [4, 0], sizes = [32, 252], strides = [1, 1]} : vector<36x252xf32> to vector<32x252xf32>
    %163 = arith.cmpf ogt, %162, %157 : vector<32x252xf32>
    %164 = arith.select %163, %162, %157 : vector<32x252xi1>, vector<32x252xf32>
    %cst_61 = arith.constant 3.000000e+00 : f32
    %165 = vector.broadcast %cst_61 : f32 to vector<32x252xf32>
    %166 = arith.select %163, %165, %159 : vector<32x252xi1>, vector<32x252xf32>
    %cst_62 = arith.constant 4.000000e+00 : f32
    %167 = vector.broadcast %cst_62 : f32 to vector<32x252xf32>
    %168 = arith.select %163, %167, %161 : vector<32x252xi1>, vector<32x252xf32>
    %169 = vector.extract_strided_slice %21 {offsets = [0, 4], sizes = [36, 252], strides = [1, 1]} : vector<36x256xf32> to vector<36x252xf32>
    %170 = vector.extract_strided_slice %169 {offsets = [0, 0], sizes = [32, 252], strides = [1, 1]} : vector<36x252xf32> to vector<32x252xf32>
    %171 = arith.cmpf ogt, %170, %164 : vector<32x252xf32>
    %172 = arith.select %171, %170, %164 : vector<32x252xi1>, vector<32x252xf32>
    %cst_63 = arith.constant 4.000000e+00 : f32
    %173 = vector.broadcast %cst_63 : f32 to vector<32x252xf32>
    %174 = arith.select %171, %173, %166 : vector<32x252xi1>, vector<32x252xf32>
    %cst_64 = arith.constant 0.000000e+00 : f32
    %175 = vector.broadcast %cst_64 : f32 to vector<32x252xf32>
    %176 = arith.select %171, %175, %168 : vector<32x252xi1>, vector<32x252xf32>
    %177 = vector.extract_strided_slice %169 {offsets = [1, 0], sizes = [32, 252], strides = [1, 1]} : vector<36x252xf32> to vector<32x252xf32>
    %178 = arith.cmpf ogt, %177, %172 : vector<32x252xf32>
    %179 = arith.select %178, %177, %172 : vector<32x252xi1>, vector<32x252xf32>
    %cst_65 = arith.constant 4.000000e+00 : f32
    %180 = vector.broadcast %cst_65 : f32 to vector<32x252xf32>
    %181 = arith.select %178, %180, %174 : vector<32x252xi1>, vector<32x252xf32>
    %cst_66 = arith.constant 1.000000e+00 : f32
    %182 = vector.broadcast %cst_66 : f32 to vector<32x252xf32>
    %183 = arith.select %178, %182, %176 : vector<32x252xi1>, vector<32x252xf32>
    %184 = vector.extract_strided_slice %169 {offsets = [2, 0], sizes = [32, 252], strides = [1, 1]} : vector<36x252xf32> to vector<32x252xf32>
    %185 = arith.cmpf ogt, %184, %179 : vector<32x252xf32>
    %186 = arith.select %185, %184, %179 : vector<32x252xi1>, vector<32x252xf32>
    %cst_67 = arith.constant 4.000000e+00 : f32
    %187 = vector.broadcast %cst_67 : f32 to vector<32x252xf32>
    %188 = arith.select %185, %187, %181 : vector<32x252xi1>, vector<32x252xf32>
    %cst_68 = arith.constant 2.000000e+00 : f32
    %189 = vector.broadcast %cst_68 : f32 to vector<32x252xf32>
    %190 = arith.select %185, %189, %183 : vector<32x252xi1>, vector<32x252xf32>
    %191 = vector.extract_strided_slice %169 {offsets = [3, 0], sizes = [32, 252], strides = [1, 1]} : vector<36x252xf32> to vector<32x252xf32>
    %192 = arith.cmpf ogt, %191, %186 : vector<32x252xf32>
    %193 = arith.select %192, %191, %186 : vector<32x252xi1>, vector<32x252xf32>
    %cst_69 = arith.constant 4.000000e+00 : f32
    %194 = vector.broadcast %cst_69 : f32 to vector<32x252xf32>
    %195 = arith.select %192, %194, %188 : vector<32x252xi1>, vector<32x252xf32>
    %cst_70 = arith.constant 3.000000e+00 : f32
    %196 = vector.broadcast %cst_70 : f32 to vector<32x252xf32>
    %197 = arith.select %192, %196, %190 : vector<32x252xi1>, vector<32x252xf32>
    %198 = vector.extract_strided_slice %169 {offsets = [4, 0], sizes = [32, 252], strides = [1, 1]} : vector<36x252xf32> to vector<32x252xf32>
    %199 = arith.cmpf ogt, %198, %193 : vector<32x252xf32>
    %200 = arith.select %199, %198, %193 : vector<32x252xi1>, vector<32x252xf32>
    %cst_71 = arith.constant 4.000000e+00 : f32
    %201 = vector.broadcast %cst_71 : f32 to vector<32x252xf32>
    %202 = arith.select %199, %201, %195 : vector<32x252xi1>, vector<32x252xf32>
    %cst_72 = arith.constant 4.000000e+00 : f32
    %203 = vector.broadcast %cst_72 : f32 to vector<32x252xf32>
    %204 = arith.select %199, %203, %197 : vector<32x252xi1>, vector<32x252xf32>
    %205 = tpu.concatenate %200, %202, %204 in 0 : vector<32x252xf32>, vector<32x252xf32>, vector<32x252xf32> -> vector<96x252xf32>
    %c0_73 = arith.constant 0 : index
    %c0_74 = arith.constant 0 : index
    %206 = vector.load %arg5[%c0_73, %c0_74] : memref<24x96xf32, #tpu.memory_space<vmem>>, vector<24x96xf32>
    %cst_75 = arith.constant dense<0.000000e+00> : vector<24x252xf32>
    %207 = tpu.matmul %206, %205, %cst_75 {dimension_numbers = #tpu.dot_dimension_numbers<[1], [0], [0], [1], [0, 0, 1, 1], [], []>} : vector<24x96xf32>, vector<96x252xf32>, vector<24x252xf32> -> vector<24x252xf32>
    %c0_76 = arith.constant 0 : index
    %c0_77 = arith.constant 0 : index
    %208 = vector.load %arg6[%c0_76, %c0_77] : memref<252x48xf32, #tpu.memory_space<vmem>>, vector<252x48xf32>
    %cst_78 = arith.constant dense<0.000000e+00> : vector<24x48xf32>
    %209 = tpu.matmul %207, %208, %cst_78 {dimension_numbers = #tpu.dot_dimension_numbers<[1], [0], [0], [1], [0, 0, 1, 1], [], []>} : vector<24x252xf32>, vector<252x48xf32>, vector<24x48xf32> -> vector<24x48xf32>
    %210 = vector.extract_strided_slice %209 {offsets = [0, 0], sizes = [8, 48], strides = [1, 1]} : vector<24x48xf32> to vector<8x48xf32>
    %211 = vector.extract_strided_slice %209 {offsets = [8, 0], sizes = [8, 48], strides = [1, 1]} : vector<24x48xf32> to vector<8x48xf32>
    %212 = vector.extract_strided_slice %209 {offsets = [16, 0], sizes = [8, 48], strides = [1, 1]} : vector<24x48xf32> to vector<8x48xf32>
    %cst_79 = arith.constant 0.000000e+00 : f32
    %213 = vector.broadcast %cst_79 : f32 to vector<7x45xf32>
    %214 = vector.extract_strided_slice %210 {offsets = [0, 0], sizes = [8, 45], strides = [1, 1]} : vector<8x48xf32> to vector<8x45xf32>
    %c0_80 = arith.constant 0 : index
    %215 = memref.load %arg8[%c0_80] : memref<8xf32, #tpu.memory_space<smem>>
    %216 = vector.extract_strided_slice %214 {offsets = [0, 0], sizes = [7, 45], strides = [1, 1]} : vector<8x45xf32> to vector<7x45xf32>
    %217 = vector.broadcast %215 : f32 to vector<7x45xf32>
    %218 = arith.mulf %217, %216 : vector<7x45xf32>
    %219 = arith.addf %213, %218 : vector<7x45xf32>
    %c1_81 = arith.constant 1 : index
    %220 = memref.load %arg8[%c1_81] : memref<8xf32, #tpu.memory_space<smem>>
    %221 = vector.extract_strided_slice %214 {offsets = [1, 0], sizes = [7, 45], strides = [1, 1]} : vector<8x45xf32> to vector<7x45xf32>
    %222 = vector.broadcast %220 : f32 to vector<7x45xf32>
    %223 = arith.mulf %222, %221 : vector<7x45xf32>
    %224 = arith.addf %219, %223 : vector<7x45xf32>
    %225 = vector.extract_strided_slice %210 {offsets = [0, 1], sizes = [8, 45], strides = [1, 1]} : vector<8x48xf32> to vector<8x45xf32>
    %c2_82 = arith.constant 2 : index
    %226 = memref.load %arg8[%c2_82] : memref<8xf32, #tpu.memory_space<smem>>
    %227 = vector.extract_strided_slice %225 {offsets = [0, 0], sizes = [7, 45], strides = [1, 1]} : vector<8x45xf32> to vector<7x45xf32>
    %228 = vector.broadcast %226 : f32 to vector<7x45xf32>
    %229 = arith.mulf %228, %227 : vector<7x45xf32>
    %230 = arith.addf %224, %229 : vector<7x45xf32>
    %c3_83 = arith.constant 3 : index
    %231 = memref.load %arg8[%c3_83] : memref<8xf32, #tpu.memory_space<smem>>
    %232 = vector.extract_strided_slice %225 {offsets = [1, 0], sizes = [7, 45], strides = [1, 1]} : vector<8x45xf32> to vector<7x45xf32>
    %233 = vector.broadcast %231 : f32 to vector<7x45xf32>
    %234 = arith.mulf %233, %232 : vector<7x45xf32>
    %235 = arith.addf %230, %234 : vector<7x45xf32>
    %236 = vector.extract_strided_slice %210 {offsets = [0, 2], sizes = [8, 45], strides = [1, 1]} : vector<8x48xf32> to vector<8x45xf32>
    %c4 = arith.constant 4 : index
    %237 = memref.load %arg8[%c4] : memref<8xf32, #tpu.memory_space<smem>>
    %238 = vector.extract_strided_slice %236 {offsets = [0, 0], sizes = [7, 45], strides = [1, 1]} : vector<8x45xf32> to vector<7x45xf32>
    %239 = vector.broadcast %237 : f32 to vector<7x45xf32>
    %240 = arith.mulf %239, %238 : vector<7x45xf32>
    %241 = arith.addf %235, %240 : vector<7x45xf32>
    %c5 = arith.constant 5 : index
    %242 = memref.load %arg8[%c5] : memref<8xf32, #tpu.memory_space<smem>>
    %243 = vector.extract_strided_slice %236 {offsets = [1, 0], sizes = [7, 45], strides = [1, 1]} : vector<8x45xf32> to vector<7x45xf32>
    %244 = vector.broadcast %242 : f32 to vector<7x45xf32>
    %245 = arith.mulf %244, %243 : vector<7x45xf32>
    %246 = arith.addf %241, %245 : vector<7x45xf32>
    %247 = vector.extract_strided_slice %210 {offsets = [0, 3], sizes = [8, 45], strides = [1, 1]} : vector<8x48xf32> to vector<8x45xf32>
    %c6 = arith.constant 6 : index
    %248 = memref.load %arg8[%c6] : memref<8xf32, #tpu.memory_space<smem>>
    %249 = vector.extract_strided_slice %247 {offsets = [0, 0], sizes = [7, 45], strides = [1, 1]} : vector<8x45xf32> to vector<7x45xf32>
    %250 = vector.broadcast %248 : f32 to vector<7x45xf32>
    %251 = arith.mulf %250, %249 : vector<7x45xf32>
    %252 = arith.addf %246, %251 : vector<7x45xf32>
    %c7 = arith.constant 7 : index
    %253 = memref.load %arg8[%c7] : memref<8xf32, #tpu.memory_space<smem>>
    %254 = vector.extract_strided_slice %247 {offsets = [1, 0], sizes = [7, 45], strides = [1, 1]} : vector<8x45xf32> to vector<7x45xf32>
    %255 = vector.broadcast %253 : f32 to vector<7x45xf32>
    %256 = arith.mulf %255, %254 : vector<7x45xf32>
    %257 = arith.addf %252, %256 : vector<7x45xf32>
    %c1_84 = arith.constant 1 : index
    %258 = memref.load %arg10[%c1_84] : memref<6xf32, #tpu.memory_space<smem>>
    %259 = vector.broadcast %258 : f32 to vector<7x45xf32>
    %260 = arith.addf %257, %259 : vector<7x45xf32>
    %cst_85 = arith.constant 0.000000e+00 : f32
    %261 = vector.broadcast %cst_85 : f32 to vector<7x45xf32>
    %262 = arith.maximumf %260, %261 : vector<7x45xf32>
    %cst_86 = arith.constant 0xFF800000 : f32
    %263 = vector.broadcast %cst_86 : f32 to vector<4x42xf32>
    %cst_87 = arith.constant 0.000000e+00 : f32
    %264 = vector.broadcast %cst_87 : f32 to vector<4x42xf32>
    %cst_88 = arith.constant 0.000000e+00 : f32
    %265 = vector.broadcast %cst_88 : f32 to vector<4x42xf32>
    %266 = vector.extract_strided_slice %262 {offsets = [0, 0], sizes = [7, 42], strides = [1, 1]} : vector<7x45xf32> to vector<7x42xf32>
    %267 = vector.extract_strided_slice %266 {offsets = [0, 0], sizes = [4, 42], strides = [1, 1]} : vector<7x42xf32> to vector<4x42xf32>
    %268 = arith.cmpf ogt, %267, %263 : vector<4x42xf32>
    %269 = arith.select %268, %267, %263 : vector<4x42xi1>, vector<4x42xf32>
    %cst_89 = arith.constant 0.000000e+00 : f32
    %270 = vector.broadcast %cst_89 : f32 to vector<4x42xf32>
    %271 = arith.select %268, %270, %264 : vector<4x42xi1>, vector<4x42xf32>
    %cst_90 = arith.constant 0.000000e+00 : f32
    %272 = vector.broadcast %cst_90 : f32 to vector<4x42xf32>
    %273 = arith.select %268, %272, %265 : vector<4x42xi1>, vector<4x42xf32>
    %274 = vector.extract_strided_slice %266 {offsets = [1, 0], sizes = [4, 42], strides = [1, 1]} : vector<7x42xf32> to vector<4x42xf32>
    %275 = arith.cmpf ogt, %274, %269 : vector<4x42xf32>
    %276 = arith.select %275, %274, %269 : vector<4x42xi1>, vector<4x42xf32>
    %cst_91 = arith.constant 0.000000e+00 : f32
    %277 = vector.broadcast %cst_91 : f32 to vector<4x42xf32>
    %278 = arith.select %275, %277, %271 : vector<4x42xi1>, vector<4x42xf32>
    %cst_92 = arith.constant 1.000000e+00 : f32
    %279 = vector.broadcast %cst_92 : f32 to vector<4x42xf32>
    %280 = arith.select %275, %279, %273 : vector<4x42xi1>, vector<4x42xf32>
    %281 = vector.extract_strided_slice %266 {offsets = [2, 0], sizes = [4, 42], strides = [1, 1]} : vector<7x42xf32> to vector<4x42xf32>
    %282 = arith.cmpf ogt, %281, %276 : vector<4x42xf32>
    %283 = arith.select %282, %281, %276 : vector<4x42xi1>, vector<4x42xf32>
    %cst_93 = arith.constant 0.000000e+00 : f32
    %284 = vector.broadcast %cst_93 : f32 to vector<4x42xf32>
    %285 = arith.select %282, %284, %278 : vector<4x42xi1>, vector<4x42xf32>
    %cst_94 = arith.constant 2.000000e+00 : f32
    %286 = vector.broadcast %cst_94 : f32 to vector<4x42xf32>
    %287 = arith.select %282, %286, %280 : vector<4x42xi1>, vector<4x42xf32>
    %288 = vector.extract_strided_slice %266 {offsets = [3, 0], sizes = [4, 42], strides = [1, 1]} : vector<7x42xf32> to vector<4x42xf32>
    %289 = arith.cmpf ogt, %288, %283 : vector<4x42xf32>
    %290 = arith.select %289, %288, %283 : vector<4x42xi1>, vector<4x42xf32>
    %cst_95 = arith.constant 0.000000e+00 : f32
    %291 = vector.broadcast %cst_95 : f32 to vector<4x42xf32>
    %292 = arith.select %289, %291, %285 : vector<4x42xi1>, vector<4x42xf32>
    %cst_96 = arith.constant 3.000000e+00 : f32
    %293 = vector.broadcast %cst_96 : f32 to vector<4x42xf32>
    %294 = arith.select %289, %293, %287 : vector<4x42xi1>, vector<4x42xf32>
    %295 = vector.extract_strided_slice %262 {offsets = [0, 1], sizes = [7, 42], strides = [1, 1]} : vector<7x45xf32> to vector<7x42xf32>
    %296 = vector.extract_strided_slice %295 {offsets = [0, 0], sizes = [4, 42], strides = [1, 1]} : vector<7x42xf32> to vector<4x42xf32>
    %297 = arith.cmpf ogt, %296, %290 : vector<4x42xf32>
    %298 = arith.select %297, %296, %290 : vector<4x42xi1>, vector<4x42xf32>
    %cst_97 = arith.constant 1.000000e+00 : f32
    %299 = vector.broadcast %cst_97 : f32 to vector<4x42xf32>
    %300 = arith.select %297, %299, %292 : vector<4x42xi1>, vector<4x42xf32>
    %cst_98 = arith.constant 0.000000e+00 : f32
    %301 = vector.broadcast %cst_98 : f32 to vector<4x42xf32>
    %302 = arith.select %297, %301, %294 : vector<4x42xi1>, vector<4x42xf32>
    %303 = vector.extract_strided_slice %295 {offsets = [1, 0], sizes = [4, 42], strides = [1, 1]} : vector<7x42xf32> to vector<4x42xf32>
    %304 = arith.cmpf ogt, %303, %298 : vector<4x42xf32>
    %305 = arith.select %304, %303, %298 : vector<4x42xi1>, vector<4x42xf32>
    %cst_99 = arith.constant 1.000000e+00 : f32
    %306 = vector.broadcast %cst_99 : f32 to vector<4x42xf32>
    %307 = arith.select %304, %306, %300 : vector<4x42xi1>, vector<4x42xf32>
    %cst_100 = arith.constant 1.000000e+00 : f32
    %308 = vector.broadcast %cst_100 : f32 to vector<4x42xf32>
    %309 = arith.select %304, %308, %302 : vector<4x42xi1>, vector<4x42xf32>
    %310 = vector.extract_strided_slice %295 {offsets = [2, 0], sizes = [4, 42], strides = [1, 1]} : vector<7x42xf32> to vector<4x42xf32>
    %311 = arith.cmpf ogt, %310, %305 : vector<4x42xf32>
    %312 = arith.select %311, %310, %305 : vector<4x42xi1>, vector<4x42xf32>
    %cst_101 = arith.constant 1.000000e+00 : f32
    %313 = vector.broadcast %cst_101 : f32 to vector<4x42xf32>
    %314 = arith.select %311, %313, %307 : vector<4x42xi1>, vector<4x42xf32>
    %cst_102 = arith.constant 2.000000e+00 : f32
    %315 = vector.broadcast %cst_102 : f32 to vector<4x42xf32>
    %316 = arith.select %311, %315, %309 : vector<4x42xi1>, vector<4x42xf32>
    %317 = vector.extract_strided_slice %295 {offsets = [3, 0], sizes = [4, 42], strides = [1, 1]} : vector<7x42xf32> to vector<4x42xf32>
    %318 = arith.cmpf ogt, %317, %312 : vector<4x42xf32>
    %319 = arith.select %318, %317, %312 : vector<4x42xi1>, vector<4x42xf32>
    %cst_103 = arith.constant 1.000000e+00 : f32
    %320 = vector.broadcast %cst_103 : f32 to vector<4x42xf32>
    %321 = arith.select %318, %320, %314 : vector<4x42xi1>, vector<4x42xf32>
    %cst_104 = arith.constant 3.000000e+00 : f32
    %322 = vector.broadcast %cst_104 : f32 to vector<4x42xf32>
    %323 = arith.select %318, %322, %316 : vector<4x42xi1>, vector<4x42xf32>
    %324 = vector.extract_strided_slice %262 {offsets = [0, 2], sizes = [7, 42], strides = [1, 1]} : vector<7x45xf32> to vector<7x42xf32>
    %325 = vector.extract_strided_slice %324 {offsets = [0, 0], sizes = [4, 42], strides = [1, 1]} : vector<7x42xf32> to vector<4x42xf32>
    %326 = arith.cmpf ogt, %325, %319 : vector<4x42xf32>
    %327 = arith.select %326, %325, %319 : vector<4x42xi1>, vector<4x42xf32>
    %cst_105 = arith.constant 2.000000e+00 : f32
    %328 = vector.broadcast %cst_105 : f32 to vector<4x42xf32>
    %329 = arith.select %326, %328, %321 : vector<4x42xi1>, vector<4x42xf32>
    %cst_106 = arith.constant 0.000000e+00 : f32
    %330 = vector.broadcast %cst_106 : f32 to vector<4x42xf32>
    %331 = arith.select %326, %330, %323 : vector<4x42xi1>, vector<4x42xf32>
    %332 = vector.extract_strided_slice %324 {offsets = [1, 0], sizes = [4, 42], strides = [1, 1]} : vector<7x42xf32> to vector<4x42xf32>
    %333 = arith.cmpf ogt, %332, %327 : vector<4x42xf32>
    %334 = arith.select %333, %332, %327 : vector<4x42xi1>, vector<4x42xf32>
    %cst_107 = arith.constant 2.000000e+00 : f32
    %335 = vector.broadcast %cst_107 : f32 to vector<4x42xf32>
    %336 = arith.select %333, %335, %329 : vector<4x42xi1>, vector<4x42xf32>
    %cst_108 = arith.constant 1.000000e+00 : f32
    %337 = vector.broadcast %cst_108 : f32 to vector<4x42xf32>
    %338 = arith.select %333, %337, %331 : vector<4x42xi1>, vector<4x42xf32>
    %339 = vector.extract_strided_slice %324 {offsets = [2, 0], sizes = [4, 42], strides = [1, 1]} : vector<7x42xf32> to vector<4x42xf32>
    %340 = arith.cmpf ogt, %339, %334 : vector<4x42xf32>
    %341 = arith.select %340, %339, %334 : vector<4x42xi1>, vector<4x42xf32>
    %cst_109 = arith.constant 2.000000e+00 : f32
    %342 = vector.broadcast %cst_109 : f32 to vector<4x42xf32>
    %343 = arith.select %340, %342, %336 : vector<4x42xi1>, vector<4x42xf32>
    %cst_110 = arith.constant 2.000000e+00 : f32
    %344 = vector.broadcast %cst_110 : f32 to vector<4x42xf32>
    %345 = arith.select %340, %344, %338 : vector<4x42xi1>, vector<4x42xf32>
    %346 = vector.extract_strided_slice %324 {offsets = [3, 0], sizes = [4, 42], strides = [1, 1]} : vector<7x42xf32> to vector<4x42xf32>
    %347 = arith.cmpf ogt, %346, %341 : vector<4x42xf32>
    %348 = arith.select %347, %346, %341 : vector<4x42xi1>, vector<4x42xf32>
    %cst_111 = arith.constant 2.000000e+00 : f32
    %349 = vector.broadcast %cst_111 : f32 to vector<4x42xf32>
    %350 = arith.select %347, %349, %343 : vector<4x42xi1>, vector<4x42xf32>
    %cst_112 = arith.constant 3.000000e+00 : f32
    %351 = vector.broadcast %cst_112 : f32 to vector<4x42xf32>
    %352 = arith.select %347, %351, %345 : vector<4x42xi1>, vector<4x42xf32>
    %353 = vector.extract_strided_slice %262 {offsets = [0, 3], sizes = [7, 42], strides = [1, 1]} : vector<7x45xf32> to vector<7x42xf32>
    %354 = vector.extract_strided_slice %353 {offsets = [0, 0], sizes = [4, 42], strides = [1, 1]} : vector<7x42xf32> to vector<4x42xf32>
    %355 = arith.cmpf ogt, %354, %348 : vector<4x42xf32>
    %356 = arith.select %355, %354, %348 : vector<4x42xi1>, vector<4x42xf32>
    %cst_113 = arith.constant 3.000000e+00 : f32
    %357 = vector.broadcast %cst_113 : f32 to vector<4x42xf32>
    %358 = arith.select %355, %357, %350 : vector<4x42xi1>, vector<4x42xf32>
    %cst_114 = arith.constant 0.000000e+00 : f32
    %359 = vector.broadcast %cst_114 : f32 to vector<4x42xf32>
    %360 = arith.select %355, %359, %352 : vector<4x42xi1>, vector<4x42xf32>
    %361 = vector.extract_strided_slice %353 {offsets = [1, 0], sizes = [4, 42], strides = [1, 1]} : vector<7x42xf32> to vector<4x42xf32>
    %362 = arith.cmpf ogt, %361, %356 : vector<4x42xf32>
    %363 = arith.select %362, %361, %356 : vector<4x42xi1>, vector<4x42xf32>
    %cst_115 = arith.constant 3.000000e+00 : f32
    %364 = vector.broadcast %cst_115 : f32 to vector<4x42xf32>
    %365 = arith.select %362, %364, %358 : vector<4x42xi1>, vector<4x42xf32>
    %cst_116 = arith.constant 1.000000e+00 : f32
    %366 = vector.broadcast %cst_116 : f32 to vector<4x42xf32>
    %367 = arith.select %362, %366, %360 : vector<4x42xi1>, vector<4x42xf32>
    %368 = vector.extract_strided_slice %353 {offsets = [2, 0], sizes = [4, 42], strides = [1, 1]} : vector<7x42xf32> to vector<4x42xf32>
    %369 = arith.cmpf ogt, %368, %363 : vector<4x42xf32>
    %370 = arith.select %369, %368, %363 : vector<4x42xi1>, vector<4x42xf32>
    %cst_117 = arith.constant 3.000000e+00 : f32
    %371 = vector.broadcast %cst_117 : f32 to vector<4x42xf32>
    %372 = arith.select %369, %371, %365 : vector<4x42xi1>, vector<4x42xf32>
    %cst_118 = arith.constant 2.000000e+00 : f32
    %373 = vector.broadcast %cst_118 : f32 to vector<4x42xf32>
    %374 = arith.select %369, %373, %367 : vector<4x42xi1>, vector<4x42xf32>
    %375 = vector.extract_strided_slice %353 {offsets = [3, 0], sizes = [4, 42], strides = [1, 1]} : vector<7x42xf32> to vector<4x42xf32>
    %376 = arith.cmpf ogt, %375, %370 : vector<4x42xf32>
    %377 = arith.select %376, %375, %370 : vector<4x42xi1>, vector<4x42xf32>
    %cst_119 = arith.constant 3.000000e+00 : f32
    %378 = vector.broadcast %cst_119 : f32 to vector<4x42xf32>
    %379 = arith.select %376, %378, %372 : vector<4x42xi1>, vector<4x42xf32>
    %cst_120 = arith.constant 3.000000e+00 : f32
    %380 = vector.broadcast %cst_120 : f32 to vector<4x42xf32>
    %381 = arith.select %376, %380, %374 : vector<4x42xi1>, vector<4x42xf32>
    %382 = vector.extract_strided_slice %377 {offsets = [0, 0], sizes = [1, 42], strides = [1, 1]} : vector<4x42xf32> to vector<1x42xf32>
    %383 = vector.extract_strided_slice %379 {offsets = [0, 0], sizes = [1, 42], strides = [1, 1]} : vector<4x42xf32> to vector<1x42xf32>
    %384 = vector.extract_strided_slice %381 {offsets = [0, 0], sizes = [1, 42], strides = [1, 1]} : vector<4x42xf32> to vector<1x42xf32>
    %385 = tpu.concatenate %382, %383, %384 in 0 : vector<1x42xf32>, vector<1x42xf32>, vector<1x42xf32> -> vector<3x42xf32>
    %c0_121 = arith.constant 0 : index
    %c0_122 = arith.constant 0 : index
    %386 = vector.load %arg7[%c0_121, %c0_122] : memref<42x6xf32, #tpu.memory_space<vmem>>, vector<42x6xf32>
    %cst_123 = arith.constant dense<0.000000e+00> : vector<3x6xf32>
    %387 = tpu.matmul %385, %386, %cst_123 {dimension_numbers = #tpu.dot_dimension_numbers<[1], [0], [0], [1], [0, 0, 1, 1], [], []>} : vector<3x42xf32>, vector<42x6xf32>, vector<3x6xf32> -> vector<3x6xf32>
    %388 = vector.extract_strided_slice %387 {offsets = [0, 0], sizes = [1, 6], strides = [1, 1]} : vector<3x6xf32> to vector<1x6xf32>
    %389 = vector.extract_strided_slice %387 {offsets = [1, 0], sizes = [1, 6], strides = [1, 1]} : vector<3x6xf32> to vector<1x6xf32>
    %390 = vector.extract_strided_slice %387 {offsets = [2, 0], sizes = [1, 6], strides = [1, 1]} : vector<3x6xf32> to vector<1x6xf32>
    %c0_124 = arith.constant 0 : index
    %c0_125 = arith.constant 0 : index
    %391 = vector.load %arg11[%c0_124, %c0_125] : memref<2x6xf32, #tpu.memory_space<vmem>>, vector<2x6xf32>
    %392 = vector.extract_strided_slice %391 {offsets = [0, 0], sizes = [1, 6], strides = [1, 1]} : vector<2x6xf32> to vector<1x6xf32>
    %393 = arith.mulf %388, %392 : vector<1x6xf32>
    %cst_126 = arith.constant dense<0.000000e+00> : vector<1xf32>
    %394 = vector.multi_reduction <add>, %393, %cst_126 [1] : vector<1x6xf32> to vector<1xf32>
    %395 = vector.shape_cast %394 : vector<1xf32> to vector<1x1xf32>
    %c4_127 = arith.constant 4 : index
    %396 = memref.load %arg10[%c4_127] : memref<6xf32, #tpu.memory_space<smem>>
    %397 = vector.broadcast %396 : f32 to vector<1x1xf32>
    %398 = arith.addf %395, %397 : vector<1x1xf32>
    %399 = vector.extract_strided_slice %391 {offsets = [1, 0], sizes = [1, 6], strides = [1, 1]} : vector<2x6xf32> to vector<1x6xf32>
    %400 = arith.mulf %388, %399 : vector<1x6xf32>
    %cst_128 = arith.constant dense<0.000000e+00> : vector<1xf32>
    %401 = vector.multi_reduction <add>, %400, %cst_128 [1] : vector<1x6xf32> to vector<1xf32>
    %402 = vector.shape_cast %401 : vector<1xf32> to vector<1x1xf32>
    %c5_129 = arith.constant 5 : index
    %403 = memref.load %arg10[%c5_129] : memref<6xf32, #tpu.memory_space<smem>>
    %404 = vector.broadcast %403 : f32 to vector<1x1xf32>
    %405 = arith.addf %402, %404 : vector<1x1xf32>
    %406 = tpu.iota {dimensions = array<i32: 1>} : vector<1x128xi32>
    %c0_i32 = arith.constant 0 : i32
    %407 = vector.broadcast %c0_i32 : i32 to vector<1x128xi32>
    %408 = arith.cmpi eq, %406, %407 : vector<1x128xi32>
    %c1_i32 = arith.constant 1 : i32
    %409 = vector.broadcast %c1_i32 : i32 to vector<1x128xi32>
    %410 = arith.cmpi eq, %406, %409 : vector<1x128xi32>
    %cst_130 = arith.constant 0.000000e+00 : f32
    %411 = vector.shape_cast %405 : vector<1x1xf32> to vector<1x1xf32>
    %412 = vector.broadcast %411 : vector<1x1xf32> to vector<1x128xf32>
    %413 = vector.broadcast %cst_130 : f32 to vector<1x128xf32>
    %414 = arith.select %410, %412, %413 : vector<1x128xi1>, vector<1x128xf32>
    %415 = vector.shape_cast %398 : vector<1x1xf32> to vector<1x1xf32>
    %416 = vector.broadcast %415 : vector<1x1xf32> to vector<1x128xf32>
    %417 = arith.select %408, %416, %414 : vector<1x128xi1>, vector<1x128xf32>
    %c0_131 = arith.constant 0 : index
    %c0_132 = arith.constant 0 : index
    %418 = vector.load %arg15[%c0_131, %c0_132] : memref<1x128xf32, #tpu.memory_space<vmem>>, vector<1x128xf32>
    tpu.vector_store %arg15[%c0_131, %c0_132], %417 {strides = array<i32>} : memref<1x128xf32, #tpu.memory_space<vmem>>, vector<1x128xf32>,
    %c0_133 = arith.constant 0 : index
    %c0_134 = arith.constant 0 : index
    %419 = vector.load %arg12[%c0_133, %c0_134] : memref<2x6xf32, #tpu.memory_space<vmem>>, vector<2x6xf32>
    %420 = vector.extract_strided_slice %419 {offsets = [0, 0], sizes = [1, 6], strides = [1, 1]} : vector<2x6xf32> to vector<1x6xf32>
    %421 = vector.broadcast %398 : vector<1x1xf32> to vector<1x6xf32>
    %422 = arith.mulf %421, %420 : vector<1x6xf32>
    %423 = vector.extract_strided_slice %419 {offsets = [1, 0], sizes = [1, 6], strides = [1, 1]} : vector<2x6xf32> to vector<1x6xf32>
    %424 = vector.broadcast %405 : vector<1x1xf32> to vector<1x6xf32>
    %425 = arith.mulf %424, %423 : vector<1x6xf32>
    %426 = arith.addf %422, %425 : vector<1x6xf32>
    %c0_135 = arith.constant 0 : index
    %c0_136 = arith.constant 0 : index
    %427 = vector.load %arg13[%c0_135, %c0_136] : memref<1x6xf32, #tpu.memory_space<vmem>>, vector<1x6xf32>
    %428 = arith.addf %426, %427 : vector<1x6xf32>
    %429 = tpu.iota {dimensions = array<i32: 0>} : vector<7x45xi32>
    %430 = arith.sitofp %429 : vector<7x45xi32> to vector<7x45xf32>
    %431 = tpu.iota {dimensions = array<i32: 1>} : vector<7x45xi32>
    %432 = arith.sitofp %431 : vector<7x45xi32> to vector<7x45xf32>
    %cst_137 = arith.constant 0.000000e+00 : f32
    %433 = vector.broadcast %cst_137 : f32 to vector<7x45xf32>
    %434 = vector.extract_strided_slice %390 {offsets = [0, 0], sizes = [1, 1], strides = [1, 1]} : vector<1x6xf32> to vector<1x1xf32>
    %435 = vector.broadcast %434 : vector<1x1xf32> to vector<7x45xf32>
    %436 = arith.cmpf oeq, %430, %435 : vector<7x45xf32>
    %437 = vector.extract_strided_slice %389 {offsets = [0, 0], sizes = [1, 1], strides = [1, 1]} : vector<1x6xf32> to vector<1x1xf32>
    %cst_138 = arith.constant 0.000000e+00 : f32
    %438 = vector.broadcast %cst_138 : f32 to vector<1x1xf32>
    %439 = arith.addf %438, %437 : vector<1x1xf32>
    %440 = vector.broadcast %439 : vector<1x1xf32> to vector<7x45xf32>
    %441 = arith.cmpf oeq, %432, %440 : vector<7x45xf32>
    %442 = arith.andi %436, %441 : vector<7x45xi1>
    %443 = vector.extract_strided_slice %428 {offsets = [0, 0], sizes = [1, 1], strides = [1, 1]} : vector<1x6xf32> to vector<1x1xf32>
    %cst_139 = arith.constant 0.000000e+00 : f32
    %444 = vector.shape_cast %443 : vector<1x1xf32> to vector<1x1xf32>
    %445 = vector.broadcast %444 : vector<1x1xf32> to vector<7x45xf32>
    %446 = vector.broadcast %cst_139 : f32 to vector<7x45xf32>
    %447 = arith.select %442, %445, %446 : vector<7x45xi1>, vector<7x45xf32>
    %448 = arith.addf %433, %447 : vector<7x45xf32>
    %449 = vector.extract_strided_slice %390 {offsets = [0, 1], sizes = [1, 1], strides = [1, 1]} : vector<1x6xf32> to vector<1x1xf32>
    %450 = vector.broadcast %449 : vector<1x1xf32> to vector<7x45xf32>
    %451 = arith.cmpf oeq, %430, %450 : vector<7x45xf32>
    %452 = vector.extract_strided_slice %389 {offsets = [0, 1], sizes = [1, 1], strides = [1, 1]} : vector<1x6xf32> to vector<1x1xf32>
    %cst_140 = arith.constant 8.000000e+00 : f32
    %453 = vector.broadcast %cst_140 : f32 to vector<1x1xf32>
    %454 = arith.addf %453, %452 : vector<1x1xf32>
    %455 = vector.broadcast %454 : vector<1x1xf32> to vector<7x45xf32>
    %456 = arith.cmpf oeq, %432, %455 : vector<7x45xf32>
    %457 = arith.andi %451, %456 : vector<7x45xi1>
    %458 = vector.extract_strided_slice %428 {offsets = [0, 1], sizes = [1, 1], strides = [1, 1]} : vector<1x6xf32> to vector<1x1xf32>
    %cst_141 = arith.constant 0.000000e+00 : f32
    %459 = vector.shape_cast %458 : vector<1x1xf32> to vector<1x1xf32>
    %460 = vector.broadcast %459 : vector<1x1xf32> to vector<7x45xf32>
    %461 = vector.broadcast %cst_141 : f32 to vector<7x45xf32>
    %462 = arith.select %457, %460, %461 : vector<7x45xi1>, vector<7x45xf32>
    %463 = arith.addf %448, %462 : vector<7x45xf32>
    %464 = vector.extract_strided_slice %390 {offsets = [0, 2], sizes = [1, 1], strides = [1, 1]} : vector<1x6xf32> to vector<1x1xf32>
    %465 = vector.broadcast %464 : vector<1x1xf32> to vector<7x45xf32>
    %466 = arith.cmpf oeq, %430, %465 : vector<7x45xf32>
    %467 = vector.extract_strided_slice %389 {offsets = [0, 2], sizes = [1, 1], strides = [1, 1]} : vector<1x6xf32> to vector<1x1xf32>
    %cst_142 = arith.constant 1.600000e+01 : f32
    %468 = vector.broadcast %cst_142 : f32 to vector<1x1xf32>
    %469 = arith.addf %468, %467 : vector<1x1xf32>
    %470 = vector.broadcast %469 : vector<1x1xf32> to vector<7x45xf32>
    %471 = arith.cmpf oeq, %432, %470 : vector<7x45xf32>
    %472 = arith.andi %466, %471 : vector<7x45xi1>
    %473 = vector.extract_strided_slice %428 {offsets = [0, 2], sizes = [1, 1], strides = [1, 1]} : vector<1x6xf32> to vector<1x1xf32>
    %cst_143 = arith.constant 0.000000e+00 : f32
    %474 = vector.shape_cast %473 : vector<1x1xf32> to vector<1x1xf32>
    %475 = vector.broadcast %474 : vector<1x1xf32> to vector<7x45xf32>
    %476 = vector.broadcast %cst_143 : f32 to vector<7x45xf32>
    %477 = arith.select %472, %475, %476 : vector<7x45xi1>, vector<7x45xf32>
    %478 = arith.addf %463, %477 : vector<7x45xf32>
    %479 = vector.extract_strided_slice %390 {offsets = [0, 3], sizes = [1, 1], strides = [1, 1]} : vector<1x6xf32> to vector<1x1xf32>
    %480 = vector.broadcast %479 : vector<1x1xf32> to vector<7x45xf32>
    %481 = arith.cmpf oeq, %430, %480 : vector<7x45xf32>
    %482 = vector.extract_strided_slice %389 {offsets = [0, 3], sizes = [1, 1], strides = [1, 1]} : vector<1x6xf32> to vector<1x1xf32>
    %cst_144 = arith.constant 2.400000e+01 : f32
    %483 = vector.broadcast %cst_144 : f32 to vector<1x1xf32>
    %484 = arith.addf %483, %482 : vector<1x1xf32>
    %485 = vector.broadcast %484 : vector<1x1xf32> to vector<7x45xf32>
    %486 = arith.cmpf oeq, %432, %485 : vector<7x45xf32>
    %487 = arith.andi %481, %486 : vector<7x45xi1>
    %488 = vector.extract_strided_slice %428 {offsets = [0, 3], sizes = [1, 1], strides = [1, 1]} : vector<1x6xf32> to vector<1x1xf32>
    %cst_145 = arith.constant 0.000000e+00 : f32
    %489 = vector.shape_cast %488 : vector<1x1xf32> to vector<1x1xf32>
    %490 = vector.broadcast %489 : vector<1x1xf32> to vector<7x45xf32>
    %491 = vector.broadcast %cst_145 : f32 to vector<7x45xf32>
    %492 = arith.select %487, %490, %491 : vector<7x45xi1>, vector<7x45xf32>
    %493 = arith.addf %478, %492 : vector<7x45xf32>
    %494 = vector.extract_strided_slice %390 {offsets = [0, 4], sizes = [1, 1], strides = [1, 1]} : vector<1x6xf32> to vector<1x1xf32>
    %495 = vector.broadcast %494 : vector<1x1xf32> to vector<7x45xf32>
    %496 = arith.cmpf oeq, %430, %495 : vector<7x45xf32>
    %497 = vector.extract_strided_slice %389 {offsets = [0, 4], sizes = [1, 1], strides = [1, 1]} : vector<1x6xf32> to vector<1x1xf32>
    %cst_146 = arith.constant 3.200000e+01 : f32
    %498 = vector.broadcast %cst_146 : f32 to vector<1x1xf32>
    %499 = arith.addf %498, %497 : vector<1x1xf32>
    %500 = vector.broadcast %499 : vector<1x1xf32> to vector<7x45xf32>
    %501 = arith.cmpf oeq, %432, %500 : vector<7x45xf32>
    %502 = arith.andi %496, %501 : vector<7x45xi1>
    %503 = vector.extract_strided_slice %428 {offsets = [0, 4], sizes = [1, 1], strides = [1, 1]} : vector<1x6xf32> to vector<1x1xf32>
    %cst_147 = arith.constant 0.000000e+00 : f32
    %504 = vector.shape_cast %503 : vector<1x1xf32> to vector<1x1xf32>
    %505 = vector.broadcast %504 : vector<1x1xf32> to vector<7x45xf32>
    %506 = vector.broadcast %cst_147 : f32 to vector<7x45xf32>
    %507 = arith.select %502, %505, %506 : vector<7x45xi1>, vector<7x45xf32>
    %508 = arith.addf %493, %507 : vector<7x45xf32>
    %509 = vector.extract_strided_slice %390 {offsets = [0, 5], sizes = [1, 1], strides = [1, 1]} : vector<1x6xf32> to vector<1x1xf32>
    %510 = vector.broadcast %509 : vector<1x1xf32> to vector<7x45xf32>
    %511 = arith.cmpf oeq, %430, %510 : vector<7x45xf32>
    %512 = vector.extract_strided_slice %389 {offsets = [0, 5], sizes = [1, 1], strides = [1, 1]} : vector<1x6xf32> to vector<1x1xf32>
    %cst_148 = arith.constant 4.000000e+01 : f32
    %513 = vector.broadcast %cst_148 : f32 to vector<1x1xf32>
    %514 = arith.addf %513, %512 : vector<1x1xf32>
    %515 = vector.broadcast %514 : vector<1x1xf32> to vector<7x45xf32>
    %516 = arith.cmpf oeq, %432, %515 : vector<7x45xf32>
    %517 = arith.andi %511, %516 : vector<7x45xi1>
    %518 = vector.extract_strided_slice %428 {offsets = [0, 5], sizes = [1, 1], strides = [1, 1]} : vector<1x6xf32> to vector<1x1xf32>
    %cst_149 = arith.constant 0.000000e+00 : f32
    %519 = vector.shape_cast %518 : vector<1x1xf32> to vector<1x1xf32>
    %520 = vector.broadcast %519 : vector<1x1xf32> to vector<7x45xf32>
    %521 = vector.broadcast %cst_149 : f32 to vector<7x45xf32>
    %522 = arith.select %517, %520, %521 : vector<7x45xi1>, vector<7x45xf32>
    %523 = arith.addf %508, %522 : vector<7x45xf32>
    %cst_150 = arith.constant 0.000000e+00 : f32
    %524 = vector.broadcast %cst_150 : f32 to vector<7x3xf32>
    %525 = tpu.concatenate %524, %523, %524 in 1 : vector<7x3xf32>, vector<7x45xf32>, vector<7x3xf32> -> vector<7x51xf32>
    %cst_151 = arith.constant 0.000000e+00 : f32
    %526 = vector.broadcast %cst_151 : f32 to vector<1x51xf32>
    %527 = tpu.concatenate %526, %525, %526 in 0 : vector<1x51xf32>, vector<7x51xf32>, vector<1x51xf32> -> vector<9x51xf32>
    %cst_152 = arith.constant 0.000000e+00 : f32
    %528 = vector.broadcast %cst_152 : f32 to vector<8x48xf32>
    %529 = vector.extract_strided_slice %527 {offsets = [0, 0], sizes = [9, 48], strides = [1, 1]} : vector<9x51xf32> to vector<9x48xf32>
    %c0_153 = arith.constant 0 : index
    %530 = memref.load %arg9[%c0_153] : memref<8xf32, #tpu.memory_space<smem>>
    %531 = vector.extract_strided_slice %529 {offsets = [0, 0], sizes = [8, 48], strides = [1, 1]} : vector<9x48xf32> to vector<8x48xf32>
    %532 = vector.broadcast %530 : f32 to vector<8x48xf32>
    %533 = arith.mulf %532, %531 : vector<8x48xf32>
    %534 = arith.addf %528, %533 : vector<8x48xf32>
    %c1_154 = arith.constant 1 : index
    %535 = memref.load %arg9[%c1_154] : memref<8xf32, #tpu.memory_space<smem>>
    %536 = vector.extract_strided_slice %529 {offsets = [1, 0], sizes = [8, 48], strides = [1, 1]} : vector<9x48xf32> to vector<8x48xf32>
    %537 = vector.broadcast %535 : f32 to vector<8x48xf32>
    %538 = arith.mulf %537, %536 : vector<8x48xf32>
    %539 = arith.addf %534, %538 : vector<8x48xf32>
    %540 = vector.extract_strided_slice %527 {offsets = [0, 1], sizes = [9, 48], strides = [1, 1]} : vector<9x51xf32> to vector<9x48xf32>
    %c2_155 = arith.constant 2 : index
    %541 = memref.load %arg9[%c2_155] : memref<8xf32, #tpu.memory_space<smem>>
    %542 = vector.extract_strided_slice %540 {offsets = [0, 0], sizes = [8, 48], strides = [1, 1]} : vector<9x48xf32> to vector<8x48xf32>
    %543 = vector.broadcast %541 : f32 to vector<8x48xf32>
    %544 = arith.mulf %543, %542 : vector<8x48xf32>
    %545 = arith.addf %539, %544 : vector<8x48xf32>
    %c3_156 = arith.constant 3 : index
    %546 = memref.load %arg9[%c3_156] : memref<8xf32, #tpu.memory_space<smem>>
    %547 = vector.extract_strided_slice %540 {offsets = [1, 0], sizes = [8, 48], strides = [1, 1]} : vector<9x48xf32> to vector<8x48xf32>
    %548 = vector.broadcast %546 : f32 to vector<8x48xf32>
    %549 = arith.mulf %548, %547 : vector<8x48xf32>
    %550 = arith.addf %545, %549 : vector<8x48xf32>
    %551 = vector.extract_strided_slice %527 {offsets = [0, 2], sizes = [9, 48], strides = [1, 1]} : vector<9x51xf32> to vector<9x48xf32>
    %c4_157 = arith.constant 4 : index
    %552 = memref.load %arg9[%c4_157] : memref<8xf32, #tpu.memory_space<smem>>
    %553 = vector.extract_strided_slice %551 {offsets = [0, 0], sizes = [8, 48], strides = [1, 1]} : vector<9x48xf32> to vector<8x48xf32>
    %554 = vector.broadcast %552 : f32 to vector<8x48xf32>
    %555 = arith.mulf %554, %553 : vector<8x48xf32>
    %556 = arith.addf %550, %555 : vector<8x48xf32>
    %c5_158 = arith.constant 5 : index
    %557 = memref.load %arg9[%c5_158] : memref<8xf32, #tpu.memory_space<smem>>
    %558 = vector.extract_strided_slice %551 {offsets = [1, 0], sizes = [8, 48], strides = [1, 1]} : vector<9x48xf32> to vector<8x48xf32>
    %559 = vector.broadcast %557 : f32 to vector<8x48xf32>
    %560 = arith.mulf %559, %558 : vector<8x48xf32>
    %561 = arith.addf %556, %560 : vector<8x48xf32>
    %562 = vector.extract_strided_slice %527 {offsets = [0, 3], sizes = [9, 48], strides = [1, 1]} : vector<9x51xf32> to vector<9x48xf32>
    %c6_159 = arith.constant 6 : index
    %563 = memref.load %arg9[%c6_159] : memref<8xf32, #tpu.memory_space<smem>>
    %564 = vector.extract_strided_slice %562 {offsets = [0, 0], sizes = [8, 48], strides = [1, 1]} : vector<9x48xf32> to vector<8x48xf32>
    %565 = vector.broadcast %563 : f32 to vector<8x48xf32>
    %566 = arith.mulf %565, %564 : vector<8x48xf32>
    %567 = arith.addf %561, %566 : vector<8x48xf32>
    %c7_160 = arith.constant 7 : index
    %568 = memref.load %arg9[%c7_160] : memref<8xf32, #tpu.memory_space<smem>>
    %569 = vector.extract_strided_slice %562 {offsets = [1, 0], sizes = [8, 48], strides = [1, 1]} : vector<9x48xf32> to vector<8x48xf32>
    %570 = vector.broadcast %568 : f32 to vector<8x48xf32>
    %571 = arith.mulf %570, %569 : vector<8x48xf32>
    %572 = arith.addf %567, %571 : vector<8x48xf32>
    %c2_161 = arith.constant 2 : index
    %573 = memref.load %arg10[%c2_161] : memref<6xf32, #tpu.memory_space<smem>>
    %574 = vector.broadcast %573 : f32 to vector<8x48xf32>
    %575 = arith.addf %572, %574 : vector<8x48xf32>
    %cst_162 = arith.constant 0.000000e+00 : f32
    %576 = vector.broadcast %cst_162 : f32 to vector<8x48xf32>
    %577 = arith.maximumf %575, %576 : vector<8x48xf32>
    %cst_163 = arith.constant 1.600000e+01 : f32
    %578 = vector.broadcast %cst_163 : f32 to vector<8x48xf32>
    %579 = arith.mulf %578, %212 : vector<8x48xf32>
    %580 = arith.addf %579, %211 : vector<8x48xf32>
    %581 = tpu.iota {dimensions = array<i32: 0>} : vector<8x48xi32>
    %582 = vector.extract_strided_slice %580 {offsets = [0, 1], sizes = [8, 47], strides = [1, 1]} : vector<8x48xf32> to vector<8x47xf32>
    %cst_164 = arith.constant -1.000000e+03 : f32
    %583 = vector.broadcast %cst_164 : f32 to vector<8x1xf32>
    %584 = tpu.concatenate %582, %583 in 1 : vector<8x47xf32>, vector<8x1xf32> -> vector<8x48xf32>
    %c7_i32 = arith.constant 7 : i32
    %585 = tpu.dynamic_rotate %580 by %c7_i32 dim 0 : vector<8x48xf32>, i32 -> vector<8x48xf32>
    %c7_i32_165 = arith.constant 7 : i32
    %586 = vector.broadcast %c7_i32_165 : i32 to vector<8x48xi32>
    %587 = arith.cmpi slt, %581, %586 : vector<8x48xi32>
    %c1_i32_166 = arith.constant 1 : i32
    %588 = tpu.dynamic_rotate %584 by %c1_i32_166 dim 0 : vector<8x48xf32>, i32 -> vector<8x48xf32>
    %c0_i32_167 = arith.constant 0 : i32
    %589 = vector.broadcast %c0_i32_167 : i32 to vector<8x48xi32>
    %590 = arith.cmpi sgt, %581, %589 : vector<8x48xi32>
    %c7_i32_168 = arith.constant 7 : i32
    %591 = tpu.dynamic_rotate %584 by %c7_i32_168 dim 0 : vector<8x48xf32>, i32 -> vector<8x48xf32>
    %c7_i32_169 = arith.constant 7 : i32
    %592 = vector.broadcast %c7_i32_169 : i32 to vector<8x48xi32>
    %593 = arith.cmpi slt, %581, %592 : vector<8x48xi32>
    %cst_170 = arith.constant 6.400000e+01 : f32
    %594 = vector.broadcast %cst_170 : f32 to vector<8x48xf32>
    %595 = arith.subf %580, %594 : vector<8x48xf32>
    %596 = arith.cmpf oeq, %585, %595 : vector<8x48xf32>
    %597 = arith.andi %596, %587 : vector<8x48xi1>
    %cst_171 = arith.constant -6.000000e+01 : f32
    %598 = vector.broadcast %cst_171 : f32 to vector<8x48xf32>
    %599 = arith.subf %580, %598 : vector<8x48xf32>
    %600 = arith.cmpf oeq, %588, %599 : vector<8x48xf32>
    %601 = arith.andi %600, %590 : vector<8x48xi1>
    %602 = arith.ori %597, %601 : vector<8x48xi1>
    %cst_172 = arith.constant 4.000000e+00 : f32
    %603 = vector.broadcast %cst_172 : f32 to vector<8x48xf32>
    %604 = arith.subf %580, %603 : vector<8x48xf32>
    %605 = arith.cmpf oeq, %584, %604 : vector<8x48xf32>
    %606 = arith.ori %602, %605 : vector<8x48xi1>
    %cst_173 = arith.constant 6.800000e+01 : f32
    %607 = vector.broadcast %cst_173 : f32 to vector<8x48xf32>
    %608 = arith.subf %580, %607 : vector<8x48xf32>
    %609 = arith.cmpf oeq, %591, %608 : vector<8x48xf32>
    %610 = arith.andi %609, %593 : vector<8x48xi1>
    %611 = arith.ori %606, %610 : vector<8x48xi1>
    %cst_174 = arith.constant 0.000000e+00 : f32
    %612 = vector.broadcast %cst_174 : f32 to vector<8x48xf32>
    %613 = arith.select %611, %612, %577 : vector<8x48xi1>, vector<8x48xf32>
    %cst_175 = arith.constant 0.000000e+00 : f32
    %614 = vector.broadcast %cst_175 : f32 to vector<8x48xf32>
    %615 = arith.cmpf oeq, %212, %614 : vector<8x48xf32>
    %cst_176 = arith.constant 0.000000e+00 : f32
    %616 = vector.broadcast %cst_176 : f32 to vector<8x48xf32>
    %617 = arith.cmpf oeq, %211, %616 : vector<8x48xf32>
    %618 = arith.andi %615, %617 : vector<8x48xi1>
    %cst_177 = arith.constant 0.000000e+00 : f32
    %619 = vector.broadcast %cst_177 : f32 to vector<8x48xf32>
    %620 = arith.select %618, %613, %619 : vector<8x48xi1>, vector<8x48xf32>
    %cst_178 = arith.constant 1.000000e+00 : f32
    %621 = vector.broadcast %cst_178 : f32 to vector<8x48xf32>
    %622 = arith.cmpf oeq, %212, %621 : vector<8x48xf32>
    %cst_179 = arith.constant 0.000000e+00 : f32
    %623 = vector.broadcast %cst_179 : f32 to vector<8x48xf32>
    %624 = arith.cmpf oeq, %211, %623 : vector<8x48xf32>
    %625 = arith.andi %622, %624 : vector<8x48xi1>
    %cst_180 = arith.constant 0.000000e+00 : f32
    %626 = vector.broadcast %cst_180 : f32 to vector<8x48xf32>
    %627 = arith.select %625, %613, %626 : vector<8x48xi1>, vector<8x48xf32>
    %cst_181 = arith.constant 2.000000e+00 : f32
    %628 = vector.broadcast %cst_181 : f32 to vector<8x48xf32>
    %629 = arith.cmpf oeq, %212, %628 : vector<8x48xf32>
    %cst_182 = arith.constant 0.000000e+00 : f32
    %630 = vector.broadcast %cst_182 : f32 to vector<8x48xf32>
    %631 = arith.cmpf oeq, %211, %630 : vector<8x48xf32>
    %632 = arith.andi %629, %631 : vector<8x48xi1>
    %cst_183 = arith.constant 0.000000e+00 : f32
    %633 = vector.broadcast %cst_183 : f32 to vector<8x48xf32>
    %634 = arith.select %632, %613, %633 : vector<8x48xi1>, vector<8x48xf32>
    %cst_184 = arith.constant 3.000000e+00 : f32
    %635 = vector.broadcast %cst_184 : f32 to vector<8x48xf32>
    %636 = arith.cmpf oeq, %212, %635 : vector<8x48xf32>
    %cst_185 = arith.constant 0.000000e+00 : f32
    %637 = vector.broadcast %cst_185 : f32 to vector<8x48xf32>
    %638 = arith.cmpf oeq, %211, %637 : vector<8x48xf32>
    %639 = arith.andi %636, %638 : vector<8x48xi1>
    %cst_186 = arith.constant 0.000000e+00 : f32
    %640 = vector.broadcast %cst_186 : f32 to vector<8x48xf32>
    %641 = arith.select %639, %613, %640 : vector<8x48xi1>, vector<8x48xf32>
    %cst_187 = arith.constant 4.000000e+00 : f32
    %642 = vector.broadcast %cst_187 : f32 to vector<8x48xf32>
    %643 = arith.cmpf oeq, %212, %642 : vector<8x48xf32>
    %cst_188 = arith.constant 0.000000e+00 : f32
    %644 = vector.broadcast %cst_188 : f32 to vector<8x48xf32>
    %645 = arith.cmpf oeq, %211, %644 : vector<8x48xf32>
    %646 = arith.andi %643, %645 : vector<8x48xi1>
    %cst_189 = arith.constant 0.000000e+00 : f32
    %647 = vector.broadcast %cst_189 : f32 to vector<8x48xf32>
    %648 = arith.select %646, %613, %647 : vector<8x48xi1>, vector<8x48xf32>
    %649 = tpu.concatenate %620, %627, %634, %641, %648 in 0 : vector<8x48xf32>, vector<8x48xf32>, vector<8x48xf32>, vector<8x48xf32>, vector<8x48xf32> -> vector<40x48xf32>
    %cst_190 = arith.constant 0.000000e+00 : f32
    %650 = vector.broadcast %cst_190 : f32 to vector<8x48xf32>
    %651 = arith.cmpf oeq, %212, %650 : vector<8x48xf32>
    %cst_191 = arith.constant 1.000000e+00 : f32
    %652 = vector.broadcast %cst_191 : f32 to vector<8x48xf32>
    %653 = arith.cmpf oeq, %211, %652 : vector<8x48xf32>
    %654 = arith.andi %651, %653 : vector<8x48xi1>
    %cst_192 = arith.constant 0.000000e+00 : f32
    %655 = vector.broadcast %cst_192 : f32 to vector<8x48xf32>
    %656 = arith.select %654, %613, %655 : vector<8x48xi1>, vector<8x48xf32>
    %cst_193 = arith.constant 1.000000e+00 : f32
    %657 = vector.broadcast %cst_193 : f32 to vector<8x48xf32>
    %658 = arith.cmpf oeq, %212, %657 : vector<8x48xf32>
    %cst_194 = arith.constant 1.000000e+00 : f32
    %659 = vector.broadcast %cst_194 : f32 to vector<8x48xf32>
    %660 = arith.cmpf oeq, %211, %659 : vector<8x48xf32>
    %661 = arith.andi %658, %660 : vector<8x48xi1>
    %cst_195 = arith.constant 0.000000e+00 : f32
    %662 = vector.broadcast %cst_195 : f32 to vector<8x48xf32>
    %663 = arith.select %661, %613, %662 : vector<8x48xi1>, vector<8x48xf32>
    %cst_196 = arith.constant 2.000000e+00 : f32
    %664 = vector.broadcast %cst_196 : f32 to vector<8x48xf32>
    %665 = arith.cmpf oeq, %212, %664 : vector<8x48xf32>
    %cst_197 = arith.constant 1.000000e+00 : f32
    %666 = vector.broadcast %cst_197 : f32 to vector<8x48xf32>
    %667 = arith.cmpf oeq, %211, %666 : vector<8x48xf32>
    %668 = arith.andi %665, %667 : vector<8x48xi1>
    %cst_198 = arith.constant 0.000000e+00 : f32
    %669 = vector.broadcast %cst_198 : f32 to vector<8x48xf32>
    %670 = arith.select %668, %613, %669 : vector<8x48xi1>, vector<8x48xf32>
    %cst_199 = arith.constant 3.000000e+00 : f32
    %671 = vector.broadcast %cst_199 : f32 to vector<8x48xf32>
    %672 = arith.cmpf oeq, %212, %671 : vector<8x48xf32>
    %cst_200 = arith.constant 1.000000e+00 : f32
    %673 = vector.broadcast %cst_200 : f32 to vector<8x48xf32>
    %674 = arith.cmpf oeq, %211, %673 : vector<8x48xf32>
    %675 = arith.andi %672, %674 : vector<8x48xi1>
    %cst_201 = arith.constant 0.000000e+00 : f32
    %676 = vector.broadcast %cst_201 : f32 to vector<8x48xf32>
    %677 = arith.select %675, %613, %676 : vector<8x48xi1>, vector<8x48xf32>
    %cst_202 = arith.constant 4.000000e+00 : f32
    %678 = vector.broadcast %cst_202 : f32 to vector<8x48xf32>
    %679 = arith.cmpf oeq, %212, %678 : vector<8x48xf32>
    %cst_203 = arith.constant 1.000000e+00 : f32
    %680 = vector.broadcast %cst_203 : f32 to vector<8x48xf32>
    %681 = arith.cmpf oeq, %211, %680 : vector<8x48xf32>
    %682 = arith.andi %679, %681 : vector<8x48xi1>
    %cst_204 = arith.constant 0.000000e+00 : f32
    %683 = vector.broadcast %cst_204 : f32 to vector<8x48xf32>
    %684 = arith.select %682, %613, %683 : vector<8x48xi1>, vector<8x48xf32>
    %685 = tpu.concatenate %656, %663, %670, %677, %684 in 0 : vector<8x48xf32>, vector<8x48xf32>, vector<8x48xf32>, vector<8x48xf32>, vector<8x48xf32> -> vector<40x48xf32>
    %cst_205 = arith.constant 0.000000e+00 : f32
    %686 = vector.broadcast %cst_205 : f32 to vector<8x48xf32>
    %687 = arith.cmpf oeq, %212, %686 : vector<8x48xf32>
    %cst_206 = arith.constant 2.000000e+00 : f32
    %688 = vector.broadcast %cst_206 : f32 to vector<8x48xf32>
    %689 = arith.cmpf oeq, %211, %688 : vector<8x48xf32>
    %690 = arith.andi %687, %689 : vector<8x48xi1>
    %cst_207 = arith.constant 0.000000e+00 : f32
    %691 = vector.broadcast %cst_207 : f32 to vector<8x48xf32>
    %692 = arith.select %690, %613, %691 : vector<8x48xi1>, vector<8x48xf32>
    %cst_208 = arith.constant 1.000000e+00 : f32
    %693 = vector.broadcast %cst_208 : f32 to vector<8x48xf32>
    %694 = arith.cmpf oeq, %212, %693 : vector<8x48xf32>
    %cst_209 = arith.constant 2.000000e+00 : f32
    %695 = vector.broadcast %cst_209 : f32 to vector<8x48xf32>
    %696 = arith.cmpf oeq, %211, %695 : vector<8x48xf32>
    %697 = arith.andi %694, %696 : vector<8x48xi1>
    %cst_210 = arith.constant 0.000000e+00 : f32
    %698 = vector.broadcast %cst_210 : f32 to vector<8x48xf32>
    %699 = arith.select %697, %613, %698 : vector<8x48xi1>, vector<8x48xf32>
    %cst_211 = arith.constant 2.000000e+00 : f32
    %700 = vector.broadcast %cst_211 : f32 to vector<8x48xf32>
    %701 = arith.cmpf oeq, %212, %700 : vector<8x48xf32>
    %cst_212 = arith.constant 2.000000e+00 : f32
    %702 = vector.broadcast %cst_212 : f32 to vector<8x48xf32>
    %703 = arith.cmpf oeq, %211, %702 : vector<8x48xf32>
    %704 = arith.andi %701, %703 : vector<8x48xi1>
    %cst_213 = arith.constant 0.000000e+00 : f32
    %705 = vector.broadcast %cst_213 : f32 to vector<8x48xf32>
    %706 = arith.select %704, %613, %705 : vector<8x48xi1>, vector<8x48xf32>
    %cst_214 = arith.constant 3.000000e+00 : f32
    %707 = vector.broadcast %cst_214 : f32 to vector<8x48xf32>
    %708 = arith.cmpf oeq, %212, %707 : vector<8x48xf32>
    %cst_215 = arith.constant 2.000000e+00 : f32
    %709 = vector.broadcast %cst_215 : f32 to vector<8x48xf32>
    %710 = arith.cmpf oeq, %211, %709 : vector<8x48xf32>
    %711 = arith.andi %708, %710 : vector<8x48xi1>
    %cst_216 = arith.constant 0.000000e+00 : f32
    %712 = vector.broadcast %cst_216 : f32 to vector<8x48xf32>
    %713 = arith.select %711, %613, %712 : vector<8x48xi1>, vector<8x48xf32>
    %cst_217 = arith.constant 4.000000e+00 : f32
    %714 = vector.broadcast %cst_217 : f32 to vector<8x48xf32>
    %715 = arith.cmpf oeq, %212, %714 : vector<8x48xf32>
    %cst_218 = arith.constant 2.000000e+00 : f32
    %716 = vector.broadcast %cst_218 : f32 to vector<8x48xf32>
    %717 = arith.cmpf oeq, %211, %716 : vector<8x48xf32>
    %718 = arith.andi %715, %717 : vector<8x48xi1>
    %cst_219 = arith.constant 0.000000e+00 : f32
    %719 = vector.broadcast %cst_219 : f32 to vector<8x48xf32>
    %720 = arith.select %718, %613, %719 : vector<8x48xi1>, vector<8x48xf32>
    %721 = tpu.concatenate %692, %699, %706, %713, %720 in 0 : vector<8x48xf32>, vector<8x48xf32>, vector<8x48xf32>, vector<8x48xf32>, vector<8x48xf32> -> vector<40x48xf32>
    %cst_220 = arith.constant 0.000000e+00 : f32
    %722 = vector.broadcast %cst_220 : f32 to vector<8x48xf32>
    %723 = arith.cmpf oeq, %212, %722 : vector<8x48xf32>
    %cst_221 = arith.constant 3.000000e+00 : f32
    %724 = vector.broadcast %cst_221 : f32 to vector<8x48xf32>
    %725 = arith.cmpf oeq, %211, %724 : vector<8x48xf32>
    %726 = arith.andi %723, %725 : vector<8x48xi1>
    %cst_222 = arith.constant 0.000000e+00 : f32
    %727 = vector.broadcast %cst_222 : f32 to vector<8x48xf32>
    %728 = arith.select %726, %613, %727 : vector<8x48xi1>, vector<8x48xf32>
    %cst_223 = arith.constant 1.000000e+00 : f32
    %729 = vector.broadcast %cst_223 : f32 to vector<8x48xf32>
    %730 = arith.cmpf oeq, %212, %729 : vector<8x48xf32>
    %cst_224 = arith.constant 3.000000e+00 : f32
    %731 = vector.broadcast %cst_224 : f32 to vector<8x48xf32>
    %732 = arith.cmpf oeq, %211, %731 : vector<8x48xf32>
    %733 = arith.andi %730, %732 : vector<8x48xi1>
    %cst_225 = arith.constant 0.000000e+00 : f32
    %734 = vector.broadcast %cst_225 : f32 to vector<8x48xf32>
    %735 = arith.select %733, %613, %734 : vector<8x48xi1>, vector<8x48xf32>
    %cst_226 = arith.constant 2.000000e+00 : f32
    %736 = vector.broadcast %cst_226 : f32 to vector<8x48xf32>
    %737 = arith.cmpf oeq, %212, %736 : vector<8x48xf32>
    %cst_227 = arith.constant 3.000000e+00 : f32
    %738 = vector.broadcast %cst_227 : f32 to vector<8x48xf32>
    %739 = arith.cmpf oeq, %211, %738 : vector<8x48xf32>
    %740 = arith.andi %737, %739 : vector<8x48xi1>
    %cst_228 = arith.constant 0.000000e+00 : f32
    %741 = vector.broadcast %cst_228 : f32 to vector<8x48xf32>
    %742 = arith.select %740, %613, %741 : vector<8x48xi1>, vector<8x48xf32>
    %cst_229 = arith.constant 3.000000e+00 : f32
    %743 = vector.broadcast %cst_229 : f32 to vector<8x48xf32>
    %744 = arith.cmpf oeq, %212, %743 : vector<8x48xf32>
    %cst_230 = arith.constant 3.000000e+00 : f32
    %745 = vector.broadcast %cst_230 : f32 to vector<8x48xf32>
    %746 = arith.cmpf oeq, %211, %745 : vector<8x48xf32>
    %747 = arith.andi %744, %746 : vector<8x48xi1>
    %cst_231 = arith.constant 0.000000e+00 : f32
    %748 = vector.broadcast %cst_231 : f32 to vector<8x48xf32>
    %749 = arith.select %747, %613, %748 : vector<8x48xi1>, vector<8x48xf32>
    %cst_232 = arith.constant 4.000000e+00 : f32
    %750 = vector.broadcast %cst_232 : f32 to vector<8x48xf32>
    %751 = arith.cmpf oeq, %212, %750 : vector<8x48xf32>
    %cst_233 = arith.constant 3.000000e+00 : f32
    %752 = vector.broadcast %cst_233 : f32 to vector<8x48xf32>
    %753 = arith.cmpf oeq, %211, %752 : vector<8x48xf32>
    %754 = arith.andi %751, %753 : vector<8x48xi1>
    %cst_234 = arith.constant 0.000000e+00 : f32
    %755 = vector.broadcast %cst_234 : f32 to vector<8x48xf32>
    %756 = arith.select %754, %613, %755 : vector<8x48xi1>, vector<8x48xf32>
    %757 = tpu.concatenate %728, %735, %742, %749, %756 in 0 : vector<8x48xf32>, vector<8x48xf32>, vector<8x48xf32>, vector<8x48xf32>, vector<8x48xf32> -> vector<40x48xf32>
    %cst_235 = arith.constant 0.000000e+00 : f32
    %758 = vector.broadcast %cst_235 : f32 to vector<8x48xf32>
    %759 = arith.cmpf oeq, %212, %758 : vector<8x48xf32>
    %cst_236 = arith.constant 4.000000e+00 : f32
    %760 = vector.broadcast %cst_236 : f32 to vector<8x48xf32>
    %761 = arith.cmpf oeq, %211, %760 : vector<8x48xf32>
    %762 = arith.andi %759, %761 : vector<8x48xi1>
    %cst_237 = arith.constant 0.000000e+00 : f32
    %763 = vector.broadcast %cst_237 : f32 to vector<8x48xf32>
    %764 = arith.select %762, %613, %763 : vector<8x48xi1>, vector<8x48xf32>
    %cst_238 = arith.constant 1.000000e+00 : f32
    %765 = vector.broadcast %cst_238 : f32 to vector<8x48xf32>
    %766 = arith.cmpf oeq, %212, %765 : vector<8x48xf32>
    %cst_239 = arith.constant 4.000000e+00 : f32
    %767 = vector.broadcast %cst_239 : f32 to vector<8x48xf32>
    %768 = arith.cmpf oeq, %211, %767 : vector<8x48xf32>
    %769 = arith.andi %766, %768 : vector<8x48xi1>
    %cst_240 = arith.constant 0.000000e+00 : f32
    %770 = vector.broadcast %cst_240 : f32 to vector<8x48xf32>
    %771 = arith.select %769, %613, %770 : vector<8x48xi1>, vector<8x48xf32>
    %cst_241 = arith.constant 2.000000e+00 : f32
    %772 = vector.broadcast %cst_241 : f32 to vector<8x48xf32>
    %773 = arith.cmpf oeq, %212, %772 : vector<8x48xf32>
    %cst_242 = arith.constant 4.000000e+00 : f32
    %774 = vector.broadcast %cst_242 : f32 to vector<8x48xf32>
    %775 = arith.cmpf oeq, %211, %774 : vector<8x48xf32>
    %776 = arith.andi %773, %775 : vector<8x48xi1>
    %cst_243 = arith.constant 0.000000e+00 : f32
    %777 = vector.broadcast %cst_243 : f32 to vector<8x48xf32>
    %778 = arith.select %776, %613, %777 : vector<8x48xi1>, vector<8x48xf32>
    %cst_244 = arith.constant 3.000000e+00 : f32
    %779 = vector.broadcast %cst_244 : f32 to vector<8x48xf32>
    %780 = arith.cmpf oeq, %212, %779 : vector<8x48xf32>
    %cst_245 = arith.constant 4.000000e+00 : f32
    %781 = vector.broadcast %cst_245 : f32 to vector<8x48xf32>
    %782 = arith.cmpf oeq, %211, %781 : vector<8x48xf32>
    %783 = arith.andi %780, %782 : vector<8x48xi1>
    %cst_246 = arith.constant 0.000000e+00 : f32
    %784 = vector.broadcast %cst_246 : f32 to vector<8x48xf32>
    %785 = arith.select %783, %613, %784 : vector<8x48xi1>, vector<8x48xf32>
    %cst_247 = arith.constant 4.000000e+00 : f32
    %786 = vector.broadcast %cst_247 : f32 to vector<8x48xf32>
    %787 = arith.cmpf oeq, %212, %786 : vector<8x48xf32>
    %cst_248 = arith.constant 4.000000e+00 : f32
    %788 = vector.broadcast %cst_248 : f32 to vector<8x48xf32>
    %789 = arith.cmpf oeq, %211, %788 : vector<8x48xf32>
    %790 = arith.andi %787, %789 : vector<8x48xi1>
    %cst_249 = arith.constant 0.000000e+00 : f32
    %791 = vector.broadcast %cst_249 : f32 to vector<8x48xf32>
    %792 = arith.select %790, %613, %791 : vector<8x48xi1>, vector<8x48xf32>
    %793 = tpu.concatenate %764, %771, %778, %785, %792 in 0 : vector<8x48xf32>, vector<8x48xf32>, vector<8x48xf32>, vector<8x48xf32>, vector<8x48xf32> -> vector<40x48xf32>
    %794 = tpu.concatenate %649, %685, %721, %757, %793 in 1 : vector<40x48xf32>, vector<40x48xf32>, vector<40x48xf32>, vector<40x48xf32>, vector<40x48xf32> -> vector<40x240xf32>
    %c0_250 = arith.constant 0 : index
    %c0_251 = arith.constant 0 : index
    %795 = vector.load %arg3[%c0_250, %c0_251] : memref<240x256xf32, #tpu.memory_space<vmem>>, vector<240x256xf32>
    %cst_252 = arith.constant dense<0.000000e+00> : vector<40x256xf32>
    %796 = tpu.matmul %794, %795, %cst_252 {dimension_numbers = #tpu.dot_dimension_numbers<[1], [0], [0], [1], [0, 0, 1, 1], [], []>} : vector<40x240xf32>, vector<240x256xf32>, vector<40x256xf32> -> vector<40x256xf32>
    %c0_253 = arith.constant 0 : index
    %c0_254 = arith.constant 0 : index
    %797 = vector.load %arg4[%c0_253, %c0_254] : memref<160x40xf32, #tpu.memory_space<vmem>>, vector<160x40xf32>
    %cst_255 = arith.constant dense<0.000000e+00> : vector<160x256xf32>
    %798 = tpu.matmul %797, %796, %cst_255 {dimension_numbers = #tpu.dot_dimension_numbers<[1], [0], [0], [1], [0, 0, 1, 1], [], []>} : vector<160x40xf32>, vector<40x256xf32>, vector<160x256xf32> -> vector<160x256xf32>
    %799 = vector.extract_strided_slice %798 {offsets = [0, 0], sizes = [40, 256], strides = [1, 1]} : vector<160x256xf32> to vector<40x256xf32>
    %c0_256 = arith.constant 0 : index
    %c0_257 = arith.constant 0 : index
    %c0_258 = arith.constant 0 : index
    %800 = vector.load %arg2[%c0_256, %c0_257, %c0_258] : memref<4x256x256xf32, #tpu.memory_space<vmem>>, vector<1x256x256xf32>
    %801 = vector.shape_cast %800 : vector<1x256x256xf32> to vector<256x256xf32>
    %cst_259 = arith.constant dense<0.000000e+00> : vector<40x256xf32>
    %802 = tpu.matmul %799, %801, %cst_259 {dimension_numbers = #tpu.dot_dimension_numbers<[1], [0], [0], [1], [0, 0, 1, 1], [], []>} : vector<40x256xf32>, vector<256x256xf32>, vector<40x256xf32> -> vector<40x256xf32>
    %803 = vector.extract_strided_slice %798 {offsets = [40, 0], sizes = [40, 256], strides = [1, 1]} : vector<160x256xf32> to vector<40x256xf32>
    %c1_260 = arith.constant 1 : index
    %c0_261 = arith.constant 0 : index
    %c0_262 = arith.constant 0 : index
    %804 = vector.load %arg2[%c1_260, %c0_261, %c0_262] : memref<4x256x256xf32, #tpu.memory_space<vmem>>, vector<1x256x256xf32>
    %805 = vector.shape_cast %804 : vector<1x256x256xf32> to vector<256x256xf32>
    %cst_263 = arith.constant dense<0.000000e+00> : vector<40x256xf32>
    %806 = tpu.matmul %803, %805, %cst_263 {dimension_numbers = #tpu.dot_dimension_numbers<[1], [0], [0], [1], [0, 0, 1, 1], [], []>} : vector<40x256xf32>, vector<256x256xf32>, vector<40x256xf32> -> vector<40x256xf32>
    %807 = arith.addf %802, %806 : vector<40x256xf32>
    %808 = vector.extract_strided_slice %798 {offsets = [80, 0], sizes = [40, 256], strides = [1, 1]} : vector<160x256xf32> to vector<40x256xf32>
    %c2_264 = arith.constant 2 : index
    %c0_265 = arith.constant 0 : index
    %c0_266 = arith.constant 0 : index
    %809 = vector.load %arg2[%c2_264, %c0_265, %c0_266] : memref<4x256x256xf32, #tpu.memory_space<vmem>>, vector<1x256x256xf32>
    %810 = vector.shape_cast %809 : vector<1x256x256xf32> to vector<256x256xf32>
    %cst_267 = arith.constant dense<0.000000e+00> : vector<40x256xf32>
    %811 = tpu.matmul %808, %810, %cst_267 {dimension_numbers = #tpu.dot_dimension_numbers<[1], [0], [0], [1], [0, 0, 1, 1], [], []>} : vector<40x256xf32>, vector<256x256xf32>, vector<40x256xf32> -> vector<40x256xf32>
    %812 = arith.addf %807, %811 : vector<40x256xf32>
    %813 = vector.extract_strided_slice %798 {offsets = [120, 0], sizes = [40, 256], strides = [1, 1]} : vector<160x256xf32> to vector<40x256xf32>
    %c3_268 = arith.constant 3 : index
    %c0_269 = arith.constant 0 : index
    %c0_270 = arith.constant 0 : index
    %814 = vector.load %arg2[%c3_268, %c0_269, %c0_270] : memref<4x256x256xf32, #tpu.memory_space<vmem>>, vector<1x256x256xf32>
    %815 = vector.shape_cast %814 : vector<1x256x256xf32> to vector<256x256xf32>
    %cst_271 = arith.constant dense<0.000000e+00> : vector<40x256xf32>
    %816 = tpu.matmul %813, %815, %cst_271 {dimension_numbers = #tpu.dot_dimension_numbers<[1], [0], [0], [1], [0, 0, 1, 1], [], []>} : vector<40x256xf32>, vector<256x256xf32>, vector<40x256xf32> -> vector<40x256xf32>
    %817 = arith.addf %812, %816 : vector<40x256xf32>
    %c3_272 = arith.constant 3 : index
    %818 = memref.load %arg10[%c3_272] : memref<6xf32, #tpu.memory_space<smem>>
    %819 = vector.broadcast %818 : f32 to vector<40x256xf32>
    %820 = arith.addf %817, %819 : vector<40x256xf32>
    %cst_273 = arith.constant 5.000000e-01 : f32
    %821 = vector.broadcast %cst_273 : f32 to vector<40x256xf32>
    %822 = arith.mulf %821, %820 : vector<40x256xf32>
    %823 = math.tanh %822 : vector<40x256xf32>
    %cst_274 = arith.constant 1.000000e+00 : f32
    %824 = vector.broadcast %cst_274 : f32 to vector<40x256xf32>
    %825 = arith.addf %823, %824 : vector<40x256xf32>
    %cst_275 = arith.constant 5.000000e-01 : f32
    %826 = vector.broadcast %cst_275 : f32 to vector<40x256xf32>
    %827 = arith.mulf %826, %825 : vector<40x256xf32>
    %c0_276 = arith.constant 0 : index
    %c0_277 = arith.constant 0 : index
    %828 = vector.load %arg14[%c0_276, %c0_277] : memref<40x256xf32, #tpu.memory_space<vmem>>, vector<40x256xf32>
    tpu.vector_store %arg14[%c0_276, %c0_277], %827 {strides = array<i32>} : memref<40x256xf32, #tpu.memory_space<vmem>>, vector<40x256xf32>,
    return
  }
}

</mosaic_0001>

<bundles_post_ra>
// kernel: conv_autoencoder_forward.1
= control target key start
LH: loop header
LB: loop body
LE: loop exit
PB: predicated region body
PF: predicated region fallthrough
CT: control target
= control target key end

     0   :  { %s14556_s0 = inlined_call_operand.vmem [shape: f32[39,200], index: 0, kind: input, shape index: {}]   ;;  %s14557_s1 = inlined_call_operand.hbm [shape: f32[4,200,256], index: 1, kind: input, shape index: {}]   ;;  %s14558_s2 = inlined_call_operand.hbm [shape: f32[4,256,256], index: 2, kind: input, shape index: {}]   ;;  %s14559_s3 = inlined_call_operand.vmem [shape: f32[240,256], index: 3, kind: input, shape index: {}]   ;;  %s14560_s4 = inlined_call_operand.vmem [shape: f32[160,40], index: 4, kind: input, shape index: {}]   ;;  %s14561_s5 = inlined_call_operand.vmem [shape: f32[24,96], index: 5, kind: input, shape index: {}]   ;;  %s14562_s6 = inlined_call_operand.vmem [shape: f32[252,48], index: 6, kind: input, shape index: {}]   ;;  %s14563_s7 = inlined_call_operand.vmem [shape: f32[42,6], index: 7, kind: input, shape index: {}]   ;;  %s14564_s8 = inlined_call_operand.vmem [shape: f32[8], index: 8, kind: input, shape index: {}]   ;;  %s14565_s9 = inlined_call_operand.vmem [shape: f32[8], index: 9, kind: input, shape index: {}]   ;;  %s14566_s10 = inlined_call_operand.vmem [shape: f32[6], index: 10, kind: input, shape index: {}]   ;;  %s14567_s11 = inlined_call_operand.vmem [shape: f32[2,6], index: 11, kind: input, shape index: {}]   ;;  %s14568_s12 = inlined_call_operand.vmem [shape: f32[2,6], index: 12, kind: input, shape index: {}]   ;;  %s14569_s13 = inlined_call_operand.vmem [shape: f32[1,6], index: 13, kind: input, shape index: {}]   ;;  %s14570_s14 = inlined_call_operand.vmem [shape: f32[40,256], index: 14, kind: output, shape index: {0}]   ;;  %s14571_s15 = inlined_call_operand.hbm [shape: f32[1,128], index: 15, kind: output, shape index: {1}]  }
   0x1   :  { %14832 = sst [smem:[#allocation37_spill]] %s14570_s14 }
   0x2   :  { %21 = vsyncpa [#allocation3], 0 }
   0x3   :  { %22 = vsyncpa [#allocation7], 0 }
   0x4   :  { %23 = vsyncpa [#allocation5], 0 }
   0x5   :  { %24 = vsyncpa [#allocation10], 0  ;;  %s78_s20 = sshll.u32 %s14565_s9, 4  ;;  %s79_s20 = int_to_ptr.vmem [resolvable:$true] %s78_s20 }
   0x6   :  { %25 = vsyncpa [#allocation4], 0  ;;  %s7891_s21 = scalar_lea.vmem %s79_s20, 16  ;;  %p7896_p1 = scmp.lt.s32.totalorder %s79_s20, %s79_s20 }
   0x7   :  { %p7892_p0 = scmp.ne.s32.totalorder %s79_s20, %s7891_s21  ;;  %p7897_p2 = scmp.lt.s32.totalorder %s7891_s21, %s7891_s21 }
   0x9   :  { %p7898_p3 = por %p7897_p2, %p7896_p1 }
   0xb   :  { %p7899_p4 = pnand %p7898_p3, %p7892_p0 }
   0xd   :  { %7902 = shalt.err (!%p7899_p4)
}
   0xe   :  { %s8003_s22 = smov [#allocation9]   ;;  %s8004_s23 = smov [#allocation2]  }
   0xf   :  { %81 = dma.vmem_to_smem %s79_s20, 16, %s8003_s22, [#allocation10]  }
  0x10   :  { %s33_s24 = sshll.u32 %s8004_s23, 4  ;;  %s7903_s27 = scalar_lea.hbm %s14557_s1, 25600  ;;  %s34_s24 = int_to_ptr.vmem [resolvable:$true] %s33_s24 }
  0x11   :  { %p7904_p5 = scmp.ne.s32.totalorder %s14557_s1, %s7903_s27  ;;  %p7907_p6 = scmp.lt.u32.totalorder %s7903_s27, %s14557_s1 }
  0x13   :  { %p7909_p7 = pnand %p7907_p6, %p7904_p5 }
  0x15   :  { %7912 = shalt.err (!%p7909_p7)
}
  0x16   :  { %s7913_s16 = scalar_lea.vmem %s34_s24, 25600  ;;  %p7918_p9 = scmp.lt.s32.totalorder %s34_s24, %s34_s24 }
  0x17   :  { %p7914_p8 = scmp.ne.s32.totalorder %s34_s24, %s7913_s16  ;;  %p7919_p10 = scmp.lt.s32.totalorder %s7913_s16, %s7913_s16 }
  0x19   :  { %p7920_p11 = por %p7919_p10, %p7918_p9 }
  0x1b   :  { %p7921_p12 = pnand %p7920_p11, %p7914_p8 }
  0x1d   :  { %7924 = shalt.err (!%p7921_p12)
}
  0x1e   :  { %s8005_s17 = smov 256   ;;  %s8006_s18 = smov 16  }
  0x1f   :  { %39 = dma.hbm_to_vmem [thread:$0]  %s14557_s1, 25600, %s34_s24, [#allocation3], %s8005_s17, %s8005_s17, %s8006_s18  }
  0x20   :  { %s68_s23 = sshll.u32 %s14564_s8, 4  ;;  %s8007_s25 = smov [#allocation6]   ;;  %s69_s23 = int_to_ptr.vmem [resolvable:$true] %s68_s23 }
  0x21   :  { %s45_s26 = sshll.u32 %s8007_s25, 4  ;;  %s7925_s9 = scalar_lea.hbm %s14558_s2, 32768  ;;  %s46_s26 = int_to_ptr.vmem [resolvable:$true] %s45_s26 }
  0x22   :  { %p7926_p13 = scmp.ne.s32.totalorder %s14558_s2, %s7925_s9  ;;  %p7929_p0 = scmp.lt.u32.totalorder %s7925_s9, %s14558_s2 }
  0x24   :  { %p7931_p1 = pnand %p7929_p0, %p7926_p13 }
  0x26   :  { %7934 = shalt.err (!%p7931_p1)
}
  0x27   :  { %s7935_s1 = scalar_lea.vmem %s46_s26, 32768  ;;  %p7940_p3 = scmp.lt.s32.totalorder %s46_s26, %s46_s26 }
  0x28   :  { %p7936_p2 = scmp.ne.s32.totalorder %s46_s26, %s7935_s1  ;;  %p7941_p4 = scmp.lt.s32.totalorder %s7935_s1, %s7935_s1 }
  0x2a   :  { %p7942_p5 = por %p7941_p4, %p7940_p3 }
  0x2c   :  { %p7943_p6 = pnand %p7942_p5, %p7936_p2 }
  0x2e   :  { %7946 = shalt.err (!%p7943_p6)
}
  0x2f   :  { %51 = dma.hbm_to_vmem [thread:$0]  %s14558_s2, 32768, %s46_s26, [#allocation7], %s8005_s17, %s8005_s17, %s8006_s18  }
  0x30   :  { %s7947_s19 = scalar_lea.vmem %s69_s23, 16  ;;  %p7952_p8 = scmp.lt.s32.totalorder %s69_s23, %s69_s23 }
  0x31   :  { %p7948_p7 = scmp.ne.s32.totalorder %s69_s23, %s7947_s19  ;;  %p7953_p9 = scmp.lt.s32.totalorder %s7947_s19, %s7947_s19 }
  0x33   :  { %p7954_p10 = por %p7953_p9, %p7952_p8 }
  0x35   :  { %p7955_p11 = pnand %p7954_p10, %p7948_p7 }
  0x37   :  { %7958 = shalt.err (!%p7955_p11)
}
  0x38   :  { %s8008_s14 = smov [#allocation8]   ;;  %s88_s22 = sshll.u32 %s14566_s10, 4  ;;  %s89_s22 = int_to_ptr.vmem [resolvable:$true] %s88_s22 }
  0x39   :  { %71 = dma.vmem_to_smem %s69_s23, 16, %s8008_s14, [#allocation5]  }
  0x3a   :  { %s7959_s25 = scalar_lea.vmem %s89_s22, 16  ;;  %p7964_p13 = scmp.lt.s32.totalorder %s89_s22, %s89_s22 }
  0x3b   :  { %p7960_p12 = scmp.ne.s32.totalorder %s89_s22, %s7959_s25  ;;  %p7965_p0 = scmp.lt.s32.totalorder %s7959_s25, %s7959_s25 }
  0x3d   :  { %p7966_p1 = por %p7965_p0, %p7964_p13 }
  0x3f   :  { %p7967_p2 = pnand %p7966_p1, %p7960_p12 }
  0x41   :  { %7970 = shalt.err (!%p7967_p2)
}
  0x42   :  { %s8009_s2 = smov [#allocation11]  }
  0x43   :  { %91 = dma.vmem_to_smem %s89_s22, 16, %s8009_s2, [#allocation10]  }
  0x44   :  { %7993 = dma.done.wait [#allocation3], 25600  }
  0x45   :  { %7994 = vsyncadd [#allocation3], 4294941696 }
  0x46   :  { %7995 = dma.done.wait [#allocation7], 32768  }
  0x47   :  { %7996 = vsyncadd [#allocation7], 4294934528 }
  0x48   :  { %7997 = dma.done.wait [#allocation5], 16  }
  0x49   :  { %7998 = vsyncadd [#allocation5], 4294967280 }
  0x4a   :  { %7999 = dma.done.wait [#allocation10], 32  }
  0x4b   :  { %8000 = vsyncadd [#allocation10], 4294967264 }
  0x4c   :  { %113 = sfence }
  0x4d   :  { %v180_v0 = vld [vmem:[#allocation2 + $0x198] sm:$0xff]  ;;  %v182_v1 = vld [vmem:[#allocation2 + $0x1a8] sm:$0xff]  ;;  %v179_v2 = vld [vmem:[#allocation2 + $0x190] sm:$0xff]  ;;  %vm14573_vm0 = vcmask 1046528   ;;  %vm263_vm1 = vcmask 588800   ;;  %vm535_vm2 = vcmask 1045504  }
  0x4e   :  { %v6944_v3 = vpack.c.bf16 %v182_v1, %v180_v0  ;;  %v181_v4 = vld [vmem:[#allocation2 + $0x1a0] sm:$0xff]  ;;  %v184_v5 = vld [vmem:[#allocation2 + $0x1b8] sm:$0xff]  ;;  %v186_v6 = vld [vmem:[#allocation2 + $0x1c8] sm:$0xff]  ;;  %vm733_vm3 = vcmask 1044480   ;;  %vm14821_vm7 = vcmask 1040384   ;;  %s8011_s27 = smov 1  }
  0x4f   :  { %v6946_v7 = vpack.c.bf16 %v181_v4, %v179_v2  ;;  %v6948_v8 = vpack.c.bf16 %v186_v6, %v184_v5  ;;  %v183_v9 = vld [vmem:[#allocation2 + $0x1b0] sm:$0xff]  ;;  %v185_v10 = vld [vmem:[#allocation2 + $0x1c0] sm:$0xff]  ;;  %v188_v11 = vld [vmem:[#allocation2 + $0x1d8] sm:$0xff]  ;;  %s8012_s28 = smov 124   ;;  %s6832_s20 = sld [smem:[#allocation8 + $0x2]] }
  0x50   :  { %6945 = vmatprep.subr.bf16.mxu0 %v6944_v3  ;;  %v190_v12 = vld [vmem:[#allocation2 + $0x1e8] sm:$0xff]  ;;  %v6950_v13 = vpack.c.bf16 %v185_v10, %v183_v9  ;;  %v187_v15 = vld [vmem:[#allocation2 + $0x1d0] sm:$0xff]  ;;  %v189_v16 = vld [vmem:[#allocation2 + $0x1e0] sm:$0xff]  ;;  %s6833_s21 = sld [smem:[#allocation8 + $0x3]]  ;;  %s6835_s22 = sld [smem:[#allocation8 + $0x5]] }
  0x51   :  { %6947 = vmatpush1.bf16.msra.mxu0 %v6946_v7  ;;  %v6952_v14 = vpack.c.bf16 %v190_v12, %v188_v11  ;;  %v192_v17 = vld [vmem:[#allocation2 + $0x1f8] sm:$0xff]  ;;  %v194_v18 = vld [vmem:[#allocation2 + $0x208] sm:$0xff]  ;;  %v6954_v19 = vpack.c.bf16 %v189_v16, %v187_v15  ;;  %v191_v21 = vld [vmem:[#allocation2 + $0x1f0] sm:$0xff]  ;;  %s6834_s25 = sld [smem:[#allocation8 + $0x4]]  ;;  %s6837_s2 = sld [smem:[#allocation8 + $0x7]] }
  0x52   :  { %6949 = vmatprep.subr.bf16.mxu0 %v6948_v8  ;;  %v6956_v20 = vpack.c.bf16 %v194_v18, %v192_v17  ;;  %v193_v22 = vld [vmem:[#allocation2 + $0x200] sm:$0xff]  ;;  %v196_v23 = vld [vmem:[#allocation2 + $0x218] sm:$0xff]  ;;  %v198_v24 = vld [vmem:[#allocation2 + $0x228] sm:$0xff]  ;;  %s6836_s10 = sld [smem:[#allocation8 + $0x6]]  ;;  %s8015_s17 = smov 126  }
  0x53   :  { %v6958_v25 = vpack.c.bf16 %v193_v22, %v191_v21  ;;  %v6960_v26 = vpack.c.bf16 %v198_v24, %v196_v23  ;;  %v195_v27 = vld [vmem:[#allocation2 + $0x210] sm:$0xff]  ;;  %v197_v28 = vld [vmem:[#allocation2 + $0x220] sm:$0xff]  ;;  %v200_v29 = vld [vmem:[#allocation2 + $0x238] sm:$0xff]  ;;  %s8016_s23 = smov 125   ;;  %s6831_s26 = sld [smem:[#allocation8 + $0x1]] }
  0x54   :  { %v202_v30 = vld [vmem:[#allocation2 + $0x248] sm:$0xff]  ;;  %v6962_v31 = vpack.c.bf16 %v197_v28, %v195_v27  ;;  %v8143_v32 = vld [vmem:[%s14556_s0 + $0x18] sm:$0xff]  ;;  %v199_v34 = vld [vmem:[#allocation2 + $0x230] sm:$0xff]  ;;  %s6838_s9 = sld [smem:[#allocation11 + $0x1]]  ;;  %s6844_s29 = sld [smem:[#allocation9 + $0x2]] }
  0x55   :  { %6951 = vmatpush1.bf16.msra.mxu0 %v6950_v13  ;;  %v6964_v33 = vpack.c.bf16 %v202_v30, %v200_v29  ;;  %v201_v35 = vld [vmem:[#allocation2 + $0x240] sm:$0xff]  ;;  %v175_v36 = vld [vmem:[%s14556_s0 + $0x8] sm:$0xfe]  ;;  %v244_v37 = vrot.slane %v8143_v32, 1  ;;  %v204_v38 = vld [vmem:[#allocation2 + $0x258] sm:$0xff]  ;;  %s6847_s30 = sld [smem:[#allocation9 + $0x5]] }
  0x56   :  { %6953 = vmatprep.subr.bf16.mxu0 %v6952_v14  ;;  %v206_v39 = vld [vmem:[#allocation2 + $0x268] sm:$0xff]  ;;  %v243_v40 = vrot.slane %v175_v36, 1  ;;  %v6966_v41 = vpack.c.bf16 %v201_v35, %v199_v34  ;;  %v203_v44 = vld [vmem:[#allocation2 + $0x250] sm:$0xff]  ;;  %v205_v45 = vld [vmem:[#allocation2 + $0x260] sm:$0xff]  ;;  %s6846_s16 = sld [smem:[#allocation9 + $0x4]]  ;;  %s6849_s1 = sld [smem:[#allocation9 + $0x7]] }
  0x57   :  { %v6968_v43 = vpack.c.bf16 %v206_v39, %v204_v38  ;;  %v208_v46 = vld [vmem:[#allocation2 + $0x278] sm:$0xff]  ;;  %v210_v47 = vld [vmem:[#allocation2 + $0x288] sm:$0xff]  ;;  %v6970_v48 = vpack.c.bf16 %v205_v45, %v203_v44  ;;  %v207_v50 = vld [vmem:[#allocation2 + $0x270] sm:$0xff] }
  0x58   :  { %v245_v42 = vsel %vm14573_vm0, %v243_v40, %v244_v37  ;;  %v6972_v49 = vpack.c.bf16 %v210_v47, %v208_v46  ;;  %v209_v51 = vld [vmem:[#allocation2 + $0x280] sm:$0xff]  ;;  %v212_v52 = vld [vmem:[#allocation2 + $0x298] sm:$0xff]  ;;  %v214_v53 = vld [vmem:[#allocation2 + $0x2a8] sm:$0xff] }
  0x59   :  { %6955 = vmatpush1.bf16.msra.mxu0 %v6954_v19  ;;  %6804 = vmatprep.mubr.msk.f32.mxu0 %vm263_vm1, %v245_v42  ;;  %v6974_v54 = vpack.c.bf16 %v209_v51, %v207_v50  ;;  %v6976_v55 = vpack.c.bf16 %v214_v53, %v212_v52  ;;  %v211_v56 = vld [vmem:[#allocation2 + $0x290] sm:$0xff]  ;;  %v213_v57 = vld [vmem:[#allocation2 + $0x2a0] sm:$0xff]  ;;  %v216_v58 = vld [vmem:[#allocation2 + $0x2b8] sm:$0xff] }
  0x5a   :  { %6957 = vmatprep.subr.bf16.mxu0 %v6956_v20  ;;  %v218_v59 = vld [vmem:[#allocation2 + $0x2c8] sm:$0xff]  ;;  %v6978_v60 = vpack.c.bf16 %v213_v57, %v211_v56  ;;  %v215_v62 = vld [vmem:[#allocation2 + $0x2b0] sm:$0xff]  ;;  %v217_v63 = vld [vmem:[#allocation2 + $0x2c0] sm:$0xff] }
  0x5b   :  { %v6980_v61 = vpack.c.bf16 %v218_v59, %v216_v58  ;;  %v220_v0 = vld [vmem:[#allocation2 + $0x2d8] sm:$0xff]  ;;  %v222_v1 = vld [vmem:[#allocation2 + $0x2e8] sm:$0xff]  ;;  %v6982_v2 = vpack.c.bf16 %v217_v63, %v215_v62  ;;  %v219_v4 = vld [vmem:[#allocation2 + $0x2d0] sm:$0xff] }
  0x5c   :  { %v6984_v3 = vpack.c.bf16 %v222_v1, %v220_v0  ;;  %v221_v5 = vld [vmem:[#allocation2 + $0x2e0] sm:$0xff]  ;;  %v224_v6 = vld [vmem:[#allocation2 + $0x2f8] sm:$0xff]  ;;  %v226_v7 = vld [vmem:[#allocation2 + $0x308] sm:$0xff] }
  0x5d   :  { %6959 = vmatpush1.bf16.msra.mxu0 %v6958_v25  ;;  %v6986_v8 = vpack.c.bf16 %v221_v5, %v219_v4  ;;  %v6988_v9 = vpack.c.bf16 %v226_v7, %v224_v6  ;;  %v223_v10 = vld [vmem:[#allocation2 + $0x2f0] sm:$0xff]  ;;  %v225_v11 = vld [vmem:[#allocation2 + $0x300] sm:$0xff]  ;;  %v8164_v15 = vld [vmem:[%s14556_s0 + $0x28] sm:$0xff] }
  0x5e   :  { %6961 = vmatprep.subr.bf16.mxu0 %v6960_v26  ;;  %v8156_v12 = vld [vmem:[%s14556_s0 + $0x10] sm:$0xff]  ;;  %v174_v13 = vld [vmem:[%s14556_s0] sm:$0xfe]  ;;  %v6990_v14 = vpack.c.bf16 %v225_v11, %v223_v10  ;;  %v228_v16 = vld [vmem:[#allocation2 + $0x318] sm:$0xff]  ;;  %v248_v23 = vrot.slane %v8164_v15, 1 }
  0x5f   :  { %v125_v17 = vld [vmem:[#allocation2 + $0x8] sm:$0xff]  ;;  %v127_v18 = vld [vmem:[#allocation2 + $0x18] sm:$0xff]  ;;  %v240_v19 = vrot.slane %v174_v13, 1  ;;  %v241_v20 = vrot.slane %v8156_v12, 1  ;;  %v124_v21 = vld [vmem:[#allocation2] sm:$0xff] }
  0x60   :  { %v126_v22 = vld [vmem:[#allocation2 + $0x10] sm:$0xff]  ;;  %v8171_v24 = vld [vmem:[%s14556_s0 + $0x20] sm:$0xff]  ;;  %v129_v25 = vld [vmem:[#allocation2 + $0x28] sm:$0xff]  ;;  %v6992_v29 = vpack.c.bf16 %v127_v18, %v125_v17  ;;  %v249_v38 = vsel %vm14573_vm0, %v244_v37, %v248_v23 }
  0x61   :  { %6963 = vmatpush1.bf16.msra.mxu0 %v6962_v31  ;;  %v131_v26 = vld [vmem:[#allocation2 + $0x38] sm:$0xff]  ;;  %v227_v28 = vld [vmem:[#allocation2 + $0x310] sm:$0xff]  ;;  %v242_v30 = vsel %vm14573_vm0, %v240_v19, %v241_v20  ;;  %v6994_v31 = vpack.c.bf16 %v126_v22, %v124_v21  ;;  %v128_v35 = vld [vmem:[#allocation2 + $0x20] sm:$0xff] }
  0x62   :  { %6965 = vmatprep.subr.bf16.mxu0 %v6964_v33  ;;  %v8176_v27 = vld [vmem:[%s14556_s0 + $0x38] sm:$0xff]  ;;  %v246_v33 = vrot.slane %v8171_v24, 1  ;;  %v6996_v34 = vpack.c.bf16 %v131_v26, %v129_v25  ;;  %v130_v36 = vld [vmem:[#allocation2 + $0x30] sm:$0xff]  ;;  %v132_v47 = vld [vmem:[#allocation2 + $0x40] sm:$0xff] }
  0x63   :  { %v252_v39 = vrot.slane %v8176_v27, 1  ;;  %v8187_v40 = vld [vmem:[%s14556_s0 + $0x30] sm:$0xff]  ;;  %v135_v42 = vld [vmem:[#allocation2 + $0x58] sm:$0xff]  ;;  %v6998_v44 = vpack.c.bf16 %v130_v36, %v128_v35  ;;  %v176_v51 = vld [vmem:[%s14556_s0 + $0x40] sm:$0x1f] }
  0x64   :  { %v247_v37 = vsel %vm14573_vm0, %v241_v20, %v246_v33  ;;  %v250_v45 = vrot.slane %v8187_v40, 1  ;;  %v137_v52 = vld [vmem:[#allocation2 + $0x68] sm:$0xff]  ;;  %v139_v53 = vld [vmem:[#allocation2 + $0x78] sm:$0xff]  ;;  %v254_v56 = vrot.slane %v176_v51, 1  ;;  %v136_v58 = vld [vmem:[#allocation2 + $0x60] sm:$0xff] }
  0x65   :  { %6967 = vmatpush1.bf16.msra.mxu0 %v6966_v41  ;;  %v133_v41 = vld [vmem:[#allocation2 + $0x48] sm:$0xff]  ;;  %v7004_v57 = vpack.c.bf16 %v139_v53, %v137_v52  ;;  %v138_v59 = vld [vmem:[#allocation2 + $0x70] sm:$0xff]  ;;  %v143_v62 = vld [vmem:[#allocation2 + $0x98] sm:$0xff] }
  0x66   :  { %6969 = vmatprep.subr.bf16.mxu0 %v6968_v43  ;;  %v177_v43 = vld [vmem:[%s14556_s0 + $0x48] sm:$0x1f]  ;;  %v7000_v46 = vpack.c.bf16 %v135_v42, %v133_v41  ;;  %v7006_v63 = vpack.c.bf16 %v138_v59, %v136_v58  ;;  %v255_v0 = vsel %vm14573_vm0, %v250_v45, %v254_v56  ;;  %v147_v5 = vld [vmem:[#allocation2 + $0xb8] sm:$0xff]  ;;  %v148_v17 = vld [vmem:[#allocation2 + $0xc0] sm:$0xff] }
  0x67   :  { %v256_v50 = vrot.slane %v177_v43, 1  ;;  %v145_v4 = vld [vmem:[#allocation2 + $0xa8] sm:$0xff]  ;;  %v151_v13 = vld [vmem:[#allocation2 + $0xd8] sm:$0xff]  ;;  %v150_v18 = vld [vmem:[#allocation2 + $0xd0] sm:$0xff] }
  0x68   :  { %v7012_v7 = vpack.c.bf16 %v147_v5, %v145_v4  ;;  %v115_v10 = vld [vmem:[%s14556_s0 + $0x8] sm:$0xff]  ;;  %v155_v20 = vld [vmem:[#allocation2 + $0xf8] sm:$0xff]  ;;  %v7018_v21 = vpack.c.bf16 %v150_v18, %v148_v17  ;;  %v154_v25 = vld [vmem:[#allocation2 + $0xf0] sm:$0xff] }
  0x69   :  { %6971 = vmatpush1.bf16.msra.mxu0 %v6970_v48  ;;  %v134_v48 = vld [vmem:[#allocation2 + $0x50] sm:$0xff]  ;;  %v149_v11 = vld [vmem:[#allocation2 + $0xc8] sm:$0xff]  ;;  %v163_v35 = vld [vmem:[#allocation2 + $0x138] sm:$0xff] }
  0x6a   :  { %6973 = vmatprep.subr.bf16.mxu0 %v6972_v49  ;;  %v253_v49 = vsel %vm14573_vm0, %v248_v23, %v252_v39  ;;  %v153_v19 = vld [vmem:[#allocation2 + $0xe8] sm:$0xff]  ;;  %v152_v23 = vld [vmem:[#allocation2 + $0xe0] sm:$0xff]  ;;  %v162_v41 = vld [vmem:[#allocation2 + $0x130] sm:$0xff] }
  0x6b   :  { %v7020_v22 = vpack.c.bf16 %v155_v20, %v153_v19  ;;  %v157_v26 = vld [vmem:[#allocation2 + $0x108] sm:$0xff]  ;;  %v167_v43 = vld [vmem:[#allocation2 + $0x158] sm:$0xff]  ;;  %v168_v51 = vld [vmem:[#allocation2 + $0x160] sm:$0xff] }
  0x6c   :  { %v165_v42 = vld [vmem:[#allocation2 + $0x148] sm:$0xff]  ;;  %v170_v52 = vld [vmem:[#allocation2 + $0x170] sm:$0xff]  ;;  %v492_v5 = vld [vmem:[#allocation2 + $0x378] sm:$0xff] }
  0x6d   :  { %6975 = vmatpush1.bf16.msra.mxu0 %v6974_v54  ;;  %v7002_v54 = vpack.c.bf16 %v134_v48, %v132_v47  ;;  %v169_v47 = vld [vmem:[#allocation2 + $0x168] sm:$0xff]  ;;  %v171_v48 = vld [vmem:[#allocation2 + $0x178] sm:$0xff]  ;;  %v7038_v53 = vpack.c.bf16 %v170_v52, %v168_v51  ;;  %v483_v58 = vld [vmem:[#allocation2 + $0x330] sm:$0xff] }
  0x6e   :  { %6977 = vmatprep.subr.bf16.mxu0 %v6976_v55  ;;  %v251_v55 = vsel %vm14573_vm0, %v246_v33, %v250_v45  ;;  %v158_v33 = vld [vmem:[#allocation2 + $0x110] sm:$0xff]  ;;  %v164_v45 = vld [vmem:[#allocation2 + $0x140] sm:$0xff]  ;;  %v486_v59 = vld [vmem:[#allocation2 + $0x348] sm:$0xff] }
  0x6f   :  { %v490_v4 = vld [vmem:[#allocation2 + $0x368] sm:$0xff]  ;;  %v495_v17 = vld [vmem:[#allocation2 + $0x390] sm:$0xff]  ;;  %v500_v19 = vld [vmem:[#allocation2 + $0x3b8] sm:$0xff] }
  0x70   :  { %v498_v18 = vld [vmem:[#allocation2 + $0x3a8] sm:$0xff]  ;;  %v511_v51 = vld [vmem:[#allocation2 + $0x410] sm:$0xff] }
  0x71   :  { %6979 = vmatpush1.bf16.msra.mxu0 %v6978_v60  ;;  %v257_v60 = vsel %vm14573_vm0, %v252_v39, %v256_v50  ;;  %v160_v39 = vld [vmem:[#allocation2 + $0x120] sm:$0xff]  ;;  %v477_v20 = vld [vmem:[%s14556_s0 + $0x8] sm:$0xfc] }
  0x72   :  { %6981 = vmatprep.subr.bf16.mxu0 %v6980_v61  ;;  %v141_v61 = vld [vmem:[#allocation2 + $0x88] sm:$0xff] }
  0x73   :  { %v7008_v1 = vpack.c.bf16 %v143_v62, %v141_v61  ;;  %v172_v61 = vld [vmem:[#allocation2 + $0x180] sm:$0xff]  ;;  %v514_v52 = vld [vmem:[#allocation2 + $0x428] sm:$0xff] }
  0x75   :  { %6983 = vmatpush1.bf16.msra.mxu0 %v6982_v2  ;;  %v140_v2 = vld [vmem:[#allocation2 + $0x80] sm:$0xff] }
  0x76   :  { %6985 = vmatprep.subr.bf16.mxu0 %v6984_v3  ;;  %v142_v3 = vld [vmem:[#allocation2 + $0x90] sm:$0xff] }
  0x77   :  { %v7010_v6 = vpack.c.bf16 %v142_v3, %v140_v2  ;;  %v485_v2 = vld [vmem:[#allocation2 + $0x340] sm:$0xff]  ;;  %v487_v3 = vld [vmem:[#allocation2 + $0x350] sm:$0xff] }
  0x79   :  { %6987 = vmatpush1.bf16.msra.mxu0 %v6986_v8  ;;  %v144_v8 = vld [vmem:[#allocation2 + $0xa0] sm:$0xff] }
  0x7a   :  { %6989 = vmatprep.subr.bf16.mxu0 %v6988_v9  ;;  %v146_v9 = vld [vmem:[#allocation2 + $0xb0] sm:$0xff] }
  0x7d   :  { %6991 = vmatpush1.bf16.msra.mxu0 %v6990_v14  ;;  %v7014_v14 = vpack.c.bf16 %v146_v9, %v144_v8  ;;  %v489_v8 = vld [vmem:[#allocation2 + $0x360] sm:$0xff]  ;;  %v491_v9 = vld [vmem:[#allocation2 + $0x370] sm:$0xff] }
  0x7e   :  { %322 = vmatprep.subr.mxu0 %v228_v16  ;;  %v7016_v16 = vpack.c.bf16 %v151_v13, %v149_v11  ;;  %v496_v11 = vld [vmem:[#allocation2 + $0x398] sm:$0xff]  ;;  %v7050_v13 = vpack.c.bf16 %v491_v9, %v489_v8 }
  0x81   :  { %323 = vmatpush1.msra.mxu0 %v227_v28  ;;  %v159_v28 = vld [vmem:[#allocation2 + $0x118] sm:$0xff] }
  0x82   :  { %6993 = vmatprep.subr.bf16.mxu0 %v6992_v29  ;;  %339 = vmatmul.mubr.f32.vlgmr.msra.gmra.mrb[0].mxu0 %v242_v30  ;;  %v7022_v29 = vpack.c.bf16 %v154_v25, %v152_v23  ;;  %v7024_v30 = vpack.c.bf16 %v159_v28, %v157_v26  ;;  %v497_v23 = vld [vmem:[#allocation2 + $0x3a0] sm:$0xff]  ;;  %v499_v25 = vld [vmem:[#allocation2 + $0x3b0] sm:$0xff]  ;;  %v123_v26 = vld [vmem:[%s14556_s0 + $0x48] sm:$0xf]  ;;  %v539_v28 = vrot.slane %v477_v20, 2  ;;  %v537_v20 = vrot.slane %v8156_v12, 2 }
  0x83   :  { %6995 = vmatpush1.bf16.msra.mxu0 %v6994_v31  ;;  %6805 = vmatprep.mubr.msk.f32.mxu0 %vm263_vm1, %v249_v38  ;;  %v156_v31 = vld [vmem:[#allocation2 + $0x100] sm:$0xff] }
  0x84   :  { %6997 = vmatprep.subr.bf16.mxu0 %v6996_v34  ;;  %v161_v34 = vld [vmem:[#allocation2 + $0x128] sm:$0xff]  ;;  %v7026_v36 = vpack.c.bf16 %v158_v33, %v156_v31  ;;  %v504_v31 = vld [vmem:[#allocation2 + $0x3d8] sm:$0xff]  ;;  %v7058_v33 = vpack.c.bf16 %v499_v25, %v497_v23  ;;  %v544_v23 = vrot.slane %v8164_v15, 2 }
  0x85   :  { %v7028_v38 = vpack.c.bf16 %v163_v35, %v161_v34  ;;  %v122_v34 = vld [vmem:[%s14556_s0 + $0x40] sm:$0xf]  ;;  %v684_v25 = vld [vmem:[#allocation2 + $0x4d8] sm:$0xff] }
  0x86   :  { %345 = vmatmul.mubr.f32.gmra.mrb[2].mxu0 %v247_v37  ;;  %v7032_v37 = vpack.c.bf16 %v167_v43, %v165_v42  ;;  %v508_v42 = vld [vmem:[#allocation2 + $0x3f8] sm:$0xff] }
  0x87   :  { %6999 = vmatpush1.bf16.msra.mxu0 %v6998_v44  ;;  %6806 = vmatprep.mubr.msk.f32.mxu0 %vm263_vm1, %v253_v49  ;;  %v7030_v44 = vpack.c.bf16 %v162_v41, %v160_v39  ;;  %v506_v41 = vld [vmem:[#allocation2 + $0x3e8] sm:$0xff] }
  0x88   :  { %7001 = vmatprep.subr.bf16.mxu0 %v7000_v46  ;;  %v166_v46 = vld [vmem:[#allocation2 + $0x150] sm:$0xff] }
  0x89   :  { %v7034_v49 = vpack.c.bf16 %v166_v46, %v164_v45  ;;  %v507_v45 = vld [vmem:[#allocation2 + $0x3f0] sm:$0xff]  ;;  %v510_v46 = vld [vmem:[#allocation2 + $0x408] sm:$0xff] }
  0x8a   :  { %351 = vmatmul.mubr.f32.gmra.mrb[4].mxu0 %v251_v55  ;;  %v482_v55 = vld [vmem:[#allocation2 + $0x328] sm:$0xff] }
  0x8b   :  { %7003 = vmatpush1.bf16.msra.mxu0 %v7002_v54  ;;  %6807 = vmatprep.mubr.msk.f32.mxu0 %vm263_vm1, %v257_v60  ;;  %v173_v54 = vld [vmem:[#allocation2 + $0x188] sm:$0xff]  ;;  %v488_v60 = vld [vmem:[#allocation2 + $0x358] sm:$0xff] }
  0x8c   :  { %7005 = vmatprep.subr.bf16.mxu0 %v7004_v57  ;;  %v481_v57 = vld [vmem:[#allocation2 + $0x320] sm:$0xff] }
  0x8e   :  { %357 = vmatmul.mubr.f32.gmra.mrb[6].mxu0 %v255_v0  ;;  %v7042_v0 = vpack.c.bf16 %v483_v58, %v481_v57  ;;  %v515_v57 = vld [vmem:[#allocation2 + $0x430] sm:$0xff]  ;;  %v518_v58 = vld [vmem:[#allocation2 + $0x448] sm:$0xff] }
  0x8f   :  { %7007 = vmatpush1.bf16.msra.mxu0 %v7006_v63  ;;  %6808 = vmatprep.mubr.msk.f32.mxu0 %vm263_vm1, %v256_v50  ;;  %v7036_v50 = vpack.c.bf16 %v171_v48, %v169_v47  ;;  %v114_v63 = vld [vmem:[%s14556_s0] sm:$0xff]  ;;  %v512_v47 = vld [vmem:[#allocation2 + $0x418] sm:$0xff] }
  0x90   :  { %7009 = vmatprep.subr.bf16.mxu0 %v7008_v1  ;;  %v7044_v1 = vpack.c.bf16 %v488_v60, %v486_v59  ;;  %v520_v59 = vld [vmem:[#allocation2 + $0x458] sm:$0xff] }
  0x92   :  { %363 = vmatmul.mubr.f32.gmra.mrb[8].mxu0 %v254_v56  ;;  %v484_v56 = vld [vmem:[#allocation2 + $0x338] sm:$0xff] }
  0x93   :  { %7011 = vmatpush1.bf16.msra.mxu0 %v7010_v6  ;;  %6809 = vmatprep.mubr.msk.f32.mxu0 %vm263_vm1, %v115_v10  ;;  %v7040_v62 = vpack.c.bf16 %v484_v56, %v482_v55  ;;  %v7046_v6 = vpack.c.bf16 %v487_v3, %v485_v2  ;;  %v494_v10 = vld [vmem:[#allocation2 + $0x388] sm:$0xff]  ;;  %v513_v56 = vld [vmem:[#allocation2 + $0x420] sm:$0xff] }
  0x94   :  { %7013 = vmatprep.subr.bf16.mxu0 %v7012_v7  ;;  %v7048_v7 = vpack.c.bf16 %v492_v5, %v490_v4  ;;  %v7074_v60 = vpack.c.bf16 %v515_v57, %v513_v56  ;;  %v521_v4 = vld [vmem:[#allocation2 + $0x460] sm:$0xff]  ;;  %v523_v5 = vld [vmem:[#allocation2 + $0x470] sm:$0xff] }
  0x95   :  { %v7082_v8 = vpack.c.bf16 %v523_v5, %v521_v4  ;;  %v697_v4 = vld [vmem:[#allocation2 + $0x540] sm:$0xff] }
  0x97   :  { %7015 = vmatpush1.bf16.msra.mxu0 %v7014_v14  ;;  %v7052_v14 = vpack.c.bf16 %v496_v11, %v494_v10  ;;  %v525_v10 = vld [vmem:[#allocation2 + $0x480] sm:$0xff]  ;;  %v527_v11 = vld [vmem:[#allocation2 + $0x490] sm:$0xff] }
  0x98   :  { %7017 = vmatprep.subr.bf16.mxu0 %v7016_v16  ;;  %v493_v16 = vld [vmem:[#allocation2 + $0x380] sm:$0xff] }
  0x9b   :  { %7019 = vmatpush1.bf16.msra.mxu0 %v7018_v21  ;;  %v7054_v21 = vpack.c.bf16 %v495_v17, %v493_v16  ;;  %v530_v16 = vld [vmem:[#allocation2 + $0x4a8] sm:$0xff]  ;;  %v680_v17 = vld [vmem:[#allocation2 + $0x4b8] sm:$0xff] }
  0x9c   :  { %7021 = vmatprep.subr.bf16.mxu0 %v7020_v22  ;;  %v7056_v22 = vpack.c.bf16 %v500_v19, %v498_v18  ;;  %v682_v18 = vld [vmem:[#allocation2 + $0x4c8] sm:$0xff] }
  0x9f   :  { %7023 = vmatpush1.bf16.msra.mxu0 %v7022_v29  ;;  %v540_v29 = vrot.slane %v8143_v32, 2 }
  0xa0   :  { %7025 = vmatprep.subr.bf16.mxu0 %v7024_v30  ;;  %v502_v30 = vld [vmem:[#allocation2 + $0x3c8] sm:$0xff] }
  0xa1   :  { %v7060_v35 = vpack.c.bf16 %v504_v31, %v502_v30  ;;  %v541_v39 = vsel %vm535_vm2, %v539_v28, %v540_v29  ;;  %v529_v28 = vld [vmem:[#allocation2 + $0x4a0] sm:$0xff]  ;;  %v7088_v30 = vpack.c.bf16 %v682_v18, %v680_v17  ;;  %v706_v17 = vld [vmem:[#allocation2 + $0x588] sm:$0xff] }
  0xa3   :  { %7027 = vmatpush1.bf16.msra.mxu0 %v7026_v36  ;;  %v501_v36 = vld [vmem:[#allocation2 + $0x3c0] sm:$0xff] }
  0xa4   :  { %7029 = vmatprep.subr.bf16.mxu0 %v7028_v38  ;;  %v503_v38 = vld [vmem:[#allocation2 + $0x3d0] sm:$0xff] }
  0xa5   :  { %v7062_v43 = vpack.c.bf16 %v503_v38, %v501_v36  ;;  %v683_v36 = vld [vmem:[#allocation2 + $0x4d0] sm:$0xff]  ;;  %v685_v38 = vld [vmem:[#allocation2 + $0x4e0] sm:$0xff] }
  0xa7   :  { %7031 = vmatpush1.bf16.msra.mxu0 %v7030_v44  ;;  %v7064_v44 = vpack.c.bf16 %v508_v42, %v506_v41  ;;  %v548_v41 = vrot.slane %v8176_v27, 2  ;;  %v688_v42 = vld [vmem:[#allocation2 + $0x4f8] sm:$0xff] }
  0xa8   :  { %7033 = vmatprep.subr.bf16.mxu0 %v7032_v37  ;;  %v505_v37 = vld [vmem:[#allocation2 + $0x3e0] sm:$0xff] }
  0xa9   :  { %v7066_v48 = vpack.c.bf16 %v507_v45, %v505_v37  ;;  %v7094_v37 = vpack.c.bf16 %v685_v38, %v683_v36  ;;  %v711_v36 = vld [vmem:[#allocation2 + $0x5b0] sm:$0xff]  ;;  %v713_v38 = vld [vmem:[#allocation2 + $0x5c0] sm:$0xff] }
  0xab   :  { %7035 = vmatpush1.bf16.msra.mxu0 %v7034_v49  ;;  %v7068_v49 = vpack.c.bf16 %v512_v47, %v510_v46  ;;  %v546_v46 = vrot.slane %v8187_v40, 2  ;;  %v687_v47 = vld [vmem:[#allocation2 + $0x4f0] sm:$0xff] }
  0xac   :  { %7037 = vmatprep.subr.bf16.mxu0 %v7036_v50  ;;  %v509_v50 = vld [vmem:[#allocation2 + $0x400] sm:$0xff] }
  0xaf   :  { %7039 = vmatpush1.bf16.msra.mxu0 %v7038_v53  ;;  %v516_v53 = vld [vmem:[#allocation2 + $0x438] sm:$0xff] }
  0xb0   :  { %429 = vmatprep.subr.mxu0 %v173_v54  ;;  %v7070_v54 = vpack.c.bf16 %v511_v51, %v509_v50  ;;  %v7072_v55 = vpack.c.bf16 %v516_v53, %v514_v52  ;;  %v478_v51 = vld [vmem:[%s14556_s0 + $0x40] sm:$0x3f]  ;;  %v692_v52 = vld [vmem:[#allocation2 + $0x518] sm:$0xff]  ;;  %v694_v53 = vld [vmem:[#allocation2 + $0x528] sm:$0xff] }
  0xb1   :  { %v550_v56 = vrot.slane %v478_v51, 2  ;;  %v7100_v57 = vpack.c.bf16 %v694_v53, %v692_v52  ;;  %v726_v51 = vld [vmem:[#allocation2 + $0x628] sm:$0xff] }
  0xb3   :  { %430 = vmatpush1.msra.mxu0 %v172_v61  ;;  %v7076_v61 = vpack.c.bf16 %v520_v59, %v518_v58  ;;  %v691_v58 = vld [vmem:[#allocation2 + $0x510] sm:$0xff]  ;;  %v693_v59 = vld [vmem:[#allocation2 + $0x520] sm:$0xff] }
  0xb4   :  { %7041 = vmatprep.subr.bf16.mxu0 %v7040_v62  ;;  %446 = vmatmul.mubr.f32.vlgmr.msra.gmra.mrb[0].mxu0 %v114_v63  ;;  %v517_v62 = vld [vmem:[#allocation2 + $0x440] sm:$0xff]  ;;  %v519_v63 = vld [vmem:[#allocation2 + $0x450] sm:$0xff] }
  0xb5   :  { %7043 = vmatpush1.bf16.msra.mxu0 %v7042_v0  ;;  %6810 = vmatprep.mubr.msk.f32.mxu0 %vm263_vm1, %v8143_v32  ;;  %v522_v0 = vld [vmem:[#allocation2 + $0x468] sm:$0xff]  ;;  %v7078_v2 = vpack.c.bf16 %v519_v63, %v517_v62 }
  0xb6   :  { %7045 = vmatprep.subr.bf16.mxu0 %v7044_v1  ;;  %v524_v1 = vld [vmem:[#allocation2 + $0x478] sm:$0xff]  ;;  %v698_v62 = vld [vmem:[#allocation2 + $0x548] sm:$0xff] }
  0xb7   :  { %v7080_v3 = vpack.c.bf16 %v524_v1, %v522_v0  ;;  %v675_v63 = vld [vmem:[%s14556_s0 + $0x8] sm:$0xf8]  ;;  %v7102_v0 = vpack.c.bf16 %v693_v59, %v691_v58  ;;  %v551_v1 = vsel %vm535_vm2, %v546_v46, %v550_v56  ;;  %v728_v58 = vld [vmem:[#allocation2 + $0x638] sm:$0xff] }
  0xb8   :  { %452 = vmatmul.mubr.f32.gmra.mrb[2].mxu0 %v8156_v12  ;;  %v737_v5 = vrot.slane %v675_v63, 3 }
  0xb9   :  { %7047 = vmatpush1.bf16.msra.mxu0 %v7046_v6  ;;  %6811 = vmatprep.mubr.msk.f32.mxu0 %vm263_vm1, %v8164_v15  ;;  %v526_v6 = vld [vmem:[#allocation2 + $0x488] sm:$0xff] }
  0xba   :  { %7049 = vmatprep.subr.bf16.mxu0 %v7048_v7  ;;  %v528_v7 = vld [vmem:[#allocation2 + $0x498] sm:$0xff] }
  0xbb   :  { %v7084_v9 = vpack.c.bf16 %v528_v7, %v526_v6  ;;  %v738_v6 = vrot.slane %v8143_v32, 3  ;;  %v700_v7 = vld [vmem:[#allocation2 + $0x558] sm:$0xff]  ;;  %v676_v32 = vld [vmem:[%s14556_s0 + $0x40] sm:$0x7f] }
  0xbc   :  { %458 = vmatmul.mubr.f32.gmra.mrb[4].mxu0 %v8171_v24 }
  0xbd   :  { %7051 = vmatpush1.bf16.msra.mxu0 %v7050_v13  ;;  %6812 = vmatprep.mubr.msk.f32.mxu0 %vm263_vm1, %v8176_v27  ;;  %v476_v13 = vld [vmem:[%s14556_s0] sm:$0xfc] }
  0xbe   :  { %7053 = vmatprep.subr.bf16.mxu0 %v7052_v14  ;;  %v7086_v14 = vpack.c.bf16 %v527_v11, %v525_v10  ;;  %v536_v19 = vrot.slane %v476_v13, 2  ;;  %v699_v11 = vld [vmem:[#allocation2 + $0x550] sm:$0xff]  ;;  %v701_v13 = vld [vmem:[#allocation2 + $0x560] sm:$0xff] }
  0xbf   :  { %v7110_v18 = vpack.c.bf16 %v701_v13, %v699_v11 }
  0xc0   :  { %464 = vmatmul.mubr.f32.gmra.mrb[6].mxu0 %v8187_v40  ;;  %v538_v31 = vsel %vm535_vm2, %v536_v19, %v537_v20 }
  0xc1   :  { %7055 = vmatpush1.bf16.msra.mxu0 %v7054_v21  ;;  %6813 = vmatprep.mubr.msk.f32.mxu0 %vm263_vm1, %v123_v26  ;;  %v679_v21 = vld [vmem:[#allocation2 + $0x4b0] sm:$0xff]  ;;  %v686_v26 = vld [vmem:[#allocation2 + $0x4e8] sm:$0xff] }
  0xc2   :  { %7057 = vmatprep.subr.bf16.mxu0 %v7056_v22  ;;  %v681_v22 = vld [vmem:[#allocation2 + $0x4c0] sm:$0xff] }
  0xc4   :  { %470 = vmatmul.mubr.f32.gmra.mrb[8].mxu0 %v122_v34  ;;  %v542_v34 = vrot.slane %v8171_v24, 2 }
  0xc5   :  { %7059 = vmatpush1.bf16.msra.mxu0 %v7058_v33  ;;  %6814 = vmatprep.mubr.msk.f32.mxu0 %vm263_vm1, %v541_v39  ;;  %v7090_v33 = vpack.c.bf16 %v681_v22, %v679_v21  ;;  %v545_v39 = vsel %vm535_vm2, %v540_v29, %v544_v23  ;;  %v705_v21 = vld [vmem:[#allocation2 + $0x580] sm:$0xff]  ;;  %v708_v22 = vld [vmem:[#allocation2 + $0x598] sm:$0xff] }
  0xc6   :  { %7061 = vmatprep.subr.bf16.mxu0 %v7060_v35  ;;  %v7092_v35 = vpack.c.bf16 %v686_v26, %v684_v25  ;;  %v543_v45 = vsel %vm535_vm2, %v537_v20, %v542_v34  ;;  %v703_v20 = vld [vmem:[#allocation2 + $0x570] sm:$0xff] }
  0xc7   :  { %v7114_v25 = vpack.c.bf16 %v705_v21, %v703_v20 }
  0xc9   :  { %7063 = vmatpush1.bf16.msra.mxu0 %v7062_v43  ;;  %v690_v43 = vld [vmem:[#allocation2 + $0x508] sm:$0xff] }
  0xca   :  { %7065 = vmatprep.subr.bf16.mxu0 %v7064_v44  ;;  %v479_v44 = vld [vmem:[%s14556_s0 + $0x48] sm:$0x3f]  ;;  %v7096_v29 = vpack.c.bf16 %v690_v43, %v688_v42  ;;  %v7122_v42 = vpack.c.bf16 %v713_v38, %v711_v36 }
  0xcb   :  { %v552_v50 = vrot.slane %v479_v44, 2  ;;  %v715_v44 = vld [vmem:[#allocation2 + $0x5d0] sm:$0xff] }
  0xcd   :  { %7067 = vmatpush1.bf16.msra.mxu0 %v7066_v48  ;;  %v689_v48 = vld [vmem:[#allocation2 + $0x500] sm:$0xff] }
  0xce   :  { %7069 = vmatprep.subr.bf16.mxu0 %v7068_v49  ;;  %v549_v49 = vsel %vm535_vm2, %v544_v23, %v548_v41  ;;  %v710_v23 = vld [vmem:[#allocation2 + $0x5a8] sm:$0xff] }
  0xcf   :  { %v7116_v26 = vpack.c.bf16 %v710_v23, %v708_v22 }
  0xd1   :  { %7071 = vmatpush1.bf16.msra.mxu0 %v7070_v54  ;;  %v7098_v54 = vpack.c.bf16 %v689_v48, %v687_v47  ;;  %v719_v48 = vld [vmem:[#allocation2 + $0x5f0] sm:$0xff] }
  0xd2   :  { %7073 = vmatprep.subr.bf16.mxu0 %v7072_v55  ;;  %v547_v55 = vsel %vm535_vm2, %v542_v34, %v546_v46  ;;  %v722_v46 = vld [vmem:[#allocation2 + $0x608] sm:$0xff] }
  0xd5   :  { %7075 = vmatpush1.bf16.msra.mxu0 %v7074_v60  ;;  %v553_v60 = vsel %vm535_vm2, %v548_v41, %v552_v50  ;;  %v718_v41 = vld [vmem:[#allocation2 + $0x5e8] sm:$0xff] }
  0xd6   :  { %7077 = vmatprep.subr.bf16.mxu0 %v7076_v61  ;;  %v696_v61 = vld [vmem:[#allocation2 + $0x538] sm:$0xff] }
  0xd9   :  { %7079 = vmatpush1.bf16.msra.mxu0 %v7078_v2  ;;  %v7104_v2 = vpack.c.bf16 %v698_v62, %v696_v61  ;;  %v742_v61 = vrot.slane %v8164_v15, 3  ;;  %v727_v62 = vld [vmem:[#allocation2 + $0x630] sm:$0xff] }
  0xda   :  { %7081 = vmatprep.subr.bf16.mxu0 %v7080_v3  ;;  %v695_v3 = vld [vmem:[#allocation2 + $0x530] sm:$0xff] }
  0xdd   :  { %7083 = vmatpush1.bf16.msra.mxu0 %v7082_v8  ;;  %v702_v8 = vld [vmem:[#allocation2 + $0x568] sm:$0xff] }
  0xde   :  { %7085 = vmatprep.subr.bf16.mxu0 %v7084_v9  ;;  %v7106_v9 = vpack.c.bf16 %v697_v4, %v695_v3  ;;  %v7108_v10 = vpack.c.bf16 %v702_v8, %v700_v7  ;;  %v744_v3 = vrot.slane %v8187_v40, 3  ;;  %v14599_v7 = vmov 0.0  }
  0xdf   :  { %4665 = vmatprep.mubr.f32.mxu1 %v14599_v7 }
  0xe1   :  { %7087 = vmatpush1.bf16.msra.mxu0 %v7086_v14  ;;  %v739_v14 = vsel %vm733_vm3, %v737_v5, %v738_v6  ;;  %v748_v5 = vrot.slane %v676_v32, 3 }
  0xe2   :  { %617 = vmatprep.subr.mxu0 %v530_v16  ;;  %v704_v16 = vld [vmem:[#allocation2 + $0x578] sm:$0xff] }
  0xe3   :  { %v7112_v19 = vpack.c.bf16 %v706_v17, %v704_v16  ;;  %v749_v40 = vsel %vm733_vm3, %v744_v3, %v748_v5 }
  0xe5   :  { %618 = vmatpush1.msra.mxu0 %v529_v28  ;;  %v707_v28 = vld [vmem:[#allocation2 + $0x590] sm:$0xff] }
  0xe6   :  { %7089 = vmatprep.subr.bf16.mxu0 %v7088_v30  ;;  %634 = vmatmul.mubr.f32.vlgmr.msra.gmra.mrb[0].mxu0 %v538_v31  ;;  %v709_v30 = vld [vmem:[#allocation2 + $0x5a0] sm:$0xff]  ;;  %v712_v31 = vld [vmem:[#allocation2 + $0x5b8] sm:$0xff] }
  0xe7   :  { %7091 = vmatpush1.bf16.msra.mxu0 %v7090_v33  ;;  %6815 = vmatprep.mubr.msk.f32.mxu0 %vm263_vm1, %v545_v39  ;;  %v714_v33 = vld [vmem:[#allocation2 + $0x5c8] sm:$0xff]  ;;  %v7118_v34 = vpack.c.bf16 %v709_v30, %v707_v28  ;;  %v716_v39 = vld [vmem:[#allocation2 + $0x5d8] sm:$0xff] }
  0xe8   :  { %7093 = vmatprep.subr.bf16.mxu0 %v7092_v35  ;;  %v7120_v35 = vpack.c.bf16 %v714_v33, %v712_v31  ;;  %v7124_v43 = vpack.c.bf16 %v718_v41, %v716_v39 }
  0xea   :  { %640 = vmatmul.mubr.f32.gmra.mrb[2].mxu0 %v543_v45  ;;  %v720_v45 = vld [vmem:[#allocation2 + $0x5f8] sm:$0xff] }
  0xeb   :  { %7095 = vmatpush1.bf16.msra.mxu0 %v7094_v37  ;;  %6816 = vmatprep.mubr.msk.f32.mxu0 %vm263_vm1, %v549_v49  ;;  %v717_v37 = vld [vmem:[#allocation2 + $0x5e0] sm:$0xff]  ;;  %v7128_v47 = vpack.c.bf16 %v722_v46, %v720_v45 }
  0xec   :  { %7097 = vmatprep.subr.bf16.mxu0 %v7096_v29  ;;  %v7126_v29 = vpack.c.bf16 %v717_v37, %v715_v44  ;;  %v721_v49 = vld [vmem:[#allocation2 + $0x600] sm:$0xff] }
  0xed   :  { %v7130_v52 = vpack.c.bf16 %v721_v49, %v719_v48 }
  0xee   :  { %646 = vmatmul.mubr.f32.gmra.mrb[4].mxu0 %v547_v55  ;;  %v725_v55 = vld [vmem:[#allocation2 + $0x620] sm:$0xff] }
  0xef   :  { %7099 = vmatpush1.bf16.msra.mxu0 %v7098_v54  ;;  %6817 = vmatprep.mubr.msk.f32.mxu0 %vm263_vm1, %v553_v60  ;;  %v723_v54 = vld [vmem:[#allocation2 + $0x610] sm:$0xff]  ;;  %v735_v60 = vrot.slane %v8156_v12, 3  ;;  %v677_v12 = vld [vmem:[%s14556_s0 + $0x48] sm:$0x7f] }
  0xf0   :  { %7101 = vmatprep.subr.bf16.mxu0 %v7100_v57  ;;  %v7134_v57 = vpack.c.bf16 %v725_v55, %v723_v54  ;;  %v750_v4 = vrot.slane %v677_v12, 3 }
  0xf2   :  { %652 = vmatmul.mubr.f32.gmra.mrb[6].mxu0 %v551_v1  ;;  %v743_v1 = vsel %vm733_vm3, %v738_v6, %v742_v61 }
  0xf3   :  { %7103 = vmatpush1.bf16.msra.mxu0 %v7102_v0  ;;  %6818 = vmatprep.mubr.msk.f32.mxu0 %vm263_vm1, %v552_v50  ;;  %v724_v50 = vld [vmem:[#allocation2 + $0x618] sm:$0xff]  ;;  %v740_v0 = vrot.slane %v8171_v24, 3 }
  0xf4   :  { %7105 = vmatprep.subr.bf16.mxu0 %v7104_v2  ;;  %v7132_v53 = vpack.c.bf16 %v726_v51, %v724_v50  ;;  %v746_v2 = vrot.slane %v8176_v27, 3 }
  0xf5   :  { %v741_v15 = vsel %vm733_vm3, %v735_v60, %v740_v0  ;;  %v745_v27 = vsel %vm733_vm3, %v740_v0, %v744_v3 }
  0xf6   :  { %658 = vmatmul.mubr.f32.gmra.mrb[8].mxu0 %v550_v56  ;;  %v674_v56 = vld [vmem:[%s14556_s0] sm:$0xf8]  ;;  %v747_v24 = vsel %vm733_vm3, %v742_v61, %v746_v2  ;;  %v751_v6 = vsel %vm733_vm3, %v746_v2, %v750_v4  ;;  %s872_s0 = sld [smem:[#allocation11]] }
  0xf7   :  { %7107 = vmatpush1.bf16.msra.mxu0 %v7106_v9  ;;  %6819 = vmatprep.mubr.msk.f32.mxu0 %vm263_vm1, %v739_v14  ;;  %v734_v59 = vrot.slane %v674_v56, 3 }
  0xf8   :  { %7109 = vmatprep.subr.bf16.mxu0 %v7108_v10 }
  0xf9   :  { %v736_v63 = vsel %vm733_vm3, %v734_v59, %v735_v60 }
  0xfb   :  { %7111 = vmatpush1.bf16.msra.mxu0 %v7110_v18 }
  0xfc   :  { %7113 = vmatprep.subr.bf16.mxu0 %v7112_v19  ;;  %v8299_v8 = vstv %s872_s0  ;;  %s4808_s0 = sld [smem:[#allocation8]] }
  0xff   :  { %7115 = vmatpush1.bf16.msra.mxu0 %v7114_v25 }
 0x100   :  { %7117 = vmatprep.subr.bf16.mxu0 %v7116_v26 }
 0x103   :  { %7119 = vmatpush1.bf16.msra.mxu0 %v7118_v34 }
 0x104   :  { %7121 = vmatprep.subr.bf16.mxu0 %v7120_v35 }
 0x107   :  { %7123 = vmatpush1.bf16.msra.mxu0 %v7122_v42 }
 0x108   :  { %7125 = vmatprep.subr.bf16.mxu0 %v7124_v43 }
 0x10b   :  { %7127 = vmatpush1.bf16.msra.mxu0 %v7126_v29 }
 0x10c   :  { %7129 = vmatprep.subr.bf16.mxu0 %v7128_v47 }
 0x10f   :  { %7131 = vmatpush1.bf16.msra.mxu0 %v7130_v52 }
 0x110   :  { %7133 = vmatprep.subr.bf16.mxu0 %v7132_v53 }
 0x113   :  { %7135 = vmatpush1.bf16.msra.mxu0 %v7134_v57 }
 0x114   :  { %815 = vmatprep.subr.mxu0 %v728_v58 }
 0x117   :  { %816 = vmatpush1.msra.mxu0 %v727_v62 }
 0x118   :  { %832 = vmatmul.mubr.f32.vlgmr.msra.gmra.mrb[0].mxu0 %v736_v63 }
 0x119   :  { %6820 = vmatprep.mubr.msk.f32.mxu0 %vm263_vm1, %v743_v1 }
 0x11c   :  { %838 = vmatmul.mubr.f32.gmra.mrb[2].mxu0 %v741_v15 }
 0x11d   :  { %6821 = vmatprep.mubr.msk.f32.mxu0 %vm263_vm1, %v747_v24 }
 0x120   :  { %844 = vmatmul.mubr.f32.gmra.mrb[4].mxu0 %v745_v27 }
 0x121   :  { %6822 = vmatprep.mubr.msk.f32.mxu0 %vm263_vm1, %v751_v6 }
 0x124   :  { %850 = vmatmul.mubr.f32.gmra.mrb[6].mxu0 %v749_v40 }
 0x125   :  { %6823 = vmatprep.mubr.msk.f32.mxu0 %vm263_vm1, %v750_v4 }
 0x128   :  { %856 = vmatmul.mubr.f32.gmra.mrb[8].mxu0 %v748_v5 }
 0x1eb   :  { %v833_v9 = vpop.f32.mrb[0].mxu0 }
 0x1ec   :  { %v8302_v10 = vadd.f32 %v8299_v8, %v833_v9  ;;  %v835_v11 = vpop.f32.mrb[1].mxu0 }
 0x1ed   :  { %v8305_v13 = vadd.f32 %v8299_v8, %v835_v11 }
 0x1ee   :  { %14833 = vst [vmem:[#allocation18_spill] sm:$0xff] %v8302_v10  ;;  %vm884_vm4 = vcmp.gt.f32.partialorder %v8302_v10, -inf }
 0x1ef   :  { %14834 = vst [vmem:[#allocation19_spill] sm:$0xff] %v8305_v13  ;;  %v839_v14 = vpop.f32.mrb[2].mxu0  ;;  %v892_v16 = vsel %vm884_vm4, %v8302_v10, -inf  ;;  %vm885_vm5 = vcmp.gt.f32.partialorder %v8305_v13, -inf  ;;  %vm14587_vm4 = vcmask 1043456  }
 0x1f0   :  { %v8311_v17 = vadd.f32 %v8299_v8, %v839_v14  ;;  %v841_v18 = vpop.f32.mrb[3].mxu0  ;;  %v909_v19 = vrot.slane %v892_v16, 7  ;;  %v893_v20 = vsel %vm885_vm5, %v8305_v13, -inf }
 0x1f1   :  { %v8315_v21 = vadd.f32 %v8299_v8, %v841_v18  ;;  %v8317_v22 = vrot.slane %v893_v20, 7 }
 0x1f2   :  { %vm886_vm6 = vcmp.gt.f32.partialorder %v8311_v17, -inf  ;;  %vm933_vm8 = vcmp.gt.f32.partialorder %v8302_v10, %v909_v19 }
 0x1f3   :  { %v845_v23 = vpop.f32.mrb[4].mxu0  ;;  %v8322_v25 = vsel %vm886_vm6, %v8311_v17, -inf  ;;  %v943_v26 = vsel %vm933_vm8, %v8302_v10, %v909_v19  ;;  %v953_v28 = vsel %vm933_vm8, 1.0, %v14599_v7  ;;  %vm887_vm9 = vcmp.gt.f32.partialorder %v8315_v21, -inf }
 0x1f4   :  { %v847_v30 = vpop.f32.mrb[5].mxu0  ;;  %v911_v31 = vrot.slane %v8322_v25, 7  ;;  %v973_v33 = vrot.slane %v943_v26, 7  ;;  %v1031_v34 = vrot.slane %v953_v28, 7  ;;  %v8329_v35 = vsel %vm887_vm9, %v8315_v21, -inf }
 0x1f5   :  { %vm934_vm10 = vcmp.gt.f32.partialorder %v8305_v13, %v8317_v22  ;;  %v913_v38 = vrot.slane %v8329_v35, 7  ;;  %v8354_v47 = vadd.f32 %v8299_v8, %v845_v23  ;;  %v8359_v51 = vadd.f32 %v8299_v8, %v847_v30 }
 0x1f6   :  { %v912_v36 = vsel %vm14821_vm7, %v909_v19, %v911_v31  ;;  %vm1001_vm11 = vcmp.gt.f32.partialorder %v8302_v10, %v973_v33  ;;  %v944_v39 = vsel %vm934_vm10, %v8305_v13, %v8317_v22 }
 0x1f7   :  { %v851_v41 = vpop.f32.mrb[6].mxu0  ;;  %vm935_vm12 = vcmp.gt.f32.partialorder %v8311_v17, %v912_v36  ;;  %v1011_v42 = vsel %vm1001_vm11, %v8302_v10, %v973_v33  ;;  %v1059_v43 = vsel %vm1001_vm11, 2.0, %v1031_v34  ;;  %v8351_v29 = vrot.slane %v944_v39, 7 }
 0x1f8   :  { %v853_v44 = vpop.f32.mrb[7].mxu0  ;;  %v8346_v37 = vsel %vm935_vm12, %v8311_v17, %v912_v36  ;;  %v8349_v45 = vsel %vm935_vm12, 1.0, %v14599_v7  ;;  %v1079_v46 = vrot.slane %v1011_v42, 7  ;;  %v1137_v50 = vrot.slane %v1059_v43, 7 }
 0x1f9   :  { %v975_v48 = vrot.slane %v8346_v37, 7  ;;  %v1033_v49 = vrot.slane %v8349_v45, 7  ;;  %v8362_v52 = vadd.f32 %v8299_v8, %v851_v41  ;;  %v8369_v53 = vsel %vm14821_vm7, %v8317_v22, %v913_v38 }
 0x1fa   :  { %vm1107_vm13 = vcmp.gt.f32.partialorder %v8302_v10, %v1079_v46  ;;  %v8372_v54 = vadd.f32 %v8299_v8, %v853_v44  ;;  %vm1002_vm15 = vcmp.gt.f32.partialorder %v8305_v13, %v8351_v29  ;;  %vm936_vm1 = vcmp.gt.f32.partialorder %v8315_v21, %v8369_v53 }
 0x1fb   :  { %v857_v55 = vpop.f32.mrb[8].mxu0  ;;  %v976_v56 = vsel %vm14821_vm7, %v973_v33, %v975_v48  ;;  %v1034_v57 = vsel %vm14821_vm7, %v1031_v34, %v1033_v49  ;;  %v1117_v58 = vsel %vm1107_vm13, %v8302_v10, %v1079_v46  ;;  %v1165_v60 = vsel %vm1107_vm13, 3.0, %v1137_v50 }
 0x1fc   :  { %v859_v59 = vpop.f32.mrb[9].mxu0  ;;  %vm1003_vm14 = vcmp.gt.f32.partialorder %v8311_v17, %v976_v56  ;;  %v1185_v61 = vrot.slane %v1117_v58, 7  ;;  %vm888_vm2 = vcmp.gt.f32.partialorder %v8354_v47, -inf  ;;  %v8400_v2 = vsel %vm936_vm1, %v8315_v21, %v8369_v53 }
 0x1fd   :  { %v8385_v62 = vsel %vm1003_vm14, %v8311_v17, %v976_v56  ;;  %v8387_v63 = vsel %vm1003_vm14, 2.0, %v1034_v57  ;;  %v8403_v12 = vadd.f32 %v8299_v8, %v857_v55  ;;  %v1243_v15 = vrot.slane %v1165_v60, 7 }
 0x1fe   :  { %v1081_v0 = vrot.slane %v8385_v62, 7  ;;  %v1139_v1 = vrot.slane %v8387_v63, 7  ;;  %vm1213_vm3 = vcmp.gt.f32.partialorder %v8302_v10, %v1185_v61  ;;  %v977_v3 = vrot.slane %v8400_v2, 7 }
 0x1ff   :  { %v1012_v24 = vsel %vm1002_vm15, %v8305_v13, %v8351_v29  ;;  %v8412_v4 = vadd.f32 %v8299_v8, %v859_v59  ;;  %v1223_v5 = vsel %vm1213_vm3, %v8302_v10, %v1185_v61  ;;  %v8435_v8 = vsel %vm888_vm2, %v8354_v47, -inf }
 0x200   :  { %v1082_v32 = vsel %vm14821_vm7, %v1079_v46, %v1081_v0  ;;  %v1140_v27 = vsel %vm14821_vm7, %v1137_v50, %v1139_v1  ;;  %v8428_v6 = vsel %vm14821_vm7, %v8351_v29, %v977_v3  ;;  %v8430_v40 = vrot.slane %v1012_v24, 7 }
 0x201   :  { %vm1109_vm5 = vcmp.gt.f32.partialorder %v8311_v17, %v1082_v32  ;;  %vm1004_vm6 = vcmp.gt.f32.partialorder %v8315_v21, %v8428_v6  ;;  %v915_v14 = vrot.slane %v8435_v8, 7  ;;  %v8448_v18 = vsel %vm1213_vm3, 4.0, %v1243_v15 }
 0x202   :  { %v8438_v9 = vsel %vm1109_vm5, %v8311_v17, %v1082_v32  ;;  %v8440_v11 = vsel %vm1109_vm5, 3.0, %v1140_v27  ;;  %v8455_v19 = vsel %vm1004_vm6, %v8315_v21, %v8428_v6  ;;  %vm1108_vm8 = vcmp.gt.f32.partialorder %v8305_v13, %v8430_v40 }
 0x203   :  { %v1187_v16 = vrot.slane %v8438_v9, 7  ;;  %v1245_v20 = vrot.slane %v8440_v11, 7  ;;  %v1083_v23 = vrot.slane %v8455_v19, 7  ;;  %v1118_v26 = vsel %vm1108_vm8, %v8305_v13, %v8430_v40 }
 0x204   :  { %v916_v28 = vsel %vm14821_vm7, %v911_v31, %v915_v14  ;;  %v1292_v33 = vrot.slane %v1223_v5, 4  ;;  %v8472_v34 = vrot.slane %v1118_v26, 7  ;;  %vm889_vm14 = vcmp.gt.f32.partialorder %v8359_v51, -inf }
 0x205   :  { %v1188_v30 = vsel %vm14821_vm7, %v1185_v61, %v1187_v16  ;;  %vm937_vm9 = vcmp.gt.f32.partialorder %v8354_v47, %v916_v28  ;;  %v8480_v36 = vsel %vm14821_vm7, %v8430_v40, %v1083_v23  ;;  %v1246_v41 = vsel %vm14821_vm7, %v1243_v15, %v1245_v20 }
 0x206   :  { %vm1215_vm11 = vcmp.gt.f32.partialorder %v8311_v17, %v1188_v30  ;;  %v8483_v25 = vsel %vm937_vm9, %v8354_v47, %v916_v28  ;;  %v8486_v31 = vsel %vm937_vm9, 1.0, %v14599_v7  ;;  %vm1110_vm12 = vcmp.gt.f32.partialorder %v8315_v21, %v8480_v36 }
 0x207   :  { %v8491_v39 = vsel %vm1215_vm11, %v8311_v17, %v1188_v30  ;;  %vm1214_vm13 = vcmp.gt.f32.partialorder %v8305_v13, %v8472_v34  ;;  %v8507_v43 = vsel %vm1110_vm12, %v8315_v21, %v8480_v36  ;;  %v979_v55 = vrot.slane %v8483_v25, 7 }
 0x208   :  { %v1293_v42 = vrot.slane %v8491_v39, 4  ;;  %v1224_v44 = vsel %vm1214_vm13, %v8305_v13, %v8472_v34  ;;  %v1189_v46 = vrot.slane %v8507_v43, 7  ;;  %v1037_v56 = vrot.slane %v8486_v31, 7 }
 0x209   :  { %v1295_v50 = vrot.slane %v1224_v44, 4  ;;  %v897_v58 = vsel %vm889_vm14, %v8359_v51, -inf  ;;  %vm890_vm2 = vcmp.gt.f32.partialorder %v8362_v52, -inf  ;;  %vm891_vm3 = vcmp.gt.f32.partialorder %v8372_v54, -inf }
 0x20a   :  { %v1294_v57 = vsel %vm14587_vm4, %v1292_v33, %v1293_v42  ;;  %v8528_v59 = vsel %vm14821_vm7, %v8472_v34, %v1189_v46  ;;  %v980_v60 = vsel %vm14821_vm7, %v975_v48, %v979_v55  ;;  %v1038_v61 = vsel %vm14821_vm7, %v1033_v49, %v1037_v56 }
 0x20b   :  { %1310 = vrot.lane.b32.xlu0 %v1294_v57, %s8011_s27  ;;  %v917_v15 = vrot.slane %v897_v58, 7  ;;  %vm1216_vm5 = vcmp.gt.f32.partialorder %v8315_v21, %v8528_v59  ;;  %vm1005_vm9 = vcmp.gt.f32.partialorder %v8354_v47, %v980_v60  ;;  %v898_v24 = vsel %vm890_vm2, %v8362_v52, -inf }
 0x20c   :  { %v899_v32 = vsel %vm891_vm3, %v8372_v54, -inf  ;;  %v8548_v37 = vsel %vm1216_vm5, %v8315_v21, %v8528_v59  ;;  %v1015_v45 = vsel %vm1005_vm9, %v8354_v47, %v980_v60  ;;  %v8551_v48 = vsel %vm1005_vm9, 2.0, %v1038_v61 }
 0x20d   :  { %v8556_v49 = vsel %vm14821_vm7, %v913_v38, %v917_v15  ;;  %v1296_v27 = vrot.slane %v8548_v37, 4  ;;  %v1085_v5 = vrot.slane %v1015_v45, 7  ;;  %v14581_v8 = vrot.slane %v8551_v48, 7 }
 0x20e   :  { %vm938_vm14 = vcmp.gt.f32.partialorder %v8359_v51, %v8556_v49  ;;  %v1373_v26 = vrot.slane %v8448_v18, 4  ;;  %v8568_v35 = vrot.slane %v898_v24, 7  ;;  %v8570_v38 = vrot.slane %v899_v32, 7 }
 0x20f   :  { %v948_v28 = vsel %vm938_vm14, %v8359_v51, %v8556_v49  ;;  %v8574_v33 = vsel %vm1215_vm11, 4.0, %v1246_v41  ;;  %v1297_v25 = vsel %vm14587_vm4, %v1295_v50, %v1296_v27  ;;  %v1086_v44 = vsel %vm14821_vm7, %v1081_v0, %v1085_v5 }
 0x210   :  { %v981_v57 = vrot.slane %v948_v28, 7  ;;  %1312 = vrot.lane.b32.xlu0 %v1297_v25, %s8011_s27  ;;  %vm1111_vm2 = vcmp.gt.f32.partialorder %v8354_v47, %v1086_v44  ;;  %v8586_v58 = vsel %vm14821_vm7, %v915_v14, %v8568_v35  ;;  %v8590_v30 = vsel %vm14821_vm7, %v917_v15, %v8570_v38 }
 0x211   :  { %vm14574_vm11 = vcmp.gt.f32.partialorder %v8403_v12, %v8568_v35  ;;  %v1121_v62 = vsel %vm1111_vm2, %v8354_v47, %v1086_v44  ;;  %v1144_v0 = vsel %vm14821_vm7, %v1139_v1, %v14581_v8  ;;  %vm939_vm3 = vcmp.gt.f32.partialorder %v8362_v52, %v8586_v58 }
 0x212   :  { %v8605_v14 = vsel %vm14821_vm7, %v977_v3, %v981_v57  ;;  %v1374_v41 = vrot.slane %v8574_v33, 4  ;;  %v1191_v50 = vrot.slane %v1121_v62, 7  ;;  %v949_v63 = vsel %vm939_vm3, %v8362_v52, %v8586_v58 }
 0x213   :  { %vm14575_vm9 = vcmp.gt.f32.partialorder %v8359_v51, %v8605_v14  ;;  %v983_v2 = vrot.slane %v949_v63, 7  ;;  %vm940_vm0 = vcmp.gt.f32.partialorder %v8372_v54, %v8590_v30  ;;  %v951_v3 = vsel %vm14574_vm11, %v8403_v12, %v8568_v35 }
 0x214   :  { %v1016_v1 = vsel %vm14575_vm9, %v8359_v51, %v8605_v14  ;;  %v8631_v60 = vsel %vm1111_vm2, 3.0, %v1144_v0  ;;  %v8636_v61 = vsel %vm14821_vm7, %v1187_v16, %v1191_v50  ;;  %v8643_v24 = vsel %vm940_vm0, %v8372_v54, %v8590_v30 }
 0x215   :  { %v1087_v15 = vrot.slane %v1016_v1, 7  ;;  %vm14577_vm11 = vcmp.gt.f32.partialorder %v8354_v47, %v8636_v61  ;;  %v8648_v32 = vsel %vm14821_vm7, %v979_v55, %v983_v2  ;;  %v985_v45 = vrot.slane %v8643_v24, 7 }
 0x216   :  { %v987_v9 = vrot.slane %v951_v3, 7  ;;  %v1227_v16 = vsel %vm14577_vm11, %v8354_v47, %v8636_v61  ;;  %vm1007_vm2 = vcmp.gt.f32.partialorder %v8362_v52, %v8648_v32  ;;  %v954_v55 = vsel %vm934_vm10, 1.0, %v14599_v7 }
 0x217   :  { %v8659_v28 = vsel %vm14821_vm7, %v1083_v23, %v1087_v15  ;;  %v1249_v25 = vrot.slane %v8631_v60, 7  ;;  %v1298_v44 = vrot.slane %v1227_v16, 4  ;;  %v1017_v19 = vsel %vm1007_vm2, %v8362_v52, %v8648_v32 }
 0x218   :  { %vm14576_vm9 = vcmp.gt.f32.partialorder %v8359_v51, %v8659_v28  ;;  %v1089_v22 = vrot.slane %v1017_v19, 7  ;;  %v8683_v62 = vsel %vm14821_vm7, %v981_v57, %v985_v45  ;;  %v8686_v0 = vsel %vm14821_vm7, %v983_v2, %v987_v9 }
 0x219   :  { %v1122_v23 = vsel %vm14576_vm9, %v8359_v51, %v8659_v28  ;;  %v1299_v63 = vsel %vm14587_vm4, %v1293_v42, %v1298_v44  ;;  %vm1008_vm10 = vcmp.gt.f32.partialorder %v8372_v54, %v8683_v62  ;;  %vm14578_vm9 = vcmp.gt.f32.partialorder %v8403_v12, %v8686_v0 }
 0x21a   :  { %v1193_v1 = vrot.slane %v1122_v23, 7  ;;  %1314 = vrot.lane.b32.xlu1 %v1299_v63, %s8011_s27  ;;  %v8697_v3 = vsel %vm14821_vm7, %v1085_v5, %v1089_v22  ;;  %v8704_v39 = vsel %vm1008_vm10, %v8372_v54, %v8683_v62  ;;  %v1019_v42 = vsel %vm14578_vm9, %v8403_v12, %v8686_v0 }
 0x21b   :  { %v8715_v57 = vsel %vm936_vm1, 1.0, %v14599_v7  ;;  %vm14579_vm11 = vcmp.gt.f32.partialorder %v8362_v52, %v8697_v3  ;;  %v1091_v2 = vrot.slane %v8704_v39, 7  ;;  %v1093_v9 = vrot.slane %v1019_v42, 7 }
 0x21c   :  { %v8720_v5 = vsel %vm14821_vm7, %v1189_v46, %v1193_v1  ;;  %v1123_v53 = vsel %vm14579_vm11, %v8362_v52, %v8697_v3  ;;  %v1032_v16 = vrot.slane %v954_v55, 7  ;;  %v1035_v43 = vrot.slane %v8715_v57, 7 }
 0x21d   :  { %vm14580_vm9 = vcmp.gt.f32.partialorder %v8359_v51, %v8720_v5  ;;  %v1195_v19 = vrot.slane %v1123_v53, 7  ;;  %v8741_v23 = vsel %vm14821_vm7, %v1087_v15, %v1091_v2  ;;  %v8744_v63 = vsel %vm14821_vm7, %v1089_v22, %v1093_v9 }
 0x21e   :  { %v1228_v46 = vsel %vm14580_vm9, %v8359_v51, %v8720_v5  ;;  %vm1114_vm1 = vcmp.gt.f32.partialorder %v8372_v54, %v8741_v23  ;;  %vm14582_vm11 = vcmp.gt.f32.partialorder %v8403_v12, %v8744_v63  ;;  %v1036_v55 = vsel %vm14821_vm7, %v1032_v16, %v1035_v43 }
 0x21f   :  { %v1300_v42 = vrot.slane %v1228_v46, 4  ;;  %v8752_v57 = vsel %vm14821_vm7, %v1191_v50, %v1195_v19  ;;  %v8759_v15 = vsel %vm1114_vm1, %v8372_v54, %v8741_v23  ;;  %v1125_v22 = vsel %vm14582_vm11, %v8403_v12, %v8744_v63 }
 0x220   :  { %v1060_v9 = vsel %vm1002_vm15, 2.0, %v1032_v16  ;;  %vm1219_vm9 = vcmp.gt.f32.partialorder %v8362_v52, %v8752_v57  ;;  %v1197_v53 = vrot.slane %v8759_v15, 7  ;;  %v1199_v46 = vrot.slane %v1125_v22, 7 }
 0x221   :  { %v1301_v50 = vsel %vm14587_vm4, %v1296_v27, %v1300_v42  ;;  %v1250_v8 = vsel %vm14821_vm7, %v1245_v20, %v1249_v25  ;;  %v1229_v29 = vsel %vm1219_vm9, %v8362_v52, %v8752_v57  ;;  %v1062_v37 = vsel %vm1004_vm6, 2.0, %v1036_v55 }
 0x222   :  { %1316 = vrot.lane.b32.xlu1 %v1301_v50, %s8011_s27  ;;  %v1138_v27 = vrot.slane %v1060_v9, 7  ;;  %v1302_v16 = vrot.slane %v1229_v29, 4  ;;  %v8792_v11 = vsel %vm14821_vm7, %v1193_v1, %v1197_v53  ;;  %v8795_v20 = vsel %vm14821_vm7, %v1195_v19, %v1199_v46 }
 0x223   :  { %v1141_v22 = vrot.slane %v1062_v37, 7  ;;  %vm1220_vm15 = vcmp.gt.f32.partialorder %v8372_v54, %v8792_v11  ;;  %vm1221_vm11 = vcmp.gt.f32.partialorder %v8403_v12, %v8795_v20  ;;  %vm942_vm6 = vcmp.gt.f32.partialorder %v8412_v4, %v8570_v38 }
 0x224   :  { %v1166_v6 = vsel %vm1108_vm8, 3.0, %v1138_v27  ;;  %v1303_v1 = vsel %vm14587_vm4, %v1298_v44, %v1302_v16  ;;  %v8812_v19 = vsel %vm1220_vm15, %v8372_v54, %v8792_v11  ;;  %v1231_v55 = vsel %vm1221_vm11, %v8403_v12, %v8795_v20 }
 0x225   :  { %v1142_v40 = vsel %vm14821_vm7, %v1138_v27, %v1141_v22  ;;  %1318 = vrot.lane.b32.xlu0 %v1303_v1, %s8011_s27  ;;  %v1304_v9 = vrot.slane %v8812_v19, 4  ;;  %v1306_v44 = vrot.slane %v1231_v55, 4  ;;  %v1244_v46 = vrot.slane %v1166_v6, 7 }
 0x226   :  { %v1168_v50 = vsel %vm1110_vm12, 3.0, %v1142_v40  ;;  %v952_v37 = vsel %vm942_vm6, %v8412_v4, %v8570_v38  ;;  %v958_v27 = vsel %vm938_vm14, 1.0, %v14599_v7  ;;  %v8838_v1 = vsel %vm939_vm3, 1.0, %v14599_v7 }
 0x227   :  { %v1247_v29 = vrot.slane %v1168_v50, 7  ;;  %v1305_v36 = vsel %vm14587_vm4, %v1300_v42, %v1304_v9  ;;  %v1272_v6 = vsel %vm1214_vm13, 4.0, %v1244_v46  ;;  %v1375_v49 = vsel %vm14587_vm4, %v1373_v26, %v1374_v41 }
 0x228   :  { %v989_v55 = vrot.slane %v952_v37, 7  ;;  %1320 = vrot.lane.b32.xlu1 %v1305_v36, %s8011_s27  ;;  %v1307_v58 = vsel %vm14587_vm4, %v1302_v16, %v1306_v44  ;;  %v960_v42 = vsel %vm940_vm0, 1.0, %v14599_v7  ;;  %v1039_v34 = vrot.slane %v958_v27, 7 }
 0x229   :  { %v1248_v40 = vsel %vm14821_vm7, %v1244_v46, %v1247_v29  ;;  %1322 = vrot.lane.b32.xlu0 %v1307_v58, %s8011_s27  ;;  %v1041_v16 = vrot.slane %v8838_v1, 7  ;;  %v1043_v44 = vrot.slane %v960_v42, 7  ;;  %v1376_v50 = vrot.slane %v1272_v6, 4 }
 0x22a   :  { %v8862_v18 = vsel %vm1216_vm5, 4.0, %v1248_v40  ;;  %v990_v26 = vsel %vm14821_vm7, %v985_v45, %v989_v55  ;;  %v1040_v30 = vsel %vm14821_vm7, %v1035_v43, %v1039_v34  ;;  %vm14835_vm8 = vcmp.gt.f32.partialorder %v8359_v51, %v8605_v14 }
 0x22b   :  { %v1377_v46 = vrot.slane %v8862_v18, 4  ;;  %vm1010_vm0 = vcmp.gt.f32.partialorder %v8412_v4, %v990_v26  ;;  %v1042_v24 = vsel %vm14821_vm7, %v1037_v56, %v1041_v16  ;;  %v1044_v45 = vsel %vm14821_vm7, %v1039_v34, %v1043_v44 }
 0x22c   :  { %v1020_v59 = vsel %vm1010_vm0, %v8412_v4, %v990_v26  ;;  %v1064_v37 = vsel %vm14835_vm8, 2.0, %v1040_v30  ;;  %v1065_v43 = vsel %vm1007_vm2, 2.0, %v1042_v24  ;;  %v1066_v36 = vsel %vm1008_vm10, 2.0, %v1044_v45 }
 0x22d   :  { %v1378_v27 = vsel %vm14587_vm4, %v1376_v50, %v1377_v46  ;;  %v1095_v1 = vrot.slane %v1020_v59, 7  ;;  %v1145_v6 = vrot.slane %v1064_v37, 7  ;;  %v1147_v56 = vrot.slane %v1065_v43, 7 }
 0x22e   :  { %v7651_v31 = vpack.i.bf16 %v1378_v27, %v1375_v49  ;;  %v1149_v55 = vrot.slane %v1066_v36, 7  ;;  %vm14836_vm12 = vcmp.gt.f32.partialorder %v8354_v47, %v8636_v61  ;;  %vm14837_vm13 = vcmp.gt.f32.partialorder %v8403_v12, %v8568_v35 }
 0x22f   :  { %v1275_v14 = vsel %vm14836_vm12, 4.0, %v1250_v8  ;;  %v1096_v58 = vsel %vm14821_vm7, %v1091_v2, %v1095_v1  ;;  %v961_v32 = vsel %vm14837_vm13, 1.0, %v14599_v7  ;;  %v962_v62 = vsel %vm942_vm6, 1.0, %v14599_v7 }
 0x230   :  { %7652 = vrot.lane.b32.xlu0 %v7651_v31, %s8011_s27  ;;  %vm1116_vm5 = vcmp.gt.f32.partialorder %v8412_v4, %v1096_v58  ;;  %v1146_v8 = vsel %vm14821_vm7, %v1141_v22, %v1145_v6  ;;  %v14838_v61 = vrot.slane %v8551_v48, 7  ;;  %v1150_v2 = vsel %vm14821_vm7, %v1145_v6, %v1149_v55 }
 0x231   :  { %v1126_v35 = vsel %vm1116_vm5, %v8412_v4, %v1096_v58  ;;  %vm14839_vm14 = vcmp.gt.f32.partialorder %v8359_v51, %v8659_v28  ;;  %vm14840_vm3 = vcmp.gt.f32.partialorder %v8362_v52, %v8697_v3  ;;  %v1172_v48 = vsel %vm1114_vm1, 3.0, %v1150_v2 }
 0x232   :  { %v1148_v39 = vsel %vm14821_vm7, %v14838_v61, %v1147_v56  ;;  %v1170_v38 = vsel %vm14839_vm14, 3.0, %v1146_v8  ;;  %v1201_v22 = vrot.slane %v1126_v35, 7  ;;  %v1255_v34 = vrot.slane %v1172_v48, 7 }
 0x233   :  { %v1171_v49 = vsel %vm14840_vm3, 3.0, %v1148_v39  ;;  %v1251_v40 = vrot.slane %v1170_v38, 7  ;;  %v1379_v18 = vrot.slane %v1275_v14, 4  ;;  %v1045_v50 = vrot.slane %v961_v32, 7 }
 0x234   :  { %v1253_v42 = vrot.slane %v1171_v49, 7  ;;  %v1047_v30 = vrot.slane %v962_v62, 7  ;;  %v1202_v28 = vsel %vm14821_vm7, %v1197_v53, %v1201_v22  ;;  %vm14841_vm10 = vcmp.gt.f32.partialorder %v8359_v51, %v8720_v5 }
 0x235   :  { %v1252_v59 = vsel %vm14821_vm7, %v1247_v29, %v1251_v40  ;;  %v1256_v23 = vsel %vm14821_vm7, %v1251_v40, %v1255_v34  ;;  %vm1222_vm2 = vcmp.gt.f32.partialorder %v8412_v4, %v1202_v28  ;;  %v1046_v27 = vsel %vm14821_vm7, %v1041_v16, %v1045_v50 }
 0x236   :  { %v1254_v3 = vsel %vm14821_vm7, %v1249_v25, %v1253_v42  ;;  %v1276_v24 = vsel %vm14841_vm10, 4.0, %v1252_v59  ;;  %v1278_v53 = vsel %vm1220_vm15, 4.0, %v1256_v23  ;;  %v1232_v60 = vsel %vm1222_vm2, %v8412_v4, %v1202_v28 }
 0x237   :  { %v1277_v15 = vsel %vm1219_vm9, 4.0, %v1254_v3  ;;  %v1381_v25 = vrot.slane %v1276_v24, 4  ;;  %v1385_v45 = vrot.slane %v1278_v53, 4  ;;  %v1308_v37 = vrot.slane %v1232_v60, 4 }
 0x238   :  { %v1383_v29 = vrot.slane %v1277_v15, 4  ;;  %v1048_v5 = vsel %vm14821_vm7, %v1043_v44, %v1047_v30  ;;  %v1380_v11 = vsel %vm14587_vm4, %v1374_v41, %v1379_v18  ;;  %vm14842_vm9 = vcmp.gt.f32.partialorder %v8403_v12, %v8686_v0 }
 0x239   :  { %v1386_v57 = vsel %vm14587_vm4, %v1381_v25, %v1385_v45  ;;  %v1067_v43 = vsel %vm14842_vm9, 2.0, %v1046_v27  ;;  %v1309_v36 = vsel %vm14587_vm4, %v1304_v9, %v1308_v37  ;;  %v1382_v16 = vsel %vm14587_vm4, %v1377_v46, %v1381_v25 }
 0x23a   :  { %v1384_v1 = vsel %vm14587_vm4, %v1379_v18, %v1383_v29  ;;  %v1068_v44 = vsel %vm1010_vm0, 2.0, %v1048_v5  ;;  %1324 = vrot.lane.b32.xlu1 %v1309_v36, %s8011_s27  ;;  %v1151_v6 = vrot.slane %v1067_v43, 7  ;;  %v7656_v41 = vpack.i.bf16 %v1382_v16, %v1380_v11 }
 0x23b   :  { %v7661_v31 = vpack.i.bf16 %v1386_v57, %v1384_v1  ;;  %v1153_v33 = vrot.slane %v1068_v44, 7  ;;  %vm14843_vm1 = vcmp.gt.f32.partialorder %v8403_v12, %v8744_v63 }
 0x23c   :  { %v1152_v0 = vsel %vm14821_vm7, %v1147_v56, %v1151_v6 }
 0x23d   :  { %7662 = vrot.lane.b32.xlu0 %v7661_v31, %s8011_s27  ;;  %v1154_v14 = vsel %vm14821_vm7, %v1149_v55, %v1153_v33  ;;  %v1173_v19 = vsel %vm14843_vm1, 3.0, %v1152_v0 }
 0x23e   :  { %v1174_v9 = vsel %vm1116_vm5, 3.0, %v1154_v14  ;;  %7657 = vrot.lane.b32.xlu1 %v7656_v41, %s8011_s27  ;;  %v1257_v26 = vrot.slane %v1173_v19, 7 }
 0x23f   :  { %v1259_v46 = vrot.slane %v1174_v9, 7 }
 0x240   :  { %v1258_v32 = vsel %vm14821_vm7, %v1253_v42, %v1257_v26 }
 0x241   :  { %v1260_v62 = vsel %vm14821_vm7, %v1255_v34, %v1259_v46  ;;  %v1279_v56 = vsel %vm1221_vm11, 4.0, %v1258_v32  ;;  %vm14635_vm11 = vcmask 7168  }
 0x242   :  { %v1280_v55 = vsel %vm1222_vm2, 4.0, %v1260_v62  ;;  %v1387_v63 = vrot.slane %v1279_v56, 4 }
 0x243   :  { %v1389_v8 = vrot.slane %v1280_v55, 4 }
 0x244   :  { %v1388_v58 = vsel %vm14587_vm4, %v1383_v29, %v1387_v63 }
 0x245   :  { %v1390_v61 = vsel %vm14587_vm4, %v1385_v45, %v1389_v8 }
 0x246   :  { %v7666_v39 = vpack.i.bf16 %v1390_v61, %v1388_v58 }
 0x248   :  { %7667 = vrot.lane.b32.xlu1 %v7666_v39, %s8011_s27 }
 0x27d   :  { %v8978_v2 = vpop.permute.xlu0 %1310 }
 0x27e   :  { %vm1339_vm15 = vcmp.gt.f32.partialorder %v8302_v10, %v8978_v2 }
 0x27f   :  { %v1347_v20 = vsel %vm1339_vm15, %v8302_v10, %v8978_v2  ;;  %v1355_v35 = vsel %vm1339_vm15, 1.0, %v14599_v7 }
 0x280   :  { %v8991_v38 = vrot.slane %v1347_v20, 7  ;;  %v1487_v49 = vrot.slane %v1355_v35, 7 }
 0x282   :  { %vm1459_vm6 = vcmp.gt.f32.partialorder %v8302_v10, %v8991_v38  ;;  %v1313_v48 = vpop.permute.xlu0 %1312 }
 0x283   :  { %v1469_v22 = vsel %vm1459_vm6, %v8302_v10, %v8991_v38  ;;  %v1511_v40 = vsel %vm1459_vm6, 1.0, %v1487_v49  ;;  %v9005_v42 = vsel %vm14635_vm11, %v8978_v2, %v1313_v48 }
 0x284   :  { %v9007_v34 = vrot.slane %v1469_v22, 7  ;;  %v1631_v18 = vrot.slane %v1511_v40, 7  ;;  %vm1340_vm0 = vcmp.gt.f32.partialorder %v8305_v13, %v9005_v42 }
 0x285   :  { %v1348_v50 = vsel %vm1340_vm0, %v8305_v13, %v9005_v42  ;;  %v9020_v30 = vsel %vm1340_vm0, 1.0, %v14599_v7 }
 0x286   :  { %vm1601_vm8 = vcmp.gt.f32.partialorder %v8302_v10, %v9007_v34  ;;  %v9024_v28 = vrot.slane %v1348_v50, 7  ;;  %v1488_v59 = vrot.slane %v9020_v30, 7 }
 0x287   :  { %v1611_v3 = vsel %vm1601_vm8, %v8302_v10, %v9007_v34  ;;  %v9035_v23 = vsel %vm1601_vm8, 1.0, %v1631_v18 }
 0x288   :  { %14844 = vst [vmem:[#allocation20_spill] sm:$0xff] %v9035_v23  ;;  %v9037_v24 = vrot.slane %v1611_v3, 7  ;;  %v14593_v15 = vrot.slane %v9035_v23, 7  ;;  %vm1460_vm12 = vcmp.gt.f32.partialorder %v8305_v13, %v9024_v28 }
 0x289   :  { %v1470_v53 = vsel %vm1460_vm12, %v8305_v13, %v9024_v28  ;;  %v9052_v60 = vsel %vm1460_vm12, 1.0, %v1488_v59 }
 0x28a   :  { %14845 = vst [vmem:[#allocation21_spill] sm:$0xff] %v9037_v24  ;;  %vm14586_vm13 = vcmp.gt.f32.partialorder %v8302_v10, %v9037_v24  ;;  %v9056_v25 = vrot.slane %v1470_v53, 7  ;;  %v1632_v29 = vrot.slane %v9052_v60, 7 }
 0x28b   :  { %v1765_v45 = vsel %vm14586_vm13, %v8302_v10, %v9037_v24  ;;  %v9069_v37 = vsel %vm14586_vm13, 1.0, %v14593_v15 }
 0x28c   :  { %14846 = vst [vmem:[#allocation22_spill] sm:$0xff] %v9069_v37  ;;  %v9071_v27 = vrot.slane %v1765_v45, 7  ;;  %vm1602_vm5 = vcmp.gt.f32.partialorder %v8305_v13, %v9056_v25  ;;  %v9075_v5 = vpop.permute.xlu1 %1314  ;;  %v14591_v11 = vrot.slane %v9069_v37, 7 }
 0x28d   :  { %v1612_v1 = vsel %vm1602_vm5, %v8305_v13, %v9056_v25  ;;  %v9087_v57 = vsel %vm1602_vm5, 1.0, %v1632_v29  ;;  %vm1341_vm14 = vcmp.gt.f32.partialorder %v8311_v17, %v9075_v5 }
 0x28e   :  { %14847 = vst [vmem:[#allocation23_spill] sm:$0xff] %v9087_v57  ;;  %v9092_v43 = vrot.slane %v1612_v1, 7  ;;  %v14592_v36 = vrot.slane %v9087_v57, 7  ;;  %v1349_v31 = vsel %vm1341_vm14, %v8311_v17, %v9075_v5  ;;  %v1357_v16 = vsel %vm1341_vm14, 1.0, %v14599_v7 }
 0x28f   :  { %v1437_v44 = vrot.slane %v1349_v31, 7  ;;  %v1489_v6 = vrot.slane %v1357_v16, 7  ;;  %vm14583_vm3 = vcmp.gt.f32.partialorder %v8302_v10, %v9071_v27 }
 0x290   :  { %vm14584_vm2 = vcmp.gt.f32.partialorder %v8305_v13, %v9092_v43  ;;  %v9132_v19 = vsel %vm14583_vm3, %v8302_v10, %v9071_v27  ;;  %v9141_v26 = vsel %vm14583_vm3, 1.0, %v14591_v11 }
 0x291   :  { %v9113_v33 = vsel %vm14584_vm2, 1.0, %v14592_v36  ;;  %v9117_v41 = vsel %vm14821_vm7, %v8991_v38, %v1437_v44  ;;  %v1490_v0 = vsel %vm14821_vm7, %v1487_v49, %v1489_v6  ;;  %v1766_v14 = vsel %vm14584_vm2, %v8305_v13, %v9092_v43  ;;  %14849 = vst [vmem:[#allocation25_spill] sm:$0xff] %v9141_v26 }
 0x292   :  { %14848 = vst [vmem:[#allocation24_spill] sm:$0xff] %v9113_v33  ;;  %vm1461_vm10 = vcmp.gt.f32.partialorder %v8311_v17, %v9117_v41  ;;  %v9134_v9 = vrot.slane %v1766_v14, 7  ;;  %v14590_v56 = vrot.slane %v9113_v33, 7 }
 0x293   :  { %v9148_v46 = vsel %vm1461_vm10, %v8311_v17, %v9117_v41  ;;  %v9153_v32 = vsel %vm1461_vm10, 1.0, %v1490_v0 }
 0x294   :  { %v1317_v62 = vpop.permute.xlu1 %1316  ;;  %v1575_v55 = vrot.slane %v9148_v46, 7  ;;  %v1633_v63 = vrot.slane %v9153_v32, 7  ;;  %vm14585_vm9 = vcmp.gt.f32.partialorder %v8305_v13, %v9134_v9 }
 0x295   :  { %v9160_v8 = vsel %vm14635_vm11, %v9075_v5, %v1317_v62  ;;  %v9172_v61 = vsel %vm14585_vm9, %v8305_v13, %v9134_v9  ;;  %v9201_v3 = vsel %vm14585_vm9, 1.0, %v14590_v56 }
 0x296   :  { %vm1342_vm1 = vcmp.gt.f32.partialorder %v8315_v21, %v9160_v8  ;;  %14850 = vst [vmem:[#allocation26_spill] sm:$0xff] %v9172_v61  ;;  %v9188_v49 = vsel %vm14821_vm7, %v9007_v34, %v1575_v55  ;;  %v1634_v48 = vsel %vm14821_vm7, %v1631_v18, %v1633_v63  ;;  %14851 = vst [vmem:[#allocation27_spill] sm:$0xff] %v9201_v3 }
 0x297   :  { %v1350_v20 = vsel %vm1342_vm1, %v8315_v21, %v9160_v8  ;;  %v9184_v35 = vsel %vm1342_vm1, 1.0, %v14599_v7  ;;  %v9192_v50 = vpop.permute.xlu0 %1318  ;;  %vm14588_vm3 = vcmp.gt.f32.partialorder %v8311_v17, %v9188_v49 }
 0x298   :  { %v1439_v22 = vrot.slane %v1350_v20, 7  ;;  %v1491_v40 = vrot.slane %v9184_v35, 7  ;;  %vm1343_vm2 = vcmp.gt.f32.partialorder %v8354_v47, %v9192_v50  ;;  %v9210_v18 = vsel %vm14588_vm3, %v8311_v17, %v9188_v49 }
 0x299   :  { %v9215_v53 = vsel %vm14588_vm3, 1.0, %v1634_v48  ;;  %v1351_v16 = vsel %vm1343_vm2, %v8354_v47, %v9192_v50  ;;  %v1359_v0 = vsel %vm1343_vm2, 1.0, %v14599_v7  ;;  %v14596_v48 = vrot.slane %v9210_v18, 7 }
 0x29a   :  { %14852 = vst [vmem:[#allocation28_spill] sm:$0xff] %v9215_v53  ;;  %v9220_v1 = vsel %vm14821_vm7, %v9024_v28, %v1439_v22  ;;  %v1492_v31 = vsel %vm14821_vm7, %v1488_v59, %v1491_v40  ;;  %v1441_v14 = vrot.slane %v1351_v16, 7  ;;  %v1493_v46 = vrot.slane %v1359_v0, 7  ;;  %v1321_v32 = vpop.permute.xlu1 %1320 }
 0x29b   :  { %vm14589_vm9 = vcmp.gt.f32.partialorder %v8315_v21, %v9220_v1  ;;  %v9247_v20 = vsel %vm14635_vm11, %v9192_v50, %v1321_v32  ;;  %v9249_v35 = vpop.permute.xlu0 %1322 }
 0x29c   :  { %v1472_v59 = vsel %vm14589_vm9, %v8315_v21, %v9220_v1  ;;  %v1514_v62 = vsel %vm14589_vm9, 1.0, %v1492_v31  ;;  %v9253_v30 = vsel %vm14821_vm7, %v1437_v44, %v1441_v14  ;;  %v1494_v39 = vsel %vm14821_vm7, %v1489_v6, %v1493_v46 }
 0x29d   :  { %v1577_v16 = vrot.slane %v1472_v59, 7  ;;  %v1635_v0 = vrot.slane %v1514_v62, 7  ;;  %vm14594_vm13 = vcmp.gt.f32.partialorder %v8354_v47, %v9253_v30  ;;  %vm1344_vm4 = vcmp.gt.f32.partialorder %v8359_v51, %v9247_v20 }
 0x29e   :  { %vm14607_vm3 = vcmp.gt.f32.partialorder %v8362_v52, %v9249_v35  ;;  %v1473_v6 = vsel %vm14594_vm13, %v8354_v47, %v9253_v30  ;;  %v1515_v59 = vsel %vm14594_vm13, 1.0, %v1494_v39  ;;  %v9285_v60 = vsel %vm1344_vm4, %v8359_v51, %v9247_v20 }
 0x29f   :  { %v9265_v32 = vsel %vm14821_vm7, %v9056_v25, %v1577_v16  ;;  %v1636_v44 = vsel %vm14821_vm7, %v1632_v29, %v1635_v0  ;;  %v1579_v62 = vrot.slane %v1473_v6, 7  ;;  %v1637_v56 = vrot.slane %v1515_v59, 7 }
 0x2a0   :  { %vm14595_vm9 = vcmp.gt.f32.partialorder %v8315_v21, %v9265_v32  ;;  %v9298_v39 = vsel %vm1344_vm4, 1.0, %v14599_v7  ;;  %v14597_v6 = vrot.slane %v9285_v60, 7  ;;  %v9305_v59 = vsel %vm14821_vm7, %v9037_v24, %v14596_v48 }
 0x2a1   :  { %v9292_v29 = vsel %vm14595_vm9, %v8315_v21, %v9265_v32  ;;  %v9310_v11 = vsel %vm14595_vm9, 1.0, %v1636_v44  ;;  %v9314_v15 = vsel %vm14821_vm7, %v1575_v55, %v1579_v62  ;;  %v1638_v31 = vsel %vm14821_vm7, %v1633_v63, %v1637_v56 }
 0x2a2   :  { %14853 = vst [vmem:[#allocation29_spill] sm:$0xff] %v9310_v11  ;;  %vm14608_vm13 = vcmp.gt.f32.partialorder %v8354_v47, %v9314_v15  ;;  %v9322_v45 = vsel %vm14821_vm7, %v1439_v22, %v14597_v6  ;;  %v14606_v58 = vrot.slane %v9298_v39, 7  ;;  %v1353_v44 = vsel %vm14607_vm3, %v8362_v52, %v9249_v35  ;;  %v7653_v36 = vpop.permute.xlu0 %7652 }
 0x2a3   :  { %v9335_v55 = vsel %vm14608_vm13, %v8354_v47, %v9314_v15  ;;  %v9340_v63 = vsel %vm14608_vm13, 1.0, %v1638_v31  ;;  %vm14609_vm9 = vcmp.gt.f32.partialorder %v8359_v51, %v9322_v45  ;;  %v1361_v22 = vsel %vm14607_vm3, 1.0, %v14599_v7 }
 0x2a4   :  { %14854 = vst [vmem:[#allocation30_spill] sm:$0xff] %v9340_v63  ;;  %v9355_v31 = vsel %vm14609_vm9, %v8359_v51, %v9322_v45  ;;  %v1496_v24 = vsel %vm14821_vm7, %v1491_v40, %v14606_v58  ;;  %v9366_v3 = vrot.slane %v1353_v44, 7  ;;  %v1497_v6 = vrot.slane %v1361_v22, 7 }
 0x2a5   :  { %v9363_v7 = vsel %vm14609_vm9, 1.0, %v1496_v24  ;;  %v14611_v48 = vrot.slane %v9355_v31, 7  ;;  %v7655_v37 = vunpack.i.h.bf16 %v7653_v36  ;;  %v7654_v57 = vunpack.i.l.bf16 %v7653_v36 }
 0x2a6   :  { %v14610_v33 = vrot.slane %v9363_v7, 7  ;;  %v9377_v24 = vsel %vm14821_vm7, %v1441_v14, %v9366_v3  ;;  %v1498_v58 = vsel %vm14821_vm7, %v1493_v46, %v1497_v6  ;;  %vm1467_vm3 = vcmp.gt.f32.partialorder %v8403_v12, %v9366_v3 }
 0x2a7   :  { %v9373_v40 = vsel %vm14821_vm7, %v1577_v16, %v14611_v48  ;;  %vm1465_vm9 = vcmp.gt.f32.partialorder %v8362_v52, %v9377_v24  ;;  %v1407_v16 = vsel %vm14635_vm11, %v7654_v57, %v7655_v37  ;;  %v1477_v22 = vsel %vm1467_vm3, %v8403_v12, %v9366_v3 }
 0x2a8   :  { %vm1606_vm13 = vcmp.gt.f32.partialorder %v8359_v51, %v9373_v40  ;;  %v1640_v36 = vsel %vm14821_vm7, %v1635_v0, %v14610_v33  ;;  %v9407_v0 = vsel %vm1465_vm9, %v8362_v52, %v9377_v24  ;;  %v9412_v37 = vsel %vm1465_vm9, 1.0, %v1498_v58 }
 0x2a9   :  { %v9395_v14 = vsel %vm1606_vm13, %v8359_v51, %v9373_v40  ;;  %v9400_v46 = vsel %vm1606_vm13, 1.0, %v1640_v36  ;;  %v1583_v26 = vrot.slane %v9407_v0, 7  ;;  %v14616_v36 = vrot.slane %v9412_v37, 7 }
 0x2aa   :  { %14855 = vst [vmem:[#allocation31_spill] sm:$0xff] %v9400_v46  ;;  %v9421_v33 = vsel %vm1339_vm15, 0.0, %v7654_v57  ;;  %v9426_v48 = vsel %vm1340_vm0, 0.0, %v1407_v16  ;;  %v9436_v0 = vsel %vm1467_vm3, 1.0, %v1497_v6  ;;  %v1587_v53 = vrot.slane %v1477_v22, 7 }
 0x2ab   :  { %v9439_v2 = vsel %vm14821_vm7, %v1579_v62, %v1583_v26  ;;  %v1642_v42 = vsel %vm14821_vm7, %v1637_v56, %v14616_v36  ;;  %v1529_v57 = vrot.slane %v9421_v33, 7  ;;  %v1530_v16 = vrot.slane %v9426_v48, 7 }
 0x2ac   :  { %v1325_v58 = vpop.permute.xlu1 %1324  ;;  %vm1607_vm15 = vcmp.gt.f32.partialorder %v8362_v52, %v9439_v2  ;;  %v14860_v61 = vrot.slane %v9285_v60, 7  ;;  %v14863_v5 = vrot.slane %v9363_v7, 7 }
 0x2ad   :  { %v9450_v46 = vsel %vm14635_vm11, %v9249_v35, %v1325_v58  ;;  %v9457_v56 = vsel %vm1607_vm15, %v8362_v52, %v9439_v2  ;;  %v9462_v33 = vsel %vm1607_vm15, 1.0, %v1642_v42  ;;  %v9467_v48 = vsel %vm1459_vm6, 1.0, %v1529_v57 }
 0x2ae   :  { %14856 = vst [vmem:[#allocation32_spill] sm:$0xff] %v9462_v33  ;;  %v9472_v62 = vsel %vm1460_vm12, 1.0, %v1530_v16  ;;  %v14620_v36 = vrot.slane %v9467_v48, 7  ;;  %vm1346_vm0 = vcmp.gt.f32.partialorder %v8372_v54, %v9450_v46 }
 0x2af   :  { %v7663_v44 = vpop.permute.xlu0 %7662  ;;  %v14623_v11 = vrot.slane %v9472_v62, 7  ;;  %v1354_v50 = vsel %vm1346_vm0, %v8372_v54, %v9450_v46 }
 0x2b0   :  { %v7665_v6 = vunpack.i.h.bf16 %v7663_v44  ;;  %v7664_v63 = vunpack.i.l.bf16 %v7663_v44  ;;  %v7658_v42 = vpop.permute.xlu1 %7657  ;;  %v9491_v58 = vsel %vm1601_vm8, 2.0, %v14620_v36  ;;  %v9511_v10 = vrot.slane %v1354_v50, 7 }
 0x2b1   :  { %v7660_v23 = vunpack.i.h.bf16 %v7658_v42  ;;  %14857 = vst [vmem:[#allocation33_spill] sm:$0xff] %v9491_v58  ;;  %v9498_v44 = vsel %vm1602_vm5, 2.0, %v14623_v11  ;;  %v7659_v33 = vunpack.i.l.bf16 %v7658_v42  ;;  %v14861_v50 = vrot.slane %v9298_v39, 7 }
 0x2b2   :  { %v1409_v38 = vsel %vm14635_vm11, %v7664_v63, %v7665_v6  ;;  %v9484_v28 = vsel %vm1343_vm2, 0.0, %v7664_v63  ;;  %14858 = vst [vmem:[#allocation34_spill] sm:$0xff] %v9498_v44  ;;  %v14859_v63 = vmov 0.0   ;;  %vm1468_vm6 = vcmp.gt.f32.partialorder %v8412_v4, %v9511_v10 }
 0x2b3   :  { %v1362_v34 = vsel %vm1346_vm0, 1.0, %v14859_v63  ;;  %v9516_v11 = vsel %vm1344_vm4, 0.0, %v1409_v38  ;;  %v9523_v63 = vsel %vm14821_vm7, %v14860_v61, %v9511_v10  ;;  %v1478_v60 = vsel %vm1468_vm6, %v8412_v4, %v9511_v10 }
 0x2b4   :  { %v1499_v25 = vrot.slane %v1362_v34, 7  ;;  %vm1466_vm4 = vcmp.gt.f32.partialorder %v8372_v54, %v9523_v63  ;;  %v1408_v22 = vsel %vm14635_vm11, %v7659_v33, %v7660_v23  ;;  %v1589_v38 = vrot.slane %v1478_v60, 7 }
 0x2b5   :  { %v1476_v39 = vsel %vm1466_vm4, %v8372_v54, %v9523_v63  ;;  %v1422_v23 = vsel %vm1342_vm1, 0.0, %v1408_v22  ;;  %v9557_v44 = vsel %vm14821_vm7, %v1583_v26, %v1587_v53  ;;  %v1645_v58 = vrot.slane %v9436_v0, 7 }
 0x2b6   :  { %v1500_v34 = vsel %vm14821_vm7, %v14861_v50, %v1499_v25  ;;  %v1520_v61 = vsel %vm1468_vm6, 1.0, %v1499_v25  ;;  %v1585_v36 = vrot.slane %v1476_v39, 7  ;;  %v1421_v25 = vsel %vm1341_vm14, 0.0, %v7659_v33 }
 0x2b7   :  { %v1518_v42 = vsel %vm1466_vm4, 1.0, %v1500_v34  ;;  %v1647_v50 = vrot.slane %v1520_v61, 7  ;;  %v1531_v20 = vrot.slane %v1421_v25, 7  ;;  %v1533_v13 = vrot.slane %v1422_v23, 7 }
 0x2b8   :  { %v1643_v6 = vrot.slane %v1518_v42, 7  ;;  %v14862_v34 = vrot.slane %v9355_v31, 7  ;;  %v9566_v61 = vsel %vm14821_vm7, %v1585_v36, %v1589_v38  ;;  %vm1757_vm8 = vcmp.gt.f32.partialorder %v8311_v17, %v9305_v59 }
 0x2b9   :  { %vm1610_vm5 = vcmp.gt.f32.partialorder %v8412_v4, %v9566_v61  ;;  %v1532_v26 = vsel %vm14821_vm7, %v1529_v57, %v1531_v20  ;;  %v1534_v53 = vsel %vm14821_vm7, %v1530_v16, %v1533_v13  ;;  %v14864_v39 = vrot.slane %v9484_v28, 7 }
 0x2ba   :  { %v9563_v60 = vsel %vm14821_vm7, %v14862_v34, %v1585_v36  ;;  %v1644_v8 = vsel %vm14821_vm7, %v14863_v5, %v1643_v6  ;;  %v1648_v33 = vsel %vm14821_vm7, %v1643_v6, %v1647_v50  ;;  %v9592_v31 = vsel %vm1610_vm5, %v8412_v4, %v9566_v61 }
 0x2bb   :  { %vm1608_vm12 = vcmp.gt.f32.partialorder %v8372_v54, %v9563_v60  ;;  %v9602_v0 = vsel %vm1610_vm5, 1.0, %v1648_v33  ;;  %v1743_v16 = vrot.slane %v9592_v31, 7  ;;  %v1536_v42 = vsel %vm14821_vm7, %v1531_v20, %v14864_v39 }
 0x2bc   :  { %v9585_v7 = vsel %vm1608_vm12, %v8372_v54, %v9563_v60  ;;  %v9597_v36 = vsel %vm1608_vm12, 1.0, %v1644_v8  ;;  %v14865_v38 = vrot.slane %v9516_v11, 7  ;;  %v1555_v25 = vsel %vm1461_vm10, 1.0, %v1532_v26 }
 0x2bd   :  { %v1739_v57 = vrot.slane %v9585_v7, 7  ;;  %v14639_v6 = vrot.slane %v9597_v36, 7  ;;  %vm14866_vm14 = vcmp.gt.f32.partialorder %v8315_v21, %v9220_v1  ;;  %vm14867_vm2 = vcmp.gt.f32.partialorder %v8354_v47, %v9253_v30  ;;  %v14903_v7 = vld [vmem:[#allocation22_spill] sm:$0xff] }
 0x2be   :  { %v1538_v50 = vsel %vm14821_vm7, %v1533_v13, %v14865_v38  ;;  %v1556_v23 = vsel %vm14866_vm14, 1.0, %v1534_v53  ;;  %v9623_v34 = vsel %vm14867_vm2, 1.0, %v1536_v42  ;;  %vm14868_vm1 = vcmp.gt.f32.partialorder %v8359_v51, %v9322_v45  ;;  %v7668_v38 = vpop.permute.xlu1 %7667 }
 0x2bf   :  { %v9628_v20 = vsel %vm14868_vm1, 1.0, %v1538_v50  ;;  %v1681_v5 = vrot.slane %v1555_v25, 7  ;;  %v1683_v13 = vrot.slane %v1556_v23, 7  ;;  %v1685_v8 = vrot.slane %v9623_v34, 7 }
 0x2c0   :  { %v1687_v41 = vrot.slane %v9628_v20, 7  ;;  %vm1609_vm10 = vcmp.gt.f32.partialorder %v8403_v12, %v9557_v44  ;;  %v14869_v1 = vrot.slane %v9412_v37, 7  ;;  %v14870_v33 = vrot.slane %v9467_v48, 7 }
 0x2c1   :  { %v14871_v45 = vrot.slane %v9472_v62, 7  ;;  %v9648_v39 = vsel %vm1609_vm10, %v8403_v12, %v9557_v44  ;;  %v1686_v48 = vsel %vm14821_vm7, %v1681_v5, %v1685_v8  ;;  %vm14872_vm14 = vcmp.gt.f32.partialorder %v8311_v17, %v9188_v49 }
 0x2c2   :  { %v1646_v30 = vsel %vm14821_vm7, %v14869_v1, %v1645_v58  ;;  %v1682_v26 = vsel %vm14821_vm7, %v14870_v33, %v1681_v5  ;;  %v1688_v58 = vsel %vm14821_vm7, %v1683_v13, %v1687_v41  ;;  %vm14873_vm2 = vcmp.gt.f32.partialorder %v8315_v21, %v9265_v32 }
 0x2c3   :  { %v1684_v53 = vsel %vm14821_vm7, %v14871_v45, %v1683_v13  ;;  %v9653_v37 = vsel %vm1609_vm10, 1.0, %v1646_v30  ;;  %v9660_v62 = vsel %vm14872_vm14, 2.0, %v1682_v26  ;;  %vm14874_vm1 = vcmp.gt.f32.partialorder %v8354_v47, %v9314_v15 }
 0x2c4   :  { %v9665_v42 = vsel %vm14873_vm2, 2.0, %v1684_v53  ;;  %v9670_v50 = vsel %vm14874_vm1, 2.0, %v1686_v48  ;;  %v9675_v25 = vsel %vm1606_vm13, 2.0, %v1688_v58  ;;  %v14640_v49 = vrot.slane %v9660_v62, 7 }
 0x2c5   :  { %v1741_v20 = vrot.slane %v9648_v39, 7  ;;  %v7670_v15 = vunpack.i.h.bf16 %v7668_v38  ;;  %v7669_v13 = vunpack.i.l.bf16 %v7668_v38  ;;  %v1767_v40 = vsel %vm1757_vm8, %v8311_v17, %v9305_v59 }
 0x2c6   :  { %v14875_v1 = vrot.slane %v9335_v55, 7  ;;  %v14876_v30 = vrot.slane %v9210_v18, 7  ;;  %v1883_v26 = vrot.slane %v1767_v40, 7  ;;  %v14877_v45 = vrot.slane %v9292_v29, 7 }
 0x2c7   :  { %v14878_v39 = vrot.slane %v9457_v56, 7  ;;  %v1410_v18 = vsel %vm14635_vm11, %v7669_v13, %v7670_v15  ;;  %vm14880_vm14 = vcmp.gt.f32.partialorder %v8362_v52, %v9249_v35  ;;  %v14881_v46 = vrot.slane %v9484_v28, 7 }
 0x2c8   :  { %v9693_v33 = vsel %vm14821_vm7, %v14876_v30, %v14875_v1  ;;  %v9701_v53 = vsel %vm14821_vm7, %v9092_v43, %v14877_v45  ;;  %v14879_v48 = vmov %v14875_v1  ;;  %v1425_v38 = vsel %vm14880_vm14, 0.0, %v7669_v13 }
 0x2c9   :  { %vm1759_vm13 = vcmp.gt.f32.partialorder %v8354_v47, %v9693_v33  ;;  %v9708_v58 = vsel %vm14821_vm7, %v14879_v48, %v14878_v39  ;;  %vm1758_vm2 = vcmp.gt.f32.partialorder %v8315_v21, %v9701_v53  ;;  %v1426_v55 = vsel %vm1346_vm0, 0.0, %v1410_v18 }
 0x2ca   :  { %v1769_v40 = vsel %vm1759_vm13, %v8354_v47, %v9693_v33  ;;  %v1539_v1 = vrot.slane %v1425_v38, 7  ;;  %v9726_v15 = vsel %vm14821_vm7, %v9071_v27, %v1883_v26  ;;  %v1541_v13 = vrot.slane %v1426_v55, 7 }
 0x2cb   :  { %v1887_v35 = vrot.slane %v1769_v40, 7  ;;  %vm1911_vm1 = vcmp.gt.f32.partialorder %v8311_v17, %v9726_v15  ;;  %v1768_v30 = vsel %vm1758_vm2, %v8315_v21, %v9701_v53  ;;  %vm1761_vm14 = vcmp.gt.f32.partialorder %v8362_v52, %v9708_v58 }
 0x2cc   :  { %v1540_v45 = vsel %vm14821_vm7, %v14881_v46, %v1539_v1  ;;  %v1561_v39 = vsel %vm1467_vm3, 1.0, %v1539_v1  ;;  %v1921_v48 = vsel %vm1911_vm1, %v8311_v17, %v9726_v15  ;;  %v14882_v38 = vrot.slane %v9516_v11, 7 }
 0x2cd   :  { %v9749_v18 = vsel %vm14821_vm7, %v1883_v26, %v1887_v35  ;;  %v1559_v28 = vsel %vm1465_vm9, 1.0, %v1540_v45  ;;  %v1562_v3 = vsel %vm1468_vm6, 1.0, %v1541_v13  ;;  %v1693_v55 = vrot.slane %v1561_v39, 7 }
 0x2ce   :  { %v1542_v40 = vsel %vm14821_vm7, %v14882_v38, %v1541_v13  ;;  %v1689_v46 = vrot.slane %v1559_v28, 7  ;;  %v1695_v26 = vrot.slane %v1562_v3, 7  ;;  %v2036_v32 = vrot.slane %v1921_v48, 4 }
 0x2cf   :  { %v1560_v1 = vsel %vm1466_vm4, 1.0, %v1542_v40  ;;  %vm1913_vm3 = vcmp.gt.f32.partialorder %v8354_v47, %v9749_v18  ;;  %v1885_v11 = vrot.slane %v1768_v30, 7  ;;  %v1771_v10 = vsel %vm1761_vm14, %v8362_v52, %v9708_v58 }
 0x2d0   :  { %v1691_v34 = vrot.slane %v1560_v1, 7  ;;  %v1690_v24 = vsel %vm14821_vm7, %v1685_v8, %v1689_v46  ;;  %v1694_v13 = vsel %vm14821_vm7, %v1689_v46, %v1693_v55  ;;  %v14883_v63 = vrot.slane %v9132_v19, 4 }
 0x2d1   :  { %vm14884_vm9 = vcmask 1043456   ;;  %v1923_v30 = vsel %vm1913_vm3, %v8354_v47, %v9749_v18  ;;  %v9785_v8 = vsel %vm1607_vm15, 2.0, %v1690_v24  ;;  %v9790_v19 = vsel %vm1609_vm10, 2.0, %v1694_v13 }
 0x2d2   :  { %v2037_v45 = vsel %vm14884_vm9, %v14883_v63, %v2036_v32  ;;  %v1692_v39 = vsel %vm14821_vm7, %v1687_v41, %v1691_v34  ;;  %v1696_v48 = vsel %vm14821_vm7, %v1691_v34, %v1695_v26  ;;  %v2041_v28 = vrot.slane %v1923_v30, 4  ;;  %vm14888_vm0 = vmmov %vm14884_vm9  ;;  %v14890_v30 = vld [vmem:[#allocation26_spill] sm:$0xff] }
 0x2d3   :  { %2053 = vrot.lane.b32.xlu0 %v2037_v45, %s8011_s27  ;;  %v9796_v38 = vsel %vm1608_vm12, 2.0, %v1692_v39  ;;  %v9801_v41 = vsel %vm1610_vm5, 2.0, %v1696_v48  ;;  %v9809_v3 = vsel %vm14821_vm7, %v9134_v9, %v1885_v11  ;;  %v1891_v60 = vrot.slane %v1771_v10, 7  ;;  %vm14892_vm5 = vmmov %vm14888_vm0 }
 0x2d4   :  { %vm1912_vm15 = vcmp.gt.f32.partialorder %v8315_v21, %v9809_v3  ;;  %v14885_v61 = vrot.slane %v9395_v14, 7  ;;  %v14886_v55 = vrot.slane %v9292_v29, 7  ;;  %v14887_v46 = vrot.slane %v9457_v56, 7 }
 0x2d5   :  { %v2042_v24 = vsel %vm14888_vm0, %v2036_v32, %v2041_v28  ;;  %v1922_v10 = vsel %vm1912_vm15, %v8315_v21, %v9809_v3  ;;  %v9837_v56 = vsel %vm14821_vm7, %v1887_v35, %v1891_v60  ;;  %v14891_v39 = vrot.slane %v14890_v30, 4 }
 0x2d6   :  { %v9818_v1 = vsel %vm14821_vm7, %v14886_v55, %v14885_v61  ;;  %v9823_v26 = vsel %vm14821_vm7, %v14887_v46, %v1741_v20  ;;  %v2039_v29 = vrot.slane %v1922_v10, 4  ;;  %vm14642_vm12 = vcmp.gt.f32.partialorder %v8362_v52, %v9837_v56  ;;  %v14893_v55 = vld [vmem:[#allocation28_spill] sm:$0xff] }
 0x2d7   :  { %vm1760_vm6 = vcmp.gt.f32.partialorder %v8359_v51, %v9818_v1  ;;  %vm14637_vm4 = vcmp.gt.f32.partialorder %v8403_v12, %v9823_v26  ;;  %2057 = vrot.lane.b32.xlu0 %v2042_v24, %s8011_s27  ;;  %v14889_v35 = vmov %v14885_v61  ;;  %v1925_v61 = vsel %vm14642_vm12, %v8362_v52, %v9837_v56  ;;  %v14895_v24 = vld [vmem:[#allocation20_spill] sm:$0xff] }
 0x2d8   :  { %v1770_v32 = vsel %vm1760_vm6, %v8359_v51, %v9818_v1  ;;  %v1773_v20 = vsel %vm14637_vm4, %v8403_v12, %v9823_v26  ;;  %v9856_v45 = vsel %vm14821_vm7, %v14889_v35, %v1739_v57  ;;  %v2040_v48 = vsel %vm14892_vm5, %v14891_v39, %v2039_v29 }
 0x2d9   :  { %v1889_v13 = vrot.slane %v1770_v32, 7  ;;  %v1895_v63 = vrot.slane %v1773_v20, 7  ;;  %vm1762_vm10 = vcmp.gt.f32.partialorder %v8372_v54, %v9856_v45  ;;  %v14894_v46 = vrot.slane %v14893_v55, 7  ;;  %2055 = vrot.lane.b32.xlu1 %v2040_v48, %s8011_s27  ;;  %v14897_v48 = vld [vmem:[#allocation29_spill] sm:$0xff] }
 0x2da   :  { %v14896_v14 = vrot.slane %v14895_v24, 7  ;;  %v2045_v32 = vrot.slane %v1925_v61, 4  ;;  %v1772_v30 = vsel %vm1762_vm10, %v8372_v54, %v9856_v45  ;;  %v14898_v61 = vrot.slane %v14897_v48, 7 }
 0x2db   :  { %v9875_v20 = vsel %vm14821_vm7, %v1885_v11, %v1889_v13  ;;  %v9878_v35 = vsel %vm14821_vm7, %v1891_v60, %v1895_v63  ;;  %v1893_v39 = vrot.slane %v1772_v30, 7  ;;  %v14899_v11 = vld [vmem:[#allocation23_spill] sm:$0xff]  ;;  %vm14901_vm11 = vcmask 1043456  }
 0x2dc   :  { %v1788_v10 = vsel %vm14821_vm7, %v14896_v14, %v14894_v46  ;;  %vm14643_vm9 = vcmp.gt.f32.partialorder %v8359_v51, %v9875_v20  ;;  %vm14636_vm0 = vcmp.gt.f32.partialorder %v8403_v12, %v9878_v35  ;;  %v14900_v46 = vrot.slane %v14899_v11, 7 }
 0x2dd   :  { %v2046_v63 = vsel %vm14892_vm5, %v2041_v28, %v2045_v32  ;;  %v1924_v24 = vsel %vm14643_vm9, %v8359_v51, %v9875_v20  ;;  %v1927_v14 = vsel %vm14636_vm0, %v8403_v12, %v9878_v35  ;;  %v1815_v30 = vsel %vm1757_vm8, 1.0, %v1788_v10  ;;  %vm14902_vm0 = vmmov %vm14901_vm11 }
 0x2de   :  { %v1790_v60 = vsel %vm14821_vm7, %v14900_v46, %v14898_v61  ;;  %2061 = vrot.lane.b32.xlu0 %v2046_v63, %s8011_s27  ;;  %v2043_v61 = vrot.slane %v1924_v24, 4  ;;  %v2049_v28 = vrot.slane %v1927_v14, 4  ;;  %v9910_v11 = vsel %vm14821_vm7, %v1889_v13, %v1893_v39 }
 0x2df   :  { %v1816_v46 = vsel %vm1758_vm2, 1.0, %v1790_v60  ;;  %vm14641_vm5 = vcmp.gt.f32.partialorder %v8372_v54, %v9910_v11  ;;  %v1941_v40 = vrot.slane %v1815_v30, 7  ;;  %v9922_v10 = vsel %vm14821_vm7, %v1739_v57, %v1743_v16  ;;  %v14905_v16 = vld [vmem:[#allocation24_spill] sm:$0xff] }
 0x2e0   :  { %v1943_v34 = vrot.slane %v1816_v46, 7  ;;  %v2044_v63 = vsel %vm14901_vm11, %v2039_v29, %v2043_v61  ;;  %v2050_v13 = vsel %vm14902_vm0, %v2045_v32, %v2049_v28  ;;  %v1926_v60 = vsel %vm14641_vm5, %v8372_v54, %v9910_v11  ;;  %vm14910_vm11 = vmmov %vm14902_vm0 }
 0x2e1   :  { %vm14638_vm4 = vcmp.gt.f32.partialorder %v8412_v4, %v9922_v10  ;;  %2059 = vrot.lane.b32.xlu1 %v2044_v63, %s8011_s27  ;;  %v2047_v31 = vrot.slane %v1926_v60, 4  ;;  %v14904_v24 = vrot.slane %v14903_v7, 7  ;;  %v14906_v29 = vrot.slane %v14905_v16, 7  ;;  %v14907_v63 = vld [vmem:[#allocation30_spill] sm:$0xff] }
 0x2e2   :  { %v1774_v14 = vsel %vm14638_vm4, %v8412_v4, %v9922_v10  ;;  %2065 = vrot.lane.b32.xlu0 %v2050_v13, %s8011_s27  ;;  %v14908_v60 = vrot.slane %v14907_v63, 7  ;;  %v14909_v7 = vrot.slane %v14893_v55, 7  ;;  %v14911_v13 = vld [vmem:[#allocation31_spill] sm:$0xff]  ;;  %v14913_v22 = vrot.slane %v14897_v48, 7 }
 0x2e3   :  { %v1942_v57 = vsel %vm14821_vm7, %v14904_v24, %v1941_v40  ;;  %v1944_v32 = vsel %vm14821_vm7, %v14906_v29, %v1943_v34  ;;  %v1897_v46 = vrot.slane %v1774_v14, 7  ;;  %v2048_v16 = vsel %vm14910_vm11, %v2043_v61, %v2047_v31  ;;  %vm14922_vm11 = vmmov %vm14902_vm0 }
 0x2e4   :  { %v1969_v30 = vsel %vm1911_vm1, 1.0, %v1942_v57  ;;  %v1970_v28 = vsel %vm1912_vm15, 1.0, %v1944_v32  ;;  %v1792_v24 = vsel %vm14821_vm7, %v14909_v7, %v14908_v60  ;;  %v14912_v2 = vrot.slane %v14911_v13, 7  ;;  %v14914_v32 = vld [vmem:[#allocation32_spill] sm:$0xff] }
 0x2e5   :  { %v2108_v29 = vrot.slane %v1969_v30, 4  ;;  %v2111_v44 = vrot.slane %v1970_v28, 4  ;;  %v9964_v5 = vsel %vm14821_vm7, %v1893_v39, %v1897_v46  ;;  %v14915_v14 = vrot.slane %v14914_v32, 7  ;;  %2063 = vrot.lane.b32.xlu1 %v2048_v16, %s8011_s27  ;;  %v14920_v28 = vld [vmem:[#allocation27_spill] sm:$0xff] }
 0x2e6   :  { %v1794_v57 = vsel %vm14821_vm7, %v14913_v22, %v14912_v2  ;;  %v14916_v23 = vmov %v14908_v60  ;;  %v14917_v61 = vmov %v14912_v2  ;;  %v1817_v48 = vsel %vm1759_vm13, 1.0, %v1792_v24  ;;  %v14918_v22 = vld [vmem:[#allocation25_spill] sm:$0xff] }
 0x2e7   :  { %v1796_v55 = vsel %vm14821_vm7, %v14916_v23, %v14915_v14  ;;  %v1798_v30 = vsel %vm14821_vm7, %v14917_v61, %v14639_v6  ;;  %v14919_v2 = vrot.slane %v14918_v22, 4  ;;  %v14921_v46 = vrot.slane %v14920_v28, 4 }
 0x2e8   :  { %vm1918_vm4 = vcmp.gt.f32.partialorder %v8412_v4, %v9964_v5  ;;  %v1818_v63 = vsel %vm1760_vm6, 1.0, %v1794_v57  ;;  %v1819_v24 = vsel %vm1761_vm14, 1.0, %v1796_v55  ;;  %v10002_v16 = vsel %vm1762_vm10, 1.0, %v1798_v30 }
 0x2e9   :  { %v2109_v39 = vsel %vm14902_vm0, %v14919_v2, %v2108_v29  ;;  %v2112_v23 = vsel %vm14922_vm11, %v14921_v46, %v2111_v44  ;;  %v1928_v7 = vsel %vm1918_vm4, %v8412_v4, %v9964_v5  ;;  %v1945_v14 = vrot.slane %v1817_v48, 7  ;;  %v14923_v2 = vld [vmem:[#allocation33_spill] sm:$0xff]  ;;  %v14926_v46 = vld [vmem:[#allocation34_spill] sm:$0xff] }
 0x2ea   :  { %v7671_v60 = vpack.i.bf16 %v2112_v23, %v2109_v39  ;;  %v2051_v13 = vrot.slane %v1928_v7, 4  ;;  %v1947_v61 = vrot.slane %v1818_v63, 7  ;;  %v1949_v57 = vrot.slane %v1819_v24, 7  ;;  %v14929_v63 = vld [vmem:[#allocation18_spill] sm:$0xff]  ;;  %v14930_v7 = vld [vmem:[#allocation21_spill] sm:$0xff] }
 0x2eb   :  { %v1951_v22 = vrot.slane %v10002_v16, 7  ;;  %v14924_v39 = vrot.slane %v14923_v2, 7  ;;  %v14925_v55 = vrot.slane %v9665_v42, 7  ;;  %v14927_v23 = vrot.slane %v14926_v46, 7 }
 0x2ec   :  { %7672 = vrot.lane.b32.xlu0 %v7671_v60, %s8011_s27  ;;  %vm14931_vm0 = vcmp.gt.f32.partialorder %v14929_v63, %v14930_v7  ;;  %v2052_v24 = vsel %vm14922_vm11, %v2047_v31, %v2051_v13  ;;  %v1946_v16 = vsel %vm14821_vm7, %v1941_v40, %v1945_v14  ;;  %v1948_v6 = vsel %vm14821_vm7, %v1943_v34, %v1947_v61 }
 0x2ed   :  { %v1836_v28 = vsel %vm14821_vm7, %v14924_v39, %v14640_v49  ;;  %v1838_v30 = vsel %vm14821_vm7, %v14927_v23, %v14925_v55  ;;  %v14928_v48 = vmov %v14924_v39  ;;  %v1950_v39 = vsel %vm14821_vm7, %v1945_v14, %v1949_v57  ;;  %2067 = vrot.lane.b32.xlu1 %v2052_v24, %s8011_s27 }
 0x2ee   :  { %v1861_v60 = vsel %vm14931_vm0, 3.0, %v14928_v48  ;;  %v1952_v49 = vsel %vm14821_vm7, %v1947_v61, %v1951_v22  ;;  %v1971_v2 = vsel %vm1913_vm3, 1.0, %v1946_v16  ;;  %v1972_v55 = vsel %vm14643_vm9, 1.0, %v1948_v6  ;;  %v14932_v48 = vld [vmem:[#allocation19_spill] sm:$0xff] }
 0x2ef   :  { %v1973_v40 = vsel %vm14642_vm12, 1.0, %v1950_v39  ;;  %v1974_v34 = vsel %vm14641_vm5, 1.0, %v1952_v49  ;;  %v2113_v31 = vrot.slane %v1971_v2, 4  ;;  %v2115_v13 = vrot.slane %v1972_v55, 4  ;;  %vm14934_vm5 = vmmov %vm14922_vm11 }
 0x2f0   :  { %v2117_v14 = vrot.slane %v1973_v40, 4  ;;  %v2119_v61 = vrot.slane %v1974_v34, 4  ;;  %vm14933_vm0 = vcmp.gt.f32.partialorder %v14932_v48, %v9092_v43  ;;  %v1863_v6 = vsel %vm1757_vm8, 3.0, %v1836_v28  ;;  %vm14935_vm12 = vmmov %vm14934_vm5 }
 0x2f1   :  { %v1862_v7 = vsel %vm14933_vm0, 3.0, %v14927_v23  ;;  %v1864_v24 = vsel %vm1758_vm2, 3.0, %v1838_v30  ;;  %v2114_v16 = vsel %vm14934_vm5, %v2108_v29, %v2113_v31  ;;  %v2116_v39 = vsel %vm14935_vm12, %v2111_v44, %v2115_v13  ;;  %vm14936_vm9 = vmmov %vm14934_vm5 }
 0x2f2   :  { %v2118_v49 = vsel %vm14922_vm11, %v2113_v31, %v2117_v14  ;;  %v1987_v2 = vrot.slane %v1861_v60, 7  ;;  %v2120_v46 = vsel %vm14936_vm9, %v2115_v13, %v2119_v61  ;;  %v7676_v55 = vpack.i.bf16 %v2116_v39, %v2114_v16 }
 0x2f3   :  { %v1988_v43 = vrot.slane %v1862_v7, 7  ;;  %v1989_v40 = vrot.slane %v1863_v6, 7  ;;  %v7681_v34 = vpack.i.bf16 %v2120_v46, %v2118_v49  ;;  %v1991_v23 = vrot.slane %v1864_v24, 7 }
 0x2f4   :  { %vm14937_vm8 = vcmp.gt.f32.partialorder %v14929_v63, %v9071_v27  ;;  %v14938_v53 = vrot.slane %v9653_v37, 7  ;;  %v14939_v28 = vrot.slane %v14914_v32, 7  ;;  %7677 = vrot.lane.b32.xlu1 %v7676_v55, %s8011_s27  ;;  %vm14940_vm2 = vcmp.gt.f32.partialorder %v14932_v48, %v9134_v9 }
 0x2f5   :  { %v2015_v59 = vsel %vm14937_vm8, 4.0, %v1987_v2  ;;  %v1990_v44 = vsel %vm14821_vm7, %v1987_v2, %v1989_v40  ;;  %v2016_v30 = vsel %vm14940_vm2, 4.0, %v1988_v43  ;;  %v14941_v31 = vrot.slane %v9602_v0, 7  ;;  %7682 = vrot.lane.b32.xlu0 %v7681_v34, %s8011_s27 }
 0x2f6   :  { %v1800_v29 = vsel %vm14821_vm7, %v14939_v28, %v14938_v53  ;;  %v2171_v60 = vrot.slane %v2015_v59, 4  ;;  %v14942_v27 = vrot.slane %v9597_v36, 7  ;;  %v1992_v37 = vsel %vm14821_vm7, %v1988_v43, %v1991_v23 }
 0x2f7   :  { %v2017_v32 = vsel %vm1911_vm1, 4.0, %v1990_v44  ;;  %v2174_v7 = vrot.slane %v2016_v30, 4  ;;  %vm14943_vm12 = vcmp.gt.f32.partialorder %v8403_v12, %v9823_v26  ;;  %v2018_v0 = vsel %vm1912_vm15, 4.0, %v1992_v37  ;;  %vm14949_vm1 = vmmov %vm14934_vm5 }
 0x2f8   :  { %v1802_v13 = vsel %vm14821_vm7, %v14942_v27, %v14941_v31  ;;  %v1821_v9 = vsel %vm14943_vm12, 1.0, %v1800_v29  ;;  %v2172_v36 = vrot.slane %v2017_v32, 4  ;;  %vm14944_vm9 = vcmp.gt.f32.partialorder %v8412_v4, %v9922_v10  ;;  %vm14954_vm15 = vmmov %vm14949_vm1 }
 0x2f9   :  { %v1822_v6 = vsel %vm14944_vm9, 1.0, %v1802_v13  ;;  %v1953_v24 = vrot.slane %v1821_v9, 7  ;;  %v2175_v49 = vrot.slane %v2018_v0, 4  ;;  %v14945_v15 = vrot.slane %v9670_v50, 7  ;;  %vm14957_vm0 = vmmov %vm14949_vm1 }
 0x2fa   :  { %v1955_v16 = vrot.slane %v1822_v6, 7  ;;  %v14946_v39 = vrot.slane %v9660_v62, 7  ;;  %v14947_v46 = vrot.slane %v9675_v25, 7  ;;  %v14948_v55 = vrot.slane %v9665_v42, 7  ;;  %vm14966_vm11 = vmmov %vm14944_vm9 }
 0x2fb   :  { %v2173_v43 = vsel %vm14949_vm1, %v2171_v60, %v2172_v36  ;;  %v1954_v34 = vsel %vm14821_vm7, %v1949_v57, %v1953_v24  ;;  %v14950_v59 = vrot.slane %v9785_v8, 7  ;;  %v14951_v53 = vmov %v14945_v15  ;;  %vm14967_vm8 = vmmov %vm14957_vm0 }
 0x2fc   :  { %v1840_v2 = vsel %vm14821_vm7, %v14946_v39, %v14945_v15  ;;  %v1842_v3 = vsel %vm14821_vm7, %v14948_v55, %v14947_v46  ;;  %v14952_v62 = vrot.slane %v9796_v38, 7  ;;  %v14953_v29 = vmov %v14947_v46  ;;  %vm14968_vm2 = vmmov %vm14957_vm0 }
 0x2fd   :  { %v1844_v28 = vsel %vm14821_vm7, %v14951_v53, %v14950_v59  ;;  %v2176_v42 = vsel %vm14954_vm15, %v2174_v7, %v2175_v49  ;;  %v1956_v30 = vsel %vm14821_vm7, %v1951_v22, %v1955_v16  ;;  %vm14955_vm5 = vcmp.gt.f32.partialorder %v8403_v12, %v9878_v35  ;;  %vm14970_vm9 = vmmov %vm14957_vm0 }
 0x2fe   :  { %v1846_v44 = vsel %vm14821_vm7, %v14953_v29, %v14952_v62  ;;  %v1975_v57 = vsel %vm14955_vm5, 1.0, %v1954_v34  ;;  %v1865_v50 = vsel %vm1759_vm13, 3.0, %v1840_v2  ;;  %v7686_v60 = vpack.i.bf16 %v2176_v42, %v2173_v43  ;;  %vm14956_vm13 = vmmov %vm14949_vm1 }
 0x2ff   :  { %v1976_v31 = vsel %vm1918_vm4, 1.0, %v1956_v30  ;;  %v2121_v25 = vrot.slane %v1975_v57, 4  ;;  %v1866_v27 = vsel %vm1760_vm6, 3.0, %v1842_v3  ;;  %v1867_v22 = vsel %vm1761_vm14, 3.0, %v1844_v28  ;;  %vm14971_vm1 = vmmov %vm14955_vm5 }
 0x300   :  { %v2123_v13 = vrot.slane %v1976_v31, 4  ;;  %v1868_v33 = vsel %vm1762_vm10, 3.0, %v1846_v44  ;;  %v1993_v37 = vrot.slane %v1865_v50, 7  ;;  %7687 = vrot.lane.b32.xlu0 %v7686_v60, %s8011_s27  ;;  %v1995_v7 = vrot.slane %v1866_v27, 7  ;;  %vm14972_vm15 = vmmov %vm14957_vm0 }
 0x301   :  { %v2122_v32 = vsel %vm14956_vm13, %v2117_v14, %v2121_v25  ;;  %v1997_v9 = vrot.slane %v1867_v22, 7  ;;  %v1999_v0 = vrot.slane %v1868_v33, 7  ;;  %v14958_v24 = vrot.slane %v9790_v19, 7  ;;  %vm14973_vm5 = vmmov %vm14957_vm0 }
 0x302   :  { %v2124_v1 = vsel %vm14957_vm0, %v2119_v61, %v2123_v13  ;;  %v1994_v6 = vsel %vm14821_vm7, %v1989_v40, %v1993_v37  ;;  %v14959_v58 = vmov %v14950_v59  ;;  %v14960_v45 = vrot.slane %v9801_v41, 7 }
 0x303   :  { %v1848_v16 = vsel %vm14821_vm7, %v14959_v58, %v14958_v24  ;;  %v14961_v15 = vmov %v14952_v62  ;;  %v7691_v14 = vpack.i.bf16 %v2124_v1, %v2122_v32  ;;  %v1996_v2 = vsel %vm14821_vm7, %v1991_v23, %v1995_v7 }
 0x304   :  { %v1850_v39 = vsel %vm14821_vm7, %v14961_v15, %v14960_v45  ;;  %v1998_v46 = vsel %vm14821_vm7, %v1993_v37, %v1997_v9  ;;  %v2000_v61 = vsel %vm14821_vm7, %v1995_v7, %v1999_v0  ;;  %v2019_v19 = vsel %vm1913_vm3, 4.0, %v1994_v6  ;;  %vm14965_vm3 = vmmov %vm14943_vm12 }
 0x305   :  { %vm14962_vm14 = vcmp.gt.f32.partialorder %v8359_v51, %v9875_v20  ;;  %vm14963_vm6 = vcmp.gt.f32.partialorder %v8362_v52, %v9837_v56  ;;  %vm14964_vm10 = vcmp.gt.f32.partialorder %v8372_v54, %v9910_v11  ;;  %7692 = vrot.lane.b32.xlu1 %v7691_v14, %s8011_s27  ;;  %v2177_v40 = vrot.slane %v2019_v19, 4  ;;  %vm14969_vm12 = vmmov %vm14957_vm0 }
 0x306   :  { %v2020_v8 = vsel %vm14962_vm14, 4.0, %v1996_v2  ;;  %v2021_v38 = vsel %vm14963_vm6, 4.0, %v1998_v46  ;;  %v2022_v41 = vsel %vm14964_vm10, 4.0, %v2000_v61  ;;  %v1869_v18 = vsel %vm14965_vm3, 3.0, %v1848_v16 }
 0x307   :  { %v2179_v23 = vrot.slane %v2020_v8, 4  ;;  %v2181_v55 = vrot.slane %v2021_v38, 4  ;;  %v2183_v3 = vrot.slane %v2022_v41, 4  ;;  %v1870_v20 = vsel %vm14966_vm11, 3.0, %v1850_v39 }
 0x308   :  { %v2178_v11 = vsel %vm14969_vm12, %v2172_v36, %v2177_v40  ;;  %v2001_v28 = vrot.slane %v1869_v18, 7  ;;  %v2003_v62 = vrot.slane %v1870_v20, 7  ;;  %vm14974_vm14 = vcmask 7168  }
 0x309   :  { %v2182_v56 = vsel %vm14967_vm8, %v2177_v40, %v2181_v55  ;;  %v2184_v43 = vsel %vm14968_vm2, %v2179_v23, %v2183_v3  ;;  %v2180_v34 = vsel %vm14970_vm9, %v2175_v49, %v2179_v23  ;;  %vm14975_vm12 = vmmov %vm14974_vm14 }
 0x30a   :  { %v7701_v59 = vpack.i.bf16 %v2184_v43, %v2182_v56  ;;  %v7696_v53 = vpack.i.bf16 %v2180_v34, %v2178_v11  ;;  %v2002_v26 = vsel %vm14821_vm7, %v1997_v9, %v2001_v28  ;;  %v2004_v10 = vsel %vm14821_vm7, %v1999_v0, %v2003_v62 }
 0x30b   :  { %v2023_v29 = vsel %vm14971_vm1, 4.0, %v2002_v26  ;;  %v2024_v36 = vsel %vm1918_vm4, 4.0, %v2004_v10 }
 0x30c   :  { %7702 = vrot.lane.b32.xlu0 %v7701_v59, %s8011_s27  ;;  %7697 = vrot.lane.b32.xlu1 %v7696_v53, %s8011_s27  ;;  %v2185_v49 = vrot.slane %v2023_v29, 4  ;;  %v2187_v44 = vrot.slane %v2024_v36, 4 }
 0x30e   :  { %v2186_v42 = vsel %vm14972_vm15, %v2181_v55, %v2185_v49  ;;  %v2188_v30 = vsel %vm14973_vm5, %v2183_v3, %v2187_v44 }
 0x30f   :  { %v7706_v57 = vpack.i.bf16 %v2188_v30, %v2186_v42 }
 0x311   :  { %7707 = vrot.lane.b32.xlu1 %v7706_v57, %s8011_s27 }
 0x345   :  { %v10181_v50 = vpop.permute.xlu0 %2053 }
 0x346   :  { %vm2081_vm13 = vcmp.gt.f32.partialorder %v14929_v63, %v10181_v50 }
 0x347   :  { %v2089_v5 = vsel %vm2081_vm13, %v14929_v63, %v10181_v50 }
 0x348   :  { %v10190_v35 = vrot.slane %v2089_v5, 7 }
 0x349   :  { %v10192_v60 = vpop.permute.xlu0 %2057 }
 0x34a   :  { %vm2257_vm4 = vcmp.gt.f32.partialorder %v14929_v63, %v10190_v35  ;;  %vm14670_vm0 = vcmp.gt.f32.partialorder %v8311_v17, %v10192_v60 }
 0x34b   :  { %v2267_v31 = vsel %vm2257_vm4, %v14929_v63, %v10190_v35  ;;  %v2091_v25 = vsel %vm14670_vm0, %v8311_v17, %v10192_v60  ;;  %v2056_v22 = vpop.permute.xlu1 %2055 }
 0x34c   :  { %v10208_v27 = vrot.slane %v2267_v31, 7  ;;  %v2235_v13 = vrot.slane %v2091_v25, 7  ;;  %v10212_v33 = vsel %vm14974_vm14, %v10181_v50, %v2056_v22 }
 0x34d   :  { %vm2082_vm10 = vcmp.gt.f32.partialorder %v14932_v48, %v10212_v33 }
 0x34e   :  { %vm14654_vm6 = vcmp.gt.f32.partialorder %v14929_v63, %v10208_v27  ;;  %v10218_v37 = vsel %vm14821_vm7, %v10190_v35, %v2235_v13  ;;  %v2090_v7 = vsel %vm2082_vm10, %v14932_v48, %v10212_v33 }
 0x34f   :  { %v2409_v32 = vsel %vm14654_vm6, %v14929_v63, %v10208_v27  ;;  %vm14651_vm3 = vcmp.gt.f32.partialorder %v8311_v17, %v10218_v37  ;;  %v10243_v6 = vrot.slane %v2090_v7, 7 }
 0x350   :  { %v10234_v9 = vpop.permute.xlu0 %2061  ;;  %v10236_v0 = vrot.slane %v2409_v32, 7  ;;  %v2269_v1 = vsel %vm14651_vm3, %v8311_v17, %v10218_v37 }
 0x351   :  { %vm2085_vm11 = vcmp.gt.f32.partialorder %v8354_v47, %v10234_v9  ;;  %v2373_v24 = vrot.slane %v2269_v1, 7  ;;  %vm2258_vm2 = vcmp.gt.f32.partialorder %v14932_v48, %v10243_v6 }
 0x352   :  { %v2093_v58 = vsel %vm2085_vm11, %v8354_v47, %v10234_v9  ;;  %vm14644_vm8 = vcmp.gt.f32.partialorder %v14929_v63, %v10236_v0  ;;  %v2268_v15 = vsel %vm2258_vm2, %v14932_v48, %v10243_v6 }
 0x353   :  { %v2239_v16 = vrot.slane %v2093_v58, 7  ;;  %v2060_v45 = vpop.permute.xlu1 %2059  ;;  %v10269_v2 = vsel %vm14821_vm7, %v10208_v27, %v2373_v24  ;;  %v2563_v46 = vsel %vm14644_vm8, %v14929_v63, %v10236_v0  ;;  %v10276_v61 = vrot.slane %v2268_v15, 7 }
 0x354   :  { %v10263_v39 = vsel %vm14975_vm12, %v10192_v60, %v2060_v45  ;;  %v10265_v14 = vpop.permute.xlu0 %2065  ;;  %vm14646_vm5 = vcmp.gt.f32.partialorder %v8311_v17, %v10269_v2  ;;  %v10317_v56 = vrot.slane %v2563_v46, 7 }
 0x355   :  { %v10279_v19 = vsel %vm14821_vm7, %v2235_v13, %v2239_v16  ;;  %vm14667_vm9 = vcmp.gt.f32.partialorder %v8315_v21, %v10263_v39  ;;  %vm14645_vm1 = vcmp.gt.f32.partialorder %v8362_v52, %v10265_v14  ;;  %vm14655_vm14 = vcmp.gt.f32.partialorder %v14932_v48, %v10276_v61 }
 0x356   :  { %vm14649_vm15 = vcmp.gt.f32.partialorder %v8354_v47, %v10279_v19  ;;  %v2092_v8 = vsel %vm14667_vm9, %v8315_v21, %v10263_v39  ;;  %v2095_v38 = vsel %vm14645_vm1, %v8362_v52, %v10265_v14  ;;  %v2410_v3 = vsel %vm14655_vm14, %v14932_v48, %v10276_v61 }
 0x357   :  { %v2271_v41 = vsel %vm14649_vm15, %v8354_v47, %v10279_v19  ;;  %v2237_v40 = vrot.slane %v2092_v8, 7  ;;  %v10306_v23 = vrot.slane %v2095_v38, 7  ;;  %v2064_v55 = vpop.permute.xlu1 %2063  ;;  %v10334_v34 = vsel %vm14646_vm5, %v8311_v17, %v10269_v2 }
 0x358   :  { %v2377_v18 = vrot.slane %v2271_v41, 7  ;;  %v10315_v20 = vsel %vm14975_vm12, %v10234_v9, %v2064_v55  ;;  %v10362_v29 = vrot.slane %v2410_v3, 7 }
 0x359   :  { %v10321_v43 = vsel %vm14821_vm7, %v10243_v6, %v2237_v40  ;;  %v10325_v11 = vsel %vm14821_vm7, %v2239_v16, %v10306_v23  ;;  %vm2086_vm8 = vcmp.gt.f32.partialorder %v8359_v51, %v10315_v20 }
 0x35a   :  { %v10337_v59 = vsel %vm14821_vm7, %v2373_v24, %v2377_v18  ;;  %vm14650_vm12 = vcmp.gt.f32.partialorder %v8315_v21, %v10321_v43  ;;  %vm14647_vm1 = vcmp.gt.f32.partialorder %v8362_v52, %v10325_v11  ;;  %v2094_v53 = vsel %vm2086_vm8, %v8359_v51, %v10315_v20  ;;  %14977 = vst [vmem:[#allocation28_spill] sm:$0xff] %v10362_v29 }
 0x35b   :  { %14976 = vst [vmem:[#allocation26_spill] sm:$0xff] %v10337_v59  ;;  %vm14648_vm5 = vcmp.gt.f32.partialorder %v8354_v47, %v10337_v59  ;;  %v2270_v62 = vsel %vm14650_vm12, %v8315_v21, %v10321_v43  ;;  %v10360_v26 = vsel %vm14647_vm1, %v8362_v52, %v10325_v11  ;;  %v2241_v10 = vrot.slane %v2094_v53, 7 }
 0x35c   :  { %v10369_v36 = vsel %vm14648_vm5, %v8354_v47, %v10337_v59  ;;  %v2375_v49 = vrot.slane %v2270_v62, 7  ;;  %v14657_v44 = vrot.slane %v10360_v26, 7  ;;  %vm14979_vm5 = vcmask 7168  }
 0x35d   :  { %v10373_v30 = vsel %vm14821_vm7, %v2237_v40, %v2241_v10  ;;  %vm14980_vm3 = vmmov %vm14979_vm5  ;;  %v14998_v33 = vrot.slane %v10360_v26, 7 }
 0x35e   :  { %v7673_v28 = vpop.permute.xlu0 %7672  ;;  %v10378_v25 = vsel %vm14821_vm7, %v10276_v61, %v2375_v49  ;;  %v10383_v13 = vsel %vm14821_vm7, %v2377_v18, %v14657_v44  ;;  %vm2262_vm1 = vcmp.gt.f32.partialorder %v8359_v51, %v10373_v30 }
 0x35f   :  { %v2068_v42 = vpop.permute.xlu1 %2067  ;;  %v7675_v5 = vunpack.i.h.bf16 %v7673_v28  ;;  %v7674_v31 = vunpack.i.l.bf16 %v7673_v28  ;;  %14978 = vst [vmem:[#allocation20_spill] sm:$0xff] %v10378_v25  ;;  %vm2402_vm15 = vcmp.gt.f32.partialorder %v8315_v21, %v10378_v25  ;;  %vm14652_vm12 = vcmp.gt.f32.partialorder %v8362_v52, %v10383_v13 }
 0x360   :  { %v10389_v22 = vsel %vm14979_vm5, %v10265_v14, %v2068_v42  ;;  %v2272_v32 = vsel %vm2262_vm1, %v8359_v51, %v10373_v30  ;;  %v10406_v1 = vsel %vm2402_vm15, %v8315_v21, %v10378_v25  ;;  %v10413_v24 = vsel %vm14652_vm12, %v8362_v52, %v10383_v13 }
 0x361   :  { %v2141_v7 = vsel %vm14980_vm3, %v7674_v31, %v7675_v5  ;;  %14981 = vst [vmem:[#allocation29_spill] sm:$0xff] %v10406_v1  ;;  %14982 = vst [vmem:[#allocation23_spill] sm:$0xff] %v10413_v24  ;;  %v2379_v58 = vrot.slane %v2272_v32, 7  ;;  %v2153_v16 = vsel %vm2081_vm13, 2.0, %v7674_v31  ;;  %vm14653_vm3 = vcmp.gt.f32.partialorder %v8372_v54, %v10389_v22 }
 0x362   :  { %v2154_v46 = vsel %vm2082_vm10, 2.0, %v2141_v7  ;;  %v2285_v8 = vrot.slane %v2153_v16, 7  ;;  %v2096_v18 = vsel %vm14653_vm3, %v8372_v54, %v10389_v22  ;;  %vm2265_vm3 = vcmp.gt.f32.partialorder %v8403_v12, %v10306_v23 }
 0x363   :  { %v10425_v41 = vsel %vm14821_vm7, %v2375_v49, %v2379_v58  ;;  %v2286_v40 = vrot.slane %v2154_v46, 7  ;;  %v10452_v5 = vrot.slane %v2096_v18, 7  ;;  %v15021_v30 = vrot.slane %v10369_v36, 7 }
 0x364   :  { %14983 = vst [vmem:[#allocation22_spill] sm:$0xff] %v10425_v41  ;;  %vm2404_vm5 = vcmp.gt.f32.partialorder %v8359_v51, %v10425_v41  ;;  %v10434_v3 = vsel %vm2257_vm4, 2.0, %v2285_v8 }
 0x365   :  { %v10446_v62 = vsel %vm2404_vm5, %v8359_v51, %v10425_v41  ;;  %v2310_v49 = vsel %vm2258_vm2, 2.0, %v2286_v40  ;;  %v2429_v42 = vrot.slane %v10434_v3, 7  ;;  %v10462_v38 = vsel %vm14821_vm7, %v2241_v10, %v10452_v5 }
 0x366   :  { %v7678_v55 = vpop.permute.xlu1 %7677  ;;  %14984 = vst [vmem:[#allocation24_spill] sm:$0xff] %v10446_v62  ;;  %v2430_v32 = vrot.slane %v2310_v49, 7  ;;  %vm14656_vm12 = vcmp.gt.f32.partialorder %v8412_v4, %v10452_v5 }
 0x367   :  { %v7683_v53 = vpop.permute.xlu0 %7682  ;;  %v7680_v28 = vunpack.i.h.bf16 %v7678_v55  ;;  %v10458_v46 = vsel %vm14654_vm6, 2.0, %v2429_v42  ;;  %v7679_v3 = vunpack.i.l.bf16 %v7678_v55  ;;  %vm2264_vm6 = vcmp.gt.f32.partialorder %v8372_v54, %v10462_v38 }
 0x368   :  { %v7685_v7 = vunpack.i.h.bf16 %v7683_v53  ;;  %v7684_v16 = vunpack.i.l.bf16 %v7683_v53  ;;  %14985 = vst [vmem:[#allocation30_spill] sm:$0xff] %v10458_v46  ;;  %v10471_v18 = vsel %vm14655_vm14, 2.0, %v2430_v32  ;;  %v2276_v10 = vsel %vm14656_vm12, %v8412_v4, %v10452_v5 }
 0x369   :  { %14986 = vst [vmem:[#allocation31_spill] sm:$0xff] %v10471_v18  ;;  %v2274_v49 = vsel %vm2264_vm6, %v8372_v54, %v10462_v38  ;;  %v2387_v31 = vrot.slane %v2276_v10, 7  ;;  %vm14987_vm14 = vcmask 7168  }
 0x36a   :  { %v2143_v53 = vsel %vm14987_vm14, %v7684_v16, %v7685_v7  ;;  %v2383_v15 = vrot.slane %v2274_v49, 7  ;;  %v10491_v45 = vsel %vm2085_vm11, 2.0, %v7684_v16  ;;  %vm14988_vm12 = vmmov %vm14987_vm14  ;;  %v2155_v7 = vsel %vm14670_vm0, 2.0, %v7679_v3 }
 0x36b   :  { %v10496_v57 = vsel %vm2086_vm8, 2.0, %v2143_v53  ;;  %v2142_v55 = vsel %vm14988_vm12, %v7679_v3, %v7680_v28  ;;  %v14672_v44 = vrot.slane %v10491_v45, 7  ;;  %v2287_v28 = vrot.slane %v2155_v7, 7 }
 0x36c   :  { %v2156_v16 = vsel %vm14667_vm9, 2.0, %v2142_v55  ;;  %v10508_v49 = vsel %vm14821_vm7, %v2379_v58, %v2383_v15  ;;  %v10511_v53 = vsel %vm14821_vm7, %v2383_v15, %v2387_v31  ;;  %v14991_v62 = vrot.slane %v10496_v57, 7 }
 0x36d   :  { %v2289_v46 = vrot.slane %v2156_v16, 7  ;;  %vm2406_vm14 = vcmp.gt.f32.partialorder %v8372_v54, %v10508_v49  ;;  %vm14671_vm12 = vcmp.gt.f32.partialorder %v8412_v4, %v10511_v53  ;;  %v2288_v31 = vsel %vm14821_vm7, %v2285_v8, %v2287_v28 }
 0x36e   :  { %v10522_v58 = vsel %vm2406_vm14, %v8372_v54, %v10508_v49  ;;  %v10529_v15 = vsel %vm14671_vm12, %v8412_v4, %v10511_v53  ;;  %vm14992_vm9 = vcmp.gt.f32.partialorder %v8311_v17, %v10218_v37  ;;  %vm14993_vm0 = vcmp.gt.f32.partialorder %v8315_v21, %v10321_v43 }
 0x36f   :  { %14989 = vst [vmem:[#allocation32_spill] sm:$0xff] %v10522_v58  ;;  %14990 = vst [vmem:[#allocation25_spill] sm:$0xff] %v10529_v15  ;;  %v2290_v55 = vsel %vm14821_vm7, %v2286_v40, %v2289_v46  ;;  %v2294_v24 = vsel %vm14821_vm7, %v2289_v46, %v14991_v62  ;;  %v2311_v1 = vsel %vm14992_vm9, 2.0, %v2288_v31  ;;  %vm14994_vm12 = vcmp.gt.f32.partialorder %v8354_v47, %v10279_v19 }
 0x370   :  { %v2312_v8 = vsel %vm14993_vm0, 2.0, %v2290_v55  ;;  %v2431_v62 = vrot.slane %v2311_v1, 7  ;;  %vm14995_vm9 = vcmask 7168   ;;  %vm14996_vm0 = vcmp.gt.f32.partialorder %v8311_v17, %v10269_v2 }
 0x371   :  { %v2433_v46 = vrot.slane %v2312_v8, 7 }
 0x372   :  { %v7688_v10 = vpop.permute.xlu0 %7687  ;;  %v2432_v1 = vsel %vm14821_vm7, %v2429_v42, %v2431_v62 }
 0x373   :  { %v7690_v3 = vunpack.i.h.bf16 %v7688_v10  ;;  %v7689_v18 = vunpack.i.l.bf16 %v7688_v10  ;;  %v2292_v10 = vsel %vm14821_vm7, %v2287_v28, %v14672_v44  ;;  %v10555_v28 = vsel %vm2262_vm1, 2.0, %v2294_v24 }
 0x374   :  { %v10550_v40 = vsel %vm14994_vm12, 2.0, %v2292_v10  ;;  %v2437_v31 = vrot.slane %v10555_v28, 7  ;;  %v2275_v24 = vsel %vm2265_vm3, %v8403_v12, %v10306_v23  ;;  %v2434_v8 = vsel %vm14821_vm7, %v2430_v32, %v2433_v46 }
 0x375   :  { %v2435_v16 = vrot.slane %v10550_v40, 7  ;;  %v2205_v7 = vsel %vm14995_vm9, %v7689_v18, %v7690_v3  ;;  %v10563_v55 = vsel %vm2081_vm13, 0.0, %v7689_v18  ;;  %v10577_v50 = vsel %vm14996_vm0, 2.0, %v2432_v1 }
 0x376   :  { %v2438_v3 = vsel %vm14821_vm7, %v2433_v46, %v2437_v31  ;;  %v10582_v18 = vsel %vm2402_vm15, 2.0, %v2434_v8  ;;  %vm14997_vm13 = vcmp.gt.f32.partialorder %v8354_v47, %v10337_v59  ;;  %v14682_v15 = vrot.slane %v10563_v55, 7 }
 0x377   :  { %v7693_v29 = vpop.permute.xlu1 %7692  ;;  %v2436_v40 = vsel %vm14821_vm7, %v2431_v62, %v2435_v16  ;;  %v10592_v32 = vsel %vm2404_vm5, 2.0, %v2438_v3  ;;  %v2385_v58 = vrot.slane %v2275_v24, 7  ;;  %vm15000_vm12 = vcmp.gt.f32.partialorder %v8362_v52, %v10265_v14 }
 0x378   :  { %v7695_v10 = vunpack.i.h.bf16 %v7693_v29  ;;  %v10587_v42 = vsel %vm14997_vm13, 2.0, %v2436_v40  ;;  %v10601_v40 = vsel %vm2082_vm10, 0.0, %v2205_v7  ;;  %v7694_v3 = vunpack.i.l.bf16 %v7693_v29  ;;  %vm14999_vm10 = vmmov %vm14995_vm9 }
 0x379   :  { %v14681_v41 = vrot.slane %v10601_v40, 7  ;;  %v10610_v8 = vsel %vm2257_vm4, 1.0, %v14682_v15  ;;  %v10615_v7 = vsel %vm14821_vm7, %v14998_v33, %v2385_v58  ;;  %vm15001_vm9 = vcmp.gt.f32.partialorder %v8372_v54, %v10389_v22  ;;  %vm15003_vm0 = vmmov %vm14999_vm10 }
 0x37a   :  { %v2144_v24 = vsel %vm14999_vm10, %v7694_v3, %v7695_v10  ;;  %v2159_v29 = vsel %vm15000_vm12, 2.0, %v7694_v3  ;;  %v14679_v35 = vrot.slane %v10610_v8, 7  ;;  %vm2407_vm4 = vcmp.gt.f32.partialorder %v8403_v12, %v10615_v7 }
 0x37b   :  { %v2160_v26 = vsel %vm15001_vm9, 2.0, %v2144_v24  ;;  %v10640_v10 = vsel %vm2407_vm4, %v8403_v12, %v10615_v7  ;;  %v2295_v6 = vrot.slane %v2159_v29, 7  ;;  %vm15004_vm13 = vcmp.gt.f32.partialorder %v14932_v48, %v10276_v61  ;;  %vm15011_vm9 = vmmov %vm15003_vm0 }
 0x37c   :  { %v2297_v3 = vrot.slane %v2160_v26, 7  ;;  %v15005_v26 = vrot.slane %v10491_v45, 7  ;;  %vm15008_vm10 = vcmp.gt.f32.partialorder %v8412_v4, %v10452_v5  ;;  %vm15009_vm12 = vcmp.gt.f32.partialorder %v8362_v52, %v10383_v13 }
 0x37d   :  { %v2317_v45 = vsel %vm2265_vm3, 2.0, %v2295_v6 }
 0x37e   :  { %v7703_v28 = vpop.permute.xlu0 %7702  ;;  %v7698_v62 = vpop.permute.xlu1 %7697  ;;  %v2296_v24 = vsel %vm14821_vm7, %v15005_v26, %v2295_v6 }
 0x37f   :  { %v7705_v25 = vunpack.i.h.bf16 %v7703_v28  ;;  %v7704_v59 = vunpack.i.l.bf16 %v7703_v28  ;;  %v7700_v46 = vunpack.i.h.bf16 %v7698_v62  ;;  %v10626_v28 = vsel %vm2258_vm2, 1.0, %v14681_v41 }
 0x380   :  { %v14680_v58 = vrot.slane %v10626_v28, 7  ;;  %vm15002_vm2 = vcmp.gt.f32.partialorder %v14929_v63, %v10208_v27  ;;  %v2443_v27 = vrot.slane %v2317_v45, 7 }
 0x381   :  { %v10647_v33 = vsel %vm15002_vm2, 2.0, %v14679_v35  ;;  %v2207_v44 = vsel %vm15003_vm0, %v7704_v59, %v7705_v25  ;;  %v10654_v1 = vsel %vm2085_vm11, 0.0, %v7704_v59  ;;  %v15006_v25 = vrot.slane %v10496_v57, 7 }
 0x382   :  { %v10661_v29 = vsel %vm15004_vm13, 2.0, %v14680_v58  ;;  %vm15007_vm11 = vcmp.gt.f32.partialorder %v8362_v52, %v10325_v11  ;;  %v2318_v57 = vsel %vm15008_vm10, 2.0, %v2297_v3  ;;  %v2333_v58 = vrot.slane %v10654_v1, 7 }
 0x383   :  { %v2298_v35 = vsel %vm14821_vm7, %v15006_v25, %v2297_v3  ;;  %v2315_v59 = vsel %vm15007_vm11, 2.0, %v2296_v24  ;;  %v2445_v9 = vrot.slane %v2318_v57, 7  ;;  %v10686_v24 = vsel %vm2086_vm8, 0.0, %v2207_v44 }
 0x384   :  { %v2316_v61 = vsel %vm2264_vm6, 2.0, %v2298_v35  ;;  %v2439_v26 = vrot.slane %v2315_v59, 7  ;;  %v7699_v35 = vunpack.i.l.bf16 %v7698_v62  ;;  %v2335_v3 = vrot.slane %v10686_v24, 7 }
 0x385   :  { %v2441_v25 = vrot.slane %v2316_v61, 7  ;;  %vm15010_vm8 = vcmp.gt.f32.partialorder %v8412_v4, %v10511_v53  ;;  %vm15012_vm2 = vcmp.gt.f32.partialorder %v8311_v17, %v10192_v60  ;;  %v15013_v57 = vrot.slane %v10334_v34, 7 }
 0x386   :  { %v2440_v41 = vsel %vm14821_vm7, %v2435_v16, %v2439_v26  ;;  %v2444_v15 = vsel %vm14821_vm7, %v2439_v26, %v2443_v27  ;;  %v7708_v27 = vpop.permute.xlu1 %7707  ;;  %v2206_v45 = vsel %vm15011_vm9, %v7699_v35, %v7700_v46  ;;  %vm15014_vm0 = vcmp.gt.f32.partialorder %v8315_v21, %v10263_v39 }
 0x387   :  { %v2442_v6 = vsel %vm14821_vm7, %v2437_v31, %v2441_v25  ;;  %v2446_v59 = vsel %vm14821_vm7, %v2441_v25, %v2445_v9  ;;  %v10697_v61 = vsel %vm15009_vm12, 2.0, %v2440_v41  ;;  %v10707_v44 = vsel %vm2407_vm4, 2.0, %v2444_v15 }
 0x388   :  { %v10702_v20 = vsel %vm2406_vm14, 2.0, %v2442_v6  ;;  %v10712_v16 = vsel %vm15010_vm8, 2.0, %v2446_v59  ;;  %v2219_v15 = vsel %vm15012_vm2, 0.0, %v7699_v35  ;;  %v10726_v26 = vsel %vm14821_vm7, %v10236_v0, %v15013_v57 }
 0x389   :  { %v2220_v25 = vsel %vm15014_vm0, 0.0, %v2206_v45  ;;  %v2329_v6 = vrot.slane %v2219_v15, 7  ;;  %vm2555_vm13 = vcmp.gt.f32.partialorder %v8311_v17, %v10726_v26  ;;  %vm2707_vm11 = vcmp.gt.f32.partialorder %v14929_v63, %v10317_v56 }
 0x38a   :  { %v2331_v46 = vrot.slane %v2220_v25, 7  ;;  %v2565_v60 = vsel %vm2555_vm13, %v8311_v17, %v10726_v26  ;;  %v2717_v39 = vsel %vm2707_vm11, %v14929_v63, %v10317_v56  ;;  %v7710_v35 = vunpack.i.h.bf16 %v7708_v27 }
 0x38b   :  { %v15015_v59 = vrot.slane %v10563_v55, 7  ;;  %v2334_v15 = vsel %vm14821_vm7, %v2329_v6, %v2333_v58  ;;  %v2681_v57 = vrot.slane %v2565_v60, 7  ;;  %v2833_v25 = vrot.slane %v2717_v39, 4 }
 0x38c   :  { %v15016_v9 = vrot.slane %v10601_v40, 7  ;;  %v2336_v41 = vsel %vm14821_vm7, %v2331_v46, %v2335_v3  ;;  %vm15017_vm10 = vcmp.gt.f32.partialorder %v8311_v17, %v10218_v37  ;;  %vm15018_vm12 = vcmp.gt.f32.partialorder %v8354_v47, %v10279_v19 }
 0x38d   :  { %v2330_v45 = vsel %vm14821_vm7, %v15015_v59, %v2329_v6  ;;  %v2355_v59 = vsel %vm15018_vm12, 1.0, %v2334_v15  ;;  %vm15019_vm8 = vcmp.gt.f32.partialorder %v8315_v21, %v10321_v43  ;;  %v2356_v40 = vsel %vm2262_vm1, 1.0, %v2336_v41 }
 0x38e   :  { %v2332_v62 = vsel %vm14821_vm7, %v15016_v9, %v2331_v46  ;;  %v2353_v55 = vsel %vm15017_vm10, 1.0, %v2330_v45  ;;  %v2483_v60 = vrot.slane %v2355_v59, 7  ;;  %v2485_v46 = vrot.slane %v2356_v40, 7 }
 0x38f   :  { %v2354_v6 = vsel %vm15019_vm8, 1.0, %v2332_v62  ;;  %v2479_v9 = vrot.slane %v2353_v55, 7  ;;  %v10771_v37 = vsel %vm14821_vm7, %v10317_v56, %v2681_v57  ;;  %v7709_v45 = vunpack.i.l.bf16 %v7708_v27 }
 0x390   :  { %v2481_v39 = vrot.slane %v2354_v6, 7  ;;  %v15020_v19 = vrot.slane %v10610_v8, 7  ;;  %vm2709_vm9 = vcmp.gt.f32.partialorder %v8311_v17, %v10771_v37  ;;  %v15022_v41 = vrot.slane %v10334_v34, 7  ;;  %v15025_v6 = vld [vmem:[#allocation26_spill] sm:$0xff] }
 0x391   :  { %v2484_v43 = vsel %vm14821_vm7, %v2479_v9, %v2483_v60  ;;  %v15023_v55 = vrot.slane %v10626_v28, 7  ;;  %vm15024_vm1 = vcmp.gt.f32.partialorder %v8311_v17, %v10269_v2  ;;  %vm15026_vm2 = vcmp.gt.f32.partialorder %v8354_v47, %v15025_v6  ;;  %v15032_v28 = vld [vmem:[#allocation29_spill] sm:$0xff] }
 0x392   :  { %v2480_v15 = vsel %vm14821_vm7, %v15020_v19, %v2479_v9  ;;  %v10784_v62 = vsel %vm14821_vm7, %v15022_v41, %v15021_v30  ;;  %v2486_v8 = vsel %vm14821_vm7, %v2481_v39, %v2485_v46  ;;  %v10798_v40 = vsel %vm15026_vm2, 2.0, %v2484_v43  ;;  %v15034_v30 = vld [vmem:[#allocation28_spill] sm:$0xff] }
 0x393   :  { %v2482_v27 = vsel %vm14821_vm7, %v15023_v55, %v2481_v39  ;;  %v10793_v59 = vsel %vm15024_vm1, 2.0, %v2480_v15  ;;  %v10808_v19 = vsel %vm2404_vm5, 2.0, %v2486_v8  ;;  %v2719_v43 = vsel %vm2709_vm9, %v8311_v17, %v10771_v37  ;;  %v15058_v39 = vld [vmem:[#allocation31_spill] sm:$0xff] }
 0x394   :  { %v10803_v9 = vsel %vm2402_vm15, 2.0, %v2482_v27  ;;  %vm15029_vm15 = vcmask 7168   ;;  %v2834_v55 = vrot.slane %v2719_v43, 4  ;;  %vm15030_vm5 = vcmp.gt.f32.partialorder %v8362_v52, %v10265_v14 }
 0x395   :  { %v2208_v41 = vsel %vm15029_vm15, %v7709_v45, %v7710_v35  ;;  %v2223_v27 = vsel %vm15030_vm5, 0.0, %v7709_v45  ;;  %vm15031_vm0 = vcmp.gt.f32.partialorder %v8372_v54, %v10389_v22  ;;  %vm2557_vm10 = vcmp.gt.f32.partialorder %v8354_v47, %v10784_v62 }
 0x396   :  { %v2224_v8 = vsel %vm15031_vm0, 0.0, %v2208_v41  ;;  %v2337_v6 = vrot.slane %v2223_v27, 7  ;;  %v2567_v35 = vsel %vm2557_vm10, %v8354_v47, %v10784_v62  ;;  %v15033_v43 = vrot.slane %v15032_v28, 7 }
 0x397   :  { %v2339_v34 = vrot.slane %v2224_v8, 7  ;;  %vm15035_vm12 = vcmask 1043456   ;;  %v2685_v45 = vrot.slane %v2567_v35, 7  ;;  %vm2554_vm8 = vcmp.gt.f32.partialorder %v14932_v48, %v15034_v30 }
 0x398   :  { %v10837_v14 = vsel %vm14821_vm7, %v15034_v30, %v15033_v43  ;;  %v2835_v22 = vsel %vm15035_vm12, %v2833_v25, %v2834_v55  ;;  %v2338_v41 = vsel %vm14821_vm7, %v2333_v58, %v2337_v6  ;;  %v2359_v25 = vsel %vm2265_vm3, 1.0, %v2337_v6 }
 0x399   :  { %vm2556_vm1 = vcmp.gt.f32.partialorder %v8315_v21, %v10837_v14  ;;  %2851 = vrot.lane.b32.xlu0 %v2835_v22, %s8011_s27  ;;  %v2340_v27 = vsel %vm14821_vm7, %v2335_v3, %v2339_v34  ;;  %vm15036_vm2 = vcmp.gt.f32.partialorder %v8412_v4, %v10452_v5  ;;  %vm15037_vm15 = vcmp.gt.f32.partialorder %v8362_v52, %v10325_v11  ;;  %v15038_v5 = vld [vmem:[#allocation23_spill] sm:$0xff] }
 0x39a   :  { %v2360_v8 = vsel %vm15036_vm2, 1.0, %v2339_v34  ;;  %v2357_v35 = vsel %vm15037_vm15, 1.0, %v2338_v41  ;;  %v2358_v1 = vsel %vm2264_vm6, 1.0, %v2340_v27  ;;  %v2491_v58 = vrot.slane %v2359_v25, 7 }
 0x39b   :  { %v2493_v24 = vrot.slane %v2360_v8, 7  ;;  %v2487_v43 = vrot.slane %v2357_v35, 7  ;;  %v2489_v3 = vrot.slane %v2358_v1, 7  ;;  %v10864_v22 = vsel %vm14821_vm7, %v2681_v57, %v2685_v45 }
 0x39c   :  { %v2564_v23 = vsel %vm2554_vm8, %v14932_v48, %v15034_v30  ;;  %vm2711_vm3 = vcmp.gt.f32.partialorder %v8354_v47, %v10864_v22  ;;  %v2566_v11 = vsel %vm2556_vm1, %v8315_v21, %v10837_v14  ;;  %v15039_v57 = vrot.slane %v15038_v5, 7 }
 0x39d   :  { %v10878_v38 = vrot.slane %v2564_v23, 7  ;;  %v15040_v6 = vrot.slane %v10369_v36, 7  ;;  %v2488_v41 = vsel %vm14821_vm7, %v2483_v60, %v2487_v43  ;;  %v2490_v27 = vsel %vm14821_vm7, %v2485_v46, %v2489_v3  ;;  %v15045_v23 = vld [vmem:[#allocation24_spill] sm:$0xff] }
 0x39e   :  { %v2492_v25 = vsel %vm14821_vm7, %v2487_v43, %v2491_v58  ;;  %v2494_v8 = vsel %vm14821_vm7, %v2489_v3, %v2493_v24  ;;  %vm15041_vm6 = vcmp.gt.f32.partialorder %v8362_v52, %v10383_v13  ;;  %v10899_v36 = vsel %vm2406_vm14, 2.0, %v2490_v27 }
 0x39f   :  { %v10885_v34 = vsel %vm14821_vm7, %v15040_v6, %v15039_v57  ;;  %v10894_v35 = vsel %vm15041_vm6, 2.0, %v2488_v41  ;;  %v10904_v60 = vsel %vm2407_vm4, 2.0, %v2492_v25  ;;  %vm15043_vm5 = vcmp.gt.f32.partialorder %v8412_v4, %v10511_v53 }
 0x3a0   :  { %15042 = vst [vmem:[#allocation27_spill] sm:$0xff] %v10904_v60  ;;  %v10909_v46 = vsel %vm15043_vm5, 2.0, %v2494_v8  ;;  %v2721_v7 = vsel %vm2711_vm3, %v8354_v47, %v10864_v22  ;;  %v2683_v24 = vrot.slane %v2566_v11, 7  ;;  %vm2708_vm14 = vcmp.gt.f32.partialorder %v14932_v48, %v10878_v38  ;;  %v15064_v60 = vld [vmem:[#allocation25_spill] sm:$0xff] }
 0x3a1   :  { %15044 = vst [vmem:[#allocation33_spill] sm:$0xff] %v10909_v46  ;;  %vm14693_vm4 = vcmp.gt.f32.partialorder %v8362_v52, %v10885_v34  ;;  %v2839_v53 = vrot.slane %v2721_v7, 4  ;;  %v2718_v43 = vsel %vm2708_vm14, %v14932_v48, %v10878_v38  ;;  %v15046_v11 = vrot.slane %v15045_v23, 7 }
 0x3a2   :  { %v2569_v3 = vsel %vm14693_vm4, %v8362_v52, %v10885_v34  ;;  %v15047_v57 = vrot.slane %v15032_v28, 7  ;;  %v10943_v41 = vsel %vm14821_vm7, %v10878_v38, %v2683_v24  ;;  %v2836_v27 = vrot.slane %v2718_v43, 4 }
 0x3a3   :  { %v2689_v25 = vrot.slane %v2569_v3, 7  ;;  %v2840_v8 = vsel %vm15035_vm12, %v2834_v55, %v2839_v53  ;;  %vm2710_vm2 = vcmp.gt.f32.partialorder %v8315_v21, %v10943_v41  ;;  %v15048_v7 = vrot.slane %v10640_v10, 7 }
 0x3a4   :  { %v10939_v6 = vsel %vm14821_vm7, %v15047_v57, %v15046_v11  ;;  %v15049_v11 = vrot.slane %v15038_v5, 7  ;;  %2855 = vrot.lane.b32.xlu0 %v2840_v8, %s8011_s27  ;;  %v2720_v55 = vsel %vm2710_vm2, %v8315_v21, %v10943_v41  ;;  %v15050_v8 = vld [vmem:[#allocation32_spill] sm:$0xff]  ;;  %v15059_v31 = vrot.slane %v15058_v39, 7 }
 0x3a5   :  { %vm2558_vm0 = vcmp.gt.f32.partialorder %v8359_v51, %v10939_v6  ;;  %v10969_v3 = vsel %vm14821_vm7, %v2685_v45, %v2689_v25  ;;  %v2837_v10 = vrot.slane %v2720_v55, 4  ;;  %v15088_v26 = vrot.slane %v10707_v44, 7 }
 0x3a6   :  { %v2568_v28 = vsel %vm2558_vm0, %v8359_v51, %v10939_v6  ;;  %v10960_v43 = vsel %vm14821_vm7, %v15049_v11, %v15048_v7  ;;  %vm14684_vm6 = vcmp.gt.f32.partialorder %v8362_v52, %v10969_v3  ;;  %v15051_v7 = vrot.slane %v15050_v8, 7 }
 0x3a7   :  { %v2687_v57 = vrot.slane %v2568_v28, 7  ;;  %vm14683_vm15 = vcmp.gt.f32.partialorder %v8403_v12, %v10960_v43  ;;  %v15052_v11 = vrot.slane %v15045_v23, 7  ;;  %v2723_v28 = vsel %vm14684_vm6, %v8362_v52, %v10969_v3  ;;  %v15110_v6 = vld [vmem:[#allocation27_spill] sm:$0xff] }
 0x3a8   :  { %v2571_v5 = vsel %vm14683_vm15, %v8403_v12, %v10960_v43  ;;  %v2838_v58 = vsel %vm15035_vm12, %v2836_v27, %v2837_v10  ;;  %v2843_v13 = vrot.slane %v2723_v28, 4  ;;  %v15097_v41 = vrot.slane %v10803_v9, 7 }
 0x3a9   :  { %v10985_v45 = vsel %vm14821_vm7, %v15052_v11, %v15051_v7  ;;  %v10993_v55 = vsel %vm14821_vm7, %v2683_v24, %v2687_v57  ;;  %v2693_v49 = vrot.slane %v2571_v5, 7  ;;  %2853 = vrot.lane.b32.xlu1 %v2838_v58, %s8011_s27  ;;  %v15054_v7 = vrot.slane %v10577_v50, 7  ;;  %v15055_v11 = vld [vmem:[#allocation30_spill] sm:$0xff] }
 0x3aa   :  { %vm14692_vm5 = vcmp.gt.f32.partialorder %v8372_v54, %v10985_v45  ;;  %vm14685_vm15 = vcmp.gt.f32.partialorder %v8359_v51, %v10993_v55  ;;  %v15056_v28 = vrot.slane %v15055_v11, 7  ;;  %v2844_v2 = vsel %vm15035_vm12, %v2839_v53, %v2843_v13 }
 0x3ab   :  { %v2570_v23 = vsel %vm14692_vm5, %v8372_v54, %v10985_v45  ;;  %v2722_v24 = vsel %vm14685_vm15, %v8359_v51, %v10993_v55  ;;  %v11012_v27 = vsel %vm14821_vm7, %v2689_v25, %v2693_v49  ;;  %v15057_v58 = vrot.slane %v10582_v18, 7  ;;  %2859 = vrot.lane.b32.xlu0 %v2844_v2, %s8011_s27 }
 0x3ac   :  { %15053 = vst [vmem:[#allocation34_spill] sm:$0xff] %v11012_v27  ;;  %v2691_v5 = vrot.slane %v2570_v23, 7  ;;  %v2586_v1 = vsel %vm14821_vm7, %v15056_v28, %v15054_v7  ;;  %v2841_v15 = vrot.slane %v2722_v24, 4  ;;  %vm14686_vm6 = vcmp.gt.f32.partialorder %v8403_v12, %v11012_v27 }
 0x3ad   :  { %v2588_v49 = vsel %vm14821_vm7, %v15059_v31, %v15057_v58  ;;  %v2725_v25 = vsel %vm14686_vm6, %v8403_v12, %v11012_v27  ;;  %v15060_v23 = vmov %v15056_v28  ;;  %vm15061_vm12 = vcmp.gt.f32.partialorder %v14929_v63, %v10236_v0 }
 0x3ae   :  { %v11034_v53 = vsel %vm14821_vm7, %v2687_v57, %v2691_v5  ;;  %v2611_v24 = vsel %vm15061_vm12, 2.0, %v15060_v23  ;;  %v15062_v7 = vmov %v15059_v31  ;;  %vm15063_vm15 = vcmask 1043456  }
 0x3af   :  { %v2612_v31 = vsel %vm2554_vm8, 2.0, %v15062_v7  ;;  %v2842_v2 = vsel %vm15063_vm15, %v2837_v10, %v2841_v15  ;;  %v2847_v28 = vrot.slane %v2725_v25, 4  ;;  %vm14694_vm6 = vcmp.gt.f32.partialorder %v8372_v54, %v11034_v53  ;;  %vm15069_vm12 = vmmov %vm15063_vm15 }
 0x3b0   :  { %v2613_v57 = vsel %vm2555_vm13, 2.0, %v2586_v1  ;;  %2857 = vrot.lane.b32.xlu1 %v2842_v2, %s8011_s27  ;;  %v2724_v39 = vsel %vm14694_vm6, %v8372_v54, %v11034_v53  ;;  %v2614_v10 = vsel %vm2556_vm1, 2.0, %v2588_v49  ;;  %v2737_v11 = vrot.slane %v2611_v24, 7 }
 0x3b1   :  { %v2738_v58 = vrot.slane %v2612_v31, 7  ;;  %v2848_v25 = vsel %vm15063_vm15, %v2843_v13, %v2847_v28  ;;  %v2845_v23 = vrot.slane %v2724_v39, 4  ;;  %v2739_v7 = vrot.slane %v2613_v57, 7 }
 0x3b2   :  { %v2741_v46 = vrot.slane %v2614_v10, 7  ;;  %2863 = vrot.lane.b32.xlu0 %v2848_v25, %s8011_s27  ;;  %v2765_v1 = vsel %vm2707_vm11, 2.0, %v2737_v11  ;;  %v15065_v27 = vrot.slane %v15064_v60, 7  ;;  %v15066_v49 = vrot.slane %v15050_v8, 7 }
 0x3b3   :  { %v2766_v2 = vsel %vm2708_vm14, 2.0, %v2738_v58  ;;  %v15067_v13 = vrot.slane %v10587_v42, 7  ;;  %v15068_v31 = vrot.slane %v10577_v50, 7  ;;  %v2846_v57 = vsel %vm15069_vm12, %v2841_v15, %v2845_v23 }
 0x3b4   :  { %v11074_v24 = vsel %vm14821_vm7, %v15066_v49, %v15065_v27  ;;  %v2740_v39 = vsel %vm14821_vm7, %v2737_v11, %v2739_v7  ;;  %v2742_v10 = vsel %vm14821_vm7, %v2738_v58, %v2741_v46  ;;  %v2905_v25 = vrot.slane %v2765_v1, 4  ;;  %2861 = vrot.lane.b32.xlu1 %v2846_v57, %s8011_s27 }
 0x3b5   :  { %v2590_v28 = vsel %vm14821_vm7, %v15068_v31, %v15067_v13  ;;  %v2767_v60 = vsel %vm2709_vm9, 2.0, %v2740_v39  ;;  %v2768_v8 = vsel %vm2710_vm2, 2.0, %v2742_v10  ;;  %v2908_v50 = vrot.slane %v2766_v2, 4 }
 0x3b6   :  { %vm14691_vm15 = vcmp.gt.f32.partialorder %v8412_v4, %v11074_v24  ;;  %v2906_v15 = vrot.slane %v2767_v60, 4  ;;  %v2909_v27 = vrot.slane %v2768_v8, 4  ;;  %v15070_v58 = vrot.slane %v10592_v32, 7 }
 0x3b7   :  { %v2572_v11 = vsel %vm14691_vm15, %v8412_v4, %v11074_v24  ;;  %v15071_v1 = vrot.slane %v10582_v18, 7  ;;  %v15072_v2 = vrot.slane %v10697_v61, 7  ;;  %v15073_v31 = vrot.slane %v10587_v42, 7  ;;  %vm15076_vm15 = vmmov %vm15069_vm12 }
 0x3b8   :  { %v2695_v13 = vrot.slane %v2572_v11, 7  ;;  %v15074_v39 = vrot.slane %v10702_v20, 7  ;;  %v15075_v10 = vmov %v15070_v58  ;;  %v2615_v8 = vsel %vm2557_vm10, 2.0, %v2590_v28 }
 0x3b9   :  { %v2592_v49 = vsel %vm14821_vm7, %v15071_v1, %v15070_v58  ;;  %v2594_v57 = vsel %vm14821_vm7, %v15073_v31, %v15072_v2  ;;  %v2907_v18 = vsel %vm15069_vm12, %v2905_v25, %v2906_v15  ;;  %v2910_v11 = vsel %vm15076_vm15, %v2908_v50, %v2909_v27 }
 0x3ba   :  { %v2596_v60 = vsel %vm14821_vm7, %v15075_v10, %v15074_v39  ;;  %v2616_v42 = vsel %vm2558_vm0, 2.0, %v2592_v49  ;;  %v11124_v58 = vsel %vm14693_vm4, 2.0, %v2594_v57  ;;  %v7711_v32 = vpack.i.bf16 %v2910_v11, %v2907_v18 }
 0x3bb   :  { %v11127_v1 = vsel %vm14821_vm7, %v2691_v5, %v2695_v13  ;;  %v11132_v28 = vsel %vm14692_vm5, 2.0, %v2596_v60  ;;  %v2743_v25 = vrot.slane %v2615_v8, 7  ;;  %v2745_v50 = vrot.slane %v2616_v42, 7 }
 0x3bc   :  { %vm2716_vm15 = vcmp.gt.f32.partialorder %v8412_v4, %v11127_v1  ;;  %v2747_v49 = vrot.slane %v11124_v58, 7  ;;  %v2749_v2 = vrot.slane %v11132_v28, 7  ;;  %7712 = vrot.lane.b32.xlu0 %v7711_v32, %s8011_s27  ;;  %v15077_v31 = vrot.slane %v10793_v59, 7 }
 0x3bd   :  { %v2726_v5 = vsel %vm2716_vm15, %v8412_v4, %v11127_v1  ;;  %v2744_v13 = vsel %vm14821_vm7, %v2739_v7, %v2743_v25  ;;  %v15078_v57 = vrot.slane %v10647_v33, 7  ;;  %v15079_v10 = vrot.slane %v10803_v9, 7 }
 0x3be   :  { %v15080_v60 = vrot.slane %v10661_v29, 7  ;;  %v2849_v18 = vrot.slane %v2726_v5, 4  ;;  %v2746_v11 = vsel %vm14821_vm7, %v2741_v46, %v2745_v50  ;;  %v2748_v42 = vsel %vm14821_vm7, %v2743_v25, %v2747_v49 }
 0x3bf   :  { %v2634_v39 = vsel %vm14821_vm7, %v15078_v57, %v15077_v31  ;;  %v2750_v58 = vsel %vm14821_vm7, %v2745_v50, %v2749_v2  ;;  %v2769_v7 = vsel %vm2711_vm3, 2.0, %v2744_v13  ;;  %vm15081_vm12 = vcmp.gt.f32.partialorder %v8359_v51, %v10993_v55 }
 0x3c0   :  { %v2636_v8 = vsel %vm14821_vm7, %v15080_v60, %v15079_v10  ;;  %v2770_v32 = vsel %vm15081_vm12, 2.0, %v2746_v11  ;;  %vm15082_vm5 = vcmp.gt.f32.partialorder %v8362_v52, %v10969_v3  ;;  %v11170_v46 = vsel %vm14694_vm6, 2.0, %v2750_v58 }
 0x3c1   :  { %v2771_v28 = vsel %vm15082_vm5, 2.0, %v2748_v42  ;;  %vm15083_vm4 = vcmask 1043456   ;;  %v2911_v50 = vrot.slane %v2769_v7, 4  ;;  %v2913_v5 = vrot.slane %v2770_v32, 4 }
 0x3c2   :  { %v2850_v25 = vsel %vm15083_vm4, %v2845_v23, %v2849_v18  ;;  %v2915_v31 = vrot.slane %v2771_v28, 4  ;;  %v2917_v13 = vrot.slane %v11170_v46, 4  ;;  %vm15084_vm12 = vcmp.gt.f32.partialorder %v14929_v63, %v10236_v0  ;;  %vm15085_vm5 = vmmov %vm15083_vm4 }
 0x3c3   :  { %2865 = vrot.lane.b32.xlu1 %v2850_v25, %s8011_s27  ;;  %v2659_v10 = vsel %vm15084_vm12, 3.0, %v15078_v57  ;;  %v2660_v11 = vsel %vm2554_vm8, 3.0, %v15080_v60  ;;  %v2661_v23 = vsel %vm2555_vm13, 3.0, %v2634_v39  ;;  %v2912_v42 = vsel %vm15085_vm5, %v2906_v15, %v2911_v50  ;;  %vm15086_vm6 = vmmov %vm15083_vm4 }
 0x3c4   :  { %v2916_v18 = vsel %vm15083_vm4, %v2911_v50, %v2915_v31  ;;  %v2914_v33 = vsel %vm15086_vm6, %v2909_v27, %v2913_v5  ;;  %v2662_v0 = vsel %vm2556_vm1, 3.0, %v2636_v8  ;;  %vm15087_vm12 = vmmov %vm15083_vm4  ;;  %v2785_v7 = vrot.slane %v2659_v10, 7 }
 0x3c5   :  { %v2918_v29 = vsel %vm15087_vm12, %v2913_v5, %v2917_v13  ;;  %v7716_v58 = vpack.i.bf16 %v2914_v33, %v2912_v42  ;;  %v2786_v30 = vrot.slane %v2660_v11, 7  ;;  %v2787_v28 = vrot.slane %v2661_v23, 7  ;;  %vm15103_vm8 = vmmov %vm15083_vm4 }
 0x3c6   :  { %v7721_v32 = vpack.i.bf16 %v2918_v29, %v2916_v18  ;;  %v2789_v46 = vrot.slane %v2662_v0, 7  ;;  %v15089_v39 = vrot.slane %v10697_v61, 7  ;;  %v2813_v14 = vsel %vm2707_vm11, 4.0, %v2785_v7  ;;  %vm15108_vm6 = vmmov %vm15083_vm4 }
 0x3c7   :  { %7717 = vrot.lane.b32.xlu1 %v7716_v58, %s8011_s27  ;;  %v2814_v27 = vsel %vm2708_vm14, 4.0, %v2786_v30  ;;  %v15090_v8 = vrot.slane %v10712_v16, 7  ;;  %v15091_v25 = vrot.slane %v10702_v20, 7  ;;  %vm15092_vm13 = vcmp.gt.f32.partialorder %v8403_v12, %v10960_v43 }
 0x3c8   :  { %v2598_v15 = vsel %vm14821_vm7, %v15089_v39, %v15088_v26  ;;  %7722 = vrot.lane.b32.xlu0 %v7721_v32, %s8011_s27  ;;  %v2788_v50 = vsel %vm14821_vm7, %v2785_v7, %v2787_v28  ;;  %v2790_v56 = vsel %vm14821_vm7, %v2786_v30, %v2789_v46  ;;  %v2969_v5 = vrot.slane %v2813_v14, 4 }
 0x3c9   :  { %v2600_v44 = vsel %vm14821_vm7, %v15091_v25, %v15090_v8  ;;  %v2619_v61 = vsel %vm15092_vm13, 2.0, %v2598_v15  ;;  %v2972_v57 = vrot.slane %v2814_v27, 4  ;;  %v2815_v16 = vsel %vm2709_vm9, 4.0, %v2788_v50  ;;  %vm15102_vm9 = vmmov %vm15083_vm4  ;;  %v15104_v15 = vld [vmem:[#allocation34_spill] sm:$0xff] }
 0x3ca   :  { %v2816_v20 = vsel %vm2710_vm2, 4.0, %v2790_v56  ;;  %vm15093_vm11 = vcmp.gt.f32.partialorder %v8412_v4, %v11074_v24  ;;  %v2751_v10 = vrot.slane %v2619_v61, 7  ;;  %v2970_v60 = vrot.slane %v2815_v16, 4 }
 0x3cb   :  { %v2620_v38 = vsel %vm15093_vm11, 2.0, %v2600_v44  ;;  %v2973_v11 = vrot.slane %v2816_v20, 4  ;;  %v15094_v18 = vrot.slane %v10798_v40, 7  ;;  %v15095_v42 = vrot.slane %v10793_v59, 7  ;;  %vm15120_vm12 = vmmov %vm15093_vm11 }
 0x3cc   :  { %v2753_v23 = vrot.slane %v2620_v38, 7  ;;  %v2752_v37 = vsel %vm14821_vm7, %v2747_v49, %v2751_v10  ;;  %v15096_v0 = vrot.slane %v10808_v19, 7  ;;  %v15098_v58 = vrot.slane %v10894_v35, 7  ;;  %v15113_v10 = vld [vmem:[#allocation33_spill] sm:$0xff]  ;;  %vm15122_vm11 = vmmov %vm15108_vm6 }
 0x3cd   :  { %v2638_v33 = vsel %vm14821_vm7, %v15095_v42, %v15094_v18  ;;  %v15099_v7 = vmov %v15094_v18  ;;  %v15100_v32 = vrot.slane %v10899_v36, 7  ;;  %v2971_v49 = vsel %vm15102_vm9, %v2969_v5, %v2970_v60  ;;  %vm15123_vm9 = vmmov %vm15108_vm6 }
 0x3ce   :  { %v2640_v29 = vsel %vm14821_vm7, %v15097_v41, %v15096_v0  ;;  %v2642_v30 = vsel %vm14821_vm7, %v15099_v7, %v15098_v58  ;;  %v15101_v59 = vmov %v15096_v0  ;;  %v2974_v39 = vsel %vm15103_vm8, %v2972_v57, %v2973_v11  ;;  %vm15124_vm8 = vmmov %vm15108_vm6 }
 0x3cf   :  { %v2644_v26 = vsel %vm14821_vm7, %v15101_v59, %v15100_v32  ;;  %v2754_v9 = vsel %vm14821_vm7, %v2749_v2, %v2753_v23  ;;  %vm15105_vm1 = vcmp.gt.f32.partialorder %v8403_v12, %v15104_v15  ;;  %v7731_v27 = vpack.i.bf16 %v2974_v39, %v2971_v49 }
 0x3d0   :  { %v2773_v14 = vsel %vm15105_vm1, 2.0, %v2752_v37  ;;  %v2774_v40 = vsel %vm2716_vm15, 2.0, %v2754_v9  ;;  %v2663_v19 = vsel %vm2557_vm10, 3.0, %v2638_v33  ;;  %v2664_v44 = vsel %vm2558_vm0, 3.0, %v2640_v29  ;;  %vm15109_vm10 = vmmov %vm15083_vm4 }
 0x3d1   :  { %v2919_v8 = vrot.slane %v2773_v14, 4  ;;  %v2921_v25 = vrot.slane %v2774_v40, 4  ;;  %vm15106_vm14 = vcmp.gt.f32.partialorder %v8362_v52, %v10885_v34  ;;  %vm15107_vm2 = vcmp.gt.f32.partialorder %v8372_v54, %v10985_v45  ;;  %7732 = vrot.lane.b32.xlu0 %v7731_v27, %s8011_s27 }
 0x3d2   :  { %v2665_v2 = vsel %vm15106_vm14, 3.0, %v2642_v30  ;;  %v2666_v61 = vsel %vm15107_vm2, 3.0, %v2644_v26  ;;  %v2791_v56 = vrot.slane %v2663_v19, 7  ;;  %v2793_v62 = vrot.slane %v2664_v44, 7  ;;  %vm15125_vm14 = vmmov %vm15108_vm6 }
 0x3d3   :  { %v2920_v50 = vsel %vm15108_vm6, %v2915_v31, %v2919_v8  ;;  %v2795_v5 = vrot.slane %v2665_v2, 7  ;;  %v2922_v57 = vsel %vm15109_vm10, %v2917_v13, %v2921_v25  ;;  %v2797_v16 = vrot.slane %v2666_v61, 7  ;;  %vm15126_vm2 = vmmov %vm15108_vm6 }
 0x3d4   :  { %v15111_v20 = vrot.slane %v15110_v6, 7  ;;  %v15112_v38 = vmov %v15098_v58  ;;  %v15114_v23 = vrot.slane %v15113_v10, 7  ;;  %v15115_v45 = vmov %v15100_v32 }
 0x3d5   :  { %v7726_v42 = vpack.i.bf16 %v2922_v57, %v2920_v50  ;;  %v2792_v31 = vsel %vm14821_vm7, %v2787_v28, %v2791_v56  ;;  %v2794_v33 = vsel %vm14821_vm7, %v2789_v46, %v2793_v62  ;;  %v2796_v13 = vsel %vm14821_vm7, %v2791_v56, %v2795_v5 }
 0x3d6   :  { %v2646_v34 = vsel %vm14821_vm7, %v15112_v38, %v15111_v20  ;;  %v2648_v18 = vsel %vm14821_vm7, %v15115_v45, %v15114_v23  ;;  %v2798_v37 = vsel %vm14821_vm7, %v2793_v62, %v2797_v16  ;;  %v2817_v35 = vsel %vm2711_vm3, 4.0, %v2792_v31  ;;  %vm15119_vm3 = vmmov %vm15092_vm13 }
 0x3d7   :  { %vm15116_vm0 = vcmp.gt.f32.partialorder %v8359_v51, %v10993_v55  ;;  %vm15117_vm4 = vcmp.gt.f32.partialorder %v8362_v52, %v10969_v3  ;;  %7727 = vrot.lane.b32.xlu1 %v7726_v42, %s8011_s27  ;;  %vm15118_vm5 = vcmp.gt.f32.partialorder %v8372_v54, %v11034_v53  ;;  %v2975_v46 = vrot.slane %v2817_v35, 4  ;;  %vm15121_vm13 = vmmov %vm15108_vm6 }
 0x3d8   :  { %v2818_v0 = vsel %vm15116_vm0, 4.0, %v2794_v33  ;;  %v2819_v36 = vsel %vm15117_vm4, 4.0, %v2796_v13  ;;  %v2820_v28 = vsel %vm15118_vm5, 4.0, %v2798_v37  ;;  %v2667_v22 = vsel %vm15119_vm3, 3.0, %v2646_v34 }
 0x3d9   :  { %v2977_v41 = vrot.slane %v2818_v0, 4  ;;  %v2979_v29 = vrot.slane %v2819_v36, 4  ;;  %v2981_v58 = vrot.slane %v2820_v28, 4  ;;  %v2668_v55 = vsel %vm15120_vm12, 3.0, %v2648_v18 }
 0x3da   :  { %v2976_v7 = vsel %vm15122_vm11, %v2970_v60, %v2975_v46  ;;  %v2799_v53 = vrot.slane %v2667_v22, 7  ;;  %v2801_v26 = vrot.slane %v2668_v55, 7  ;;  %vm15128_vm5 = vcmask 7168  }
 0x3db   :  { %v2980_v3 = vsel %vm15121_vm13, %v2975_v46, %v2979_v29  ;;  %v2978_v30 = vsel %vm15123_vm9, %v2973_v11, %v2977_v41  ;;  %v2982_v32 = vsel %vm15124_vm8, %v2977_v41, %v2981_v58  ;;  %vm15131_vm11 = vmmov %vm15128_vm5 }
 0x3dc   :  { %v7736_v59 = vpack.i.bf16 %v2978_v30, %v2976_v7  ;;  %v7741_v49 = vpack.i.bf16 %v2982_v32, %v2980_v3  ;;  %v2800_v39 = vsel %vm14821_vm7, %v2795_v5, %v2799_v53  ;;  %v2802_v43 = vsel %vm14821_vm7, %v2797_v16, %v2801_v26 }
 0x3dd   :  { %v2821_v24 = vsel %vm15105_vm1, 4.0, %v2800_v39  ;;  %v2822_v60 = vsel %vm2716_vm15, 4.0, %v2802_v43 }
 0x3de   :  { %7737 = vrot.lane.b32.xlu1 %v7736_v59, %s8011_s27  ;;  %7742 = vrot.lane.b32.xlu0 %v7741_v49, %s8011_s27  ;;  %v2983_v11 = vrot.slane %v2821_v24, 4  ;;  %v2985_v9 = vrot.slane %v2822_v60, 4 }
 0x3e0   :  { %v2984_v14 = vsel %vm15125_vm14, %v2979_v29, %v2983_v11  ;;  %v2986_v27 = vsel %vm15126_vm2, %v2981_v58, %v2985_v9 }
 0x3e1   :  { %v7746_v40 = vpack.i.bf16 %v2986_v27, %v2984_v14 }
 0x3e3   :  { %7747 = vrot.lane.b32.xlu1 %v7746_v40, %s8011_s27 }
 0x40b   :  { %v11322_v8 = vpop.permute.xlu0 %2851 }
 0x40c   :  { %vm2879_vm6 = vcmp.gt.f32.partialorder %v14929_v63, %v11322_v8 }
 0x40d   :  { %v2887_v1 = vsel %vm2879_vm6, %v14929_v63, %v11322_v8 }
 0x40e   :  { %v11331_v15 = vrot.slane %v2887_v1, 7 }
 0x410   :  { %vm3055_vm15 = vcmp.gt.f32.partialorder %v14929_v63, %v11331_v15 }
 0x411   :  { %v3065_v19 = vsel %vm3055_vm15, %v14929_v63, %v11331_v15 }
 0x412   :  { %v11340_v25 = vrot.slane %v3065_v19, 7 }
 0x414   :  { %vm14713_vm10 = vcmp.gt.f32.partialorder %v14929_v63, %v11340_v25 }
 0x415   :  { %v3207_v44 = vsel %vm14713_vm10, %v14929_v63, %v11340_v25 }
 0x416   :  { %v11349_v2 = vpop.permute.xlu0 %2855  ;;  %v11351_v61 = vrot.slane %v3207_v44, 7 }
 0x417   :  { %15127 = vst [vmem:[#allocation18_spill] sm:$0xff] %v11349_v2  ;;  %vm14726_vm0 = vcmp.gt.f32.partialorder %v8311_v17, %v11349_v2 }
 0x418   :  { %v2889_v50 = vsel %vm14726_vm0, %v8311_v17, %v11349_v2  ;;  %vm3351_vm4 = vcmp.gt.f32.partialorder %v14929_v63, %v11351_v61 }
 0x419   :  { %v3033_v56 = vrot.slane %v2889_v50, 7  ;;  %v3361_v62 = vsel %vm3351_vm4, %v14929_v63, %v11351_v61 }
 0x41a   :  { %v11381_v20 = vrot.slane %v3361_v62, 7 }
 0x41b   :  { %v2854_v5 = vpop.permute.xlu1 %2853  ;;  %v11369_v57 = vsel %vm14821_vm7, %v11331_v15, %v3033_v56 }
 0x41c   :  { %v11373_v16 = vsel %vm15128_vm5, %v11322_v8, %v2854_v5  ;;  %vm14698_vm3 = vcmp.gt.f32.partialorder %v8311_v17, %v11369_v57  ;;  %15130 = vst [vmem:[#allocation19_spill] sm:$0xff] %v11381_v20  ;;  %vm14695_vm1 = vcmp.gt.f32.partialorder %v14929_v63, %v11381_v20 }
 0x41d   :  { %vm2880_vm12 = vcmp.gt.f32.partialorder %v14932_v48, %v11373_v16  ;;  %v11379_v6 = vpop.permute.xlu0 %2859  ;;  %v3067_v38 = vsel %vm14698_vm3, %v8311_v17, %v11369_v57  ;;  %v11454_v22 = vsel %vm14695_vm1, %v14929_v63, %v11381_v20 }
 0x41e   :  { %15129 = vst [vmem:[#allocation21_spill] sm:$0xff] %v11379_v6  ;;  %v2888_v34 = vsel %vm2880_vm12, %v14932_v48, %v11373_v16  ;;  %vm14727_vm13 = vcmp.gt.f32.partialorder %v8354_v47, %v11379_v6  ;;  %v3171_v31 = vrot.slane %v3067_v38, 7  ;;  %15134 = vst [vmem:[#allocation22_spill] sm:$0xff] %v11454_v22 }
 0x41f   :  { %v11395_v10 = vrot.slane %v2888_v34, 7  ;;  %v2891_v23 = vsel %vm14727_vm13, %v8354_v47, %v11379_v6 }
 0x420   :  { %v3037_v18 = vrot.slane %v2891_v23, 7  ;;  %v11464_v7 = vsel %vm14821_vm7, %v11340_v25, %v3171_v31 }
 0x421   :  { %vm3056_vm9 = vcmp.gt.f32.partialorder %v14932_v48, %v11395_v10 }
 0x422   :  { %v2858_v45 = vpop.permute.xlu1 %2857  ;;  %v3066_v13 = vsel %vm3056_vm9, %v14932_v48, %v11395_v10  ;;  %v11420_v37 = vsel %vm14821_vm7, %v3033_v56, %v3037_v18 }
 0x423   :  { %v11404_v42 = vsel %vm15131_vm11, %v11349_v2, %v2858_v45  ;;  %v11429_v0 = vrot.slane %v3066_v13, 7  ;;  %vm14697_vm2 = vcmp.gt.f32.partialorder %v8354_v47, %v11420_v37 }
 0x424   :  { %15132 = vst [vmem:[#allocation26_spill] sm:$0xff] %v11404_v42  ;;  %vm14725_vm8 = vcmp.gt.f32.partialorder %v8315_v21, %v11404_v42  ;;  %v11410_v33 = vpop.permute.xlu0 %2863  ;;  %v3069_v41 = vsel %vm14697_vm2, %v8354_v47, %v11420_v37 }
 0x425   :  { %v2890_v35 = vsel %vm14725_vm8, %v8315_v21, %v11404_v42  ;;  %vm14696_vm14 = vcmp.gt.f32.partialorder %v8362_v52, %v11410_v33  ;;  %vm14712_vm11 = vcmp.gt.f32.partialorder %v14932_v48, %v11429_v0  ;;  %v3175_v55 = vrot.slane %v3069_v41, 7 }
 0x426   :  { %v3035_v36 = vrot.slane %v2890_v35, 7  ;;  %v2893_v28 = vsel %vm14696_vm14, %v8362_v52, %v11410_v33  ;;  %v2862_v46 = vpop.permute.xlu1 %2861  ;;  %v3208_v53 = vsel %vm14712_vm11, %v14932_v48, %v11429_v0 }
 0x427   :  { %v11443_v29 = vrot.slane %v2893_v28, 7  ;;  %v11447_v58 = vsel %vm15128_vm5, %v11379_v6, %v2862_v46  ;;  %v11482_v32 = vsel %vm14821_vm7, %v3171_v31, %v3175_v55  ;;  %v11522_v1 = vrot.slane %v3208_v53, 7 }
 0x428   :  { %15133 = vst [vmem:[#allocation20_spill] sm:$0xff] %v11447_v58  ;;  %v11460_v3 = vsel %vm14821_vm7, %v11395_v10, %v3035_v36  ;;  %vm14705_vm14 = vcmp.gt.f32.partialorder %v8359_v51, %v11447_v58  ;;  %vm14701_vm3 = vcmp.gt.f32.partialorder %v8354_v47, %v11482_v32 }
 0x429   :  { %vm14702_vm5 = vcmp.gt.f32.partialorder %v8315_v21, %v11460_v3  ;;  %v11470_v30 = vsel %vm14821_vm7, %v3037_v18, %v11443_v29  ;;  %vm14700_vm1 = vcmp.gt.f32.partialorder %v8403_v12, %v11443_v29  ;;  %v11508_v43 = vsel %vm14701_vm3, %v8354_v47, %v11482_v32 }
 0x42a   :  { %v3068_v59 = vsel %vm14702_vm5, %v8315_v21, %v11460_v3  ;;  %vm14699_vm2 = vcmp.gt.f32.partialorder %v8362_v52, %v11470_v30  ;;  %v3073_v39 = vsel %vm14700_vm1, %v8403_v12, %v11443_v29  ;;  %v2892_v11 = vsel %vm14705_vm14, %v8359_v51, %v11447_v58 }
 0x42b   :  { %v3173_v26 = vrot.slane %v3068_v59, 7  ;;  %v3071_v49 = vsel %vm14699_vm2, %v8362_v52, %v11470_v30  ;;  %v3183_v60 = vrot.slane %v3073_v39, 7  ;;  %v3039_v27 = vrot.slane %v2892_v11, 7 }
 0x42c   :  { %v3179_v24 = vrot.slane %v3071_v49, 7  ;;  %vm14704_vm2 = vcmp.gt.f32.partialorder %v8311_v17, %v11464_v7 }
 0x42d   :  { %v11517_v14 = vsel %vm14821_vm7, %v11429_v0, %v3173_v26  ;;  %v11536_v56 = vsel %vm14821_vm7, %v3035_v36, %v3039_v27  ;;  %v11552_v38 = vsel %vm14704_vm2, %v8311_v17, %v11464_v7 }
 0x42e   :  { %v7713_v9 = vpop.permute.xlu0 %7712  ;;  %vm14703_vm1 = vcmp.gt.f32.partialorder %v8315_v21, %v11517_v14  ;;  %v11527_v19 = vsel %vm14821_vm7, %v3175_v55, %v3179_v24  ;;  %v11530_v44 = vsel %vm14821_vm7, %v3179_v24, %v3183_v60  ;;  %vm3060_vm5 = vcmp.gt.f32.partialorder %v8359_v51, %v11536_v56 }
 0x42f   :  { %vm14706_vm3 = vcmp.gt.f32.partialorder %v8362_v52, %v11527_v19  ;;  %v7715_v62 = vunpack.i.h.bf16 %v7713_v9  ;;  %v11543_v5 = vsel %vm14703_vm1, %v8315_v21, %v11517_v14  ;;  %v7714_v34 = vunpack.i.l.bf16 %v7713_v9 }
 0x430   :  { %v11559_v45 = vsel %vm14706_vm3, %v8362_v52, %v11527_v19  ;;  %v3070_v18 = vsel %vm3060_vm5, %v8359_v51, %v11536_v56  ;;  %vm15136_vm1 = vcmask 7168   ;;  %vm14707_vm2 = vcmp.gt.f32.partialorder %v8403_v12, %v11530_v44 }
 0x431   :  { %15135 = vst [vmem:[#allocation29_spill] sm:$0xff] %v11559_v45  ;;  %v3177_v13 = vrot.slane %v3070_v18, 7  ;;  %vm15137_vm14 = vmmov %vm15136_vm1  ;;  %v11576_v36 = vsel %vm2879_vm6, 3.0, %v7714_v34 }
 0x432   :  { %v2939_v35 = vsel %vm15137_vm14, %v7714_v34, %v7715_v62  ;;  %v3083_v41 = vrot.slane %v11576_v36, 7 }
 0x433   :  { %v2952_v46 = vsel %vm2880_vm12, 3.0, %v2939_v35  ;;  %v11592_v59 = vsel %vm14821_vm7, %v3173_v26, %v3177_v13  ;;  %v11607_v26 = vsel %vm14707_vm2, %v8403_v12, %v11530_v44 }
 0x434   :  { %v3084_v49 = vrot.slane %v2952_v46, 7  ;;  %v11600_v11 = vsel %vm3055_vm15, 3.0, %v3083_v41  ;;  %15138 = vst [vmem:[#allocation28_spill] sm:$0xff] %v11607_v26 }
 0x435   :  { %v2866_v23 = vpop.permute.xlu1 %2865 }
 0x436   :  { %v11568_v31 = vsel %vm15136_vm1, %v11410_v33, %v2866_v23  ;;  %v11612_v34 = vsel %vm3056_vm9, 3.0, %v3084_v49  ;;  %v3227_v23 = vrot.slane %v11600_v11, 7  ;;  %vm3202_vm1 = vcmp.gt.f32.partialorder %v8359_v51, %v11592_v59 }
 0x437   :  { %vm2886_vm3 = vcmp.gt.f32.partialorder %v8372_v54, %v11568_v31  ;;  %v3228_v36 = vrot.slane %v11612_v34, 7  ;;  %v11648_v53 = vsel %vm3202_vm1, %v8359_v51, %v11592_v59 }
 0x438   :  { %v2894_v55 = vsel %vm2886_vm3, %v8372_v54, %v11568_v31  ;;  %v11629_v46 = vsel %vm14713_vm10, 3.0, %v3227_v23  ;;  %vm15144_vm10 = vcmask 7168  }
 0x439   :  { %v11594_v39 = vrot.slane %v2894_v55, 7  ;;  %v7718_v24 = vpop.permute.xlu1 %7717  ;;  %15139 = vst [vmem:[#allocation23_spill] sm:$0xff] %v11629_v46  ;;  %v14714_v11 = vrot.slane %v11629_v46, 7  ;;  %v11653_v50 = vsel %vm14712_vm11, 3.0, %v3228_v36 }
 0x43a   :  { %v7723_v9 = vpop.permute.xlu0 %7722  ;;  %v7720_v62 = vunpack.i.h.bf16 %v7718_v24  ;;  %v7719_v35 = vunpack.i.l.bf16 %v7718_v24  ;;  %15140 = vst [vmem:[#allocation24_spill] sm:$0xff] %v11653_v50 }
 0x43b   :  { %v11617_v18 = vsel %vm14821_vm7, %v3039_v27, %v11594_v39  ;;  %vm3064_vm2 = vcmp.gt.f32.partialorder %v8412_v4, %v11594_v39  ;;  %v7725_v24 = vunpack.i.h.bf16 %v7723_v9  ;;  %v7724_v28 = vunpack.i.l.bf16 %v7723_v9 }
 0x43c   :  { %vm14708_vm14 = vcmp.gt.f32.partialorder %v8372_v54, %v11617_v18  ;;  %v3074_v55 = vsel %vm3064_vm2, %v8412_v4, %v11594_v39  ;;  %v2953_v26 = vsel %vm14726_vm0, 3.0, %v7719_v35  ;;  %vm15150_vm0 = vcmp.gt.f32.partialorder %v8354_v47, %v11420_v37 }
 0x43d   :  { %v3072_v27 = vsel %vm14708_vm14, %v8372_v54, %v11617_v18  ;;  %v3185_v60 = vrot.slane %v3074_v55, 7  ;;  %vm15141_vm14 = vcmask 7168   ;;  %v2941_v9 = vsel %vm15144_vm10, %v7724_v28, %v7725_v24 }
 0x43e   :  { %v3181_v34 = vrot.slane %v3072_v27, 7  ;;  %v2940_v45 = vsel %vm15141_vm14, %v7719_v35, %v7720_v62  ;;  %v11661_v27 = vsel %vm3351_vm4, 3.0, %v14714_v11  ;;  %v2955_v35 = vsel %vm14727_vm13, 3.0, %v7724_v28 }
 0x43f   :  { %15142 = vst [vmem:[#allocation32_spill] sm:$0xff] %v11661_v27  ;;  %vm15146_vm10 = vcmp.gt.f32.partialorder %v8359_v51, %v11447_v58  ;;  %v3089_v46 = vrot.slane %v2955_v35, 7  ;;  %v3085_v2 = vrot.slane %v2953_v26, 7  ;;  %vm15151_vm13 = vcmask 7168  }
 0x440   :  { %v11664_v55 = vsel %vm14821_vm7, %v3177_v13, %v3181_v34  ;;  %v11667_v40 = vsel %vm14821_vm7, %v3181_v34, %v3185_v60  ;;  %v2954_v13 = vsel %vm14725_vm8, 3.0, %v2940_v45  ;;  %v11700_v45 = vsel %vm15146_vm10, 3.0, %v2941_v9 }
 0x441   :  { %15143 = vst [vmem:[#allocation30_spill] sm:$0xff] %v11667_v40  ;;  %vm3204_vm14 = vcmp.gt.f32.partialorder %v8372_v54, %v11664_v55  ;;  %vm3206_vm11 = vcmp.gt.f32.partialorder %v8412_v4, %v11667_v40  ;;  %v3091_v22 = vrot.slane %v11700_v45, 7  ;;  %v3087_v6 = vrot.slane %v2954_v13, 7 }
 0x442   :  { %v11685_v60 = vsel %vm3204_vm14, %v8372_v54, %v11664_v55  ;;  %v11692_v62 = vsel %vm3206_vm11, %v8412_v4, %v11667_v40  ;;  %v15147_v9 = vrot.slane %v11552_v38, 7  ;;  %v3086_v35 = vsel %vm14821_vm7, %v3083_v41, %v3085_v2 }
 0x443   :  { %15145 = vst [vmem:[#allocation31_spill] sm:$0xff] %v11692_v62  ;;  %v7733_v24 = vpop.permute.xlu0 %7732  ;;  %v3088_v45 = vsel %vm14821_vm7, %v3084_v49, %v3087_v6  ;;  %v3090_v20 = vsel %vm14821_vm7, %v3085_v2, %v3089_v46  ;;  %v3092_v11 = vsel %vm14821_vm7, %v3087_v6, %v3091_v22  ;;  %vm15148_vm10 = vcmp.gt.f32.partialorder %v8311_v17, %v11369_v57 }
 0x444   :  { %v7735_v40 = vunpack.i.h.bf16 %v7733_v24  ;;  %v7734_v58 = vunpack.i.l.bf16 %v7733_v24  ;;  %v11712_v34 = vsel %vm14821_vm7, %v11351_v61, %v15147_v9  ;;  %v3109_v13 = vsel %vm15148_vm10, 3.0, %v3086_v35 }
 0x445   :  { %vm15149_vm8 = vcmp.gt.f32.partialorder %v8315_v21, %v11460_v3  ;;  %v3111_v9 = vsel %vm15150_vm0, 3.0, %v3090_v20  ;;  %v3112_v41 = vsel %vm3060_vm5, 3.0, %v3092_v11  ;;  %v3229_v2 = vrot.slane %v3109_v13, 7 }
 0x446   :  { %v3110_v24 = vsel %vm15149_vm8, 3.0, %v3088_v45  ;;  %v3233_v6 = vrot.slane %v3111_v9, 7  ;;  %v3235_v28 = vrot.slane %v3112_v41, 7  ;;  %v3003_v42 = vsel %vm15151_vm13, %v7734_v58, %v7735_v40 }
 0x447   :  { %v3231_v49 = vrot.slane %v3110_v24, 7  ;;  %v11734_v35 = vsel %vm2879_vm6, 0.0, %v7734_v58  ;;  %v3230_v27 = vsel %vm14821_vm7, %v3227_v23, %v3229_v2  ;;  %vm15152_vm0 = vcmp.gt.f32.partialorder %v8311_v17, %v11464_v7 }
 0x448   :  { %v3234_v50 = vsel %vm14821_vm7, %v3229_v2, %v3233_v6  ;;  %v11743_v13 = vsel %vm15152_vm0, 3.0, %v3230_v27  ;;  %vm15153_vm13 = vcmp.gt.f32.partialorder %v8315_v21, %v11517_v14  ;;  %vm15155_vm6 = vcmp.gt.f32.partialorder %v8354_v47, %v11482_v32 }
 0x449   :  { %v7728_v26 = vpop.permute.xlu1 %7727  ;;  %v3232_v20 = vsel %vm14821_vm7, %v3228_v36, %v3231_v49  ;;  %v3236_v11 = vsel %vm14821_vm7, %v3231_v49, %v3235_v28  ;;  %v11753_v58 = vsel %vm15155_vm6, 3.0, %v3234_v50  ;;  %v15157_v40 = vrot.slane %v11508_v43, 7 }
 0x44a   :  { %v7730_v45 = vunpack.i.h.bf16 %v7728_v26  ;;  %v7729_v62 = vunpack.i.l.bf16 %v7728_v26  ;;  %v11748_v8 = vsel %vm15153_vm13, 3.0, %v3232_v20  ;;  %15156 = vst [vmem:[#allocation34_spill] sm:$0xff] %v11753_v58  ;;  %v15158_v23 = vrot.slane %v11552_v38, 7 }
 0x44b   :  { %15154 = vst [vmem:[#allocation25_spill] sm:$0xff] %v11748_v8  ;;  %v11765_v27 = vsel %vm3202_vm1, 3.0, %v3236_v11  ;;  %v15159_v50 = vrot.slane %v11543_v5, 7  ;;  %v11778_v38 = vsel %vm2880_vm12, 0.0, %v3003_v42  ;;  %v14734_v2 = vrot.slane %v11734_v35, 7 }
 0x44c   :  { %v11760_v36 = vsel %vm14821_vm7, %v15158_v23, %v15157_v40  ;;  %vm15160_vm8 = vcmask 7168   ;;  %vm15161_vm10 = vcmp.gt.f32.partialorder %v8362_v52, %v11410_v33  ;;  %v14733_v40 = vrot.slane %v11778_v38, 7 }
 0x44d   :  { %v11773_v41 = vsel %vm14821_vm7, %v11522_v1, %v15159_v50  ;;  %v2942_v49 = vsel %vm15160_vm8, %v7729_v62, %v7730_v45  ;;  %v2957_v20 = vsel %vm15161_vm10, 3.0, %v7729_v62  ;;  %v11795_v16 = vsel %vm3055_vm15, 1.0, %v14734_v2  ;;  %vm15169_vm6 = vmmov %vm15160_vm8 }
 0x44e   :  { %v2958_v23 = vsel %vm2886_vm3, 3.0, %v2942_v49  ;;  %v3093_v50 = vrot.slane %v2957_v20, 7  ;;  %v11802_v62 = vsel %vm3056_vm9, 1.0, %v14733_v40  ;;  %v14737_v49 = vrot.slane %v11795_v16, 7 }
 0x44f   :  { %v3095_v42 = vrot.slane %v2958_v23, 7  ;;  %vm15162_vm12 = vcmp.gt.f32.partialorder %v8403_v12, %v11443_v29  ;;  %v14741_v23 = vrot.slane %v11802_v62, 7  ;;  %vm15163_vm15 = vcmp.gt.f32.partialorder %v8362_v52, %v11470_v30 }
 0x450   :  { %v7743_v9 = vpop.permute.xlu0 %7742  ;;  %v3094_v20 = vsel %vm14821_vm7, %v3089_v46, %v3093_v50  ;;  %v3115_v15 = vsel %vm15162_vm12, 3.0, %v3093_v50  ;;  %v7738_v11 = vpop.permute.xlu1 %7737  ;;  %vm15164_vm9 = vcmp.gt.f32.partialorder %v14929_v63, %v11340_v25  ;;  %vm15166_vm0 = vcmp.gt.f32.partialorder %v8372_v54, %v11617_v18 }
 0x451   :  { %v7745_v45 = vunpack.i.h.bf16 %v7743_v9  ;;  %v7744_v24 = vunpack.i.l.bf16 %v7743_v9  ;;  %v3096_v9 = vsel %vm14821_vm7, %v3091_v22, %v3095_v42  ;;  %v3113_v26 = vsel %vm15163_vm15, 3.0, %v3094_v20 }
 0x452   :  { %v3116_v10 = vsel %vm3064_vm2, 3.0, %v3095_v42  ;;  %v11822_v46 = vsel %vm15164_vm9, 2.0, %v14737_v49  ;;  %v3114_v50 = vsel %vm15166_vm0, 3.0, %v3096_v9  ;;  %v3237_v22 = vrot.slane %v3113_v26, 7  ;;  %vm15179_vm9 = vmmov %vm15169_vm6 }
 0x453   :  { %15165 = vst [vmem:[#allocation27_spill] sm:$0xff] %v11822_v46  ;;  %v3241_v40 = vrot.slane %v3115_v15, 7  ;;  %vm15167_vm13 = vcmp.gt.f32.partialorder %v14932_v48, %v11429_v0  ;;  %v14740_v42 = vrot.slane %v11822_v46, 7  ;;  %v3239_v2 = vrot.slane %v3114_v50, 7 }
 0x454   :  { %v11832_v20 = vsel %vm15167_vm13, 2.0, %v14741_v23  ;;  %v3243_v58 = vrot.slane %v3116_v10, 7  ;;  %v3238_v49 = vsel %vm14821_vm7, %v3233_v6, %v3237_v22  ;;  %v3005_v26 = vsel %vm15169_vm6, %v7744_v24, %v7745_v45  ;;  %v15177_v6 = vld [vmem:[#allocation20_spill] sm:$0xff] }
 0x455   :  { %15168 = vst [vmem:[#allocation33_spill] sm:$0xff] %v11832_v20  ;;  %v3242_v8 = vsel %vm14821_vm7, %v3237_v22, %v3241_v40  ;;  %v11844_v0 = vsel %vm3351_vm4, 3.0, %v14740_v42  ;;  %v3240_v15 = vsel %vm14821_vm7, %v3235_v28, %v3239_v2  ;;  %vm15171_vm8 = vcmp.gt.f32.partialorder %v8362_v52, %v11527_v19  ;;  %v7748_v50 = vpop.permute.xlu1 %7747  ;;  %v15175_v40 = vld [vmem:[#allocation21_spill] sm:$0xff] }
 0x456   :  { %15170 = vst [vmem:[#allocation35_spill] sm:$0xff] %v11844_v0  ;;  %v3244_v9 = vsel %vm14821_vm7, %v3239_v2, %v3243_v58  ;;  %v11851_v10 = vsel %vm15171_vm8, 3.0, %v3238_v49  ;;  %v11858_v45 = vsel %vm3204_vm14, 3.0, %v3240_v15  ;;  %v7740_v61 = vunpack.i.h.bf16 %v7738_v11  ;;  %v15182_v49 = vld [vmem:[#allocation26_spill] sm:$0xff]  ;;  %v15204_v58 = vld [vmem:[#allocation29_spill] sm:$0xff] }
 0x457   :  { %15172 = vst [vmem:[#allocation36_spill] sm:$0xff] %v11858_v45  ;;  %vm15173_vm4 = vcmp.gt.f32.partialorder %v8403_v12, %v11530_v44  ;;  %v11868_v2 = vsel %vm3206_vm11, 3.0, %v3244_v9  ;;  %vm15176_vm10 = vcmp.gt.f32.partialorder %v8354_v47, %v15175_v40  ;;  %vm15178_vm12 = vcmp.gt.f32.partialorder %v8359_v51, %v15177_v6  ;;  %v15180_v40 = vld [vmem:[#allocation18_spill] sm:$0xff] }
 0x458   :  { %v11863_v28 = vsel %vm15173_vm4, 3.0, %v3242_v8  ;;  %v3019_v15 = vsel %vm15176_vm10, 0.0, %v7744_v24  ;;  %v3020_v42 = vsel %vm15178_vm12, 0.0, %v3005_v26  ;;  %v7739_v25 = vunpack.i.l.bf16 %v7738_v11 }
 0x459   :  { %vm3353_vm15 = vcmp.gt.f32.partialorder %v8311_v17, %v11712_v34  ;;  %v3131_v8 = vrot.slane %v3019_v15, 7  ;;  %v3133_v23 = vrot.slane %v3020_v42, 7  ;;  %v7750_v22 = vunpack.i.h.bf16 %v7748_v50 }
 0x45a   :  { %v11885_v9 = vsel %vm3353_vm15, %v8311_v17, %v11712_v34  ;;  %v3004_v24 = vsel %vm15179_vm9, %v7739_v25, %v7740_v61  ;;  %vm15181_vm0 = vcmp.gt.f32.partialorder %v8311_v17, %v15180_v40  ;;  %v7749_v6 = vunpack.i.l.bf16 %v7748_v50  ;;  %v15184_v61 = vld [vmem:[#allocation19_spill] sm:$0xff] }
 0x45b   :  { %v3017_v26 = vsel %vm15181_vm0, 0.0, %v7739_v25  ;;  %v3479_v11 = vrot.slane %v11885_v9, 7  ;;  %vm15183_vm13 = vcmp.gt.f32.partialorder %v8315_v21, %v15182_v49  ;;  %vm15185_vm8 = vcmp.gt.f32.partialorder %v8362_v52, %v11410_v33 }
 0x45c   :  { %v3018_v0 = vsel %vm15183_vm13, 0.0, %v3004_v24  ;;  %v3127_v20 = vrot.slane %v3017_v26, 7  ;;  %v3006_v25 = vsel %vm15169_vm6, %v7749_v6, %v7750_v22  ;;  %v3021_v50 = vsel %vm15185_vm8, 0.0, %v7749_v6 }
 0x45d   :  { %v3129_v46 = vrot.slane %v3018_v0, 7  ;;  %v11901_v45 = vsel %vm14821_vm7, %v15184_v61, %v3479_v11  ;;  %vm3355_vm4 = vcmp.gt.f32.partialorder %v8354_v47, %v11760_v36  ;;  %vm3352_vm10 = vcmp.gt.f32.partialorder %v14932_v48, %v11522_v1 }
 0x45e   :  { %vm14752_vm12 = vcmp.gt.f32.partialorder %v8315_v21, %v11773_v41  ;;  %v15186_v0 = vrot.slane %v11734_v35, 7  ;;  %v3132_v24 = vsel %vm14821_vm7, %v3127_v20, %v3131_v8  ;;  %vm3507_vm9 = vcmp.gt.f32.partialorder %v8311_v17, %v11901_v45 }
 0x45f   :  { %v3022_v33 = vsel %vm2886_vm3, 0.0, %v3006_v25  ;;  %v15187_v22 = vrot.slane %v11778_v38, 7  ;;  %v3134_v26 = vsel %vm14821_vm7, %v3129_v46, %v3133_v23  ;;  %vm15188_vm0 = vcmp.gt.f32.partialorder %v8311_v17, %v11369_v57 }
 0x460   :  { %v3128_v49 = vsel %vm14821_vm7, %v15186_v0, %v3127_v20  ;;  %vm15189_vm13 = vcmp.gt.f32.partialorder %v8354_v47, %v11420_v37  ;;  %vm15190_vm6 = vcmp.gt.f32.partialorder %v8315_v21, %v11460_v3  ;;  %v3154_v31 = vsel %vm3060_vm5, 1.0, %v3134_v26 }
 0x461   :  { %v3130_v40 = vsel %vm14821_vm7, %v15187_v22, %v3129_v46  ;;  %v3151_v35 = vsel %vm15188_vm0, 1.0, %v3128_v49  ;;  %v3153_v20 = vsel %vm15189_vm13, 1.0, %v3132_v24  ;;  %v3283_v46 = vrot.slane %v3154_v31, 7  ;;  %v15196_v31 = vld [vmem:[#allocation22_spill] sm:$0xff] }
 0x462   :  { %v3152_v6 = vsel %vm15190_vm6, 1.0, %v3130_v40  ;;  %v3277_v38 = vrot.slane %v3151_v35, 7  ;;  %v3281_v25 = vrot.slane %v3153_v20, 7  ;;  %v11943_v57 = vsel %vm3507_vm9, %v8311_v17, %v11901_v45 }
 0x463   :  { %v3279_v0 = vrot.slane %v3152_v6, 7  ;;  %v3135_v37 = vrot.slane %v3021_v50, 7  ;;  %v15191_v49 = vrot.slane %v11795_v16, 7  ;;  %v3632_v56 = vrot.slane %v11943_v57, 4 }
 0x464   :  { %v3282_v24 = vsel %vm14821_vm7, %v3277_v38, %v3281_v25  ;;  %v3137_v22 = vrot.slane %v3022_v33, 7  ;;  %v15192_v40 = vrot.slane %v11802_v62, 7  ;;  %vm15193_vm3 = vcmp.gt.f32.partialorder %v8311_v17, %v11464_v7 }
 0x465   :  { %v3278_v3 = vsel %vm14821_vm7, %v15191_v49, %v3277_v38  ;;  %v3284_v35 = vsel %vm14821_vm7, %v3279_v0, %v3283_v46  ;;  %vm15194_vm5 = vcmp.gt.f32.partialorder %v8354_v47, %v11482_v32  ;;  %vm15195_vm8 = vcmp.gt.f32.partialorder %v8315_v21, %v11517_v14  ;;  %v15226_v32 = vld [vmem:[#allocation32_spill] sm:$0xff] }
 0x466   :  { %v3280_v26 = vsel %vm14821_vm7, %v15192_v40, %v3279_v0  ;;  %v11957_v20 = vsel %vm15193_vm3, 2.0, %v3278_v3  ;;  %v11962_v16 = vsel %vm15194_vm5, 2.0, %v3282_v24  ;;  %v11972_v62 = vsel %vm3202_vm1, 2.0, %v3284_v35 }
 0x467   :  { %v11967_v50 = vsel %vm15195_vm8, 2.0, %v3280_v26  ;;  %v15197_v38 = vrot.slane %v15196_v31, 4  ;;  %vm15198_vm0 = vcmask 1043456   ;;  %v3136_v14 = vsel %vm14821_vm7, %v3131_v8, %v3135_v37 }
 0x468   :  { %v3138_v59 = vsel %vm14821_vm7, %v3133_v23, %v3137_v22  ;;  %vm15199_vm1 = vcmp.gt.f32.partialorder %v8362_v52, %v11470_v30  ;;  %vm15200_vm13 = vcmp.gt.f32.partialorder %v8403_v12, %v11443_v29  ;;  %v3158_v3 = vsel %vm3064_vm2, 1.0, %v3137_v22 }
 0x469   :  { %v3633_v0 = vsel %vm15198_vm0, %v15197_v38, %v3632_v56  ;;  %v3155_v57 = vsel %vm15199_vm1, 1.0, %v3136_v14  ;;  %v3157_v49 = vsel %vm15200_vm13, 1.0, %v3135_v37  ;;  %vm15201_vm6 = vcmp.gt.f32.partialorder %v8372_v54, %v11617_v18 }
 0x46a   :  { %3649 = vrot.lane.b32.xlu0 %v3633_v0, %s8011_s27  ;;  %v3156_v8 = vsel %vm15201_vm6, 1.0, %v3138_v59  ;;  %v3285_v24 = vrot.slane %v3155_v57, 7  ;;  %v3289_v40 = vrot.slane %v3157_v49, 7  ;;  %v3291_v26 = vrot.slane %v3158_v3, 7 }
 0x46b   :  { %v3287_v23 = vrot.slane %v3156_v8, 7  ;;  %v3365_v30 = vsel %vm3355_vm4, %v8354_v47, %v11760_v36  ;;  %v3362_v29 = vsel %vm3352_vm10, %v14932_v48, %v11522_v1  ;;  %v3364_v39 = vsel %vm14752_vm12, %v8315_v21, %v11773_v41 }
 0x46c   :  { %v3286_v18 = vsel %vm14821_vm7, %v3281_v25, %v3285_v24  ;;  %v3290_v37 = vsel %vm14821_vm7, %v3285_v24, %v3289_v40  ;;  %v3483_v22 = vrot.slane %v3365_v30, 7  ;;  %v12013_v35 = vrot.slane %v3362_v29, 7 }
 0x46d   :  { %v3288_v31 = vsel %vm14821_vm7, %v3283_v46, %v3287_v23  ;;  %v3292_v38 = vsel %vm14821_vm7, %v3287_v23, %v3291_v26  ;;  %vm15202_vm2 = vcmp.gt.f32.partialorder %v8362_v52, %v11527_v19  ;;  %vm15203_vm3 = vcmp.gt.f32.partialorder %v8403_v12, %v11530_v44 }
 0x46e   :  { %v12020_v0 = vsel %vm15202_vm2, 2.0, %v3286_v18  ;;  %v12025_v14 = vsel %vm15203_vm3, 2.0, %v3290_v37  ;;  %v12030_v25 = vsel %vm3204_vm14, 2.0, %v3288_v31  ;;  %v12035_v46 = vsel %vm3206_vm11, 2.0, %v3292_v38  ;;  %v15209_v37 = vld [vmem:[#allocation28_spill] sm:$0xff] }
 0x46f   :  { %v12044_v49 = vsel %vm14821_vm7, %v3479_v11, %v3483_v22  ;;  %v3481_v55 = vrot.slane %v3364_v39, 7  ;;  %vm3506_vm11 = vcmp.gt.f32.partialorder %v14932_v48, %v12013_v35  ;;  %v15205_v3 = vrot.slane %v15204_v58, 7 }
 0x470   :  { %vm14754_vm14 = vcmp.gt.f32.partialorder %v8354_v47, %v12044_v49  ;;  %v15206_v8 = vrot.slane %v11508_v43, 7  ;;  %v15207_v40 = vrot.slane %v11648_v53, 7  ;;  %v15208_v9 = vrot.slane %v11543_v5, 7 }
 0x471   :  { %v3519_v26 = vsel %vm14754_vm14, %v8354_v47, %v12044_v49  ;;  %v12071_v23 = vsel %vm14821_vm7, %v12013_v35, %v3481_v55  ;;  %v3516_v43 = vsel %vm3506_vm11, %v14932_v48, %v12013_v35  ;;  %v15210_v31 = vrot.slane %v15209_v37, 7 }
 0x472   :  { %v12055_v24 = vsel %vm14821_vm7, %v15206_v8, %v15205_v3  ;;  %v12062_v11 = vsel %vm14821_vm7, %v15208_v9, %v15207_v40  ;;  %v3637_v5 = vrot.slane %v3519_v26, 4  ;;  %vm3508_vm8 = vcmp.gt.f32.partialorder %v8315_v21, %v12071_v23 }
 0x473   :  { %vm3357_vm5 = vcmp.gt.f32.partialorder %v8362_v52, %v12055_v24  ;;  %v3634_v30 = vrot.slane %v3516_v43, 4  ;;  %v3518_v39 = vsel %vm3508_vm8, %v8315_v21, %v12071_v23  ;;  %vm3356_vm0 = vcmp.gt.f32.partialorder %v8359_v51, %v12062_v11 }
 0x474   :  { %v3367_v29 = vsel %vm3357_vm5, %v8362_v52, %v12055_v24  ;;  %v15211_v38 = vmov %v15205_v3  ;;  %vm15212_vm1 = vcmask 1043456   ;;  %v3635_v40 = vrot.slane %v3518_v39, 4 }
 0x475   :  { %v3487_v18 = vrot.slane %v3367_v29, 7  ;;  %v12099_v3 = vsel %vm14821_vm7, %v15211_v38, %v15210_v31  ;;  %v3638_v8 = vsel %vm15212_vm1, %v3632_v56, %v3637_v5  ;;  %v3366_v9 = vsel %vm3356_vm0, %v8359_v51, %v12062_v11  ;;  %vm15215_vm6 = vmmov %vm15212_vm1 }
 0x476   :  { %vm14749_vm13 = vcmp.gt.f32.partialorder %v8403_v12, %v12099_v3  ;;  %3653 = vrot.lane.b32.xlu0 %v3638_v8, %s8011_s27  ;;  %v3485_v58 = vrot.slane %v3366_v9, 7  ;;  %v15213_v43 = vrot.slane %v11685_v60, 7  ;;  %v15214_v29 = vrot.slane %v11648_v53, 7  ;;  %v15217_v8 = vld [vmem:[#allocation23_spill] sm:$0xff] }
 0x477   :  { %v12111_v26 = vsel %vm14821_vm7, %v3483_v22, %v3487_v18  ;;  %v3369_v56 = vsel %vm14749_vm13, %v8403_v12, %v12099_v3  ;;  %v3636_v37 = vsel %vm15215_vm6, %v3634_v30, %v3635_v40  ;;  %v15216_v38 = vrot.slane %v11743_v13, 7 }
 0x478   :  { %v12123_v39 = vsel %vm14821_vm7, %v15214_v29, %v15213_v43  ;;  %vm14750_vm2 = vcmp.gt.f32.partialorder %v8362_v52, %v12111_v26  ;;  %v3491_v22 = vrot.slane %v3369_v56, 7  ;;  %3651 = vrot.lane.b32.xlu1 %v3636_v37, %s8011_s27  ;;  %v12137_v31 = vsel %vm14821_vm7, %v3481_v55, %v3485_v58 }
 0x479   :  { %vm14753_vm3 = vcmp.gt.f32.partialorder %v8372_v54, %v12123_v39  ;;  %v3521_v53 = vsel %vm14750_vm2, %v8362_v52, %v12111_v26  ;;  %v15218_v9 = vrot.slane %v15217_v8, 7  ;;  %vm14756_vm1 = vcmp.gt.f32.partialorder %v8359_v51, %v12137_v31  ;;  %v15219_v8 = vld [vmem:[#allocation25_spill] sm:$0xff] }
 0x47a   :  { %v3368_v30 = vsel %vm14753_vm3, %v8372_v54, %v12123_v39  ;;  %v3641_v43 = vrot.slane %v3521_v53, 4  ;;  %v12152_v29 = vsel %vm14821_vm7, %v3487_v18, %v3491_v22  ;;  %v3520_v37 = vsel %vm14756_vm1, %v8359_v51, %v12137_v31 }
 0x47b   :  { %v3384_v56 = vsel %vm14821_vm7, %v15218_v9, %v15216_v38  ;;  %v3489_v55 = vrot.slane %v3368_v30, 7  ;;  %vm14751_vm6 = vcmp.gt.f32.partialorder %v8403_v12, %v12152_v29  ;;  %v15220_v44 = vrot.slane %v15219_v8, 7  ;;  %v15221_v38 = vld [vmem:[#allocation24_spill] sm:$0xff] }
 0x47c   :  { %v15222_v53 = vrot.slane %v15221_v38, 7  ;;  %vm15224_vm13 = vcmask 1043456   ;;  %v3639_v30 = vrot.slane %v3520_v37, 4  ;;  %v3523_v57 = vsel %vm14751_vm6, %v8403_v12, %v12152_v29 }
 0x47d   :  { %v3642_v22 = vsel %vm15224_vm13, %v3637_v5, %v3641_v43  ;;  %v12178_v59 = vsel %vm14821_vm7, %v3485_v58, %v3489_v55  ;;  %vm15225_vm6 = vmmov %vm15224_vm13  ;;  %v15227_v7 = vrot.slane %v15226_v32, 7  ;;  %v15268_v45 = vrot.slane %v11957_v20, 7 }
 0x47e   :  { %v3386_v9 = vsel %vm14821_vm7, %v15222_v53, %v15220_v44  ;;  %v15223_v19 = vmov %v15222_v53  ;;  %3657 = vrot.lane.b32.xlu0 %v3642_v22, %s8011_s27  ;;  %v3645_v44 = vrot.slane %v3523_v57, 4  ;;  %vm14755_vm2 = vcmp.gt.f32.partialorder %v8372_v54, %v12178_v59 }
 0x47f   :  { %v3410_v18 = vsel %vm3352_vm10, 3.0, %v15223_v19  ;;  %v3411_v19 = vsel %vm3353_vm15, 3.0, %v3384_v56  ;;  %v3412_v5 = vsel %vm14752_vm12, 3.0, %v3386_v9  ;;  %v3640_v37 = vsel %vm15224_vm13, %v3635_v40, %v3639_v30  ;;  %vm15240_vm13 = vmmov %vm15225_vm6 }
 0x480   :  { %v3522_v58 = vsel %vm14755_vm2, %v8372_v54, %v12178_v59  ;;  %v3536_v57 = vrot.slane %v3410_v18, 7  ;;  %v3537_v38 = vrot.slane %v3411_v19, 7  ;;  %3655 = vrot.lane.b32.xlu1 %v3640_v37, %s8011_s27  ;;  %v3646_v53 = vsel %vm15225_vm6, %v3641_v43, %v3645_v44  ;;  %v15230_v37 = vld [vmem:[#allocation31_spill] sm:$0xff] }
 0x481   :  { %v3643_v22 = vrot.slane %v3522_v58, 4  ;;  %v3539_v56 = vrot.slane %v3412_v5, 7  ;;  %vm15228_vm12 = vcmp.gt.f32.partialorder %v14929_v63, %v15184_v61  ;;  %v15229_v9 = vmov %v15227_v7 }
 0x482   :  { %v3563_v40 = vsel %vm15228_vm12, 3.0, %v15227_v7  ;;  %v3538_v42 = vsel %vm14821_vm7, %v15229_v9, %v3537_v38  ;;  %v3564_v18 = vsel %vm3506_vm11, 3.0, %v3536_v57  ;;  %v15231_v15 = vrot.slane %v15230_v37, 7  ;;  %3661 = vrot.lane.b32.xlu0 %v3646_v53, %s8011_s27 }
 0x483   :  { %v3703_v19 = vrot.slane %v3563_v40, 4  ;;  %v15232_v43 = vrot.slane %v11685_v60, 7  ;;  %v3644_v7 = vsel %vm15225_vm6, %v3639_v30, %v3643_v22  ;;  %v3540_v32 = vsel %vm14821_vm7, %v3536_v57, %v3539_v56  ;;  %v15233_v60 = vld [vmem:[#allocation34_spill] sm:$0xff] }
 0x484   :  { %v3565_v5 = vsel %vm3507_vm9, 3.0, %v3538_v42  ;;  %v3706_v58 = vrot.slane %v3564_v18, 4  ;;  %v3566_v40 = vsel %vm3508_vm8, 3.0, %v3540_v32  ;;  %v15235_v53 = vrot.slane %v11743_v13, 7  ;;  %3659 = vrot.lane.b32.xlu1 %v3644_v7, %s8011_s27 }
 0x485   :  { %v12213_v44 = vsel %vm14821_vm7, %v15232_v43, %v15231_v15  ;;  %v3704_v9 = vrot.slane %v3565_v5, 4  ;;  %v15234_v15 = vrot.slane %v15233_v60, 7  ;;  %v3707_v57 = vrot.slane %v3566_v40, 4 }
 0x486   :  { %vm3360_vm12 = vcmp.gt.f32.partialorder %v8412_v4, %v12213_v44  ;;  %v15236_v18 = vrot.slane %v11765_v27, 7  ;;  %v15237_v37 = vrot.slane %v15219_v8, 7  ;;  %v15238_v32 = vrot.slane %v11851_v10, 7 }
 0x487   :  { %v3388_v30 = vsel %vm14821_vm7, %v15235_v53, %v15234_v15  ;;  %v3370_v42 = vsel %vm3360_vm12, %v8412_v4, %v12213_v44  ;;  %v15239_v13 = vmov %v15234_v15  ;;  %v3705_v7 = vsel %vm15240_vm13, %v3703_v19, %v3704_v9  ;;  %v15241_v15 = vld [vmem:[#allocation36_spill] sm:$0xff] }
 0x488   :  { %v3390_v43 = vsel %vm14821_vm7, %v15237_v37, %v15236_v18  ;;  %v3392_v5 = vsel %vm14821_vm7, %v15239_v13, %v15238_v32  ;;  %v3493_v40 = vrot.slane %v3370_v42, 7  ;;  %v15242_v53 = vrot.slane %v15241_v15, 7  ;;  %v15245_v13 = vld [vmem:[#allocation27_spill] sm:$0xff] }
 0x489   :  { %v15243_v6 = vmov %v15236_v18  ;;  %v3413_v8 = vsel %vm3355_vm4, 3.0, %v3388_v30  ;;  %v3708_v18 = vsel %vm15225_vm6, %v3706_v58, %v3707_v57  ;;  %v3414_v60 = vsel %vm3356_vm0, 3.0, %v3390_v43 }
 0x48a   :  { %v3394_v33 = vsel %vm14821_vm7, %v15243_v6, %v15242_v53  ;;  %v12263_v19 = vsel %vm3357_vm5, 3.0, %v3392_v5  ;;  %v7751_v6 = vpack.i.bf16 %v3708_v18, %v3705_v7  ;;  %v12271_v42 = vsel %vm14821_vm7, %v3489_v55, %v3493_v40 }
 0x48b   :  { %v12268_v27 = vsel %vm14753_vm3, 3.0, %v3394_v33  ;;  %v3541_v30 = vrot.slane %v3413_v8, 7  ;;  %v3543_v58 = vrot.slane %v3414_v60, 7  ;;  %vm3514_vm13 = vcmp.gt.f32.partialorder %v8412_v4, %v12271_v42  ;;  %v15248_v8 = vld [vmem:[#allocation33_spill] sm:$0xff] }
 0x48c   :  { %v3545_v37 = vrot.slane %v12263_v19, 7  ;;  %v3547_v43 = vrot.slane %v12268_v27, 7  ;;  %v15244_v32 = vrot.slane %v11957_v20, 7  ;;  %v15246_v5 = vrot.slane %v15245_v13, 7  ;;  %7752 = vrot.lane.b32.xlu0 %v7751_v6, %s8011_s27 }
 0x48d   :  { %v3524_v55 = vsel %vm3514_vm13, %v8412_v4, %v12271_v42  ;;  %v3542_v7 = vsel %vm14821_vm7, %v3537_v38, %v3541_v30  ;;  %v3544_v40 = vsel %vm14821_vm7, %v3539_v56, %v3543_v58  ;;  %v15247_v53 = vrot.slane %v11967_v50, 7 }
 0x48e   :  { %v3432_v33 = vsel %vm14821_vm7, %v15246_v5, %v15244_v32  ;;  %v15249_v18 = vrot.slane %v15248_v8, 7  ;;  %v3647_v19 = vrot.slane %v3524_v55, 4  ;;  %v3546_v27 = vsel %vm14821_vm7, %v3541_v30, %v3545_v37 }
 0x48f   :  { %v3548_v6 = vsel %vm14821_vm7, %v3543_v58, %v3547_v43  ;;  %v3567_v32 = vsel %vm14754_vm14, 3.0, %v3542_v7  ;;  %v3568_v38 = vsel %vm14756_vm1, 3.0, %v3544_v40  ;;  %vm15250_vm6 = vcmp.gt.f32.partialorder %v8362_v52, %v12111_v26 }
 0x490   :  { %v3434_v60 = vsel %vm14821_vm7, %v15249_v18, %v15247_v53  ;;  %v3569_v56 = vsel %vm15250_vm6, 3.0, %v3546_v27  ;;  %v3570_v13 = vsel %vm14755_vm2, 3.0, %v3548_v6  ;;  %v3709_v5 = vrot.slane %v3567_v32, 4 }
 0x491   :  { %vm15251_vm3 = vcmask 1043456   ;;  %v3711_v58 = vrot.slane %v3568_v38, 4  ;;  %v3713_v55 = vrot.slane %v3569_v56, 4  ;;  %v3715_v53 = vrot.slane %v3570_v13, 4  ;;  %v15258_v13 = vld [vmem:[#allocation35_spill] sm:$0xff] }
 0x492   :  { %v3648_v30 = vsel %vm15251_vm3, %v3643_v22, %v3647_v19  ;;  %vm15252_vm14 = vmmov %vm15251_vm3  ;;  %v15253_v40 = vmov %v15249_v18  ;;  %v3459_v27 = vsel %vm3353_vm15, 3.0, %v3432_v33  ;;  %vm15254_vm3 = vcmp.gt.f32.partialorder %v8315_v21, %v11773_v41 }
 0x493   :  { %3663 = vrot.lane.b32.xlu1 %v3648_v30, %s8011_s27  ;;  %v3710_v7 = vsel %vm15252_vm14, %v3704_v9, %v3709_v5  ;;  %v3458_v18 = vsel %vm3352_vm10, 3.0, %v15253_v40  ;;  %v3460_v22 = vsel %vm15254_vm3, 3.0, %v3434_v60  ;;  %vm15255_vm6 = vmmov %vm15252_vm14  ;;  %v3585_v56 = vrot.slane %v3459_v27, 7 }
 0x494   :  { %v3714_v19 = vsel %vm15255_vm6, %v3709_v5, %v3713_v55  ;;  %vm15256_vm2 = vmmov %vm15255_vm6  ;;  %v3584_v32 = vrot.slane %v3458_v18, 7  ;;  %v3587_v1 = vrot.slane %v3460_v22, 7  ;;  %v15259_v30 = vrot.slane %v15258_v13, 7 }
 0x495   :  { %v3716_v6 = vsel %vm15256_vm2, %v3711_v58, %v3715_v53  ;;  %vm15257_vm1 = vmmov %vm15256_vm2  ;;  %vm15260_vm15 = vcmp.gt.f32.partialorder %v14929_v63, %v15184_v61  ;;  %v15261_v33 = vrot.slane %v11863_v28, 7  ;;  %v15262_v60 = vrot.slane %v11851_v10, 7 }
 0x496   :  { %v3712_v9 = vsel %vm15257_vm1, %v3707_v57, %v3711_v58  ;;  %v7761_v8 = vpack.i.bf16 %v3716_v6, %v3714_v19  ;;  %v3611_v34 = vsel %vm15260_vm15, 4.0, %v15259_v30  ;;  %v3612_v41 = vsel %vm3506_vm11, 4.0, %v3584_v32  ;;  %vm15276_vm14 = vmmov %vm15257_vm1 }
 0x497   :  { %v7756_v38 = vpack.i.bf16 %v3712_v9, %v3710_v7  ;;  %v3396_v57 = vsel %vm14821_vm7, %v15262_v60, %v15261_v33  ;;  %v15263_v5 = vrot.slane %v11868_v2, 7  ;;  %v15264_v58 = vrot.slane %v15241_v15, 7  ;;  %vm15280_vm2 = vmmov %vm15257_vm1 }
 0x498   :  { %7762 = vrot.lane.b32.xlu0 %v7761_v8, %s8011_s27  ;;  %v15265_v61 = vmov %v15259_v30  ;;  %v3588_v28 = vsel %vm14821_vm7, %v3584_v32, %v3587_v1  ;;  %v3767_v40 = vrot.slane %v3611_v34, 4  ;;  %v3770_v10 = vrot.slane %v3612_v41, 4  ;;  %vm15290_vm15 = vmmov %vm15280_vm2 }
 0x499   :  { %v3398_v7 = vsel %vm14821_vm7, %v15264_v58, %v15263_v5  ;;  %7757 = vrot.lane.b32.xlu1 %v7756_v38, %s8011_s27  ;;  %v3586_v35 = vsel %vm14821_vm7, %v15265_v61, %v3585_v56  ;;  %v3614_v15 = vsel %vm3508_vm8, 4.0, %v3588_v28  ;;  %vm15266_vm10 = vcmp.gt.f32.partialorder %v8403_v12, %v12099_v3 }
 0x49a   :  { %v3613_v2 = vsel %vm3507_vm9, 4.0, %v3586_v35  ;;  %v3417_v18 = vsel %vm15266_vm10, 3.0, %v3396_v57  ;;  %v3418_v27 = vsel %vm3360_vm12, 3.0, %v3398_v7  ;;  %v3771_v19 = vrot.slane %v3614_v15, 4  ;;  %vm15275_vm9 = vmmov %vm15257_vm1 }
 0x49b   :  { %v3768_v22 = vrot.slane %v3613_v2, 4  ;;  %v3549_v6 = vrot.slane %v3417_v18, 7  ;;  %v3551_v9 = vrot.slane %v3418_v27, 7  ;;  %v15267_v32 = vrot.slane %v11962_v16, 7  ;;  %vm15289_vm6 = vmmov %vm15266_vm10 }
 0x49c   :  { %v15269_v23 = vrot.slane %v11972_v62, 7  ;;  %v15270_v38 = vrot.slane %v11967_v50, 7  ;;  %v15271_v30 = vrot.slane %v12020_v0, 7  ;;  %v15273_v33 = vrot.slane %v12030_v25, 7  ;;  %vm15291_vm10 = vmmov %vm15280_vm2 }
 0x49d   :  { %v3436_v8 = vsel %vm14821_vm7, %v15268_v45, %v15267_v32  ;;  %v15272_v34 = vmov %v15267_v32  ;;  %v3769_v57 = vsel %vm15275_vm9, %v3767_v40, %v3768_v22  ;;  %v3772_v5 = vsel %vm15276_vm14, %v3770_v10, %v3771_v19  ;;  %vm15292_vm9 = vmmov %vm15280_vm2 }
 0x49e   :  { %v3438_v13 = vsel %vm14821_vm7, %v15270_v38, %v15269_v23  ;;  %v3440_v41 = vsel %vm14821_vm7, %v15272_v34, %v15271_v30  ;;  %v15274_v60 = vmov %v15269_v23  ;;  %v3550_v50 = vsel %vm14821_vm7, %v3545_v37, %v3549_v6  ;;  %vm15293_vm14 = vmmov %vm15280_vm2 }
 0x49f   :  { %v3442_v20 = vsel %vm14821_vm7, %v15274_v60, %v15273_v33  ;;  %v3552_v58 = vsel %vm14821_vm7, %v3547_v43, %v3551_v9  ;;  %v7771_v7 = vpack.i.bf16 %v3772_v5, %v3769_v57  ;;  %vm15277_vm11 = vcmp.gt.f32.partialorder %v8403_v12, %v12152_v29 }
 0x4a0   :  { %v3571_v16 = vsel %vm15277_vm11, 3.0, %v3550_v50  ;;  %v3572_v61 = vsel %vm3514_vm13, 3.0, %v3552_v58  ;;  %v3461_v62 = vsel %vm3355_vm4, 3.0, %v3436_v8  ;;  %v3462_v37 = vsel %vm3356_vm0, 3.0, %v3438_v13  ;;  %vm15279_vm4 = vmmov %vm15257_vm1 }
 0x4a1   :  { %v3717_v35 = vrot.slane %v3571_v16, 4  ;;  %v3719_v28 = vrot.slane %v3572_v61, 4  ;;  %v3463_v43 = vsel %vm3357_vm5, 3.0, %v3440_v41  ;;  %7772 = vrot.lane.b32.xlu0 %v7771_v7, %s8011_s27  ;;  %vm15278_vm8 = vcmp.gt.f32.partialorder %v8372_v54, %v12123_v39 }
 0x4a2   :  { %v3464_v40 = vsel %vm15278_vm8, 3.0, %v3442_v20  ;;  %v3589_v10 = vrot.slane %v3461_v62, 7  ;;  %v3591_v2 = vrot.slane %v3462_v37, 7  ;;  %v3593_v36 = vrot.slane %v3463_v43, 7  ;;  %vm15295_vm8 = vmmov %vm15280_vm2 }
 0x4a3   :  { %v3718_v15 = vsel %vm15279_vm4, %v3713_v55, %v3717_v35  ;;  %v3720_v18 = vsel %vm15280_vm2, %v3715_v53, %v3719_v28  ;;  %v3595_v27 = vrot.slane %v3464_v40, 7  ;;  %v15281_v11 = vrot.slane %v12025_v14, 7 }
 0x4a4   :  { %v15282_v6 = vmov %v15271_v30  ;;  %v7766_v9 = vpack.i.bf16 %v3720_v18, %v3718_v15  ;;  %v3590_v32 = vsel %vm14821_vm7, %v3585_v56, %v3589_v10  ;;  %v3592_v39 = vsel %vm14821_vm7, %v3587_v1, %v3591_v2 }
 0x4a5   :  { %v3444_v24 = vsel %vm14821_vm7, %v15282_v6, %v15281_v11  ;;  %v3594_v45 = vsel %vm14821_vm7, %v3589_v10, %v3593_v36  ;;  %v3596_v8 = vsel %vm14821_vm7, %v3591_v2, %v3595_v27  ;;  %vm15283_vm5 = vcmp.gt.f32.partialorder %v8354_v47, %v12044_v49 }
 0x4a6   :  { %v3615_v55 = vsel %vm15283_vm5, 4.0, %v3590_v32  ;;  %vm15284_vm0 = vcmp.gt.f32.partialorder %v8359_v51, %v12137_v31  ;;  %vm15285_vm1 = vcmp.gt.f32.partialorder %v8362_v52, %v12111_v26  ;;  %7767 = vrot.lane.b32.xlu1 %v7766_v9, %s8011_s27  ;;  %vm15286_vm3 = vcmp.gt.f32.partialorder %v8372_v54, %v12178_v59 }
 0x4a7   :  { %v3616_v14 = vsel %vm15284_vm0, 4.0, %v3592_v39  ;;  %v3617_v0 = vsel %vm15285_vm1, 4.0, %v3594_v45  ;;  %v3618_v53 = vsel %vm15286_vm3, 4.0, %v3596_v8  ;;  %v3773_v56 = vrot.slane %v3615_v55, 4 }
 0x4a8   :  { %v3775_v1 = vrot.slane %v3616_v14, 4  ;;  %v3777_v23 = vrot.slane %v3617_v0, 4  ;;  %v3779_v38 = vrot.slane %v3618_v53, 4  ;;  %v15287_v49 = vrot.slane %v12035_v46, 7 }
 0x4a9   :  { %v15288_v13 = vmov %v15273_v33  ;;  %v3465_v26 = vsel %vm15289_vm6, 3.0, %v3444_v24  ;;  %v3774_v34 = vsel %vm15291_vm10, %v3768_v22, %v3773_v56  ;;  %vm15296_vm1 = vcmask 7168  }
 0x4aa   :  { %v3446_v31 = vsel %vm14821_vm7, %v15288_v13, %v15287_v49  ;;  %v3778_v30 = vsel %vm15290_vm15, %v3773_v56, %v3777_v23  ;;  %v3776_v59 = vsel %vm15292_vm9, %v3771_v19, %v3775_v1  ;;  %v3780_v46 = vsel %vm15293_vm14, %v3775_v1, %v3779_v38  ;;  %vm15298_vm9 = vmmov %vm15296_vm1 }
 0x4ab   :  { %v3466_v41 = vsel %vm3360_vm12, 3.0, %v3446_v31  ;;  %v7776_v33 = vpack.i.bf16 %v3776_v59, %v3774_v34  ;;  %v3597_v25 = vrot.slane %v3465_v26, 7  ;;  %v7781_v20 = vpack.i.bf16 %v3780_v46, %v3778_v30  ;;  %vm15294_vm12 = vmmov %vm15280_vm2 }
 0x4ac   :  { %v3599_v60 = vrot.slane %v3466_v41, 7 }
 0x4ad   :  { %7777 = vrot.lane.b32.xlu1 %v7776_v33, %s8011_s27  ;;  %v3598_v3 = vsel %vm14821_vm7, %v3593_v36, %v3597_v25  ;;  %7782 = vrot.lane.b32.xlu0 %v7781_v20, %s8011_s27 }
 0x4ae   :  { %v3600_v57 = vsel %vm14821_vm7, %v3595_v27, %v3599_v60  ;;  %v3619_v22 = vsel %vm15277_vm11, 4.0, %v3598_v3 }
 0x4af   :  { %v3620_v44 = vsel %vm3514_vm13, 4.0, %v3600_v57  ;;  %v3781_v19 = vrot.slane %v3619_v22, 4 }
 0x4b0   :  { %v3783_v5 = vrot.slane %v3620_v44, 4 }
 0x4b1   :  { %v3782_v50 = vsel %vm15294_vm12, %v3777_v23, %v3781_v19 }
 0x4b2   :  { %v3784_v58 = vsel %vm15295_vm8, %v3779_v38, %v3783_v5 }
 0x4b3   :  { %v7786_v7 = vpack.i.bf16 %v3784_v58, %v3782_v50 }
 0x4b5   :  { %7787 = vrot.lane.b32.xlu1 %v7786_v7, %s8011_s27 }
 0x4dc   :  { %v12457_v16 = vpop.permute.xlu0 %3649 }
 0x4dd   :  { %vm3677_vm4 = vcmp.gt.f32.partialorder %v14929_v63, %v12457_v16 }
 0x4de   :  { %v3685_v29 = vsel %vm3677_vm4, %v14929_v63, %v12457_v16 }
 0x4df   :  { %v12466_v42 = vrot.slane %v3685_v29, 7 }
 0x4e1   :  { %vm3853_vm13 = vcmp.gt.f32.partialorder %v14929_v63, %v12466_v42 }
 0x4e2   :  { %v3863_v61 = vsel %vm3853_vm13, %v14929_v63, %v12466_v42 }
 0x4e3   :  { %v12475_v62 = vrot.slane %v3863_v61, 7 }
 0x4e5   :  { %vm3995_vm2 = vcmp.gt.f32.partialorder %v14929_v63, %v12475_v62 }
 0x4e6   :  { %v4005_v35 = vsel %vm3995_vm2, %v14929_v63, %v12475_v62 }
 0x4e7   :  { %v12484_v28 = vrot.slane %v4005_v35, 7 }
 0x4e8   :  { %v12486_v37 = vpop.permute.xlu0 %3653 }
 0x4e9   :  { %vm14796_vm5 = vcmp.gt.f32.partialorder %v8311_v17, %v12486_v37  ;;  %vm14780_vm0 = vcmp.gt.f32.partialorder %v14929_v63, %v12484_v28 }
 0x4ea   :  { %v3687_v43 = vsel %vm14796_vm5, %v8311_v17, %v12486_v37  ;;  %v3652_v40 = vpop.permute.xlu1 %3651  ;;  %v4159_v36 = vsel %vm14780_vm0, %v14929_v63, %v12484_v28 }
 0x4eb   :  { %v3831_v10 = vrot.slane %v3687_v43, 7  ;;  %v12499_v2 = vsel %vm15296_vm1, %v12457_v16, %v3652_v40  ;;  %v12523_v6 = vrot.slane %v4159_v36, 7 }
 0x4ec   :  { %vm3678_vm3 = vcmp.gt.f32.partialorder %v14932_v48, %v12499_v2 }
 0x4ed   :  { %v12510_v15 = vsel %vm14821_vm7, %v12466_v42, %v3831_v10  ;;  %v3686_v18 = vsel %vm3678_vm3, %v14932_v48, %v12499_v2  ;;  %15297 = vst [vmem:[#allocation30_spill] sm:$0xff] %v12523_v6  ;;  %vm14759_vm11 = vcmp.gt.f32.partialorder %v14929_v63, %v12523_v6 }
 0x4ee   :  { %vm14766_vm6 = vcmp.gt.f32.partialorder %v8311_v17, %v12510_v15  ;;  %v12519_v27 = vrot.slane %v3686_v18, 7  ;;  %v12604_v59 = vsel %vm14759_vm11, %v14929_v63, %v12523_v6 }
 0x4ef   :  { %v3865_v24 = vsel %vm14766_vm6, %v8311_v17, %v12510_v15  ;;  %15301 = vst [vmem:[#allocation18_spill] sm:$0xff] %v12604_v59 }
 0x4f0   :  { %v12521_v11 = vpop.permute.xlu0 %3657  ;;  %v3969_v9 = vrot.slane %v3865_v24, 7  ;;  %vm14769_vm10 = vcmp.gt.f32.partialorder %v14932_v48, %v12519_v27 }
 0x4f1   :  { %vm14779_vm15 = vcmp.gt.f32.partialorder %v8354_v47, %v12521_v11  ;;  %v3864_v45 = vsel %vm14769_vm10, %v14932_v48, %v12519_v27 }
 0x4f2   :  { %v3689_v32 = vsel %vm14779_vm15, %v8354_v47, %v12521_v11  ;;  %v3656_v39 = vpop.permute.xlu1 %3655  ;;  %v12550_v14 = vsel %vm14821_vm7, %v12475_v62, %v3969_v9  ;;  %v12552_v0 = vrot.slane %v3864_v45, 7 }
 0x4f3   :  { %v3835_v8 = vrot.slane %v3689_v32, 7  ;;  %v12546_v55 = vsel %vm15298_vm9, %v12486_v37, %v3656_v39  ;;  %vm14757_vm12 = vcmp.gt.f32.partialorder %v8311_v17, %v12550_v14 }
 0x4f4   :  { %15299 = vst [vmem:[#allocation21_spill] sm:$0xff] %v12546_v55  ;;  %vm14795_vm14 = vcmp.gt.f32.partialorder %v8315_v21, %v12546_v55  ;;  %v12556_v53 = vpop.permute.xlu0 %3661  ;;  %v12577_v23 = vsel %vm14757_vm12, %v8311_v17, %v12550_v14  ;;  %vm3996_vm1 = vcmp.gt.f32.partialorder %v14932_v48, %v12552_v0 }
 0x4f5   :  { %v12563_v56 = vsel %vm14821_vm7, %v3831_v10, %v3835_v8  ;;  %v3688_v1 = vsel %vm14795_vm14, %v8315_v21, %v12546_v55  ;;  %vm14758_vm8 = vcmp.gt.f32.partialorder %v8362_v52, %v12556_v53  ;;  %15300 = vst [vmem:[#allocation20_spill] sm:$0xff] %v12577_v23  ;;  %v14770_v41 = vrot.slane %v12577_v23, 7 }
 0x4f6   :  { %vm14760_vm9 = vcmp.gt.f32.partialorder %v8354_v47, %v12563_v56  ;;  %v3833_v38 = vrot.slane %v3688_v1, 7  ;;  %v3660_v49 = vpop.permute.xlu1 %3659  ;;  %v3691_v31 = vsel %vm14758_vm8, %v8362_v52, %v12556_v53  ;;  %v4006_v46 = vsel %vm3996_vm1, %v14932_v48, %v12552_v0 }
 0x4f7   :  { %v3867_v13 = vsel %vm14760_vm9, %v8354_v47, %v12563_v56  ;;  %v12597_v34 = vrot.slane %v3691_v31, 7  ;;  %vm15302_vm8 = vcmask 7168   ;;  %v12665_v61 = vrot.slane %v4006_v46, 7 }
 0x4f8   :  { %v3973_v26 = vrot.slane %v3867_v13, 7  ;;  %v12595_v30 = vsel %vm14821_vm7, %v12519_v27, %v3833_v38  ;;  %v12616_v33 = vsel %vm15302_vm8, %v12521_v11, %v3660_v49  ;;  %v12673_v43 = vsel %vm14821_vm7, %v12484_v28, %v14770_v41 }
 0x4f9   :  { %vm14761_vm12 = vcmp.gt.f32.partialorder %v8315_v21, %v12595_v30  ;;  %v12628_v20 = vsel %vm14821_vm7, %v3835_v8, %v12597_v34  ;;  %vm14763_vm11 = vcmp.gt.f32.partialorder %v8403_v12, %v12597_v34  ;;  %15304 = vst [vmem:[#allocation19_spill] sm:$0xff] %v12673_v43 }
 0x4fa   :  { %v12619_v25 = vsel %vm14821_vm7, %v3969_v9, %v3973_v26  ;;  %v3866_v60 = vsel %vm14761_vm12, %v8315_v21, %v12595_v30  ;;  %vm14762_vm9 = vcmp.gt.f32.partialorder %v8362_v52, %v12628_v20  ;;  %v3871_v57 = vsel %vm14763_vm11, %v8403_v12, %v12597_v34 }
 0x4fb   :  { %vm14764_vm8 = vcmp.gt.f32.partialorder %v8354_v47, %v12619_v25  ;;  %v3971_v3 = vrot.slane %v3866_v60, 7  ;;  %v3869_v44 = vsel %vm14762_vm9, %v8362_v52, %v12628_v20  ;;  %v3981_v19 = vrot.slane %v3871_v57, 7 }
 0x4fc   :  { %v12646_v22 = vsel %vm14764_vm8, %v8354_v47, %v12619_v25  ;;  %vm14778_vm12 = vcmp.gt.f32.partialorder %v8359_v51, %v12616_v33  ;;  %v3977_v58 = vrot.slane %v3869_v44, 7 }
 0x4fd   :  { %15303 = vst [vmem:[#allocation26_spill] sm:$0xff] %v12646_v22  ;;  %v12657_v50 = vsel %vm14821_vm7, %v12552_v0, %v3971_v3  ;;  %v3690_v7 = vsel %vm14778_vm12, %v8359_v51, %v12616_v33 }
 0x4fe   :  { %v7753_v5 = vpop.permute.xlu0 %7752  ;;  %vm14765_vm9 = vcmp.gt.f32.partialorder %v8315_v21, %v12657_v50  ;;  %v3837_v35 = vrot.slane %v3690_v7, 7  ;;  %v12684_v36 = vsel %vm14821_vm7, %v3973_v26, %v3977_v58  ;;  %v12687_v9 = vsel %vm14821_vm7, %v3977_v58, %v3981_v19 }
 0x4ff   :  { %v12681_v10 = vsel %vm14765_vm9, %v8315_v21, %v12657_v50  ;;  %v7755_v18 = vunpack.i.h.bf16 %v7753_v5  ;;  %vm14767_vm11 = vcmp.gt.f32.partialorder %v8362_v52, %v12684_v36  ;;  %v7754_v39 = vunpack.i.l.bf16 %v7753_v5 }
 0x500   :  { %15305 = vst [vmem:[#allocation22_spill] sm:$0xff] %v12681_v10  ;;  %v12692_v32 = vsel %vm14821_vm7, %v3833_v38, %v3837_v35  ;;  %v12700_v8 = vsel %vm14767_vm11, %v8362_v52, %v12684_v36  ;;  %vm15307_vm9 = vcmask 7168  }
 0x501   :  { %15306 = vst [vmem:[#allocation29_spill] sm:$0xff] %v12700_v8  ;;  %vm3858_vm8 = vcmp.gt.f32.partialorder %v8359_v51, %v12692_v32  ;;  %vm15308_vm6 = vmmov %vm15307_vm9  ;;  %v12718_v31 = vsel %vm3677_vm4, 4.0, %v7754_v39 }
 0x502   :  { %v3868_v49 = vsel %vm3858_vm8, %v8359_v51, %v12692_v32  ;;  %v3737_v13 = vsel %vm15308_vm6, %v7754_v39, %v7755_v18  ;;  %v3881_v60 = vrot.slane %v12718_v31, 7 }
 0x503   :  { %v3975_v26 = vrot.slane %v3868_v49, 7  ;;  %v12725_v46 = vsel %vm3678_vm3, 4.0, %v3737_v13 }
 0x504   :  { %v3882_v19 = vrot.slane %v12725_v46, 7 }
 0x505   :  { %v3664_v24 = vpop.permute.xlu1 %3663  ;;  %v12737_v18 = vsel %vm14821_vm7, %v3971_v3, %v3975_v26 }
 0x506   :  { %v12706_v1 = vsel %vm15307_vm9, %v12556_v53, %v3664_v24  ;;  %vm14798_vm9 = vcmp.gt.f32.partialorder %v14932_v48, %v12665_v61  ;;  %v12742_v24 = vsel %vm3853_vm13, 4.0, %v3881_v60  ;;  %vm4000_vm6 = vcmp.gt.f32.partialorder %v8359_v51, %v12737_v18 }
 0x507   :  { %vm14768_vm11 = vcmp.gt.f32.partialorder %v8372_v54, %v12706_v1  ;;  %v12751_v13 = vsel %vm14769_vm10, 4.0, %v3882_v19  ;;  %v4025_v31 = vrot.slane %v12742_v24, 7  ;;  %v12760_v46 = vsel %vm4000_vm6, %v8359_v51, %v12737_v18 }
 0x508   :  { %v3692_v5 = vsel %vm14768_vm11, %v8372_v54, %v12706_v1  ;;  %vm15309_vm11 = vcmask 7168   ;;  %15310 = vst [vmem:[#allocation28_spill] sm:$0xff] %v12760_v46 }
 0x509   :  { %v12744_v39 = vrot.slane %v3692_v5, 7 }
 0x50a   :  { %v7763_v57 = vpop.permute.xlu0 %7762 }
 0x50b   :  { %v7758_v44 = vpop.permute.xlu1 %7757  ;;  %v7765_v58 = vunpack.i.h.bf16 %v7763_v57  ;;  %v7764_v7 = vunpack.i.l.bf16 %v7763_v57  ;;  %v4026_v57 = vrot.slane %v12751_v13, 7  ;;  %v12765_v5 = vsel %vm14821_vm7, %v3837_v35, %v12744_v39 }
 0x50c   :  { %v7760_v49 = vunpack.i.h.bf16 %v7758_v44  ;;  %vm3862_vm10 = vcmp.gt.f32.partialorder %v8412_v4, %v12744_v39  ;;  %v7759_v41 = vunpack.i.l.bf16 %v7758_v44 }
 0x50d   :  { %v3739_v3 = vsel %vm15309_vm11, %v7764_v7, %v7765_v58  ;;  %v12773_v58 = vsel %vm3995_vm2, 4.0, %v4025_v31  ;;  %vm3860_vm11 = vcmp.gt.f32.partialorder %v8372_v54, %v12765_v5  ;;  %v3872_v35 = vsel %vm3862_vm10, %v8412_v4, %v12744_v39  ;;  %v15367_v39 = vld [vmem:[#allocation26_spill] sm:$0xff] }
 0x50e   :  { %15311 = vst [vmem:[#allocation23_spill] sm:$0xff] %v12773_v58  ;;  %v12785_v13 = vsel %vm3996_vm1, 4.0, %v4026_v57  ;;  %v14777_v29 = vrot.slane %v12773_v58, 7  ;;  %v3870_v38 = vsel %vm3860_vm11, %v8372_v54, %v12765_v5  ;;  %v3983_v24 = vrot.slane %v3872_v35, 7 }
 0x50f   :  { %15312 = vst [vmem:[#allocation25_spill] sm:$0xff] %v12785_v13  ;;  %v3979_v40 = vrot.slane %v3870_v38, 7  ;;  %v12797_v45 = vsel %vm14779_vm15, 4.0, %v7764_v7  ;;  %v12802_v59 = vsel %vm14778_vm12, 4.0, %v3739_v3  ;;  %v15314_v7 = vrot.slane %v12785_v13, 7 }
 0x510   :  { %v12809_v6 = vsel %vm14780_vm0, 4.0, %v14777_v29  ;;  %vm15316_vm0 = vcmask 7168   ;;  %v15318_v10 = vrot.slane %v12802_v59, 7 }
 0x511   :  { %15313 = vst [vmem:[#allocation24_spill] sm:$0xff] %v12809_v6  ;;  %v12818_v8 = vsel %vm14798_vm9, 4.0, %v15314_v7  ;;  %v12822_v58 = vsel %vm14821_vm7, %v3975_v26, %v3979_v40  ;;  %v12825_v29 = vsel %vm14821_vm7, %v3979_v40, %v3983_v24  ;;  %v3738_v44 = vsel %vm15316_vm0, %v7759_v41, %v7760_v49 }
 0x512   :  { %15315 = vst [vmem:[#allocation32_spill] sm:$0xff] %v12818_v8  ;;  %vm4002_vm12 = vcmp.gt.f32.partialorder %v8372_v54, %v12822_v58  ;;  %vm14797_vm15 = vcmp.gt.f32.partialorder %v8412_v4, %v12825_v29  ;;  %v3751_v24 = vsel %vm14796_vm5, 4.0, %v7759_v41  ;;  %v3752_v49 = vsel %vm14795_vm14, 4.0, %v3738_v44 }
 0x513   :  { %v7773_v7 = vpop.permute.xlu0 %7772  ;;  %v12838_v26 = vsel %vm4002_vm12, %v8372_v54, %v12822_v58  ;;  %v12845_v40 = vsel %vm14797_vm15, %v8412_v4, %v12825_v29  ;;  %vm4003_vm0 = vcmp.gt.f32.partialorder %v8403_v12, %v12687_v9  ;;  %v3883_v8 = vrot.slane %v3751_v24, 7 }
 0x514   :  { %v3885_v6 = vrot.slane %v3752_v49, 7  ;;  %v7775_v13 = vunpack.i.h.bf16 %v7773_v7  ;;  %v7774_v46 = vunpack.i.l.bf16 %v7773_v7  ;;  %v15317_v44 = vrot.slane %v12797_v45, 7 }
 0x515   :  { %v3884_v41 = vsel %vm14821_vm7, %v3881_v60, %v3883_v8  ;;  %vm15319_vm14 = vcmp.gt.f32.partialorder %v8311_v17, %v12510_v15  ;;  %vm15320_vm5 = vcmp.gt.f32.partialorder %v8315_v21, %v12595_v30  ;;  %vm15321_vm15 = vcmp.gt.f32.partialorder %v8354_v47, %v12563_v56 }
 0x516   :  { %v3886_v43 = vsel %vm14821_vm7, %v3882_v19, %v3885_v6  ;;  %v3888_v55 = vsel %vm14821_vm7, %v3883_v8, %v15317_v44  ;;  %v3890_v3 = vsel %vm14821_vm7, %v3885_v6, %v15318_v10  ;;  %v3907_v24 = vsel %vm15319_vm14, 4.0, %v3884_v41 }
 0x517   :  { %v3909_v60 = vsel %vm15321_vm15, 4.0, %v3888_v55  ;;  %v3910_v8 = vsel %vm3858_vm8, 4.0, %v3890_v3  ;;  %v4027_v19 = vrot.slane %v3907_v24, 7  ;;  %vm15322_vm9 = vcmask 7168  }
 0x518   :  { %v7768_v35 = vpop.permute.xlu1 %7767  ;;  %v4031_v49 = vrot.slane %v3909_v60, 7  ;;  %v4033_v6 = vrot.slane %v3910_v8, 7  ;;  %v3801_v10 = vsel %vm15322_vm9, %v7774_v46, %v7775_v13  ;;  %v12881_v41 = vsel %vm3677_vm4, 0.0, %v7774_v46 }
 0x519   :  { %v7770_v23 = vunpack.i.h.bf16 %v7768_v35  ;;  %v7769_v22 = vunpack.i.l.bf16 %v7768_v35  ;;  %v3908_v35 = vsel %vm15320_vm5, 4.0, %v3886_v43  ;;  %vm15323_vm5 = vmmov %vm15322_vm9  ;;  %vm15324_vm15 = vcmp.gt.f32.partialorder %v8362_v52, %v12556_v53 }
 0x51a   :  { %v4029_v7 = vrot.slane %v3908_v35, 7  ;;  %v4028_v44 = vsel %vm14821_vm7, %v4025_v31, %v4027_v19  ;;  %v4032_v24 = vsel %vm14821_vm7, %v4027_v19, %v4031_v49  ;;  %vm15325_vm14 = vcmp.gt.f32.partialorder %v8311_v17, %v12550_v14 }
 0x51b   :  { %v3740_v43 = vsel %vm15323_vm5, %v7769_v22, %v7770_v23  ;;  %v3755_v55 = vsel %vm15324_vm15, 4.0, %v7769_v22  ;;  %v12894_v16 = vsel %vm15325_vm14, 4.0, %v4028_v44  ;;  %vm15326_vm4 = vcmp.gt.f32.partialorder %v8315_v21, %v12657_v50 }
 0x51c   :  { %v4030_v3 = vsel %vm14821_vm7, %v4026_v57, %v4029_v7  ;;  %v4034_v35 = vsel %vm14821_vm7, %v4029_v7, %v4033_v6  ;;  %vm15327_vm9 = vcmp.gt.f32.partialorder %v8354_v47, %v12619_v25  ;;  %v12918_v19 = vsel %vm3678_vm3, 0.0, %v3801_v10 }
 0x51d   :  { %v12899_v23 = vsel %vm15326_vm4, 4.0, %v4030_v3  ;;  %v12904_v22 = vsel %vm15327_vm9, 4.0, %v4032_v24  ;;  %v12909_v31 = vsel %vm4000_vm6, 4.0, %v4034_v35  ;;  %v14800_v7 = vrot.slane %v12881_v41, 7 }
 0x51e   :  { %15328 = vst [vmem:[#allocation31_spill] sm:$0xff] %v12904_v22  ;;  %15329 = vst [vmem:[#allocation34_spill] sm:$0xff] %v12909_v31  ;;  %vm15330_vm5 = vcmp.gt.f32.partialorder %v8372_v54, %v12706_v1  ;;  %v3891_v3 = vrot.slane %v3755_v55, 7  ;;  %v14799_v24 = vrot.slane %v12918_v19, 7  ;;  %v12930_v8 = vsel %vm4003_vm0, %v8403_v12, %v12687_v9  ;;  %v15375_v9 = vld [vmem:[#allocation28_spill] sm:$0xff] }
 0x51f   :  { %v7783_v46 = vpop.permute.xlu0 %7782  ;;  %v3756_v44 = vsel %vm15330_vm5, 4.0, %v3740_v43  ;;  %v12937_v10 = vsel %vm3853_vm13, 1.0, %v14800_v7  ;;  %v15331_v43 = vrot.slane %v12797_v45, 7  ;;  %vm15332_vm3 = vcmp.gt.f32.partialorder %v8403_v12, %v12597_v34 }
 0x520   :  { %v3893_v35 = vrot.slane %v3756_v44, 7  ;;  %v7785_v2 = vunpack.i.h.bf16 %v7783_v46  ;;  %v3913_v44 = vsel %vm15332_vm3, 4.0, %v3891_v3  ;;  %vm15333_vm15 = vcmp.gt.f32.partialorder %v14932_v48, %v12519_v27 }
 0x521   :  { %v3892_v55 = vsel %vm14821_vm7, %v15331_v43, %v3891_v3  ;;  %v12951_v13 = vsel %vm15333_vm15, 1.0, %v14799_v24  ;;  %v14808_v42 = vrot.slane %v12937_v10, 7  ;;  %v15334_v57 = vrot.slane %v12802_v59, 7  ;;  %v7778_v3 = vpop.permute.xlu1 %7777 }
 0x522   :  { %vm15335_vm13 = vcmp.gt.f32.partialorder %v8362_v52, %v12628_v20  ;;  %v14807_v38 = vrot.slane %v12951_v13, 7  ;;  %v3914_v27 = vsel %vm3862_vm10, 4.0, %v3893_v35  ;;  %v7784_v31 = vunpack.i.l.bf16 %v7783_v46 }
 0x523   :  { %v3894_v45 = vsel %vm14821_vm7, %v15334_v57, %v3893_v35  ;;  %v3911_v43 = vsel %vm15335_vm13, 4.0, %v3892_v55  ;;  %v12972_v59 = vsel %vm3995_vm2, 2.0, %v14808_v42  ;;  %v4039_v55 = vrot.slane %v3913_v44, 7 }
 0x524   :  { %v3912_v60 = vsel %vm3860_vm11, 4.0, %v3894_v45  ;;  %v4035_v24 = vrot.slane %v3911_v43, 7  ;;  %v4041_v7 = vrot.slane %v3914_v27, 7  ;;  %v12979_v45 = vsel %vm3996_vm1, 2.0, %v14807_v38 }
 0x525   :  { %v4037_v57 = vrot.slane %v3912_v60, 7  ;;  %v14806_v35 = vrot.slane %v12972_v59, 7  ;;  %v14805_v22 = vrot.slane %v12979_v45, 7  ;;  %vm15336_vm2 = vcmp.gt.f32.partialorder %v14929_v63, %v12484_v28 }
 0x526   :  { %v4036_v43 = vsel %vm14821_vm7, %v4031_v49, %v4035_v24  ;;  %v4040_v60 = vsel %vm14821_vm7, %v4035_v24, %v4039_v55  ;;  %vm15337_vm1 = vcmp.gt.f32.partialorder %v8362_v52, %v12684_v36  ;;  %vm15338_vm14 = vcmp.gt.f32.partialorder %v14932_v48, %v12665_v61 }
 0x527   :  { %v4038_v62 = vsel %vm14821_vm7, %v4033_v6, %v4037_v57  ;;  %v4042_v44 = vsel %vm14821_vm7, %v4037_v57, %v4041_v7  ;;  %v12992_v0 = vsel %vm15336_vm2, 3.0, %v14806_v35  ;;  %v12997_v49 = vsel %vm15337_vm1, 4.0, %v4036_v43  ;;  %v7788_v57 = vpop.permute.xlu1 %7787 }
 0x528   :  { %v13002_v6 = vsel %vm4002_vm12, 4.0, %v4038_v62  ;;  %v13007_v46 = vsel %vm4003_vm0, 4.0, %v4040_v60  ;;  %v13014_v28 = vsel %vm15338_vm14, 3.0, %v14805_v22  ;;  %vm15340_vm4 = vcmp.gt.f32.partialorder %v8412_v4, %v12825_v29  ;;  %v15346_v60 = vld [vmem:[#allocation22_spill] sm:$0xff] }
 0x529   :  { %15339 = vst [vmem:[#allocation36_spill] sm:$0xff] %v13014_v28  ;;  %v13020_v24 = vsel %vm15340_vm4, 4.0, %v4042_v44  ;;  %vm15341_vm9 = vcmask 7168   ;;  %vm15342_vm5 = vcmp.gt.f32.partialorder %v8354_v47, %v12521_v11  ;;  %v7780_v35 = vunpack.i.h.bf16 %v7778_v3 }
 0x52a   :  { %v3803_v22 = vsel %vm15341_vm9, %v7784_v31, %v7785_v2  ;;  %v3817_v7 = vsel %vm15342_vm5, 0.0, %v7784_v31  ;;  %v7779_v44 = vunpack.i.l.bf16 %v7778_v3  ;;  %vm15343_vm3 = vcmp.gt.f32.partialorder %v8359_v51, %v12616_v33  ;;  %vm15344_vm15 = vmmov %vm15341_vm9  ;;  %v15348_v31 = vld [vmem:[#allocation19_spill] sm:$0xff]  ;;  %v15349_v33 = vld [vmem:[#allocation21_spill] sm:$0xff] }
 0x52b   :  { %v3818_v27 = vsel %vm15343_vm3, 0.0, %v3803_v22  ;;  %v3929_v38 = vrot.slane %v3817_v7, 7  ;;  %v7790_v55 = vunpack.i.h.bf16 %v7788_v57  ;;  %v7789_v42 = vunpack.i.l.bf16 %v7788_v57  ;;  %vm15351_vm14 = vmmov %vm15341_vm9 }
 0x52c   :  { %v3931_v43 = vrot.slane %v3818_v27, 7  ;;  %v3802_v62 = vsel %vm15344_vm15, %v7779_v44, %v7780_v35  ;;  %vm15345_vm13 = vcmp.gt.f32.partialorder %v8311_v17, %v12486_v37  ;;  %v15347_v28 = vrot.slane %v15346_v60, 7 }
 0x52d   :  { %v3815_v2 = vsel %vm15345_vm13, 0.0, %v7779_v44  ;;  %vm4151_vm2 = vcmp.gt.f32.partialorder %v8311_v17, %v15348_v31  ;;  %vm15350_vm1 = vcmp.gt.f32.partialorder %v8315_v21, %v15349_v33  ;;  %v3804_v35 = vsel %vm15351_vm14, %v7789_v42, %v7790_v55 }
 0x52e   :  { %v13042_v11 = vsel %vm14821_vm7, %v12665_v61, %v15347_v28  ;;  %v3816_v22 = vsel %vm15350_vm1, 0.0, %v3802_v62  ;;  %v3925_v3 = vrot.slane %v3815_v2, 7  ;;  %vm15352_vm4 = vcmp.gt.f32.partialorder %v8362_v52, %v12556_v53 }
 0x52f   :  { %v3819_v37 = vsel %vm15352_vm4, 0.0, %v7789_v42  ;;  %v3927_v7 = vrot.slane %v3816_v22, 7  ;;  %vm15353_vm9 = vcmp.gt.f32.partialorder %v8372_v54, %v12706_v1  ;;  %vm4152_vm5 = vcmp.gt.f32.partialorder %v8315_v21, %v13042_v11 }
 0x530   :  { %v3820_v28 = vsel %vm15353_vm9, 0.0, %v3804_v35  ;;  %v3933_v27 = vrot.slane %v3819_v37, 7  ;;  %v15354_v57 = vrot.slane %v12881_v41, 7  ;;  %v3930_v44 = vsel %vm14821_vm7, %v3925_v3, %v3929_v38 }
 0x531   :  { %v3935_v55 = vrot.slane %v3820_v28, 7  ;;  %vm15355_vm3 = vcmp.gt.f32.partialorder %v14932_v48, %v12665_v61  ;;  %v15356_v1 = vrot.slane %v12918_v19, 7  ;;  %v3932_v2 = vsel %vm14821_vm7, %v3927_v7, %v3931_v43 }
 0x532   :  { %v3926_v62 = vsel %vm14821_vm7, %v15354_v57, %v3925_v3  ;;  %v4160_v53 = vsel %vm15355_vm3, %v14932_v48, %v12665_v61  ;;  %vm15357_vm15 = vcmp.gt.f32.partialorder %v8311_v17, %v12510_v15  ;;  %vm15358_vm13 = vcmp.gt.f32.partialorder %v8354_v47, %v12563_v56 }
 0x533   :  { %v3928_v42 = vsel %vm14821_vm7, %v15356_v1, %v3927_v7  ;;  %v3949_v41 = vsel %vm15357_vm15, 1.0, %v3926_v62  ;;  %v3951_v33 = vsel %vm15358_vm13, 1.0, %v3930_v44  ;;  %vm15359_vm1 = vcmp.gt.f32.partialorder %v8315_v21, %v12595_v30  ;;  %v15396_v1 = vld [vmem:[#allocation25_spill] sm:$0xff] }
 0x534   :  { %v3950_v22 = vsel %vm15359_vm1, 1.0, %v3928_v42  ;;  %v3952_v61 = vsel %vm3858_vm8, 1.0, %v3932_v2  ;;  %v4075_v19 = vrot.slane %v3949_v41, 7  ;;  %v4079_v3 = vrot.slane %v3951_v33, 7 }
 0x535   :  { %v4077_v35 = vrot.slane %v3950_v22, 7  ;;  %v4081_v37 = vrot.slane %v3952_v61, 7  ;;  %v3934_v7 = vsel %vm14821_vm7, %v3929_v38, %v3933_v27  ;;  %v3936_v15 = vsel %vm14821_vm7, %v3931_v43, %v3935_v55  ;;  %v15369_v61 = vld [vmem:[#allocation20_spill] sm:$0xff] }
 0x536   :  { %v15360_v28 = vrot.slane %v12937_v10, 7  ;;  %v4080_v57 = vsel %vm14821_vm7, %v4075_v19, %v4079_v3  ;;  %vm15361_vm14 = vcmp.gt.f32.partialorder %v8362_v52, %v12628_v20  ;;  %v3954_v32 = vsel %vm3860_vm11, 1.0, %v3936_v15 }
 0x537   :  { %v3953_v30 = vsel %vm15361_vm14, 1.0, %v3934_v7  ;;  %v15362_v62 = vrot.slane %v12951_v13, 7  ;;  %v4082_v43 = vsel %vm14821_vm7, %v4077_v35, %v4081_v37  ;;  %vm15363_vm8 = vcmp.gt.f32.partialorder %v8311_v17, %v12550_v14 }
 0x538   :  { %v4076_v56 = vsel %vm14821_vm7, %v15360_v28, %v4075_v19  ;;  %vm15364_vm4 = vcmp.gt.f32.partialorder %v8354_v47, %v12619_v25  ;;  %vm15365_vm9 = vcmp.gt.f32.partialorder %v8315_v21, %v12657_v50  ;;  %v13117_v13 = vsel %vm4000_vm6, 2.0, %v4082_v43 }
 0x539   :  { %v4078_v38 = vsel %vm14821_vm7, %v15362_v62, %v4077_v35  ;;  %v13102_v10 = vsel %vm15363_vm8, 2.0, %v4076_v56  ;;  %v13107_v20 = vsel %vm15364_vm4, 2.0, %v4080_v57  ;;  %vm15366_vm11 = vcmp.gt.f32.partialorder %v8403_v12, %v12597_v34 }
 0x53a   :  { %v13112_v5 = vsel %vm15365_vm9, 2.0, %v4078_v38  ;;  %v3955_v42 = vsel %vm15366_vm11, 1.0, %v3933_v27  ;;  %v3956_v50 = vsel %vm3862_vm10, 1.0, %v3935_v55  ;;  %v4083_v2 = vrot.slane %v3953_v30, 7 }
 0x53b   :  { %v4085_v18 = vrot.slane %v3954_v32, 7  ;;  %v4087_v41 = vrot.slane %v3955_v42, 7  ;;  %v4089_v33 = vrot.slane %v3956_v50, 7  ;;  %v4161_v22 = vsel %vm4151_vm2, %v8311_v17, %v15348_v31 }
 0x53c   :  { %v4162_v34 = vsel %vm4152_vm5, %v8315_v21, %v13042_v11  ;;  %v13139_v27 = vrot.slane %v4160_v53, 7  ;;  %v15368_v55 = vrot.slane %v15367_v39, 7  ;;  %v15370_v19 = vrot.slane %v15369_v61, 7 }
 0x53d   :  { %v4084_v7 = vsel %vm14821_vm7, %v4079_v3, %v4083_v2  ;;  %v4086_v15 = vsel %vm14821_vm7, %v4081_v37, %v4085_v18  ;;  %v4088_v28 = vsel %vm14821_vm7, %v4083_v2, %v4087_v41  ;;  %v4090_v56 = vsel %vm14821_vm7, %v4085_v18, %v4089_v33  ;;  %v15378_v2 = vld [vmem:[#allocation29_spill] sm:$0xff]  ;;  %v15381_v33 = vld [vmem:[#allocation30_spill] sm:$0xff] }
 0x53e   :  { %v13146_v35 = vsel %vm14821_vm7, %v15370_v19, %v15368_v55  ;;  %vm15371_vm10 = vcmp.gt.f32.partialorder %v8362_v52, %v12684_v36  ;;  %v13160_v57 = vsel %vm4002_vm12, 2.0, %v4086_v15  ;;  %v13165_v3 = vsel %vm4003_vm0, 2.0, %v4088_v28  ;;  %v15393_v36 = vld [vmem:[#allocation23_spill] sm:$0xff] }
 0x53f   :  { %v13155_v53 = vsel %vm15371_vm10, 2.0, %v4084_v7  ;;  %15372 = vst [vmem:[#allocation27_spill] sm:$0xff] %v13165_v3  ;;  %vm15373_vm6 = vcmp.gt.f32.partialorder %v8412_v4, %v12825_v29  ;;  %v4277_v62 = vrot.slane %v4161_v22, 7  ;;  %v4279_v38 = vrot.slane %v4162_v34, 7 }
 0x540   :  { %v13170_v37 = vsel %vm15373_vm6, 2.0, %v4090_v56  ;;  %vm4304_vm12 = vcmp.gt.f32.partialorder %v14932_v48, %v13139_v27  ;;  %v15376_v43 = vrot.slane %v15375_v9, 7  ;;  %v15377_v42 = vrot.slane %v15346_v60, 7 }
 0x541   :  { %15374 = vst [vmem:[#allocation33_spill] sm:$0xff] %v13170_v37  ;;  %v4314_v50 = vsel %vm4304_vm12, %v14932_v48, %v13139_v27  ;;  %vm4153_vm0 = vcmp.gt.f32.partialorder %v8354_v47, %v13146_v35  ;;  %v15379_v18 = vrot.slane %v15378_v2, 7  ;;  %v15380_v41 = vmov %v15368_v55 }
 0x542   :  { %v13183_v29 = vsel %vm14821_vm7, %v15377_v42, %v15376_v43  ;;  %v13203_v22 = vsel %vm14821_vm7, %v15381_v33, %v4277_v62  ;;  %v13207_v34 = vsel %vm14821_vm7, %v13139_v27, %v4279_v38  ;;  %v4432_v55 = vrot.slane %v4314_v50, 4 }
 0x543   :  { %vm4154_vm3 = vcmp.gt.f32.partialorder %v8359_v51, %v13183_v29  ;;  %v13199_v60 = vsel %vm14821_vm7, %v15380_v41, %v15379_v18  ;;  %v4163_v61 = vsel %vm4153_vm0, %v8354_v47, %v13146_v35  ;;  %vm4305_vm15 = vcmp.gt.f32.partialorder %v8311_v17, %v13203_v22 }
 0x544   :  { %vm4306_vm13 = vcmp.gt.f32.partialorder %v8315_v21, %v13207_v34  ;;  %v4164_v39 = vsel %vm4154_vm3, %v8359_v51, %v13183_v29  ;;  %v4281_v19 = vrot.slane %v4163_v61, 7  ;;  %v4315_v7 = vsel %vm4305_vm15, %v8311_v17, %v13203_v22 }
 0x545   :  { %v4316_v15 = vsel %vm4306_vm13, %v8315_v21, %v13207_v34  ;;  %v4283_v28 = vrot.slane %v4164_v39, 7  ;;  %v15382_v56 = vrot.slane %v12838_v26, 7  ;;  %v4430_v50 = vrot.slane %v4315_v7, 4 }
 0x546   :  { %v4433_v18 = vrot.slane %v4316_v15, 4  ;;  %v13241_v41 = vsel %vm14821_vm7, %v4277_v62, %v4281_v19  ;;  %v15383_v61 = vrot.slane %v12930_v8, 7  ;;  %v15384_v58 = vrot.slane %v15378_v2, 7  ;;  %v15387_v8 = vld [vmem:[#allocation18_spill] sm:$0xff]  ;;  %v15455_v34 = vld [vmem:[#allocation27_spill] sm:$0xff] }
 0x547   :  { %v13238_v42 = vsel %vm14821_vm7, %v15376_v43, %v15382_v56  ;;  %v13251_v39 = vsel %vm14821_vm7, %v4279_v38, %v4283_v28  ;;  %vm4307_vm1 = vcmp.gt.f32.partialorder %v8354_v47, %v13241_v41  ;;  %v15385_v9 = vrot.slane %v12845_v40, 7 }
 0x548   :  { %v13248_v32 = vsel %vm14821_vm7, %v15384_v58, %v15383_v61  ;;  %v15386_v7 = vmov %v15382_v56  ;;  %vm4155_vm14 = vcmp.gt.f32.partialorder %v8362_v52, %v13199_v60  ;;  %v15388_v2 = vrot.slane %v15387_v8, 4 }
 0x549   :  { %v13260_v62 = vsel %vm14821_vm7, %v15386_v7, %v15385_v9  ;;  %vm15389_vm8 = vcmask 1043456   ;;  %vm14819_vm9 = vcmp.gt.f32.partialorder %v8359_v51, %v13251_v39  ;;  %v4317_v26 = vsel %vm4307_vm1, %v8354_v47, %v13241_v41 }
 0x54a   :  { %v4431_v58 = vsel %vm15389_vm8, %v15388_v2, %v4430_v50  ;;  %vm15390_vm4 = vmmov %vm15389_vm8  ;;  %v4318_v15 = vsel %vm14819_vm9, %v8359_v51, %v13251_v39  ;;  %v4435_v56 = vrot.slane %v4317_v26, 4  ;;  %vm4156_vm11 = vcmp.gt.f32.partialorder %v8372_v54, %v13238_v42 }
 0x54b   :  { %v4434_v38 = vsel %vm15390_vm4, %v4432_v55, %v4433_v18  ;;  %v4437_v55 = vrot.slane %v4318_v15, 4  ;;  %vm14814_vm10 = vcmp.gt.f32.partialorder %v8403_v12, %v13248_v32  ;;  %vm14813_vm6 = vcmp.gt.f32.partialorder %v8412_v4, %v13260_v62  ;;  %vm15391_vm8 = vmmov %vm15390_vm4 }
 0x54c   :  { %v7791_v40 = vpack.i.bf16 %v4434_v38, %v4431_v58  ;;  %v4165_v43 = vsel %vm4155_vm14, %v8362_v52, %v13199_v60  ;;  %v4436_v61 = vsel %vm15391_vm8, %v4430_v50, %v4435_v56  ;;  %v4166_v9 = vsel %vm4156_vm11, %v8372_v54, %v13238_v42 }
 0x54d   :  { %v4167_v7 = vsel %vm14814_vm10, %v8403_v12, %v13248_v32  ;;  %v4168_v8 = vsel %vm14813_vm6, %v8412_v4, %v13260_v62  ;;  %v4438_v50 = vsel %vm15390_vm4, %v4433_v18, %v4437_v55  ;;  %v4285_v2 = vrot.slane %v4165_v43, 7 }
 0x54e   :  { %7792 = vrot.lane.b32.xlu0 %v7791_v40, %s8012_s28  ;;  %v4287_v58 = vrot.slane %v4166_v9, 7  ;;  %v4289_v38 = vrot.slane %v4167_v7, 7  ;;  %v7796_v26 = vpack.i.bf16 %v4438_v50, %v4436_v61  ;;  %v4291_v40 = vrot.slane %v4168_v8, 7  ;;  %v15398_v61 = vld [vmem:[#allocation31_spill] sm:$0xff] }
 0x54f   :  { %v15392_v15 = vrot.slane %v12894_v16, 7  ;;  %v15394_v30 = vrot.slane %v15393_v36, 7  ;;  %v15395_v14 = vrot.slane %v12899_v23, 7  ;;  %v15397_v44 = vrot.slane %v15396_v1, 7 }
 0x550   :  { %v13320_v3 = vsel %vm14821_vm7, %v4281_v19, %v4285_v2  ;;  %v13323_v18 = vsel %vm14821_vm7, %v4283_v28, %v4287_v58  ;;  %v13326_v43 = vsel %vm14821_vm7, %v4285_v2, %v4289_v38  ;;  %v15399_v9 = vrot.slane %v15398_v61, 7  ;;  %7797 = vrot.lane.b32.xlu1 %v7796_v26, %s8012_s28  ;;  %v15401_v2 = vld [vmem:[#allocation34_spill] sm:$0xff] }
 0x551   :  { %v4182_v25 = vsel %vm14821_vm7, %v15394_v30, %v15392_v15  ;;  %v4184_v37 = vsel %vm14821_vm7, %v15397_v44, %v15395_v14  ;;  %v15400_v36 = vmov %v15392_v15  ;;  %v13335_v1 = vsel %vm14821_vm7, %v4287_v58, %v4291_v40 }
 0x552   :  { %v4186_v30 = vsel %vm14821_vm7, %v15400_v36, %v15399_v9  ;;  %vm14818_vm8 = vcmp.gt.f32.partialorder %v8362_v52, %v13320_v3  ;;  %vm14817_vm4 = vcmp.gt.f32.partialorder %v8372_v54, %v13323_v18  ;;  %vm14815_vm6 = vcmp.gt.f32.partialorder %v8403_v12, %v13326_v43 }
 0x553   :  { %vm14816_vm10 = vcmp.gt.f32.partialorder %v8412_v4, %v13335_v1  ;;  %v4319_v16 = vsel %vm14818_vm8, %v8362_v52, %v13320_v3  ;;  %v4320_v44 = vsel %vm14817_vm4, %v8372_v54, %v13323_v18  ;;  %v4321_v14 = vsel %vm14815_vm6, %v8403_v12, %v13326_v43 }
 0x554   :  { %v4322_v19 = vsel %vm14816_vm10, %v8412_v4, %v13335_v1  ;;  %v4439_v28 = vrot.slane %v4319_v16, 4  ;;  %v4441_v7 = vrot.slane %v4320_v44, 4  ;;  %v4443_v8 = vrot.slane %v4321_v14, 4 }
 0x555   :  { %v4445_v50 = vrot.slane %v4322_v19, 4  ;;  %v15402_v58 = vrot.slane %v15401_v2, 7  ;;  %v15403_v38 = vrot.slane %v12899_v23, 7  ;;  %v4209_v40 = vsel %vm4151_vm2, 4.0, %v4182_v25 }
 0x556   :  { %v4210_v15 = vsel %vm4152_vm5, 4.0, %v4184_v37  ;;  %vm15404_vm6 = vcmask 1043456   ;;  %v4211_v23 = vsel %vm4153_vm0, 4.0, %v4186_v30  ;;  %v4335_v19 = vrot.slane %v4209_v40, 7 }
 0x557   :  { %v4188_v26 = vsel %vm14821_vm7, %v15403_v38, %v15402_v58  ;;  %v4444_v9 = vsel %vm15404_vm6, %v4439_v28, %v4443_v8  ;;  %vm15405_vm10 = vmmov %vm15404_vm6  ;;  %v4337_v37 = vrot.slane %v4210_v15, 7  ;;  %v4339_v38 = vrot.slane %v4211_v23, 7 }
 0x558   :  { %v4440_v36 = vsel %vm15405_vm10, %v4435_v56, %v4439_v28  ;;  %vm15406_vm4 = vmmov %vm15404_vm6  ;;  %v4212_v25 = vsel %vm4154_vm3, 4.0, %v4188_v26  ;;  %v15408_v56 = vld [vmem:[#allocation24_spill] sm:$0xff]  ;;  %vm15411_vm10 = vcmp.gt.f32.partialorder %v14929_v63, %v15381_v33  ;;  %v15414_v40 = vrot.slane %v12997_v49, 7 }
 0x559   :  { %v4442_v16 = vsel %vm15406_vm4, %v4437_v55, %v4441_v7  ;;  %vm15407_vm8 = vmmov %vm15406_vm4  ;;  %v4341_v8 = vrot.slane %v4212_v25, 7  ;;  %v15409_v55 = vrot.slane %v15408_v56, 7  ;;  %v15415_v15 = vrot.slane %v15398_v61, 7 }
 0x55a   :  { %v4446_v44 = vsel %vm15407_vm8, %v4441_v7, %v4445_v50  ;;  %v7801_v14 = vpack.i.bf16 %v4442_v16, %v4440_v36  ;;  %v15412_v50 = vld [vmem:[#allocation32_spill] sm:$0xff]  ;;  %vm15423_vm6 = vmmov %vm15406_vm4  ;;  %v15453_v17 = vrot.slane %v13160_v57, 7  ;;  %v15454_v22 = vrot.slane %v13117_v13, 7 }
 0x55b   :  { %v7806_v58 = vpack.i.bf16 %v4446_v44, %v4444_v9  ;;  %v4336_v28 = vsel %vm14821_vm7, %v15409_v55, %v4335_v19  ;;  %v15410_v30 = vmov %v15409_v55  ;;  %v15413_v36 = vrot.slane %v15412_v50, 7  ;;  %vm15424_vm8 = vmmov %vm15406_vm4 }
 0x55c   :  { %7802 = vrot.lane.b32.xlu0 %v7801_v14, %s8012_s28  ;;  %v4361_v7 = vsel %vm15411_vm10, 4.0, %v15410_v30  ;;  %v4190_v9 = vsel %vm14821_vm7, %v15415_v15, %v15414_v40  ;;  %v4340_v44 = vsel %vm14821_vm7, %v4335_v19, %v4339_v38  ;;  %v4342_v14 = vsel %vm14821_vm7, %v4337_v37, %v4341_v8  ;;  %vm15425_vm10 = vmmov %vm15406_vm4 }
 0x55d   :  { %v4362_v26 = vsel %vm4304_vm12, 4.0, %v15413_v36  ;;  %7807 = vrot.lane.b32.xlu1 %v7806_v58, %s8012_s28  ;;  %v15416_v16 = vmov %v15413_v36  ;;  %v4363_v25 = vsel %vm4305_vm15, 4.0, %v4336_v28  ;;  %v4365_v58 = vsel %vm4307_vm1, 4.0, %v4340_v44 }
 0x55e   :  { %v4338_v23 = vsel %vm14821_vm7, %v15416_v16, %v4337_v37  ;;  %v4366_v56 = vsel %vm14819_vm9, 4.0, %v4342_v14  ;;  %v4458_v55 = vrot.slane %v4363_v25, 4  ;;  %v4463_v30 = vrot.slane %v4365_v58, 4 }
 0x55f   :  { %v4364_v61 = vsel %vm4306_vm13, 4.0, %v4338_v23  ;;  %v4465_v37 = vrot.slane %v4366_v56, 4  ;;  %v4457_v50 = vrot.slane %v4361_v7, 4  ;;  %v4460_v36 = vrot.slane %v4362_v26, 4 }
 0x560   :  { %v4461_v19 = vrot.slane %v4364_v61, 4  ;;  %v15417_v28 = vrot.slane %v13002_v6, 7  ;;  %v15418_v40 = vrot.slane %v15401_v2, 7  ;;  %v15419_v16 = vrot.slane %v13007_v46, 7 }
 0x561   :  { %v15420_v23 = vrot.slane %v12997_v49, 7  ;;  %v15421_v14 = vrot.slane %v13020_v24, 7  ;;  %v4464_v7 = vsel %vm15423_vm6, %v4458_v55, %v4463_v30  ;;  %v4459_v2 = vsel %vm15406_vm4, %v4457_v50, %v4458_v55 }
 0x562   :  { %v4192_v15 = vsel %vm14821_vm7, %v15418_v40, %v15417_v28  ;;  %v15422_v25 = vmov %v15417_v28  ;;  %v4466_v26 = vsel %vm15424_vm8, %v4461_v19, %v4465_v37  ;;  %v4213_v46 = vsel %vm4155_vm14, 4.0, %v4190_v9 }
 0x563   :  { %v4194_v44 = vsel %vm14821_vm7, %v15420_v23, %v15419_v16  ;;  %v4196_v61 = vsel %vm14821_vm7, %v15422_v25, %v15421_v14  ;;  %v7816_v58 = vpack.i.bf16 %v4466_v26, %v4464_v7  ;;  %v4462_v49 = vsel %vm15425_vm10, %v4460_v36, %v4461_v19 }
 0x564   :  { %v4214_v24 = vsel %vm4156_vm11, 4.0, %v4192_v15  ;;  %vm15426_vm9 = vcmp.gt.f32.partialorder %v8403_v12, %v13248_v32  ;;  %v7811_v56 = vpack.i.bf16 %v4462_v49, %v4459_v2  ;;  %vm15427_vm6 = vcmp.gt.f32.partialorder %v8412_v4, %v13260_v62 }
 0x565   :  { %v4215_v6 = vsel %vm15426_vm9, 4.0, %v4194_v44  ;;  %v4216_v55 = vsel %vm15427_vm6, 4.0, %v4196_v61  ;;  %v4343_v50 = vrot.slane %v4213_v46, 7  ;;  %v4345_v28 = vrot.slane %v4214_v24, 7  ;;  %7817 = vrot.lane.b32.xlu1 %v7816_v58, %s8012_s28 }
 0x566   :  { %v4347_v9 = vrot.slane %v4215_v6, 7  ;;  %v4349_v40 = vrot.slane %v4216_v55, 7  ;;  %v15428_v19 = vrot.slane %v13102_v10, 7  ;;  %v15429_v36 = vrot.slane %v12972_v59, 7  ;;  %7812 = vrot.lane.b32.xlu0 %v7811_v56, %s8012_s28 }
 0x567   :  { %v15430_v16 = vrot.slane %v13112_v5, 7  ;;  %v15431_v23 = vrot.slane %v12979_v45, 7  ;;  %v4344_v14 = vsel %vm14821_vm7, %v4339_v38, %v4343_v50  ;;  %v4346_v25 = vsel %vm14821_vm7, %v4341_v8, %v4345_v28 }
 0x568   :  { %v4230_v15 = vsel %vm14821_vm7, %v15429_v36, %v15428_v19  ;;  %v15432_v61 = vrot.slane %v13107_v20, 7  ;;  %v15433_v7 = vmov %v15428_v19  ;;  %v15434_v26 = vrot.slane %v13117_v13, 7 }
 0x569   :  { %v4232_v44 = vsel %vm14821_vm7, %v15431_v23, %v15430_v16  ;;  %v15435_v2 = vmov %v15430_v16  ;;  %v4348_v46 = vsel %vm14821_vm7, %v4343_v50, %v4347_v9  ;;  %v4350_v58 = vsel %vm14821_vm7, %v4345_v28, %v4349_v40 }
 0x56a   :  { %v4234_v59 = vsel %vm14821_vm7, %v15433_v7, %v15432_v61  ;;  %v4236_v45 = vsel %vm14821_vm7, %v15435_v2, %v15434_v26  ;;  %vm15436_vm9 = vcmp.gt.f32.partialorder %v8362_v52, %v13320_v3  ;;  %vm15437_vm8 = vcmp.gt.f32.partialorder %v8372_v54, %v13323_v18 }
 0x56b   :  { %v4367_v38 = vsel %vm15436_vm9, 4.0, %v4344_v14  ;;  %v4368_v10 = vsel %vm15437_vm8, 4.0, %v4346_v25  ;;  %vm15438_vm4 = vcmp.gt.f32.partialorder %v8403_v12, %v13326_v43  ;;  %vm15439_vm10 = vcmp.gt.f32.partialorder %v8412_v4, %v13335_v1  ;;  %v15447_v25 = vld [vmem:[#allocation36_spill] sm:$0xff] }
 0x56c   :  { %v4369_v8 = vsel %vm15438_vm4, 4.0, %v4348_v46  ;;  %v4370_v5 = vsel %vm15439_vm10, 4.0, %v4350_v58  ;;  %v4467_v49 = vrot.slane %v4367_v38, 4  ;;  %v4469_v24 = vrot.slane %v4368_v10, 4 }
 0x56d   :  { %v4471_v6 = vrot.slane %v4369_v8, 4  ;;  %v4473_v56 = vrot.slane %v4370_v5, 4  ;;  %v4257_v55 = vsel %vm4151_vm2, 3.0, %v4230_v15  ;;  %v4258_v50 = vsel %vm4152_vm5, 3.0, %v4232_v44 }
 0x56e   :  { %vm15440_vm6 = vcmask 1043456   ;;  %v4259_v40 = vsel %vm4153_vm0, 3.0, %v4234_v59  ;;  %v4260_v19 = vsel %vm4154_vm3, 3.0, %v4236_v45  ;;  %v4383_v16 = vrot.slane %v4257_v55, 7 }
 0x56f   :  { %v4468_v28 = vsel %vm15440_vm6, %v4463_v30, %v4467_v49  ;;  %vm15441_vm9 = vmmov %vm15440_vm6  ;;  %v4385_v23 = vrot.slane %v4258_v50, 7  ;;  %v4387_v44 = vrot.slane %v4259_v40, 7  ;;  %v4389_v30 = vrot.slane %v4260_v19, 7 }
 0x570   :  { %v4470_v9 = vsel %vm15441_vm9, %v4465_v37, %v4469_v24  ;;  %vm15442_vm8 = vmmov %vm15440_vm6  ;;  %v15444_v37 = vrot.slane %v12992_v0, 7  ;;  %vm15446_vm2 = vcmp.gt.f32.partialorder %v14929_v63, %v15381_v33  ;;  %v15448_v61 = vrot.slane %v15447_v25, 7 }
 0x571   :  { %v4472_v36 = vsel %vm15442_vm8, %v4467_v49, %v4471_v6  ;;  %vm15443_vm4 = vmmov %vm15440_vm6  ;;  %v7821_v15 = vpack.i.bf16 %v4470_v9, %v4468_v28  ;;  %v15449_v59 = vrot.slane %v13155_v53, 7  ;;  %v15450_v26 = vrot.slane %v13107_v20, 7 }
 0x572   :  { %v4474_v31 = vsel %vm15443_vm4, %v4469_v24, %v4473_v56  ;;  %v4384_v35 = vsel %vm14821_vm7, %v15444_v37, %v4383_v16  ;;  %v15445_v14 = vmov %v15444_v37  ;;  %v4410_v7 = vsel %vm4304_vm12, 4.0, %v15448_v61  ;;  %vm15461_vm12 = vmmov %vm15443_vm4 }
 0x573   :  { %v7826_v11 = vpack.i.bf16 %v4474_v31, %v4472_v36  ;;  %7822 = vrot.lane.b32.xlu0 %v7821_v15, %s8012_s28  ;;  %v4409_v29 = vsel %vm15446_vm2, 4.0, %v15445_v14  ;;  %v4238_v2 = vsel %vm14821_vm7, %v15450_v26, %v15449_v59  ;;  %v15451_v0 = vmov %v15448_v61  ;;  %vm15462_vm0 = vmmov %vm15443_vm4  ;;  %v4703_v61 = vld [vmem:[%s14562_s6 + $0x98] sm:$0xff] }
 0x574   :  { %v4386_v45 = vsel %vm14821_vm7, %v15451_v0, %v4385_v23  ;;  %v4388_v63 = vsel %vm14821_vm7, %v4383_v16, %v4387_v44  ;;  %v4390_v33 = vsel %vm14821_vm7, %v4385_v23, %v4389_v30  ;;  %v4411_v48 = vsel %vm4305_vm15, 4.0, %v4384_v35  ;;  %vm15463_vm3 = vmmov %vm15462_vm0  ;;  %v4686_v0 = vld [vmem:[%s14562_s6 + $0x10] sm:$0xff] }
 0x575   :  { %7827 = vrot.lane.b32.xlu1 %v7826_v11, %s8012_s28  ;;  %v4412_v20 = vsel %vm4306_vm13, 4.0, %v4386_v45  ;;  %v4413_v27 = vsel %vm4307_vm1, 4.0, %v4388_v63  ;;  %vm15452_vm5 = vcmp.gt.f32.partialorder %v8359_v51, %v13251_v39  ;;  %v4486_v58 = vrot.slane %v4411_v48, 4  ;;  %v15458_v51 = vld [vmem:[#allocation33_spill] sm:$0xff]  ;;  %vm15464_vm15 = vmmov %vm15462_vm0 }
 0x576   :  { %v4414_v46 = vsel %vm15452_vm5, 4.0, %v4390_v33  ;;  %v4489_v38 = vrot.slane %v4412_v20, 4  ;;  %v4491_v10 = vrot.slane %v4413_v27, 4  ;;  %v4485_v5 = vrot.slane %v4409_v29, 4  ;;  %vm15471_vm9 = vmmov %vm15462_vm0  ;;  %v4687_v45 = vld [vmem:[%s14562_s6 + $0x18] sm:$0xff]  ;;  %v4704_v63 = vld [vmem:[%s14562_s6 + $0xa0] sm:$0xff] }
 0x577   :  { %v4493_v8 = vrot.slane %v4414_v46, 4  ;;  %v4488_v49 = vrot.slane %v4410_v7, 4  ;;  %v4240_v21 = vsel %vm14821_vm7, %v15454_v22, %v15453_v17  ;;  %v15456_v24 = vrot.slane %v15455_v34, 7  ;;  %vm15472_vm8 = vmmov %vm15462_vm0  ;;  %v4705_v20 = vld [vmem:[%s14562_s6 + $0xa8] sm:$0xff]  ;;  %v4691_v22 = vld [vmem:[%s14562_s6 + $0x38] sm:$0xff] }
 0x578   :  { %v15457_v47 = vmov %v15449_v59  ;;  %v15459_v39 = vrot.slane %v15458_v51, 7  ;;  %v15460_v6 = vmov %v15453_v17  ;;  %v4492_v55 = vsel %vm15461_vm12, %v4486_v58, %v4491_v10  ;;  %vm15473_vm4 = vmmov %vm15462_vm0  ;;  %v4690_v17 = vld [vmem:[%s14562_s6 + $0x30] sm:$0xff]  ;;  %v4709_v34 = vld [vmem:[%s14562_s6 + $0xc8] sm:$0xff] }
 0x579   :  { %v4242_v41 = vsel %vm14821_vm7, %v15457_v47, %v15456_v24  ;;  %v4494_v50 = vsel %vm15462_vm0, %v4489_v38, %v4493_v8  ;;  %v4487_v13 = vsel %vm15463_vm3, %v4485_v5, %v4486_v58  ;;  %v4261_v28 = vsel %vm4155_vm14, 3.0, %v4238_v2  ;;  %vm15474_vm2 = vmmov %vm15462_vm0  ;;  %v4688_v58 = vld [vmem:[%s14562_s6 + $0x20] sm:$0xff]  ;;  %v4693_v51 = vld [vmem:[%s14562_s6 + $0x48] sm:$0xff] }
 0x57a   :  { %v4244_v56 = vsel %vm14821_vm7, %v15460_v6, %v15459_v39  ;;  %v7836_v9 = vpack.i.bf16 %v4494_v50, %v4492_v55  ;;  %v4490_v53 = vsel %vm15464_vm15, %v4488_v49, %v4489_v38  ;;  %v4262_v40 = vsel %vm4156_vm11, 3.0, %v4240_v21  ;;  %v4689_v38 = vld [vmem:[%s14562_s6 + $0x28] sm:$0xff]  ;;  %v4708_v21 = vld [vmem:[%s14562_s6 + $0xc0] sm:$0xff]  ;;  %v4710_v39 = vld [vmem:[%s14562_s6 + $0xd0] sm:$0xff] }
 0x57b   :  { %vm15465_vm13 = vcmp.gt.f32.partialorder %v8403_v12, %v13248_v32  ;;  %v7831_v19 = vpack.i.bf16 %v4490_v53, %v4487_v13  ;;  %vm15466_vm1 = vcmp.gt.f32.partialorder %v8412_v4, %v13260_v62  ;;  %v4391_v31 = vrot.slane %v4261_v28, 7  ;;  %v4711_v6 = vld [vmem:[%s14562_s6 + $0xd8] sm:$0xff]  ;;  %v4694_v50 = vld [vmem:[%s14562_s6 + $0x50] sm:$0xff]  ;;  %v4712_v28 = vld [vmem:[%s14562_s6 + $0xe0] sm:$0xff] }
 0x57c   :  { %v4263_v57 = vsel %vm15465_vm13, 3.0, %v4242_v41  ;;  %v4264_v36 = vsel %vm15466_vm1, 3.0, %v4244_v56  ;;  %v4393_v15 = vrot.slane %v4262_v40, 7  ;;  %7837 = vrot.lane.b32.xlu1 %v7836_v9, %s8012_s28  ;;  %vm15467_vm14 = vcmp.gt.f32.partialorder %v8362_v52, %v13320_v3  ;;  %v4700_v52 = vld [vmem:[%s14562_s6 + $0x80] sm:$0xff]  ;;  %v4695_v13 = vld [vmem:[%s14562_s6 + $0x58] sm:$0xff]  ;;  %v4713_v9 = vld [vmem:[%s14562_s6 + $0xe8] sm:$0xff] }
 0x57d   :  { %v4395_v60 = vrot.slane %v4263_v57, 7  ;;  %v4397_v16 = vrot.slane %v4264_v36, 7  ;;  %7832 = vrot.lane.b32.xlu0 %v7831_v19, %s8012_s28  ;;  %v4392_v42 = vsel %vm14821_vm7, %v4387_v44, %v4391_v31  ;;  %vm15468_vm11 = vcmp.gt.f32.partialorder %v8372_v54, %v13323_v18  ;;  %v4701_v54 = vld [vmem:[%s14562_s6 + $0x88] sm:$0xff]  ;;  %v4692_v41 = vld [vmem:[%s14562_s6 + $0x40] sm:$0xff]  ;;  %v4714_v36 = vld [vmem:[%s14562_s6 + $0xf0] sm:$0xff] }
 0x57e   :  { %v4394_v11 = vsel %vm14821_vm7, %v4389_v30, %v4393_v15  ;;  %v4415_v62 = vsel %vm15467_vm14, 4.0, %v4392_v42  ;;  %vm15469_vm10 = vcmp.gt.f32.partialorder %v8403_v12, %v13326_v43  ;;  %vm15470_vm6 = vcmp.gt.f32.partialorder %v8412_v4, %v13335_v1  ;;  %v4684_v12 = vld [vmem:[%s14562_s6] sm:$0xff]  ;;  %v4685_v43 = vld [vmem:[%s14562_s6 + $0x8] sm:$0xff]  ;;  %v4702_v1 = vld [vmem:[%s14562_s6 + $0x90] sm:$0xff] }
 0x57f   :  { %v4396_v32 = vsel %vm14821_vm7, %v4391_v31, %v4395_v60  ;;  %v4398_v23 = vsel %vm14821_vm7, %v4393_v15, %v4397_v16  ;;  %v4416_v37 = vsel %vm15468_vm11, 4.0, %v4394_v11  ;;  %v4495_v30 = vrot.slane %v4415_v62, 4  ;;  %v4696_v57 = vld [vmem:[%s14562_s6 + $0x60] sm:$0xff]  ;;  %v4697_v19 = vld [vmem:[%s14562_s6 + $0x68] sm:$0xff]  ;;  %v4715_v31 = vld [vmem:[%s14562_s6 + $0xf8] sm:$0xf] }
 0x580   :  { %v4417_v35 = vsel %vm15469_vm10, 4.0, %v4396_v32  ;;  %v4418_v44 = vsel %vm15470_vm6, 4.0, %v4398_v23  ;;  %v4497_v14 = vrot.slane %v4416_v37, 4  ;;  %v7160_v18 = vpack.c.bf16 %v4701_v54, %v4700_v52  ;;  %vm15475_vm12 = vmmov %vm15462_vm0 }
 0x581   :  { %v4499_v29 = vrot.slane %v4417_v35, 4  ;;  %v4501_v25 = vrot.slane %v4418_v44, 4  ;;  %v4496_v3 = vsel %vm15471_vm9, %v4491_v10, %v4495_v30  ;;  %v7162_v2 = vpack.c.bf16 %v4685_v43, %v4684_v12  ;;  %v4706_v10 = vld [vmem:[%s14562_s6 + $0xb0] sm:$0xff] }
 0x582   :  { %v4498_v4 = vsel %vm15472_vm8, %v4493_v8, %v4497_v14  ;;  %7161 = vmatprep.subr.bf16.mxu0 %v7160_v18  ;;  %v7164_v48 = vpack.c.bf16 %v4703_v61, %v4702_v1  ;;  %v7166_v27 = vpack.c.bf16 %v4687_v45, %v4686_v0  ;;  %v7168_v46 = vpack.c.bf16 %v4705_v20, %v4704_v63  ;;  %v4707_v8 = vld [vmem:[%s14562_s6 + $0xb8] sm:$0xff] }
 0x583   :  { %v4500_v7 = vsel %vm15473_vm4, %v4495_v30, %v4499_v29  ;;  %v4502_v59 = vsel %vm15474_vm2, %v4497_v14, %v4501_v25  ;;  %v7841_v26 = vpack.i.bf16 %v4498_v4, %v4496_v3  ;;  %7163 = vmatpush3.bf16.msra.mxu0 %v7162_v2  ;;  %v7170_v5 = vpack.c.bf16 %v4689_v38, %v4688_v58 }
 0x584   :  { %v7846_v33 = vpack.i.bf16 %v4502_v59, %v4500_v7  ;;  %7165 = vmatprep.subr.bf16.mxu0 %v7164_v48  ;;  %v7172_v49 = vpack.c.bf16 %v4707_v8, %v4706_v10  ;;  %v7174_v24 = vpack.c.bf16 %v4691_v22, %v4690_v17  ;;  %v7176_v47 = vpack.c.bf16 %v4709_v34, %v4708_v21 }
 0x585   :  { %7842 = vrot.lane.b32.xlu0 %v7841_v26, %s8012_s28  ;;  %v7178_v56 = vpack.c.bf16 %v4693_v51, %v4692_v41  ;;  %v7180_v55 = vpack.c.bf16 %v4711_v6, %v4710_v39  ;;  %v7182_v53 = vpack.c.bf16 %v4695_v13, %v4694_v50  ;;  %v7184_v40 = vpack.c.bf16 %v4713_v9, %v4712_v28 }
 0x586   :  { %7847 = vrot.lane.b32.xlu1 %v7846_v33, %s8012_s28  ;;  %v7186_v15 = vpack.c.bf16 %v4697_v19, %v4696_v57  ;;  %v7188_v60 = vpack.c.bf16 %v4715_v31, %v4714_v36  ;;  %vm8013_vm5 = vmmov 1   ;;  %vm4554_vm3 = vcmask 1014784   ;;  %v4503_v36 = vld [vmem:[%s14561_s5] sm:$0xff] }
 0x587   :  { %7167 = vmatpush3.bf16.msra.mxu0 %v7166_v27  ;;  %vm7189_vm0 = vmpackc.low %vm15475_vm12, %vm8013_vm5  ;;  %vm14820_vm15 = vcmask 785408   ;;  %v15476_v31 = vmov 0.0  }
 0x588   :  { %7169 = vmatprep.subr.bf16.mxu0 %v7168_v46 }
 0x58b   :  { %7171 = vmatpush3.bf16.msra.mxu0 %v7170_v5 }
 0x58c   :  { %7173 = vmatprep.subr.bf16.mxu0 %v7172_v49 }
 0x58f   :  { %7175 = vmatpush3.bf16.msra.mxu0 %v7174_v24 }
 0x590   :  { %7177 = vmatprep.subr.bf16.mxu0 %v7176_v47 }
 0x593   :  { %7179 = vmatpush3.bf16.msra.mxu0 %v7178_v56 }
 0x594   :  { %7181 = vmatprep.subr.bf16.mxu0 %v7180_v55 }
 0x597   :  { %7183 = vmatpush3.bf16.msra.mxu0 %v7182_v53 }
 0x598   :  { %7185 = vmatprep.subr.bf16.mxu0 %v7184_v40 }
 0x59b   :  { %7187 = vmatpush3.bf16.msra.mxu0 %v7186_v15  ;;  %v4698_v15 = vld [vmem:[%s14562_s6 + $0x70] sm:$0xff] }
 0x59c   :  { %7190 = vmatprep.subr.msk.bf16.mxu0 %vm7189_vm0, %v7188_v60  ;;  %v4699_v60 = vld [vmem:[%s14562_s6 + $0x78] sm:$0xff]  ;;  %s8014_s6 = smov 127  }
 0x5c0   :  { %v7793_v16 = vpop.permute.xlu0 %7792 }
 0x5c1   :  { %v7795_v42 = vunpack.i.h.bf16 %v7793_v16  ;;  %v7794_v11 = vunpack.i.l.bf16 %v7793_v16  ;;  %v7191_v16 = vpack.c.bf16 %v4699_v60, %v4698_v15 }
 0x5c2   :  { %v7798_v32 = vpop.permute.xlu1 %7797 }
 0x5c3   :  { %v7800_v23 = vunpack.i.h.bf16 %v7798_v32  ;;  %v7799_v62 = vunpack.i.l.bf16 %v7798_v32  ;;  %v4555_v35 = vsel %vm4554_vm3, %v7794_v11, %v7795_v42  ;;  %7192 = vmatpush3.bf16.msra.mxu0 %v7191_v16 }
 0x5c5   :  { %v7136_v37 = vpack.c.bf16 %v7800_v23, %v7795_v42  ;;  %v4556_v44 = vsel %vm4554_vm3, %v7799_v62, %v7800_v23  ;;  %v4820_v62 = vstv %s6832_s20 }
 0x5c6   :  { %v7138_v30 = vpack.c.bf16 %v4556_v44, %v4555_v35  ;;  %v4845_v44 = vstv %s6835_s22 }
 0x5c7   :  { %7137 = vmatprep.subr.bf16.mxu1 %v7136_v37  ;;  %v4828_v37 = vstv %s6833_s21 }
 0x5c8   :  { %7139 = vmatpush1.bf16.msra.mxu1 %v7138_v30 }
 0x5ce   :  { %v7803_v14 = vpop.permute.xlu0 %7802 }
 0x5cf   :  { %v7808_v29 = vpop.permute.xlu1 %7807  ;;  %v7805_v25 = vunpack.i.h.bf16 %v7803_v14  ;;  %v7804_v52 = vunpack.i.l.bf16 %v7803_v14 }
 0x5d0   :  { %v7810_v54 = vunpack.i.h.bf16 %v7808_v29  ;;  %v7809_v12 = vunpack.i.l.bf16 %v7808_v29  ;;  %v4837_v29 = vstv %s6834_s25 }
 0x5d1   :  { %v4557_v3 = vsel %vm4554_vm3, %v7804_v52, %v7805_v25 }
 0x5d2   :  { %v7140_v4 = vpack.c.bf16 %v7810_v54, %v7805_v25  ;;  %v4558_v18 = vsel %vm4554_vm3, %v7809_v12, %v7810_v54  ;;  %v4862_v54 = vstv %s6837_s2 }
 0x5d3   :  { %v7142_v43 = vpack.c.bf16 %v4558_v18, %v4557_v3  ;;  %v4854_v3 = vstv %s6836_s10 }
 0x5d4   :  { %7141 = vmatprep.subr.bf16.mxu1 %v7140_v4 }
 0x5d5   :  { %7143 = vmatpush1.bf16.msra.mxu1 %v7142_v43 }
 0x5d7   :  { %v7818_v1 = vpop.permute.xlu1 %7817 }
 0x5d8   :  { %v7820_v61 = vunpack.i.h.bf16 %v7818_v1  ;;  %v7819_v7 = vunpack.i.l.bf16 %v7818_v1  ;;  %v7813_v59 = vpop.permute.xlu0 %7812 }
 0x5d9   :  { %v7815_v26 = vunpack.i.h.bf16 %v7813_v59  ;;  %v7814_v2 = vunpack.i.l.bf16 %v7813_v59  ;;  %v4809_v59 = vstv %s4808_s0  ;;  %s6842_s0 = sld [smem:[#allocation11 + $0x5]] }
 0x5da   :  { %v4560_v0 = vsel %vm4554_vm3, %v7819_v7, %v7820_v61 }
 0x5db   :  { %v7144_v45 = vpack.c.bf16 %v7820_v61, %v7815_v26  ;;  %v4559_v63 = vsel %vm4554_vm3, %v7814_v2, %v7815_v26  ;;  %v4813_v61 = vstv %s6831_s26 }
 0x5dc   :  { %v7146_v33 = vpack.c.bf16 %v4560_v0, %v4559_v63 }
 0x5dd   :  { %7145 = vmatprep.subr.bf16.mxu1 %v7144_v45 }
 0x5de   :  { %7147 = vmatpush1.bf16.msra.mxu1 %v7146_v33 }
 0x5e5   :  { %v7823_v48 = vpop.permute.xlu0 %7822 }
 0x5e6   :  { %v7825_v27 = vunpack.i.h.bf16 %v7823_v48  ;;  %v7824_v46 = vunpack.i.l.bf16 %v7823_v48 }
 0x5e7   :  { %v7828_v20 = vpop.permute.xlu1 %7827 }
 0x5e8   :  { %v7830_v58 = vunpack.i.h.bf16 %v7828_v20  ;;  %v7829_v38 = vunpack.i.l.bf16 %v7828_v20  ;;  %v4561_v10 = vsel %vm4554_vm3, %v7824_v46, %v7825_v27 }
 0x5ea   :  { %v7148_v8 = vpack.c.bf16 %v7830_v58, %v7825_v27  ;;  %v4562_v5 = vsel %vm4554_vm3, %v7829_v38, %v7830_v58 }
 0x5eb   :  { %v7150_v49 = vpack.c.bf16 %v4562_v5, %v4561_v10 }
 0x5ec   :  { %7149 = vmatprep.subr.bf16.mxu1 %v7148_v8  ;;  %v4871_v8 = vstv %s6838_s9  ;;  %s6841_s9 = sld [smem:[#allocation11 + $0x4]] }
 0x5ed   :  { %7151 = vmatpush1.bf16.msra.mxu1 %v7150_v49 }
 0x5ee   :  { %v7838_v17 = vpop.permute.xlu1 %7837 }
 0x5ef   :  { %v7840_v22 = vunpack.i.h.bf16 %v7838_v17  ;;  %v7839_v21 = vunpack.i.l.bf16 %v7838_v17  ;;  %v7833_v34 = vpop.permute.xlu0 %7832 }
 0x5f0   :  { %v7835_v24 = vunpack.i.h.bf16 %v7833_v34  ;;  %v7834_v47 = vunpack.i.l.bf16 %v7833_v34 }
 0x5f1   :  { %v4564_v41 = vsel %vm4554_vm3, %v7839_v21, %v7840_v22 }
 0x5f2   :  { %v7152_v51 = vpack.c.bf16 %v7840_v22, %v7835_v24  ;;  %v4563_v39 = vsel %vm4554_vm3, %v7834_v47, %v7835_v24 }
 0x5f3   :  { %v7154_v6 = vpack.c.bf16 %v4564_v41, %v4563_v39 }
 0x5f4   :  { %7153 = vmatprep.subr.bf16.mxu1 %v7152_v51 }
 0x5f5   :  { %7155 = vmatpush1.bf16.msra.mxu1 %v7154_v6 }
 0x5f7   :  { %v7843_v56 = vpop.permute.xlu0 %7842 }
 0x5f8   :  { %v7848_v55 = vpop.permute.xlu1 %7847  ;;  %v7845_v50 = vunpack.i.h.bf16 %v7843_v56  ;;  %v7844_v13 = vunpack.i.l.bf16 %v7843_v56 }
 0x5f9   :  { %v7850_v28 = vunpack.i.h.bf16 %v7848_v55  ;;  %v7849_v9 = vunpack.i.l.bf16 %v7848_v55 }
 0x5fa   :  { %v4565_v53 = vsel %vm4554_vm3, %v7844_v13, %v7845_v50 }
 0x5fb   :  { %v7156_v40 = vpack.c.bf16 %v7850_v28, %v7845_v50  ;;  %v4566_v57 = vsel %vm4554_vm3, %v7849_v9, %v7850_v28 }
 0x5fc   :  { %v7158_v19 = vpack.c.bf16 %v4566_v57, %v4565_v53 }
 0x5fd   :  { %7157 = vmatprep.subr.bf16.mxu1 %v7156_v40 }
 0x5fe   :  { %7159 = vmatpush1.bf16.msra.mxu1 %v7158_v19 }
 0x601   :  { %6824 = vmatmul.mubr.msk.f32.vlgmr.msra.gmra.mrb[0].mxu1 %vm14820_vm15, %v4503_v36 }
 0x602   :  { %4671 = vmatprep.mubr.f32.mxu1 %v15476_v31 }
 0x6d4   :  { %v4667_v42 = vpop.f32.mrb[0].mxu1 }
 0x6d5   :  { %v4669_v11 = vpop.f32.mrb[1].mxu1 }
 0x6d6   :  { %6828 = vmatprep.mubr.msk.f32.mxu0 %vm4554_vm3, %v4669_v11 }
 0x6d7   :  { %4793 = vmatmul.mubr.f32.vlgmr.msra.gmra.mrb[10].mxu0 %v4667_v42 }
 0x7aa   :  { %v6913_v32 = vpop.f32.mrb[10].mxu0 }
 0x7ab   :  { %v6914_v23 = vpop.f32.mrb[11].mxu0 }
 0x7ac   :  { %v6915_v35 = vadd.f32 %v6914_v23, %v6913_v32 }
 0x7ae   :  { %v4821_v30 = vmul.f32 %v6915_v35, %v4820_v62  ;;  %v4829_v14 = vmul.f32 %v6915_v35, %v4828_v37  ;;  %v4846_v52 = vmul.f32 %v6915_v35, %v4845_v44  ;;  %v4838_v12 = vmul.f32 %v6915_v35, %v4837_v29 }
 0x7af   :  { %v4863_v18 = vmul.f32 %v6915_v35, %v4862_v54  ;;  %v4855_v43 = vmul.f32 %v6915_v35, %v4854_v3  ;;  %v4814_v7 = vmul.f32 %v6915_v35, %v4813_v61  ;;  %v4810_v2 = vmul.f32 %v6915_v35, %v4809_v59 }
 0x7b0   :  { %4823 = vrot.lane.b32.xlu0 %v4821_v30, %s8014_s6  ;;  %v4831_v25 = vrot.slane %v4829_v14, 1  ;;  %v4848_v4 = vrot.slane %v4846_v52, 1 }
 0x7b1   :  { %v4865_v1 = vrot.slane %v4863_v18, 1  ;;  %v4816_v26 = vrot.slane %v4814_v7, 1 }
 0x7b2   :  { %4832 = vrot.lane.b32.xlu1 %v4831_v25, %s8014_s6 }
 0x7b3   :  { %v4818_v0 = vadd.f32 %v4816_v26, %v4810_v2 }
 0x7b4   :  { %4840 = vrot.lane.b32.xlu0 %v4838_v12, %s8015_s17 }
 0x7b6   :  { %4849 = vrot.lane.b32.xlu1 %v4848_v4, %s8015_s17 }
 0x7b8   :  { %4857 = vrot.lane.b32.xlu0 %v4855_v43, %s8016_s23 }
 0x7ba   :  { %4866 = vrot.lane.b32.xlu1 %v4865_v1, %s8016_s23 }
 0x822   :  { %v4824_v45 = vpop.permute.xlu0 %4823 }
 0x823   :  { %v4826_v63 = vadd.f32 %v4824_v45, %v4818_v0 }
 0x824   :  { %v4833_v33 = vpop.permute.xlu1 %4832 }
 0x825   :  { %v4835_v48 = vadd.f32 %v4833_v33, %v4826_v63 }
 0x826   :  { %v4841_v20 = vpop.permute.xlu0 %4840 }
 0x827   :  { %v4843_v27 = vadd.f32 %v4841_v20, %v4835_v48 }
 0x828   :  { %v4850_v46 = vpop.permute.xlu1 %4849 }
 0x829   :  { %v4852_v58 = vadd.f32 %v4850_v46, %v4843_v27 }
 0x82a   :  { %v4858_v38 = vpop.permute.xlu0 %4857 }
 0x82b   :  { %v4860_v10 = vadd.f32 %v4858_v38, %v4852_v58 }
 0x82c   :  { %v4867_v5 = vpop.permute.xlu1 %4866 }
 0x82d   :  { %v4869_v49 = vadd.f32 %v4867_v5, %v4860_v10 }
 0x82f   :  { %v4872_v17 = vadd.f32 %v4871_v8, %v4869_v49 }
 0x831   :  { %v13722_v22 = vmax.f32 %v4872_v17, 0.0 }
 0x833   :  { %vm4874_vm13 = vcmp.gt.f32.partialorder %v13722_v22, -inf }
 0x834   :  { %v4875_v21 = vsel %vm4874_vm13, %v13722_v22, -inf  ;;  %vm8018_vm13 = vmmov 0  }
 0x835   :  { %v4877_v34 = vrot.slane %v4875_v21, 7 }
 0x837   :  { %vm4879_vm1 = vcmp.gt.f32.partialorder %v13722_v22, %v4877_v34 }
 0x838   :  { %v4880_v24 = vsel %vm4879_vm1, %v13722_v22, %v4877_v34  ;;  %v4881_v47 = vsel %vm4879_vm1, 1.0, %v15476_v31  ;;  %vm5079_vm1 = vcmask 1041408  }
 0x839   :  { %v4883_v41 = vrot.slane %v4880_v24, 7  ;;  %v4888_v51 = vrot.slane %v4881_v47, 7 }
 0x83b   :  { %vm4885_vm14 = vcmp.gt.f32.partialorder %v13722_v22, %v4883_v41 }
 0x83c   :  { %v4886_v39 = vsel %vm4885_vm14, %v13722_v22, %v4883_v41  ;;  %v4890_v6 = vsel %vm4885_vm14, 2.0, %v4888_v51  ;;  %vm7201_vm14 = vmpackc.low %vm5079_vm1, %vm8013_vm5 }
 0x83d   :  { %v4892_v56 = vrot.slane %v4886_v39, 7  ;;  %v4897_v55 = vrot.slane %v4890_v6, 7 }
 0x83f   :  { %vm4894_vm11 = vcmp.gt.f32.partialorder %v13722_v22, %v4892_v56 }
 0x840   :  { %v4899_v50 = vsel %vm4894_vm11, 3.0, %v4897_v55  ;;  %v4895_v13 = vsel %vm4894_vm11, %v13722_v22, %v4892_v56  ;;  %v4504_v56 = vld [vmem:[%s14561_s5 + $0x8] sm:$0xff]  ;;  %v5081_v55 = vld [vmem:[%s14563_s7] sm:$0xff] }
 0x841   :  { %v4909_v28 = vrot.slane %v4899_v50, 3  ;;  %v4901_v9 = vrot.slane %v4895_v13, 3  ;;  %6825 = vmatmul.mubr.msk.f32.gmra.mrb[2].mxu1 %vm14820_vm15, %v4504_v56  ;;  %v8017_v50 = vmov 0.0|0.0   ;;  %v5082_v13 = vld [vmem:[%s14563_s7 + $0x8] sm:$0xff] }
 0x842   :  { %7193 = vmatprep.subr.bf16.mxu1 %v8017_v50  ;;  %4677 = vmatprep.mubr.f32.mxu1 %v15476_v31 }
 0x843   :  { %4910 = vrot.lane.b32.xlu1 %v4909_v28, %s8011_s27  ;;  %4902 = vrot.lane.b32.xlu0 %v4901_v9, %s8011_s27  ;;  %v5083_v28 = vld [vmem:[%s14563_s7 + $0x10] sm:$0xff]  ;;  %v5084_v9 = vld [vmem:[%s14563_s7 + $0x18] sm:$0xff] }
 0x8b5   :  { %v4911_v53 = vpop.permute.xlu1 %4910  ;;  %v4903_v40 = vpop.permute.xlu0 %4902 }
 0x8b6   :  { %vm4905_vm10 = vcmp.gt.f32.partialorder %v13722_v22, %v4903_v40 }
 0x8b7   :  { %v4906_v57 = vsel %vm4905_vm10, %v13722_v22, %v4903_v40  ;;  %v4907_v19 = vsel %vm4905_vm10, 1.0, %v15476_v31  ;;  %v4913_v36 = vsel %vm4905_vm10, 0.0, %v4911_v53  ;;  %v4505_v53 = vld [vmem:[%s14561_s5 + $0x10] sm:$0xff]  ;;  %v7194_v40 = vpack.c.bf16 %v5082_v13, %v5081_v55 }
 0x8b8   :  { %v4915_v15 = vrot.slane %v4906_v57, 7  ;;  %v4920_v60 = vrot.slane %v4907_v19, 7  ;;  %v4924_v16 = vrot.slane %v4913_v36, 7  ;;  %v7197_v57 = vpack.c.bf16 %v5084_v9, %v5083_v28  ;;  %6826 = vmatmul.mubr.msk.f32.gmra.mrb[4].mxu1 %vm14820_vm15, %v4505_v53  ;;  %v5085_v19 = vld [vmem:[%s14563_s7 + $0x20] sm:$0xff]  ;;  %v5086_v36 = vld [vmem:[%s14563_s7 + $0x28] sm:$0x3] }
 0x8b9   :  { %7195 = vmatpush3.bf16.msra.mxu1 %v7194_v40  ;;  %6941 = vmatprep.mubr.msk.f32.mxu1 %vm8018_vm13, %v15476_v31 }
 0x8ba   :  { %vm4917_vm6 = vcmp.gt.f32.partialorder %v13722_v22, %v4915_v15  ;;  %7196 = vmatprep.subr.bf16.mxu1 %v8017_v50 }
 0x8bb   :  { %v4918_v42 = vsel %vm4917_vm6, %v13722_v22, %v4915_v15  ;;  %v4922_v11 = vsel %vm4917_vm6, 1.0, %v4920_v60  ;;  %v4926_v32 = vsel %vm4917_vm6, 1.0, %v4924_v16  ;;  %v7200_v15 = vpack.c.bf16 %v5086_v36, %v5085_v19 }
 0x8bc   :  { %v4928_v23 = vrot.slane %v4918_v42, 7  ;;  %v4933_v62 = vrot.slane %v4922_v11, 7  ;;  %v4937_v37 = vrot.slane %v4926_v32, 7 }
 0x8bd   :  { %7198 = vmatpush3.bf16.msra.mxu1 %v7197_v57 }
 0x8be   :  { %vm4930_vm9 = vcmp.gt.f32.partialorder %v13722_v22, %v4928_v23  ;;  %7199 = vmatprep.subr.bf16.mxu1 %v8017_v50 }
 0x8bf   :  { %v4931_v35 = vsel %vm4930_vm9, %v13722_v22, %v4928_v23  ;;  %v4935_v44 = vsel %vm4930_vm9, 1.0, %v4933_v62  ;;  %v4939_v30 = vsel %vm4930_vm9, 2.0, %v4937_v37  ;;  %vm5090_vm9 = vcmask 343040  }
 0x8c0   :  { %v4941_v14 = vrot.slane %v4931_v35, 7  ;;  %v4946_v29 = vrot.slane %v4935_v44, 7  ;;  %v4950_v25 = vrot.slane %v4939_v30, 7 }
 0x8c1   :  { %7202 = vmatpush3.bf16.msk.msra.mxu1 %vm7201_vm14, %v7200_v15 }
 0x8c2   :  { %vm4943_vm8 = vcmp.gt.f32.partialorder %v13722_v22, %v4941_v14 }
 0x8c3   :  { %v4944_v52 = vsel %vm4943_vm8, %v13722_v22, %v4941_v14  ;;  %v4948_v54 = vsel %vm4943_vm8, 1.0, %v4946_v29  ;;  %v4952_v12 = vsel %vm4943_vm8, 3.0, %v4950_v25  ;;  %vm5168_vm8 = vcmask 40960  }
 0x8c4   :  { %v4954_v3 = vrot.slane %v4944_v52, 3  ;;  %v4961_v4 = vrot.slane %v4948_v54, 3  ;;  %v4967_v18 = vrot.slane %v4952_v12, 3 }
 0x8c6   :  { %4955 = vrot.lane.b32.xlu0 %v4954_v3, %s8011_s27  ;;  %v7851_v43 = vpack.i.bf16 %v4967_v18, %v4961_v4 }
 0x8c8   :  { %7852 = vrot.lane.b32.xlu1 %v7851_v43, %s8011_s27 }
 0x938   :  { %v4956_v1 = vpop.permute.xlu0 %4955 }
 0x939   :  { %vm4958_vm4 = vcmp.gt.f32.partialorder %v13722_v22, %v4956_v1 }
 0x93a   :  { %v4959_v61 = vsel %vm4958_vm4, %v13722_v22, %v4956_v1  ;;  %v7853_v7 = vpop.permute.xlu1 %7852 }
 0x93b   :  { %v4973_v59 = vrot.slane %v4959_v61, 7  ;;  %v7855_v26 = vunpack.i.h.bf16 %v7853_v7  ;;  %v7854_v2 = vunpack.i.l.bf16 %v7853_v7 }
 0x93d   :  { %vm4975_vm2 = vcmp.gt.f32.partialorder %v13722_v22, %v4973_v59  ;;  %v4965_v0 = vsel %vm4958_vm4, 2.0, %v7854_v2  ;;  %v4971_v45 = vsel %vm4958_vm4, 0.0, %v7855_v26 }
 0x93e   :  { %v4976_v63 = vsel %vm4975_vm2, %v13722_v22, %v4973_v59  ;;  %v4978_v33 = vrot.slane %v4965_v0, 7  ;;  %v4982_v48 = vrot.slane %v4971_v45, 7 }
 0x93f   :  { %v4986_v20 = vrot.slane %v4976_v63, 7 }
 0x940   :  { %v4980_v27 = vsel %vm4975_vm2, 2.0, %v4978_v33  ;;  %v4984_v46 = vsel %vm4975_vm2, 1.0, %v4982_v48  ;;  %v4673_v33 = vpop.f32.mrb[2].mxu1 }
 0x941   :  { %vm4988_vm12 = vcmp.gt.f32.partialorder %v13722_v22, %v4986_v20  ;;  %v4991_v58 = vrot.slane %v4980_v27, 7  ;;  %v4995_v38 = vrot.slane %v4984_v46, 7  ;;  %v4675_v48 = vpop.f32.mrb[3].mxu1  ;;  %v5166_v46 = vld [vmem:[%s14567_s11] sm:$0x3]  ;;  %s8019_s11 = smov 123  }
 0x942   :  { %v4989_v10 = vsel %vm4988_vm12, %v13722_v22, %v4986_v20  ;;  %6829 = vmatprep.mubr.msk.f32.mxu0 %vm4554_vm3, %v4675_v48 }
 0x943   :  { %v4993_v8 = vsel %vm4988_vm12, 2.0, %v4991_v58  ;;  %v4997_v5 = vsel %vm4988_vm12, 2.0, %v4995_v38  ;;  %v4999_v49 = vrot.slane %v4989_v10, 7  ;;  %4798 = vmatmul.mubr.f32.gmra.mrb[12].mxu0 %v4673_v33  ;;  %v5176_v58 = vrot.slane %v5166_v46, 1 }
 0x944   :  { %v5004_v17 = vrot.slane %v4993_v8, 7  ;;  %v5008_v21 = vrot.slane %v4997_v5, 7 }
 0x945   :  { %vm5001_vm0 = vcmp.gt.f32.partialorder %v13722_v22, %v4999_v49 }
 0x946   :  { %v5002_v34 = vsel %vm5001_vm0, %v13722_v22, %v4999_v49  ;;  %v5006_v24 = vsel %vm5001_vm0, 2.0, %v5004_v17  ;;  %v5010_v47 = vsel %vm5001_vm0, 3.0, %v5008_v21 }
 0x947   :  { %v5012_v41 = vrot.slane %v5002_v34, 3  ;;  %v5019_v51 = vrot.slane %v5006_v24, 3  ;;  %v5025_v39 = vrot.slane %v5010_v47, 3 }
 0x949   :  { %5013 = vrot.lane.b32.xlu0 %v5012_v41, %s8011_s27  ;;  %v7856_v6 = vpack.i.bf16 %v5025_v39, %v5019_v51 }
 0x94b   :  { %7857 = vrot.lane.b32.xlu1 %v7856_v6, %s8011_s27 }
 0x98b   :  { %v4679_v20 = vpop.f32.mrb[4].mxu1 }
 0x98c   :  { %v4681_v27 = vpop.f32.mrb[5].mxu1 }
 0x98d   :  { %6830 = vmatprep.mubr.msk.f32.mxu0 %vm4554_vm3, %v4681_v27 }
 0x98e   :  { %4803 = vmatmul.mubr.f32.gmra.mrb[14].mxu0 %v4679_v20 }
 0x9bb   :  { %v5014_v60 = vpop.permute.xlu0 %5013 }
 0x9bc   :  { %vm5016_vm11 = vcmp.gt.f32.partialorder %v13722_v22, %v5014_v60 }
 0x9bd   :  { %v5017_v16 = vsel %vm5016_vm11, %v13722_v22, %v5014_v60  ;;  %v7858_v42 = vpop.permute.xlu1 %7857 }
 0x9be   :  { %v5031_v11 = vrot.slane %v5017_v16, 7  ;;  %v7860_v32 = vunpack.i.h.bf16 %v7858_v42  ;;  %v7859_v23 = vunpack.i.l.bf16 %v7858_v42  ;;  %v15485_v42 = vmov 0 }
 0x9c0   :  { %vm5033_vm10 = vcmp.gt.f32.partialorder %v13722_v22, %v5031_v11  ;;  %v5023_v62 = vsel %vm5016_vm11, 3.0, %v7859_v23  ;;  %v5029_v37 = vsel %vm5016_vm11, 0.0, %v7860_v32  ;;  %v15489_v32 = vmov 0 }
 0x9c1   :  { %v5034_v35 = vsel %vm5033_vm10, %v13722_v22, %v5031_v11  ;;  %v5036_v44 = vrot.slane %v5023_v62, 7  ;;  %v5040_v30 = vrot.slane %v5029_v37, 7  ;;  %v15487_v11 = vmov 0 }
 0x9c2   :  { %v5044_v14 = vrot.slane %v5034_v35, 7  ;;  %v15491_v23 = vmov 0  ;;  %v15493_v62 = vmov 0  ;;  %v15495_v37 = vmov 0 }
 0x9c3   :  { %v5038_v29 = vsel %vm5033_vm10, 3.0, %v5036_v44  ;;  %v5042_v25 = vsel %vm5033_vm10, 1.0, %v5040_v30  ;;  %v15497_v35 = vmov 0  ;;  %v15500_v44 = vmov 0 }
 0x9c4   :  { %vm5046_vm5 = vcmp.gt.f32.partialorder %v13722_v22, %v5044_v14  ;;  %v5049_v52 = vrot.slane %v5038_v29, 7  ;;  %v5053_v54 = vrot.slane %v5042_v25, 7  ;;  %v15503_v30 = vmov 0 }
 0x9c5   :  { %v5047_v12 = vsel %vm5046_vm5, %v13722_v22, %v5044_v14  ;;  %v15506_v14 = vmov 0  ;;  %v15511_v25 = vmov 0 }
 0x9c6   :  { %v5051_v3 = vsel %vm5046_vm5, 3.0, %v5049_v52  ;;  %v5055_v4 = vsel %vm5046_vm5, 2.0, %v5053_v54  ;;  %v5057_v18 = vrot.slane %v5047_v12, 7  ;;  %v15514_v52 = vmov 0 }
 0x9c7   :  { %v5062_v43 = vrot.slane %v5051_v3, 7  ;;  %v5066_v1 = vrot.slane %v5055_v4, 7  ;;  %v15517_v54 = vmov 0  ;;  %v15520_v12 = vmov 0 }
 0x9c8   :  { %vm5059_vm6 = vcmp.gt.f32.partialorder %v13722_v22, %v5057_v18  ;;  %v15523_v3 = vmov 0 }
 0x9c9   :  { %v5060_v61 = vsel %vm5059_vm6, %v13722_v22, %v5057_v18  ;;  %v5064_v7 = vsel %vm5059_vm6, 3.0, %v5062_v43  ;;  %v5068_v59 = vsel %vm5059_vm6, 3.0, %v5066_v1  ;;  %v15532_v43 = vmov 0 }
 0x9ca   :  { %v5070_v26 = vrot.slane %v5060_v61, 3  ;;  %v5073_v2 = vrot.slane %v5064_v7, 2  ;;  %v5076_v0 = vrot.slane %v5068_v59, 1  ;;  %v15535_v1 = vmov 0  ;;  %v5192_v59 = vld [vmem:[%s14568_s12] sm:$0x3] }
 0x9cb   :  { %v15537_v61 = vmov 0  ;;  %v5185_v7 = vlaneseq }
 0x9cc   :  { %v5078_v45 = vsel %vm14821_vm7, %v5070_v26, %v5073_v2  ;;  %v5183_v2 = vstv %s6842_s0  ;;  %s8020_s0 = smov 3  }
 0x9cd   :  { %v5080_v63 = vsel %vm5079_vm1, %v5078_v45, %v5076_v0  ;;  %v13967_v26 = vand.u32 127, %v5185_v7  ;;  %v5173_v0 = vstv %s6841_s9  ;;  %v5195_v45 = vrot.slane %v5192_v59, 1  ;;  %s6845_s9 = sld [smem:[#allocation9 + $0x3]] }
 0x9ce   :  { %5088 = vrot.lane.b32.xlu0 %v5080_v63, %s8016_s23 }
 0xa16   :  { %v6916_v50 = vpop.f32.mrb[12].mxu0 }
 0xa17   :  { %v6917_v13 = vpop.f32.mrb[13].mxu0 }
 0xa18   :  { %v6918_v28 = vadd.f32 %v6917_v13, %v6916_v50 }
 0xa1a   :  { %vm14823_vm4 = vcmp.eq.f32.partialorder %v6918_v28, 3.0  ;;  %vm14824_vm2 = vcmp.eq.f32.partialorder %v6918_v28, 2.0  ;;  %vm14826_vm0 = vcmp.eq.f32.partialorder %v6918_v28, 4.0  ;;  %vm14827_vm13 = vcmp.eq.f32.partialorder %v6918_v28, 1.0 }
 0xa40   :  { %v5089_v22 = vpop.permute.xlu0 %5088 }
 0xa41   :  { %6942 = vmatmul.mubr.msk.f32.vlgmr.msra.gmra.mrb[6].mxu1 %vm5090_vm9, %v5089_v22 }
 0xa42   :  { %5958 = vmatprep.mubr.f32.mxu1 %v15476_v31 }
 0xa61   :  { %v6919_v9 = vpop.f32.mrb[14].mxu0 }
 0xa62   :  { %v6920_v53 = vpop.f32.mrb[15].mxu0 }
 0xa63   :  { %v6921_v40 = vadd.f32 %v6920_v53, %v6919_v9  ;;  %v13981_v53 = vshrl.u32 %v5185_v7, 7 }
 0xa65   :  { %v5434_v57 = vmul.f32 16.0, %v6921_v40  ;;  %vm14822_vm3 = vcmp.eq.f32.partialorder %v6921_v40, 0.0  ;;  %vm14825_vm11 = vcmp.eq.f32.partialorder %v6921_v40, 1.0  ;;  %vm14828_vm6 = vcmp.eq.f32.partialorder %v6921_v40, 2.0 }
 0xa66   :  { %vm13826_vm12 = vmand %vm14822_vm3, %vm14823_vm4  ;;  %vm14829_vm7 = vcmp.eq.f32.partialorder %v6921_v40, 3.0 }
 0xa67   :  { %v13822_v19 = vadd.f32 %v6918_v28, %v5434_v57  ;;  %vm13832_vm1 = vmand %vm14822_vm3, %vm14824_vm2  ;;  %v5204_v57 = vcvt.s32.f32 %v13967_v26 }
 0xa68   :  { %vm13838_vm14 = vmand %vm14822_vm3, %vm14826_vm0 }
 0xa69   :  { %vm13844_vm10 = vmand %vm14822_vm3, %vm14827_vm13 }
 0xa6a   :  { %vm13850_vm5 = vmand %vm14825_vm11, %vm14827_vm13 }
 0xa6b   :  { %v15486_v42 = vsel %vm13850_vm5, 4294967295, %v15485_v42  ;;  %vm13856_vm9 = vmand %vm14825_vm11, %vm14823_vm4 }
 0xa6c   :  { %v15488_v11 = vsel %vm13856_vm9, 4294967295, %v15487_v11  ;;  %vm13868_vm15 = vmand %vm14828_vm6, %vm14824_vm2 }
 0xa6d   :  { %v15492_v23 = vsel %vm13868_vm15, 4294967295, %v15491_v23  ;;  %vm13874_vm3 = vmand %vm14825_vm11, %vm14826_vm0 }
 0xa6e   :  { %v15494_v62 = vsel %vm13874_vm3, 4294967295, %v15493_v62  ;;  %vm13880_vm4 = vmand %vm14828_vm6, %vm14827_vm13  ;;  %vm15505_vm3 = vcmp.eq.f32.partialorder %v6918_v28, 4.0 }
 0xa6f   :  { %v15496_v37 = vsel %vm13880_vm4, 4294967295, %v15495_v37  ;;  %vm13904_vm4 = vmand %vm14828_vm6, %vm15505_vm3 }
 0xa70   :  { %v15507_v14 = vsel %vm13904_vm4, 4294967295, %v15506_v14  ;;  %vm15519_vm4 = vcmp.eq.f32.partialorder %v6918_v28, 4.0 }
 0xb14   :  { %v13803_v38 = vpop.f32.mrb[6].mxu1 }
 0xb15   :  { %v6943_v10 = vpop.f32.mrb[7].mxu1  ;;  %v5206_v8 = vrot.slane %v13803_v38, 2  ;;  %v5213_v5 = vrot.slane %v13803_v38, 1  ;;  %v5178_v49 = vmul.f32 %v5176_v58, %v13803_v38  ;;  %v5167_v17 = vmul.f32 %v5166_v46, %v13803_v38  ;;  %v5199_v58 = vld [vmem:[%s14569_s13] sm:$0x1] }
 0xb16   :  { %v5231_v24 = vadd.f32 8.0, %v13803_v38  ;;  %v5254_v41 = vadd.f32 16.0, %v13803_v38  ;;  %v5300_v39 = vadd.f32 32.0, %v13803_v38  ;;  %v5277_v6 = vadd.f32 24.0, %v13803_v38 }
 0xb17   :  { %7593 = vpush %v5206_v8  ;;  %v5179_v21 = vsel %vm5168_vm8, %v5178_v49, 0.0  ;;  %v5169_v34 = vsel %vm5168_vm8, %v5167_v17, 0.0  ;;  %vm13862_vm8 = vmand %vm14825_vm11, %vm14824_vm2  ;;  %vm15499_vm2 = vcmp.eq.f32.partialorder %v6918_v28, 3.0  ;;  %vm15502_vm11 = vcmp.eq.f32.partialorder %v6918_v28, 2.0 }
 0xb18   :  { %7595 = vpush %v5213_v5  ;;  %5180 = vadd.xlane.f32.xlu0 %v5179_v21  ;;  %5170 = vadd.xlane.f32.xlu1 %v5169_v34  ;;  %v5233_v47 = vrot.slane %v5231_v24, 1  ;;  %v5256_v51 = vrot.slane %v5254_v41, 1  ;;  %v5302_v56 = vrot.slane %v5300_v39, 1  ;;  %v5279_v55 = vrot.slane %v5277_v6, 1  ;;  %vm13892_vm15 = vmand %vm14828_vm6, %vm15499_vm2 }
 0xb19   :  { %v15490_v32 = vsel %vm13862_vm8, 4294967295, %v15489_v32  ;;  %vm13886_vm8 = vmand %vm14829_vm7, %vm14827_vm13  ;;  %v15501_v44 = vsel %vm13892_vm15, 4294967295, %v15500_v44  ;;  %vm5475_vm13 = vcmp.eq.f32.partialorder %v6921_v40, 4.0  ;;  %v5323_v34 = vadd.f32 40.0, %v13803_v38 }
 0xb1a   :  { %v15498_v35 = vsel %vm13886_vm8, 4294967295, %v15497_v35  ;;  %vm13898_vm0 = vmand %vm14829_vm7, %vm15502_vm11 }
 0xb1b   :  { %v15504_v30 = vsel %vm13898_vm0, 4294967295, %v15503_v30  ;;  %vm15508_vm8 = vmmov %vm15505_vm3  ;;  %vm15516_vm3 = vcmp.eq.f32.partialorder %v6918_v28, 2.0 }
 0xb1c   :  { %vm13910_vm9 = vmand %vm14829_vm7, %vm15508_vm8  ;;  %vm5463_vm8 = vcmp.eq.f32.partialorder %v6918_v28, 0.0 }
 0xb1d   :  { %vm13916_vm15 = vmand %vm14829_vm7, %vm15499_vm2 }
 0xb1e   :  { %v15512_v25 = vsel %vm13916_vm15, 4294967295, %v15511_v25  ;;  %vm15513_vm11 = vmmov %vm15499_vm2  ;;  %vm15522_vm2 = vcmp.eq.f32.partialorder %v6918_v28, 1.0 }
 0xb1f   :  { %vm13921_vm0 = vmand %vm5475_vm13, %vm15513_vm11  ;;  %vm15525_vm11 = vcmp.eq.f32.partialorder %v6921_v40, 0.0 }
 0xb20   :  { %v15515_v52 = vsel %vm13921_vm0, 4294967295, %v15514_v52  ;;  %vm13926_vm6 = vmand %vm5475_vm13, %vm15516_vm3  ;;  %vm15528_vm3 = vcmp.eq.f32.partialorder %v6921_v40, 1.0 }
 0xb21   :  { %v15518_v54 = vsel %vm13926_vm6, 4294967295, %v15517_v54  ;;  %vm13931_vm5 = vmand %vm5475_vm13, %vm15519_vm4  ;;  %vm15531_vm6 = vcmp.eq.f32.partialorder %v6921_v40, 2.0 }
 0xb22   :  { %v15521_v12 = vsel %vm13931_vm5, 4294967295, %v15520_v12  ;;  %vm13936_vm7 = vmand %vm5475_vm13, %vm15522_vm2  ;;  %vm15534_vm5 = vcmp.eq.f32.partialorder %v6921_v40, 3.0  ;;  %v5203_v40 = vcvt.s32.f32 %v13981_v53 }
 0xb23   :  { %v15524_v3 = vsel %vm13936_vm7, 4294967295, %v15523_v3  ;;  %vm13941_vm15 = vmand %vm15525_vm11, %vm5463_vm8 }
 0xb24   :  { %vm13946_vm0 = vmand %vm15528_vm3, %vm5463_vm8 }
 0xb25   :  { %vm13951_vm4 = vmand %vm15531_vm6, %vm5463_vm8 }
 0xb26   :  { %v15533_v43 = vsel %vm13951_vm4, 4294967295, %v15532_v43  ;;  %vm13956_vm2 = vmand %vm15534_vm5, %vm5463_vm8  ;;  %vm5188_vm5 = vcmp.eq.s32.totalorder %v13967_v26, 1 }
 0xb27   :  { %v15536_v1 = vsel %vm13956_vm2, 4294967295, %v15535_v1  ;;  %vm13960_vm7 = vmand %vm5475_vm13, %vm5463_vm8  ;;  %vm5187_vm13 = vcmp.eq.s32.totalorder %v13967_v26, 0 }
 0xb28   :  { %v15538_v61 = vsel %vm13960_vm7, 4294967295, %v15537_v61 }
 0xb29   :  { %5271 = vrot.lane.b32.xlu1 %v5206_v8, %s8016_s23 }
 0xb2d   :  { %5317 = vrot.lane.b32.xlu1 %v5206_v8, %s8019_s11 }
 0xb2e   :  { %5225 = vrot.lane.b32.xlu0 %v5206_v8, %s8014_s6 }
 0xb31   :  { %5234 = vrot.lane.b32.xlu1 %v5233_v47, %s8014_s6  ;;  %v5325_v47 = vrot.slane %v5323_v34, 1 }
 0xb32   :  { %5248 = vrot.lane.b32.xlu0 %v5206_v8, %s8015_s17 }
 0xb35   :  { %5257 = vrot.lane.b32.xlu1 %v5256_v51, %s8015_s17 }
 0xb36   :  { %5294 = vrot.lane.b32.xlu0 %v5206_v8, %s8012_s28 }
 0xb39   :  { %5303 = vrot.lane.b32.xlu1 %v5302_v56, %s8012_s28 }
 0xb3a   :  { %5280 = vrot.lane.b32.xlu0 %v5279_v55, %s8016_s23 }
 0xb48   :  { %s7594_s12 = spop %7593 }
 0xb49   :  { %s7596_s13 = spop %7595 }
 0xba5   :  { %v5181_v63 = vpop.xlane.xlu0 %5180  ;;  %v5171_v33 = vpop.xlane.xlu1 %5170 }
 0xba6   :  { %v5184_v48 = vadd.f32 %v5183_v2, %v5181_v63  ;;  %v5174_v20 = vadd.f32 %v5173_v0, %v5171_v33  ;;  %v5215_v2 = vstv %s7596_s13 }
 0xba7   :  { %vm5217_vm8 = vcmp.eq.f32.partialorder %v5204_v57, %v5215_v2 }
 0xba8   :  { %v5189_v27 = vsel %vm5188_vm5, %v5184_v48, 0.0  ;;  %v5197_v22 = vmul.f32 %v5195_v45, %v5184_v48  ;;  %v5193_v46 = vmul.f32 %v5192_v59, %v5174_v20  ;;  %v5208_v59 = vstv %s7594_s12  ;;  %s6848_s12 = sld [smem:[#allocation9 + $0x6]] }
 0xba9   :  { %v5272_v10 = vpop.permute.xlu1 %5271  ;;  %v5190_v8 = vsel %vm5187_vm13, %v5174_v20, %v5189_v27  ;;  %v5226_v21 = vpop.permute.xlu0 %5225  ;;  %vm5210_vm6 = vcmp.eq.f32.partialorder %v5203_v40, %v5208_v59  ;;  %v5397_v59 = vstv %s6847_s30  ;;  %s6843_s30 = sld [smem:[#allocation9 + $0x1]] }
 0xbaa   :  { %v5198_v5 = vadd.f32 %v5197_v22, %v5193_v46  ;;  %5191 = vst [vmem:[#allocation12] sm:$0x1] %v5190_v8  ;;  %vm5218_vm3 = vmand %vm5210_vm6, %vm5217_vm8 }
 0xbac   :  { %v5200_v49 = vadd.f32 %v5199_v58, %v5198_v5 }
 0xbad   :  { %v5318_v17 = vpop.permute.xlu1 %5317  ;;  %v5249_v41 = vpop.permute.xlu0 %5248 }
 0xbae   :  { %5264 = vrot.lane.b32.xlu0 %v5200_v49, %s8015_s17  ;;  %5241 = vrot.lane.b32.xlu1 %v5200_v49, %s8014_s6  ;;  %7597 = vpush %v5200_v49 }
 0xbaf   :  { %7599 = vpush %v5226_v21 }
 0xbb1   :  { %v5235_v24 = vpop.permute.xlu1 %5234  ;;  %v5295_v51 = vpop.permute.xlu0 %5294 }
 0xbb2   :  { %5310 = vrot.lane.b32.xlu0 %v5200_v49, %s8012_s28  ;;  %5287 = vrot.lane.b32.xlu1 %v5200_v49, %s8016_s23  ;;  %7601 = vpush %v5235_v24 }
 0xbb5   :  { %v5258_v39 = vpop.permute.xlu1 %5257  ;;  %v5281_v6 = vpop.permute.xlu0 %5280 }
 0xbb6   :  { %5326 = vrot.lane.b32.xlu0 %v5325_v47, %s8019_s11  ;;  %5333 = vrot.lane.b32.xlu1 %v5200_v49, %s8019_s11 }
 0xbb9   :  { %v5304_v56 = vpop.permute.xlu1 %5303 }
 0xbdf   :  { %s7598_s28 = spop %7597 }
 0xbe0   :  { %s7600_s8 = spop %7599  ;;  %v5221_v63 = vstv %s7598_s28 }
 0xbe1   :  { %v5228_v45 = vstv %s7600_s8  ;;  %v5223_v33 = vsel %vm5218_vm3, %v5221_v63, 0.0 }
 0xbe2   :  { %vm5230_vm5 = vcmp.eq.f32.partialorder %v5203_v40, %v5228_v45 }
 0xbe3   :  { %s7602_s24 = spop %7601 }
 0xbe4   :  { %v5237_v0 = vstv %s7602_s24 }
 0xbe5   :  { %vm5239_vm11 = vcmp.eq.f32.partialorder %v5204_v57, %v5237_v0 }
 0xbe6   :  { %vm5240_vm13 = vmand %vm5230_vm5, %vm5239_vm11 }
 0xc20   :  { %v5265_v55 = vpop.permute.xlu0 %5264  ;;  %v5242_v50 = vpop.permute.xlu1 %5241 }
 0xc21   :  { %7603 = vpush %v5242_v50  ;;  %v5376_v50 = vstv %s6845_s9 }
 0xc22   :  { %7605 = vpush %v5249_v41 }
 0xc23   :  { %7607 = vpush %v5258_v39 }
 0xc24   :  { %7609 = vpush %v5265_v55  ;;  %v5311_v38 = vpop.permute.xlu0 %5310  ;;  %v5288_v13 = vpop.permute.xlu1 %5287 }
 0xc25   :  { %7611 = vpush %v5272_v10 }
 0xc26   :  { %7613 = vpush %v5281_v6 }
 0xc27   :  { %7615 = vpush %v5288_v13 }
 0xc28   :  { %7617 = vpush %v5295_v51  ;;  %v5327_v28 = vpop.permute.xlu0 %5326  ;;  %v5334_v9 = vpop.permute.xlu1 %5333 }
 0xc29   :  { %7619 = vpush %v5304_v56 }
 0xc2a   :  { %7621 = vpush %v5311_v38 }
 0xc2b   :  { %7623 = vpush %v5318_v17 }
 0xc2c   :  { %7625 = vpush %v5327_v28  ;;  %v5378_v28 = vmul.f32 0.0, %v5376_v50 }
 0xc2d   :  { %7627 = vpush %v5334_v9 }
 0xc2e   :  { %v5382_v0 = vrot.slane %v5378_v28, 1  ;;  %v5630_v28 = vld [vmem:[%s14559_s3 + $0x30] sm:$0xff] }
 0xc52   :  { %s7604_s19 = spop %7603 }
 0xc53   :  { %v5244_v7 = vstv %s7604_s19  ;;  %s7606_s14 = spop %7605 }
 0xc54   :  { %v5246_v48 = vsel %vm5240_vm13, %v5244_v7, 0.0  ;;  %v5251_v20 = vstv %s7606_s14  ;;  %s7608_s27 = spop %7607 }
 0xc55   :  { %v5247_v27 = vadd.f32 %v5246_v48, %v5223_v33  ;;  %vm5253_vm7 = vcmp.eq.f32.partialorder %v5203_v40, %v5251_v20  ;;  %v5260_v26 = vstv %s7608_s27  ;;  %s7610_s20 = spop %7609  ;;  %v5399_v33 = vmul.f32 0.0, %v5397_v59 }
 0xc56   :  { %vm5262_vm2 = vcmp.eq.f32.partialorder %v5204_v57, %v5260_v26  ;;  %s7612_s21 = spop %7611  ;;  %v5267_v22 = vstv %s7610_s20  ;;  %v5389_v48 = vstv %s6846_s16  ;;  %s5352_s16 = sld [smem:[#allocation9]] }
 0xc57   :  { %vm5263_vm4 = vmand %vm5253_vm7, %vm5262_vm2  ;;  %v5274_v46 = vstv %s7612_s21  ;;  %s7614_s22 = spop %7613 }
 0xc58   :  { %v5269_v58 = vsel %vm5263_vm4, %v5267_v22, 0.0  ;;  %vm5276_vm6 = vcmp.eq.f32.partialorder %v5203_v40, %v5274_v46  ;;  %v5283_v10 = vstv %s7614_s22  ;;  %s7616_s25 = spop %7615 }
 0xc59   :  { %v5270_v8 = vadd.f32 %v5269_v58, %v5247_v27  ;;  %vm5285_vm8 = vcmp.eq.f32.partialorder %v5204_v57, %v5283_v10  ;;  %v5290_v5 = vstv %s7616_s25  ;;  %s7618_s2 = spop %7617  ;;  %v5418_v27 = vstv %s6849_s1  ;;  %s14165_s1 = sld [smem:[#allocation11 + $0x2]] }
 0xc5a   :  { %vm5286_vm11 = vmand %vm5276_vm6, %vm5285_vm8  ;;  %v5297_v49 = vstv %s7618_s2  ;;  %s7620_s10 = spop %7619  ;;  %vm5344_vm6 = vcmask 23552   ;;  %vm14831_vm8 = vcmask 392192   ;;  %v5403_v58 = vrot.slane %v5399_v33, 1 }
 0xc5b   :  { %v5292_v17 = vsel %vm5286_vm11, %v5290_v5, 0.0  ;;  %vm5299_vm3 = vcmp.eq.f32.partialorder %v5203_v40, %v5297_v49  ;;  %v5306_v21 = vstv %s7620_s10  ;;  %s7622_s26 = spop %7621  ;;  %vm15539_vm11 = vcmask 1040384   ;;  %s8022_s10 = smov 64  }
 0xc5c   :  { %v5293_v34 = vadd.f32 %v5292_v17, %v5270_v8  ;;  %vm5308_vm7 = vcmp.eq.f32.partialorder %v5204_v57, %v5306_v21  ;;  %s7624_s5 = spop %7623  ;;  %v5313_v24 = vstv %s7622_s26  ;;  %v5410_v10 = vstv %s6848_s12  ;;  %s8023_s26 = smov 48  }
 0xc5d   :  { %vm5309_vm2 = vmand %vm5299_vm3, %vm5308_vm7  ;;  %v5320_v47 = vstv %s7624_s5  ;;  %s7626_s7 = spop %7625  ;;  %vm15540_vm3 = vcmask 1046528   ;;  %v5420_v5 = vmul.f32 0.0, %v5418_v27 }
 0xc5e   :  { %v5315_v41 = vsel %vm5309_vm2, %v5313_v24, 0.0  ;;  %v5329_v51 = vstv %s7626_s7  ;;  %s7628_s11 = spop %7627  ;;  %vm5322_vm4 = vcmp.eq.f32.partialorder %v5203_v40, %v5320_v47  ;;  %vm15541_vm7 = vmmov %vm15540_vm3  ;;  %v5625_v47 = vld [vmem:[%s14559_s3 + $0x8] sm:$0xff] }
 0xc5f   :  { %vm5331_vm5 = vcmp.eq.f32.partialorder %v5204_v57, %v5329_v51  ;;  %v5316_v39 = vadd.f32 %v5315_v41, %v5293_v34  ;;  %v5336_v6 = vstv %s7628_s11  ;;  %v5368_v57 = vstv %s6844_s29  ;;  %vm15542_vm2 = vmmov %vm15540_vm3  ;;  %v5627_v41 = vld [vmem:[%s14559_s3 + $0x18] sm:$0xff]  ;;  %v5624_v51 = vld [vmem:[%s14559_s3] sm:$0xff] }
 0xc60   :  { %vm5332_vm13 = vmand %vm5322_vm4, %vm5331_vm5  ;;  %v5424_v34 = vrot.slane %v5420_v5, 1  ;;  %v5645_v5 = vld [vmem:[%s14559_s3 + $0xa8] sm:$0xff]  ;;  %vm5440_vm5 = vcmask 384000  }
 0xc61   :  { %v5338_v56 = vsel %vm5332_vm13, %v5336_v6, 0.0  ;;  %v5626_v6 = vld [vmem:[%s14559_s3 + $0x10] sm:$0xff]  ;;  %vm15543_vm4 = vmmov %vm15542_vm2  ;;  %vm5443_vm13 = vcmp.lt.s32.totalorder %v13981_v53, 7 }
 0xc62   :  { %v5339_v55 = vadd.f32 %v5338_v56, %v5316_v39  ;;  %v7203_v39 = vpack.c.bf16 %v5627_v41, %v5625_v47  ;;  %v5629_v56 = vld [vmem:[%s14559_s3 + $0x28] sm:$0xff]  ;;  %v5651_v41 = vld [vmem:[%s14559_s3 + $0xd8] sm:$0xff] }
 0xc63   :  { %v5649_v47 = vld [vmem:[%s14559_s3 + $0xc8] sm:$0xff] }
 0xc64   :  { %5341 = vrot.lane.b32.xlu0 %v5339_v55, %s8020_s0  ;;  %v5631_v55 = vld [vmem:[%s14559_s3 + $0x38] sm:$0xff]  ;;  %7204 = vmatprep.subr.bf16.mxu0 %v7203_v39  ;;  %v7227_v39 = vpack.c.bf16 %v5651_v41, %v5649_v47  ;;  %v5670_v47 = vld [vmem:[%s14559_s3 + $0x170] sm:$0xff]  ;;  %v5673_v41 = vld [vmem:[%s14559_s3 + $0x188] sm:$0xff] }
 0xcd6   :  { %v5342_v38 = vpop.permute.xlu0 %5341 }
 0xcd7   :  { %v5345_v13 = vsel %vm5344_vm6, 0.0, %v5342_v38  ;;  %v7207_v38 = vpack.c.bf16 %v5631_v55, %v5629_v56  ;;  %v5650_v56 = vld [vmem:[%s14559_s3 + $0xd0] sm:$0xff]  ;;  %v5653_v55 = vld [vmem:[%s14559_s3 + $0xe8] sm:$0xff] }
 0xcd8   :  { %v5347_v9 = vsel %vm14831_vm8, %v5345_v13, 0.0  ;;  %v5628_v13 = vld [vmem:[%s14559_s3 + $0x20] sm:$0xff] }
 0xcd9   :  { %v5349_v40 = vrot.slane %v5347_v9, 7  ;;  %v5633_v9 = vld [vmem:[%s14559_s3 + $0x48] sm:$0xff] }
 0xcdb   :  { %v13987_v2 = vsel %vm15539_vm11, 0.0, %v5349_v40  ;;  %v5635_v40 = vld [vmem:[%s14559_s3 + $0x58] sm:$0xff]  ;;  %vm5445_vm11 = vcmp.gt.s32.totalorder %v13981_v53, 0 }
 0xcdc   :  { %v5369_v45 = vmul.f32 %v5368_v57, %v13987_v2  ;;  %v5377_v63 = vmul.f32 %v5376_v50, %v13987_v2  ;;  %v5398_v7 = vmul.f32 %v5397_v59, %v13987_v2  ;;  %v5390_v22 = vmul.f32 %v5389_v48, %v13987_v2 }
 0xcdd   :  { %v5419_v8 = vmul.f32 %v5418_v27, %v13987_v2  ;;  %v5411_v17 = vmul.f32 %v5410_v10, %v13987_v2  ;;  %v7205_v50 = vpack.c.bf16 %v5626_v6, %v5624_v51  ;;  %v7209_v57 = vpack.c.bf16 %v5630_v28, %v5628_v13  ;;  %v5638_v27 = vld [vmem:[%s14559_s3 + $0x70] sm:$0xff]  ;;  %v5640_v10 = vld [vmem:[%s14559_s3 + $0x80] sm:$0xff] }
 0xcde   :  { %5371 = vrot.lane.b32.xlu1 %v5369_v45, %s8014_s6  ;;  %v5381_v20 = vrot.slane %v5377_v63, 1  ;;  %v5402_v46 = vrot.slane %v5398_v7, 1  ;;  %v7211_v59 = vpack.c.bf16 %v5635_v40, %v5633_v9  ;;  %v5634_v45 = vld [vmem:[%s14559_s3 + $0x50] sm:$0xff]  ;;  %v5637_v63 = vld [vmem:[%s14559_s3 + $0x68] sm:$0xff]  ;;  %v5639_v7 = vld [vmem:[%s14559_s3 + $0x78] sm:$0xff] }
 0xcdf   :  { %v5423_v21 = vrot.slane %v5419_v8, 1  ;;  %7206 = vmatpush1.bf16.msra.mxu0 %v7205_v50  ;;  %v7215_v48 = vpack.c.bf16 %v5639_v7, %v5637_v63  ;;  %v5642_v8 = vld [vmem:[%s14559_s3 + $0x90] sm:$0xff]  ;;  %v5648_v6 = vld [vmem:[%s14559_s3 + $0xc0] sm:$0xff]  ;;  %v5655_v50 = vld [vmem:[%s14559_s3 + $0xf8] sm:$0xff] }
 0xce0   :  { %v5383_v26 = vsel %vm15540_vm3, %v5381_v20, %v5382_v0  ;;  %v5404_v49 = vsel %vm15541_vm7, %v5402_v46, %v5403_v58  ;;  %7208 = vmatprep.subr.bf16.mxu0 %v7207_v38  ;;  %v5632_v0 = vld [vmem:[%s14559_s3 + $0x40] sm:$0xff]  ;;  %v7229_v38 = vpack.c.bf16 %v5650_v56, %v5648_v6  ;;  %v7231_v13 = vpack.c.bf16 %v5655_v50, %v5653_v55  ;;  %v5654_v9 = vld [vmem:[%s14559_s3 + $0xf0] sm:$0xff]  ;;  %v5657_v40 = vld [vmem:[%s14559_s3 + $0x108] sm:$0xff] }
 0xce1   :  { %5384 = vrot.lane.b32.xlu0 %v5383_v26, %s8014_s6  ;;  %v5425_v24 = vsel %vm15542_vm2, %v5423_v21, %v5424_v34  ;;  %v7213_v33 = vpack.c.bf16 %v5634_v45, %v5632_v0  ;;  %v5636_v20 = vld [vmem:[%s14559_s3 + $0x60] sm:$0xff]  ;;  %v5641_v26 = vld [vmem:[%s14559_s3 + $0x88] sm:$0xff]  ;;  %v5658_v63 = vld [vmem:[%s14559_s3 + $0x110] sm:$0xff] }
 0xce2   :  { %5392 = vrot.lane.b32.xlu1 %v5390_v22, %s8015_s17  ;;  %v5643_v22 = vld [vmem:[%s14559_s3 + $0x98] sm:$0xff]  ;;  %v7217_v46 = vpack.c.bf16 %v5638_v27, %v5636_v20  ;;  %v5644_v34 = vld [vmem:[%s14559_s3 + $0xa0] sm:$0xff]  ;;  %v5661_v7 = vld [vmem:[%s14559_s3 + $0x128] sm:$0xff] }
 0xce3   :  { %7210 = vmatpush1.bf16.msra.mxu0 %v7209_v57  ;;  %v7219_v58 = vpack.c.bf16 %v5643_v22, %v5641_v26  ;;  %v5652_v28 = vld [vmem:[%s14559_s3 + $0xe0] sm:$0xff]  ;;  %v5659_v57 = vld [vmem:[%s14559_s3 + $0x118] sm:$0xff]  ;;  %v5662_v26 = vld [vmem:[%s14559_s3 + $0x130] sm:$0xff] }
 0xce4   :  { %7212 = vmatprep.subr.bf16.mxu0 %v7211_v59  ;;  %v7233_v59 = vpack.c.bf16 %v5654_v9, %v5652_v28  ;;  %v7235_v0 = vpack.c.bf16 %v5659_v57, %v5657_v40  ;;  %v5656_v45 = vld [vmem:[%s14559_s3 + $0x100] sm:$0xff]  ;;  %v5665_v22 = vld [vmem:[%s14559_s3 + $0x148] sm:$0xff]  ;;  %v5674_v55 = vld [vmem:[%s14559_s3 + $0x190] sm:$0xff]  ;;  %v5353_v57 = vstv %s5352_s16 }
 0xce5   :  { %5405 = vrot.lane.b32.xlu0 %v5404_v49, %s8015_s17  ;;  %v5647_v49 = vld [vmem:[%s14559_s3 + $0xb8] sm:$0xff]  ;;  %v5660_v27 = vld [vmem:[%s14559_s3 + $0x120] sm:$0xff] }
 0xce6   :  { %5413 = vrot.lane.b32.xlu1 %v5411_v17, %s8016_s23  ;;  %v7221_v17 = vpack.c.bf16 %v5642_v8, %v5640_v10  ;;  %v7223_v21 = vpack.c.bf16 %v5647_v49, %v5645_v5  ;;  %v5664_v8 = vld [vmem:[%s14559_s3 + $0x140] sm:$0xff]  ;;  %v5666_v5 = vld [vmem:[%s14559_s3 + $0x150] sm:$0xff]  ;;  %v5669_v49 = vld [vmem:[%s14559_s3 + $0x168] sm:$0xff] }
 0xce7   :  { %7214 = vmatpush1.bf16.msra.mxu0 %v7213_v33  ;;  %v5663_v33 = vld [vmem:[%s14559_s3 + $0x138] sm:$0xff]  ;;  %v5672_v56 = vld [vmem:[%s14559_s3 + $0x180] sm:$0xff] }
 0xce8   :  { %7216 = vmatprep.subr.bf16.mxu0 %v7215_v48  ;;  %v7237_v48 = vpack.c.bf16 %v5658_v63, %v5656_v45  ;;  %v7239_v20 = vpack.c.bf16 %v5663_v33, %v5661_v7  ;;  %v7253_v50 = vpack.c.bf16 %v5674_v55, %v5672_v56 }
 0xce9   :  { %5437 = vrot.lane.b32.xlu0 %v13822_v19, %s8014_s6 }
 0xcea   :  { %5426 = vrot.lane.b32.xlu1 %v5425_v24, %s8016_s23  ;;  %v5646_v24 = vld [vmem:[%s14559_s3 + $0xb0] sm:$0xff] }
 0xceb   :  { %7218 = vmatpush1.bf16.msra.mxu0 %v7217_v46  ;;  %v7225_v51 = vpack.c.bf16 %v5646_v24, %v5644_v34  ;;  %v5667_v46 = vld [vmem:[%s14559_s3 + $0x158] sm:$0xff]  ;;  %v5668_v24 = vld [vmem:[%s14559_s3 + $0x160] sm:$0xff] }
 0xcec   :  { %7220 = vmatprep.subr.bf16.mxu0 %v7219_v58  ;;  %v7241_v58 = vpack.c.bf16 %v5662_v26, %v5660_v27  ;;  %v7243_v10 = vpack.c.bf16 %v5667_v46, %v5665_v22 }
 0xcef   :  { %7222 = vmatpush1.bf16.msra.mxu0 %v7221_v17  ;;  %v5671_v17 = vld [vmem:[%s14559_s3 + $0x178] sm:$0xff] }
 0xcf0   :  { %7224 = vmatprep.subr.bf16.mxu0 %v7223_v21  ;;  %v7245_v21 = vpack.c.bf16 %v5666_v5, %v5664_v8  ;;  %v7247_v34 = vpack.c.bf16 %v5671_v17, %v5669_v49  ;;  %v5679_v5 = vld [vmem:[%s14559_s3 + $0x1b8] sm:$0xff]  ;;  %v5676_v49 = vld [vmem:[%s14559_s3 + $0x1a0] sm:$0xff] }
 0xcf3   :  { %7226 = vmatpush1.bf16.msra.mxu0 %v7225_v51  ;;  %v5675_v51 = vld [vmem:[%s14559_s3 + $0x198] sm:$0xff] }
 0xcf4   :  { %7228 = vmatprep.subr.bf16.mxu0 %v7227_v39  ;;  %v7249_v39 = vpack.c.bf16 %v5670_v47, %v5668_v24  ;;  %v7251_v6 = vpack.c.bf16 %v5675_v51, %v5673_v41  ;;  %v5678_v24 = vld [vmem:[%s14559_s3 + $0x1b0] sm:$0xff]  ;;  %v5431_v41 = vstv %s14165_s1 }
 0xcf7   :  { %7230 = vmatpush1.bf16.msra.mxu0 %v7229_v38  ;;  %v5357_v38 = vstv %s6843_s30 }
 0xcf8   :  { %7232 = vmatprep.subr.bf16.mxu0 %v7231_v13  ;;  %v5359_v13 = vmul.f32 0.0, %v5357_v38  ;;  %v5358_v28 = vmul.f32 %v5357_v38, %v13987_v2 }
 0xcfa   :  { %v5363_v9 = vrot.slane %v5359_v13, 1  ;;  %v5362_v40 = vrot.slane %v5358_v28, 1  ;;  %v6853_v13 = vadd.f32 -4.0, %v13822_v19 }
 0xcfb   :  { %7234 = vmatpush1.bf16.msra.mxu0 %v7233_v59 }
 0xcfc   :  { %7236 = vmatprep.subr.bf16.mxu0 %v7235_v0  ;;  %v5364_v59 = vsel %vm15543_vm4, %v5362_v40, %v5363_v9  ;;  %v5354_v0 = vmul.f32 %v5353_v57, %v13987_v2  ;;  %v5677_v2 = vld [vmem:[%s14559_s3 + $0x1a8] sm:$0xff]  ;;  %v5683_v40 = vld [vmem:[%s14559_s3 + $0x1d8] sm:$0xff] }
 0xcfd   :  { %v5681_v9 = vld [vmem:[%s14559_s3 + $0x1c8] sm:$0xff] }
 0xcfe   :  { %v5366_v45 = vadd.f32 %v5364_v59, %v5354_v0  ;;  %v7259_v59 = vpack.c.bf16 %v5683_v40, %v5681_v9  ;;  %v5682_v0 = vld [vmem:[%s14559_s3 + $0x1d0] sm:$0xff] }
 0xcff   :  { %7238 = vmatpush1.bf16.msra.mxu0 %v7237_v48 }
 0xd00   :  { %7240 = vmatprep.subr.bf16.mxu0 %v7239_v20 }
 0xd03   :  { %7242 = vmatpush1.bf16.msra.mxu0 %v7241_v58  ;;  %v5442_v58 = vrot.slane %v13822_v19, 1 }
 0xd04   :  { %7244 = vmatprep.subr.bf16.mxu0 %v7243_v10  ;;  %v6851_v10 = vadd.f32 -64.0, %v13822_v19 }
 0xd06   :  { %vm5448_vm6 = vcmp.eq.f32.partialorder %v5442_v58, %v6851_v10 }
 0xd07   :  { %7246 = vmatpush1.bf16.msra.mxu0 %v7245_v21  ;;  %v6852_v21 = vadd.f32 60.0, %v13822_v19  ;;  %vm14188_vm3 = vmand %vm5448_vm6, %vm5443_vm13 }
 0xd08   :  { %7248 = vmatprep.subr.bf16.mxu0 %v7247_v34  ;;  %v7255_v34 = vpack.c.bf16 %v5679_v5, %v5677_v2 }
 0xd0b   :  { %7250 = vmatpush1.bf16.msra.mxu0 %v7249_v39  ;;  %v7257_v39 = vpack.c.bf16 %v5678_v24, %v5676_v49 }
 0xd0c   :  { %7252 = vmatprep.subr.bf16.mxu0 %v7251_v6 }
 0xd0f   :  { %7254 = vmatpush1.bf16.msra.mxu0 %v7253_v50  ;;  %v6854_v50 = vadd.f32 -68.0, %v13822_v19  ;;  %v5680_v19 = vld [vmem:[%s14559_s3 + $0x1c0] sm:$0xff]  ;;  %s8021_s3 = smov 96  }
 0xd10   :  { %7256 = vmatprep.subr.bf16.mxu0 %v7255_v34 }
 0xd13   :  { %7258 = vmatpush1.bf16.msra.mxu0 %v7257_v39 }
 0xd14   :  { %7260 = vmatprep.subr.bf16.mxu0 %v7259_v59 }
 0xd50   :  { %v5372_v63 = vpop.permute.xlu1 %5371 }
 0xd51   :  { %v5374_v7 = vadd.f32 %v5372_v63, %v5366_v45  ;;  %v7261_v45 = vpack.c.bf16 %v5682_v0, %v5680_v19 }
 0xd53   :  { %v5385_v33 = vpop.permute.xlu0 %5384  ;;  %7262 = vmatpush1.bf16.msra.mxu0 %v7261_v45 }
 0xd54   :  { %v5387_v48 = vadd.f32 %v5385_v33, %v5374_v7  ;;  %v5393_v20 = vpop.permute.xlu1 %5392 }
 0xd56   :  { %v5395_v27 = vadd.f32 %v5393_v20, %v5387_v48 }
 0xd57   :  { %v5406_v26 = vpop.permute.xlu0 %5405 }
 0xd58   :  { %v5408_v22 = vadd.f32 %v5406_v26, %v5395_v27  ;;  %v5414_v46 = vpop.permute.xlu1 %5413 }
 0xd5a   :  { %v5416_v8 = vadd.f32 %v5414_v46, %v5408_v22 }
 0xd5b   :  { %v5438_v17 = vpop.permute.xlu0 %5437 }
 0xd5c   :  { %v5441_v47 = vsel %vm5440_vm5, %v5438_v17, -1000.0  ;;  %v5427_v51 = vpop.permute.xlu1 %5426 }
 0xd5d   :  { %v5444_v6 = vrot.slane %v5441_v47, 7  ;;  %v5446_v56 = vrot.slane %v5441_v47, 1  ;;  %v5429_v55 = vadd.f32 %v5427_v51, %v5416_v8  ;;  %vm5455_vm6 = vcmp.eq.f32.partialorder %v5441_v47, %v6853_v13 }
 0xd5f   :  { %vm5451_vm7 = vcmp.eq.f32.partialorder %v5444_v6, %v6852_v21  ;;  %v5432_v28 = vadd.f32 %v5431_v41, %v5429_v55  ;;  %vm5458_vm4 = vcmp.eq.f32.partialorder %v5446_v56, %v6854_v50 }
 0xd60   :  { %vm5452_vm2 = vmand %vm5451_vm7, %vm5445_vm11 }
 0xd61   :  { %vm5453_vm5 = vmor %vm14188_vm3, %vm5452_vm2  ;;  %v5433_v57 = vmax.f32 %v5432_v28, 0.0  ;;  %vm15552_vm3 = vnez %v15498_v35  ;;  %vm15553_vm2 = vnez %v15501_v44 }
 0xd62   :  { %vm5456_vm11 = vmor %vm5453_vm5, %vm5455_vm6  ;;  %vm15555_vm5 = vnez %v15507_v14  ;;  %vm15556_vm6 = vnez %v15512_v25 }
 0xd63   :  { %vm5459_vm7 = vmand %vm5458_vm4, %vm5443_vm13  ;;  %vm15551_vm13 = vnez %v15496_v37  ;;  %vm15554_vm4 = vnez %v15504_v30 }
 0xd64   :  { %vm5460_vm8 = vmor %vm5456_vm11, %vm5459_vm7  ;;  %vm15557_vm11 = vnez %v15515_v52  ;;  %vm15558_vm7 = vnez %v15518_v54 }
 0xd65   :  { %v14209_v63 = vsel %vm5460_vm8, 0.0, %v5433_v57  ;;  %vm15550_vm8 = vnez %v15494_v62 }
 0xd66   :  { %v5502_v7 = vsel %vm13826_vm12, %v14209_v63, 0.0  ;;  %v5491_v33 = vsel %vm13832_vm1, %v14209_v63, 0.0  ;;  %v5513_v48 = vsel %vm13838_vm14, %v14209_v63, 0.0  ;;  %v5480_v53 = vsel %vm13844_vm10, %v14209_v63, 0.0 }
 0xd67   :  { %5567 = vrot.lane.b32.xlu1 %v5502_v7, %s8006_s18  ;;  %5547 = vrot.lane.b32.xlu0 %v5491_v33, %s8021_s3  ;;  %vm15546_vm12 = vnez %v15486_v42  ;;  %vm15547_vm1 = vnez %v15488_v11  ;;  %vm15548_vm14 = vnez %v15490_v32  ;;  %vm15549_vm10 = vnez %v15492_v23 }
 0xd68   :  { %v5482_v36 = vsel %vm15546_vm12, %v14209_v63, 0.0  ;;  %v5504_v15 = vsel %vm15547_vm1, %v14209_v63, 0.0  ;;  %v5493_v60 = vsel %vm15548_vm14, %v14209_v63, 0.0  ;;  %v5495_v16 = vsel %vm15549_vm10, %v14209_v63, 0.0 }
 0xd69   :  { %v7861_v20 = vpack.i.bf16 %v5482_v36, %v5480_v53  ;;  %v5515_v27 = vsel %vm15550_vm8, %v14209_v63, 0.0  ;;  %v5484_v42 = vsel %vm15551_vm13, %v14209_v63, 0.0  ;;  %v5486_v11 = vsel %vm15552_vm3, %v14209_v63, 0.0 }
 0xd6a   :  { %v7866_v26 = vpack.i.bf16 %v5486_v11, %v5484_v42  ;;  %v5506_v32 = vsel %vm15553_vm2, %v14209_v63, 0.0  ;;  %v5497_v23 = vsel %vm15554_vm4, %v14209_v63, 0.0  ;;  %v5517_v62 = vsel %vm15555_vm5, %v14209_v63, 0.0 }
 0xd6b   :  { %v5519_v37 = vsel %vm13910_vm9, %v14209_v63, 0.0  ;;  %v5508_v35 = vsel %vm15556_vm6, %v14209_v63, 0.0  ;;  %v5510_v44 = vsel %vm15557_vm11, %v14209_v63, 0.0  ;;  %v5499_v30 = vsel %vm15558_vm7, %v14209_v63, 0.0  ;;  %5587 = vrot.lane.b32.xlu1 %v5513_v48, %s8022_s10  ;;  %7862 = vrot.lane.b32.xlu0 %v7861_v20, %s8023_s26 }
 0xd6c   :  { %vm15559_vm12 = vnez %v15521_v12  ;;  %vm15560_vm9 = vnez %v15524_v3  ;;  %v5465_v25 = vsel %vm13941_vm15, %v14209_v63, 0.0  ;;  %v5468_v52 = vsel %vm13946_vm0, %v14209_v63, 0.0 }
 0xd6d   :  { %v5521_v14 = vsel %vm15559_vm12, %v14209_v63, 0.0  ;;  %v5488_v29 = vsel %vm15560_vm9, %v14209_v63, 0.0  ;;  %vm15561_vm1 = vnez %v15533_v43  ;;  %vm15562_vm14 = vnez %v15536_v1 }
 0xd6e   :  { %v5471_v54 = vsel %vm15561_vm1, %v14209_v63, 0.0  ;;  %v5474_v12 = vsel %vm15562_vm14, %v14209_v63, 0.0  ;;  %vm15563_vm10 = vnez %v15538_v61  ;;  %vm5612_vm15 = vcmask 130048  }
 0xd6f   :  { %v5477_v3 = vsel %vm15563_vm10, %v14209_v63, 0.0  ;;  %5569 = vrot.lane.b32.xlu1 %v5504_v15, %s8006_s18  ;;  %5549 = vrot.lane.b32.xlu0 %v5493_v60, %s8021_s3  ;;  %vm5618_vm0 = vcmask 523264   ;;  %vm5684_vm8 = vcmask 916480   ;;  %vm15564_vm13 = vcmask 392192  }
 0xd70   :  { %vm15565_vm3 = vcmask 785408   ;;  %vm15566_vm2 = vmmov %vm15564_vm13  ;;  %vm5815_vm1 = vcmask 326656  }
 0xd71   :  { %vm15567_vm4 = vmmov %vm15565_vm3 }
 0xd72   :  { %vm15568_vm5 = vmmov %vm15566_vm2 }
 0xd73   :  { %5551 = vrot.lane.b32.xlu1 %v5495_v16, %s8021_s3  ;;  %5589 = vrot.lane.b32.xlu0 %v5515_v27, %s8022_s10  ;;  %vm15569_vm6 = vmmov %vm15565_vm3 }
 0xd74   :  { %vm15570_vm11 = vmmov %vm15566_vm2 }
 0xd75   :  { %vm15571_vm7 = vmmov %vm15565_vm3 }
 0xd76   :  { %vm15572_vm12 = vmmov %vm15566_vm2 }
 0xd77   :  { %7867 = vrot.lane.b32.xlu1 %v7866_v26, %s8023_s26  ;;  %5571 = vrot.lane.b32.xlu0 %v5506_v32, %s8006_s18  ;;  %vm15573_vm9 = vmmov %vm15565_vm3 }
 0xd7b   :  { %5553 = vrot.lane.b32.xlu1 %v5497_v23, %s8021_s3  ;;  %5591 = vrot.lane.b32.xlu0 %v5517_v62, %s8022_s10 }
 0xd7f   :  { %5593 = vrot.lane.b32.xlu1 %v5519_v37, %s8022_s10  ;;  %5573 = vrot.lane.b32.xlu0 %v5508_v35, %s8006_s18 }
 0xd83   :  { %5575 = vrot.lane.b32.xlu1 %v5510_v44, %s8006_s18  ;;  %5555 = vrot.lane.b32.xlu0 %v5499_v30, %s8021_s3  ;;  %v6127_v44 = vld [vmem:[#allocation6 + $0x208] sm:$0xff]  ;;  %v6129_v30 = vld [vmem:[#allocation6 + $0x218] sm:$0xff] }
 0xd87   :  { %5595 = vrot.lane.b32.xlu1 %v5521_v14, %s8022_s10  ;;  %5535 = vrot.lane.b32.xlu0 %v5488_v29, %s8023_s26  ;;  %v6126_v29 = vld [vmem:[#allocation6 + $0x200] sm:$0xff] }
 0xdd9   :  { %v5568_v4 = vpop.permute.xlu1 %5567  ;;  %v5548_v18 = vpop.permute.xlu0 %5547 }
 0xdda   :  { %v5613_v43 = vsel %vm5612_vm15, %v5548_v18, %v5568_v4 }
 0xddd   :  { %v5588_v1 = vpop.permute.xlu1 %5587  ;;  %v7863_v22 = vpop.permute.xlu0 %7862 }
 0xdde   :  { %v5619_v46 = vsel %vm5618_vm0, %v5613_v43, %v5588_v1  ;;  %v7864_v58 = vunpack.i.l.bf16 %v7863_v22  ;;  %v7865_v10 = vunpack.i.h.bf16 %v7863_v22  ;;  %v6133_v43 = vld [vmem:[#allocation6 + $0x238] sm:$0xff]  ;;  %v6130_v1 = vld [vmem:[#allocation6 + $0x220] sm:$0xff]  ;;  %v6132_v22 = vld [vmem:[#allocation6 + $0x230] sm:$0xff] }
 0xddf   :  { %6855 = vmatprep.mubr.msk.f32.mxu0 %vm5684_vm8, %v5619_v46  ;;  %v5799_v46 = vld [vmem:[%s14560_s4 + $0x20] sm:$0xff] }
 0xde0   :  { %v5602_v8 = vsel %vm15564_vm13, %v5465_v25, %v7864_v58  ;;  %v5603_v17 = vsel %vm15566_vm2, %v5468_v52, %v7865_v10  ;;  %v6128_v25 = vld [vmem:[#allocation6 + $0x210] sm:$0xff]  ;;  %v5796_v58 = vld [vmem:[%s14560_s4 + $0x8] sm:$0xff] }
 0xde1   :  { %v5570_v2 = vpop.permute.xlu1 %5569  ;;  %v5550_v5 = vpop.permute.xlu0 %5549  ;;  %v5607_v49 = vsel %vm15565_vm3, %v5602_v8, %v5548_v18  ;;  %v7273_v4 = vpack.c.bf16 %v6128_v25, %v6126_v29  ;;  %v6131_v18 = vld [vmem:[#allocation6 + $0x228] sm:$0xff]  ;;  %v5806_v29 = vld [vmem:[%s14560_s4 + $0x58] sm:$0xff] }
 0xde2   :  { %5765 = vmatmul.mubr.f32.vlgmr.msra.gmra.mrb[16].mxu0 %v5607_v49  ;;  %v5614_v21 = vsel %vm5612_vm15, %v5550_v5, %v5570_v2  ;;  %v5608_v41 = vsel %vm15567_vm4, %v5603_v17, %v5550_v5  ;;  %v7275_v10 = vpack.c.bf16 %v6133_v43, %v6131_v18  ;;  %v6135_v8 = vld [vmem:[#allocation6 + $0x248] sm:$0xff]  ;;  %v6137_v2 = vld [vmem:[#allocation6 + $0x258] sm:$0xff]  ;;  %v7277_v5 = vpack.c.bf16 %v6132_v22, %v6130_v1  ;;  %v6134_v17 = vld [vmem:[#allocation6 + $0x240] sm:$0xff] }
 0xde3   :  { %v5800_v49 = vld [vmem:[%s14560_s4 + $0x28] sm:$0xff]  ;;  %v5807_v18 = vld [vmem:[%s14560_s4 + $0x60] sm:$0xff]  ;;  %v6169_v1 = vld [vmem:[#allocation6 + $0x358] sm:$0xff] }
 0xde4   :  { %v6163_v25 = vld [vmem:[#allocation6 + $0x328] sm:$0xff] }
 0xde5   :  { %v5552_v34 = vpop.permute.xlu1 %5551  ;;  %v5590_v24 = vpop.permute.xlu0 %5589  ;;  %v6167_v43 = vld [vmem:[#allocation6 + $0x348] sm:$0xff] }
 0xde6   :  { %v5620_v47 = vsel %vm5618_vm0, %v5614_v21, %v5590_v24  ;;  %v6136_v21 = vld [vmem:[#allocation6 + $0x250] sm:$0xff]  ;;  %v7279_v24 = vpack.c.bf16 %v6137_v2, %v6135_v8  ;;  %v5808_v8 = vld [vmem:[%s14560_s4 + $0x68] sm:$0xff] }
 0xde7   :  { %6856 = vmatprep.mubr.msk.f32.mxu0 %vm5684_vm8, %v5620_v47  ;;  %v6139_v47 = vld [vmem:[#allocation6 + $0x268] sm:$0xff] }
 0xde8   :  { %5771 = vmatmul.mubr.f32.gmra.mrb[18].mxu0 %v5608_v41  ;;  %v6141_v41 = vld [vmem:[#allocation6 + $0x278] sm:$0xff]  ;;  %v6171_v2 = vld [vmem:[#allocation6 + $0x368] sm:$0xff] }
 0xde9   :  { %v7868_v51 = vpop.permute.xlu1 %7867  ;;  %v5572_v39 = vpop.permute.xlu0 %5571 }
 0xdea   :  { %v7869_v6 = vunpack.i.l.bf16 %v7868_v51  ;;  %v7870_v55 = vunpack.i.h.bf16 %v7868_v51  ;;  %v5615_v50 = vsel %vm5612_vm15, %v5552_v34, %v5572_v39  ;;  %v7281_v51 = vpack.c.bf16 %v6136_v21, %v6134_v17  ;;  %v6170_v21 = vld [vmem:[#allocation6 + $0x360] sm:$0xff] }
 0xdeb   :  { %v7283_v39 = vpack.c.bf16 %v6141_v41, %v6139_v47  ;;  %v6175_v47 = vld [vmem:[#allocation6 + $0x388] sm:$0xff]  ;;  %v6177_v41 = vld [vmem:[#allocation6 + $0x398] sm:$0xff] }
 0xdec   :  { %v5604_v56 = vsel %vm15568_vm5, %v5471_v54, %v7869_v6  ;;  %v5605_v59 = vsel %vm15570_vm11, %v5474_v12, %v7870_v55  ;;  %v5798_v54 = vld [vmem:[%s14560_s4 + $0x18] sm:$0xff]  ;;  %v5795_v12 = vld [vmem:[%s14560_s4] sm:$0xff]  ;;  %v5801_v55 = vld [vmem:[%s14560_s4 + $0x30] sm:$0xff] }
 0xded   :  { %v5554_v38 = vpop.permute.xlu1 %5553  ;;  %v5592_v13 = vpop.permute.xlu0 %5591  ;;  %v5609_v9 = vsel %vm15569_vm6, %v5604_v56, %v5552_v34  ;;  %v5797_v34 = vld [vmem:[%s14560_s4 + $0x10] sm:$0xff]  ;;  %v6138_v6 = vld [vmem:[#allocation6 + $0x260] sm:$0xff] }
 0xdee   :  { %v5621_v28 = vsel %vm5618_vm0, %v5615_v50, %v5592_v13  ;;  %v5610_v45 = vsel %vm15571_vm7, %v5605_v59, %v5554_v38  ;;  %v6140_v56 = vld [vmem:[#allocation6 + $0x270] sm:$0xff]  ;;  %v6143_v50 = vld [vmem:[#allocation6 + $0x288] sm:$0xff] }
 0xdef   :  { %6857 = vmatprep.mubr.msk.f32.mxu0 %vm5684_vm8, %v5621_v28  ;;  %v7285_v13 = vpack.c.bf16 %v6140_v56, %v6138_v6  ;;  %v6147_v59 = vld [vmem:[#allocation6 + $0x2a8] sm:$0xff]  ;;  %v6174_v6 = vld [vmem:[#allocation6 + $0x380] sm:$0xff]  ;;  %v6176_v56 = vld [vmem:[#allocation6 + $0x390] sm:$0xff] }
 0xdf0   :  { %5777 = vmatmul.mubr.f32.gmra.mrb[20].mxu0 %v5609_v9  ;;  %v6142_v9 = vld [vmem:[#allocation6 + $0x280] sm:$0xff] }
 0xdf1   :  { %v5594_v40 = vpop.permute.xlu1 %5593  ;;  %v5574_v57 = vpop.permute.xlu0 %5573 }
 0xdf2   :  { %v5616_v19 = vsel %vm5612_vm15, %v5554_v38, %v5574_v57  ;;  %v6145_v38 = vld [vmem:[#allocation6 + $0x298] sm:$0xff] }
 0xdf3   :  { %v5622_v0 = vsel %vm5618_vm0, %v5616_v19, %v5594_v40  ;;  %v7287_v28 = vpack.c.bf16 %v6145_v38, %v6143_v50  ;;  %v6144_v40 = vld [vmem:[#allocation6 + $0x290] sm:$0xff]  ;;  %v5802_v57 = vld [vmem:[%s14560_s4 + $0x38] sm:$0xff]  ;;  %v6179_v50 = vld [vmem:[#allocation6 + $0x3a8] sm:$0xff] }
 0xdf4   :  { %6858 = vmatprep.mubr.msk.f32.mxu0 %vm5684_vm8, %v5622_v0  ;;  %v6149_v19 = vld [vmem:[#allocation6 + $0x2b8] sm:$0xff]  ;;  %v7289_v0 = vpack.c.bf16 %v6144_v40, %v6142_v9  ;;  %v6178_v9 = vld [vmem:[#allocation6 + $0x3a0] sm:$0xff]  ;;  %v6180_v40 = vld [vmem:[#allocation6 + $0x3b0] sm:$0xff] }
 0xdf5   :  { %v5576_v7 = vpop.permute.xlu1 %5575  ;;  %v5556_v33 = vpop.permute.xlu0 %5555  ;;  %5783 = vmatmul.mubr.f32.gmra.mrb[22].mxu0 %v5610_v45  ;;  %v7291_v45 = vpack.c.bf16 %v6149_v19, %v6147_v59  ;;  %v6181_v38 = vld [vmem:[#allocation6 + $0x3b8] sm:$0xff]  ;;  %v7325_v59 = vpack.c.bf16 %v6180_v40, %v6178_v9  ;;  %v5812_v19 = vld [vmem:[%s14560_s4 + $0x88] sm:$0xff]  ;;  %v6079_v9 = vld [vmem:[#allocation6 + $0x90] sm:$0xff] }
 0xdf6   :  { %v5617_v48 = vsel %vm5612_vm15, %v5556_v33, %v5576_v7  ;;  %v6146_v7 = vld [vmem:[#allocation6 + $0x2a0] sm:$0xff] }
 0xdf9   :  { %v5596_v53 = vpop.permute.xlu1 %5595  ;;  %v5536_v36 = vpop.permute.xlu0 %5535 }
 0xdfa   :  { %v5623_v15 = vsel %vm5618_vm0, %v5617_v48, %v5596_v53  ;;  %v5606_v60 = vsel %vm15572_vm12, %v5477_v3, %v5536_v36  ;;  %v7271_v3 = vpack.c.bf16 %v6129_v30, %v6127_v44  ;;  %v5803_v48 = vld [vmem:[%s14560_s4 + $0x40] sm:$0xff]  ;;  %v6151_v53 = vld [vmem:[#allocation6 + $0x2c8] sm:$0xff]  ;;  %v6153_v36 = vld [vmem:[#allocation6 + $0x2d8] sm:$0xff] }
 0xdfb   :  { %6859 = vmatprep.mubr.msk.f32.mxu0 %vm5684_vm8, %v5623_v15  ;;  %v5611_v16 = vsel %vm15573_vm9, %v5606_v60, %v5556_v33  ;;  %v6148_v33 = vld [vmem:[#allocation6 + $0x2b0] sm:$0xff]  ;;  %v7295_v60 = vpack.c.bf16 %v6153_v36, %v6151_v53  ;;  %v6158_v30 = vld [vmem:[#allocation6 + $0x300] sm:$0xff] }
 0xdfc   :  { %5789 = vmatmul.mubr.f32.gmra.mrb[24].mxu0 %v5611_v16  ;;  %v7293_v15 = vpack.c.bf16 %v6148_v33, %v6146_v7  ;;  %v6150_v16 = vld [vmem:[#allocation6 + $0x2c0] sm:$0xff]  ;;  %v6185_v7 = vld [vmem:[#allocation6 + $0x3d8] sm:$0xff]  ;;  %v6184_v36 = vld [vmem:[#allocation6 + $0x3d0] sm:$0xff] }
 0xdfd   :  { %5940 = vmatprep.mubr.f32.mxu0 %v15476_v31  ;;  %v5814_v33 = vld [vmem:[%s14560_s4 + $0x98] sm:$0xff]  ;;  %v6182_v53 = vld [vmem:[#allocation6 + $0x3c0] sm:$0xff] }
 0xeb5   :  { %v5766_v20 = vpop.f32.mrb[16].mxu0 }
 0xeb6   :  { %v5768_v27 = vpop.f32.mrb[17].mxu0 }
 0xebb   :  { %v5772_v42 = vpop.f32.mrb[18].mxu0 }
 0xebc   :  { %v7265_v11 = vpack.c.bf16 %v5772_v42, %v5766_v20  ;;  %v5774_v26 = vpop.f32.mrb[19].mxu0  ;;  %v6152_v20 = vld [vmem:[#allocation6 + $0x2d0] sm:$0xff]  ;;  %v6155_v42 = vld [vmem:[#allocation6 + $0x2e8] sm:$0xff] }
 0xebd   :  { %v7263_v32 = vpack.c.bf16 %v5774_v26, %v5768_v27  ;;  %v5804_v27 = vld [vmem:[%s14560_s4 + $0x48] sm:$0xff]  ;;  %v7297_v26 = vpack.c.bf16 %v6152_v20, %v6150_v16  ;;  %v6189_v16 = vld [vmem:[#allocation6 + $0x3f8] sm:$0xff]  ;;  %v6186_v20 = vld [vmem:[#allocation6 + $0x3e0] sm:$0xff] }
 0xebf   :  { %7264 = vmatprep.subr.bf16.mxu0 %v7263_v32  ;;  %7527 = vmatprep.subr.bf16.mxu1 %v7263_v32 }
 0xec0   :  { %7266 = vmatpush1.bf16.msra.mxu0 %v7265_v11  ;;  %7530 = vmatpush1.bf16.msra.mxu1 %v7265_v11  ;;  %v6157_v11 = vld [vmem:[#allocation6 + $0x2f8] sm:$0xff] }
 0xec1   :  { %v7299_v32 = vpack.c.bf16 %v6157_v11, %v6155_v42  ;;  %v6188_v42 = vld [vmem:[#allocation6 + $0x3f0] sm:$0xff]  ;;  %v6062_v11 = vld [vmem:[#allocation6 + $0x8] sm:$0xff] }
 0xec3   :  { %v5778_v61 = vpop.f32.mrb[20].mxu0 }
 0xec4   :  { %v5780_v63 = vpop.f32.mrb[21].mxu0 }
 0xec8   :  { %v5784_v23 = vpop.f32.mrb[22].mxu0 }
 0xec9   :  { %v7269_v62 = vpack.c.bf16 %v5784_v23, %v5778_v61  ;;  %v5786_v37 = vpop.f32.mrb[23].mxu0  ;;  %v6154_v61 = vld [vmem:[#allocation6 + $0x2e0] sm:$0xff]  ;;  %v5805_v23 = vld [vmem:[%s14560_s4 + $0x50] sm:$0xff] }
 0xeca   :  { %v7267_v35 = vpack.c.bf16 %v5786_v37, %v5780_v63  ;;  %v6156_v63 = vld [vmem:[#allocation6 + $0x2f0] sm:$0xff]  ;;  %v6161_v37 = vld [vmem:[#allocation6 + $0x318] sm:$0xff] }
 0xecc   :  { %7268 = vmatprep.subr.bf16.mxu0 %v7267_v35  ;;  %7528 = vmatprep.subr.bf16.mxu1 %v7267_v35  ;;  %v7301_v35 = vpack.c.bf16 %v6156_v63, %v6154_v61 }
 0xecd   :  { %7270 = vmatpush1.bf16.msra.mxu0 %v7269_v62  ;;  %7531 = vmatpush1.bf16.msra.mxu1 %v7269_v62  ;;  %v6159_v62 = vld [vmem:[#allocation6 + $0x308] sm:$0xff] }
 0xece   :  { %v7303_v44 = vpack.c.bf16 %v6161_v37, %v6159_v62 }
 0xecf   :  { %v5790_v14 = vpop.f32.mrb[24].mxu0 }
 0xed0   :  { %v5792_v52 = vpop.f32.mrb[25].mxu0 }
 0xed1   :  { %5884 = vmatprep.subr.mxu0 %v5792_v52  ;;  %7529 = vmatprep.subr.mxu1 %v5792_v52  ;;  %v6165_v52 = vld [vmem:[#allocation6 + $0x338] sm:$0xff] }
 0xed2   :  { %5885 = vmatpush1.msra.mxu0 %v5790_v14  ;;  %7532 = vmatpush1.msra.mxu1 %v5790_v14  ;;  %v6160_v14 = vld [vmem:[#allocation6 + $0x310] sm:$0xff] }
 0xed3   :  { %6863 = vmatmul.mubr.msk.f32.vlgmr.msra.gmra.mrb[8].mxu1 %vm5815_vm1, %v5798_v54  ;;  %6860 = vmatmul.mubr.msk.f32.vlgmr.msra.gmra.mrb[26].mxu0 %vm5815_vm1, %v5795_v12  ;;  %v7305_v54 = vpack.c.bf16 %v6160_v14, %v6158_v30  ;;  %v7307_v12 = vpack.c.bf16 %v6165_v52, %v6163_v25  ;;  %v6061_v30 = vld [vmem:[#allocation6] sm:$0xff]  ;;  %v6063_v14 = vld [vmem:[#allocation6 + $0x10] sm:$0xff]  ;;  %v6066_v25 = vld [vmem:[#allocation6 + $0x28] sm:$0xff] }
 0xed4   :  { %5964 = vmatprep.mubr.f32.mxu1 %v15476_v31  ;;  %5946 = vmatprep.mubr.f32.mxu0 %v15476_v31  ;;  %v6068_v52 = vld [vmem:[#allocation6 + $0x38] sm:$0xff] }
 0xed5   :  { %7272 = vmatprep.subr.bf16.mxu1 %v7271_v3  ;;  %v6162_v3 = vld [vmem:[#allocation6 + $0x320] sm:$0xff] }
 0xed6   :  { %7274 = vmatpush1.bf16.msra.mxu1 %v7273_v4  ;;  %v6164_v4 = vld [vmem:[#allocation6 + $0x330] sm:$0xff] }
 0xed7   :  { %6864 = vmatmul.mubr.msk.f32.gmra.mrb[10].mxu1 %vm5815_vm1, %v5799_v46  ;;  %6861 = vmatmul.mubr.msk.f32.gmra.mrb[28].mxu0 %vm5815_vm1, %v5796_v58  ;;  %v7309_v22 = vpack.c.bf16 %v6164_v4, %v6162_v3  ;;  %v7311_v46 = vpack.c.bf16 %v6169_v1, %v6167_v43  ;;  %v6166_v58 = vld [vmem:[#allocation6 + $0x340] sm:$0xff]  ;;  %v6067_v1 = vld [vmem:[#allocation6 + $0x30] sm:$0xff] }
 0xed8   :  { %5970 = vmatprep.mubr.f32.mxu1 %v15476_v31  ;;  %5952 = vmatprep.mubr.f32.mxu0 %v15476_v31  ;;  %v6065_v43 = vld [vmem:[#allocation6 + $0x20] sm:$0xff] }
 0xed9   :  { %7276 = vmatprep.subr.bf16.mxu1 %v7275_v10  ;;  %v6168_v10 = vld [vmem:[#allocation6 + $0x350] sm:$0xff] }
 0xeda   :  { %7278 = vmatpush1.bf16.msra.mxu1 %v7277_v5  ;;  %v6173_v5 = vld [vmem:[#allocation6 + $0x378] sm:$0xff] }
 0xedb   :  { %6865 = vmatmul.mubr.msk.f32.gmra.mrb[12].mxu1 %vm5815_vm1, %v5800_v49  ;;  %6862 = vmatmul.mubr.msk.f32.gmra.mrb[30].mxu0 %vm5815_vm1, %v5797_v34  ;;  %v7313_v49 = vpack.c.bf16 %v6168_v10, %v6166_v58  ;;  %v7315_v17 = vpack.c.bf16 %v6173_v5, %v6171_v2  ;;  %v6172_v34 = vld [vmem:[#allocation6 + $0x370] sm:$0xff]  ;;  %v6072_v58 = vld [vmem:[#allocation6 + $0x58] sm:$0xff]  ;;  %v7341_v10 = vpack.c.bf16 %v6067_v1, %v6065_v43  ;;  %v6069_v5 = vld [vmem:[#allocation6 + $0x40] sm:$0xff] }
 0xedc   :  { %5976 = vmatprep.mubr.f32.mxu1 %v15476_v31  ;;  %7280 = vmatprep.subr.bf16.mxu1 %v7279_v24  ;;  %v5809_v24 = vld [vmem:[%s14560_s4 + $0x70] sm:$0xff]  ;;  %v6100_v43 = vld [vmem:[#allocation6 + $0x138] sm:$0xff] }
 0xede   :  { %7282 = vmatpush1.bf16.msra.mxu1 %v7281_v51  ;;  %v7317_v51 = vpack.c.bf16 %v6172_v34, %v6170_v21  ;;  %v6074_v21 = vld [vmem:[#allocation6 + $0x68] sm:$0xff]  ;;  %v6076_v34 = vld [vmem:[#allocation6 + $0x78] sm:$0xff] }
 0xedf   :  { %6866 = vmatmul.mubr.msk.f32.gmra.mrb[14].mxu1 %vm5815_vm1, %v5801_v55  ;;  %7284 = vmatprep.subr.bf16.mxu1 %v7283_v39  ;;  %v7319_v39 = vpack.c.bf16 %v6177_v41, %v6175_v47  ;;  %v5810_v55 = vld [vmem:[%s14560_s4 + $0x78] sm:$0xff]  ;;  %v7347_v41 = vpack.c.bf16 %v6076_v34, %v6074_v21  ;;  %v6103_v21 = vld [vmem:[#allocation6 + $0x150] sm:$0xff]  ;;  %v6106_v34 = vld [vmem:[#allocation6 + $0x168] sm:$0xff] }
 0xee0   :  { %5982 = vmatprep.mubr.f32.mxu1 %v15476_v31 }
 0xee2   :  { %7286 = vmatpush1.bf16.msra.mxu1 %v7285_v13  ;;  %v7321_v13 = vpack.c.bf16 %v6176_v56, %v6174_v6  ;;  %v6078_v56 = vld [vmem:[#allocation6 + $0x88] sm:$0xff] }
 0xee3   :  { %6867 = vmatmul.mubr.msk.f32.gmra.mrb[16].mxu1 %vm5815_vm1, %v5802_v57  ;;  %7288 = vmatprep.subr.bf16.mxu1 %v7287_v28  ;;  %v7323_v28 = vpack.c.bf16 %v6181_v38, %v6179_v50  ;;  %v5811_v57 = vld [vmem:[%s14560_s4 + $0x80] sm:$0xff] }
 0xee4   :  { %5988 = vmatprep.mubr.f32.mxu1 %v15476_v31 }
 0xee6   :  { %7290 = vmatpush1.bf16.msra.mxu1 %v7289_v0  ;;  %v5813_v0 = vld [vmem:[%s14560_s4 + $0x90] sm:$0xff]  ;;  %s8024_s4 = smov [#allocation12]  }
 0xee7   :  { %6868 = vmatmul.mubr.msk.f32.gmra.mrb[18].mxu1 %vm5815_vm1, %v5803_v48  ;;  %7292 = vmatprep.subr.bf16.mxu1 %v7291_v45  ;;  %v6183_v45 = vld [vmem:[#allocation6 + $0x3c8] sm:$0xff]  ;;  %s6790_s13 = sshll.u32 %s8024_s4, 4  ;;  %s6791_s13 = int_to_ptr.vmem [resolvable:$true] %s6790_s13 }
 0xee8   :  { %5994 = vmatprep.mubr.f32.mxu1 %v15476_v31  ;;  %v7327_v48 = vpack.c.bf16 %v6185_v7, %v6183_v45  ;;  %v6081_v7 = vld [vmem:[#allocation6 + $0xa0] sm:$0xff]  ;;  %s7971_s28 = scalar_lea.vmem %s6791_s13, 16  ;;  %s7975_s8 = scalar_lea.vmem %s6791_s13, 32 }
 0xee9   :  { %p7972_p3 = scmp.ne.s32.totalorder %s6791_s13, %s7971_s28  ;;  %p7976_p4 = scmp.lt.s32.totalorder %s6791_s13, %s6791_s13 }
 0xeea   :  { %7294 = vmatpush1.bf16.msra.mxu1 %v7293_v15  ;;  %v7329_v15 = vpack.c.bf16 %v6184_v36, %v6182_v53  ;;  %v6086_v53 = vld [vmem:[#allocation6 + $0xc8] sm:$0xff]  ;;  %v6088_v36 = vld [vmem:[#allocation6 + $0xd8] sm:$0xff]  ;;  %p7977_p5 = scmp.lt.s32.totalorder %s7975_s8, %s7971_s28 }
 0xeeb   :  { %6869 = vmatmul.mubr.msk.f32.gmra.mrb[20].mxu1 %vm5815_vm1, %v5804_v27  ;;  %7296 = vmatprep.subr.bf16.mxu1 %v7295_v60  ;;  %v6187_v60 = vld [vmem:[#allocation6 + $0x3e8] sm:$0xff] }
 0xeec   :  { %6000 = vmatprep.mubr.f32.mxu1 %v15476_v31  ;;  %v7331_v27 = vpack.c.bf16 %v6189_v16, %v6187_v60  ;;  %v7359_v16 = vpack.c.bf16 %v6088_v36, %v6086_v53  ;;  %v6120_v53 = vld [vmem:[#allocation6 + $0x1d8] sm:$0xff]  ;;  %p7978_p6 = por %p7977_p5, %p7976_p4 }
 0xeee   :  { %7298 = vmatpush1.bf16.msra.mxu1 %v7297_v26  ;;  %v6064_v26 = vld [vmem:[#allocation6 + $0x18] sm:$0xff]  ;;  %p7979_p7 = pnand %p7978_p6, %p7972_p3 }
 0xeef   :  { %6870 = vmatmul.mubr.msk.f32.gmra.mrb[22].mxu1 %vm5815_vm1, %v5805_v23  ;;  %7300 = vmatprep.subr.bf16.mxu1 %v7299_v32  ;;  %v7335_v32 = vpack.c.bf16 %v6064_v26, %v6062_v11  ;;  %v6092_v11 = vld [vmem:[#allocation6 + $0xf8] sm:$0xff] }
 0xef0   :  { %6006 = vmatprep.mubr.f32.mxu1 %v15476_v31 }
 0xef2   :  { %7302 = vmatpush1.bf16.msra.mxu1 %v7301_v35 }
 0xef3   :  { %6871 = vmatmul.mubr.msk.f32.gmra.mrb[24].mxu1 %vm5815_vm1, %v5806_v29  ;;  %7304 = vmatprep.subr.bf16.mxu1 %v7303_v44 }
 0xef4   :  { %6012 = vmatprep.mubr.f32.mxu1 %v15476_v31 }
 0xef6   :  { %7306 = vmatpush1.bf16.msra.mxu1 %v7305_v54 }
 0xef7   :  { %6872 = vmatmul.mubr.msk.f32.gmra.mrb[26].mxu1 %vm5815_vm1, %v5807_v18  ;;  %7308 = vmatprep.subr.bf16.mxu1 %v7307_v12  ;;  %v7337_v12 = vpack.c.bf16 %v6063_v14, %v6061_v30  ;;  %v7339_v18 = vpack.c.bf16 %v6068_v52, %v6066_v25  ;;  %v6089_v30 = vld [vmem:[#allocation6 + $0xe0] sm:$0xff]  ;;  %v6091_v14 = vld [vmem:[#allocation6 + $0xf0] sm:$0xff]  ;;  %v6094_v25 = vld [vmem:[#allocation6 + $0x108] sm:$0xff] }
 0xef8   :  { %6018 = vmatprep.mubr.f32.mxu1 %v15476_v31  ;;  %v6096_v52 = vld [vmem:[#allocation6 + $0x118] sm:$0xff] }
 0xefa   :  { %7310 = vmatpush1.bf16.msra.mxu1 %v7309_v22 }
 0xefb   :  { %6873 = vmatmul.mubr.msk.f32.gmra.mrb[28].mxu1 %vm5815_vm1, %v5808_v8  ;;  %7312 = vmatprep.subr.bf16.mxu1 %v7311_v46  ;;  %v6070_v46 = vld [vmem:[#allocation6 + $0x48] sm:$0xff] }
 0xefc   :  { %6024 = vmatprep.mubr.f32.mxu1 %v15476_v31  ;;  %v7343_v2 = vpack.c.bf16 %v6072_v58, %v6070_v46  ;;  %v6097_v58 = vld [vmem:[#allocation6 + $0x120] sm:$0xff] }
 0xefe   :  { %7314 = vmatpush1.bf16.msra.mxu1 %v7313_v49  ;;  %v6071_v49 = vld [vmem:[#allocation6 + $0x50] sm:$0xff] }
 0xeff   :  { %6874 = vmatmul.mubr.msk.f32.gmra.mrb[30].mxu1 %vm5815_vm1, %v5809_v24  ;;  %7316 = vmatprep.subr.bf16.mxu1 %v7315_v17  ;;  %v7345_v24 = vpack.c.bf16 %v6071_v49, %v6069_v5 }
 0xf00   :  { %6030 = vmatprep.mubr.f32.mxu1 %v15476_v31 }
 0xf02   :  { %7318 = vmatpush1.bf16.msra.mxu1 %v7317_v51  ;;  %v6073_v51 = vld [vmem:[#allocation6 + $0x60] sm:$0xff] }
 0xf03   :  { %6875 = vmatmul.mubr.msk.f32.gmra.mrb[32].mxu1 %vm5815_vm1, %v5810_v55  ;;  %7320 = vmatprep.subr.bf16.mxu1 %v7319_v39  ;;  %v6075_v39 = vld [vmem:[#allocation6 + $0x70] sm:$0xff]  ;;  %v6080_v55 = vld [vmem:[#allocation6 + $0x98] sm:$0xff] }
 0xf04   :  { %6036 = vmatprep.mubr.f32.mxu1 %v15476_v31  ;;  %v7349_v50 = vpack.c.bf16 %v6075_v39, %v6073_v51  ;;  %v6105_v51 = vld [vmem:[#allocation6 + $0x160] sm:$0xff]  ;;  %v6107_v39 = vld [vmem:[#allocation6 + $0x170] sm:$0xff] }
 0xf06   :  { %7322 = vmatpush1.bf16.msra.mxu1 %v7321_v13  ;;  %v7351_v13 = vpack.c.bf16 %v6080_v55, %v6078_v56  ;;  %v6112_v56 = vld [vmem:[#allocation6 + $0x198] sm:$0xff]  ;;  %v7381_v55 = vpack.c.bf16 %v6107_v39, %v6105_v51 }
 0xf07   :  { %6876 = vmatmul.mubr.msk.f32.gmra.mrb[34].mxu1 %vm5815_vm1, %v5811_v57  ;;  %7324 = vmatprep.subr.bf16.mxu1 %v7323_v28  ;;  %v6077_v28 = vld [vmem:[#allocation6 + $0x80] sm:$0xff]  ;;  %v6082_v57 = vld [vmem:[#allocation6 + $0xa8] sm:$0xff] }
 0xf08   :  { %6042 = vmatprep.mubr.f32.mxu1 %v15476_v31 }
 0xf0a   :  { %7326 = vmatpush1.bf16.msra.mxu1 %v7325_v59  ;;  %v6084_v59 = vld [vmem:[#allocation6 + $0xb8] sm:$0xff] }
 0xf0b   :  { %6877 = vmatmul.mubr.msk.f32.gmra.mrb[36].mxu1 %vm5815_vm1, %v5812_v19  ;;  %7328 = vmatprep.subr.bf16.mxu1 %v7327_v48  ;;  %v7353_v19 = vpack.c.bf16 %v6079_v9, %v6077_v28  ;;  %v7355_v45 = vpack.c.bf16 %v6084_v59, %v6082_v57  ;;  %v6111_v28 = vld [vmem:[#allocation6 + $0x190] sm:$0xff]  ;;  %v6116_v57 = vld [vmem:[#allocation6 + $0x1b8] sm:$0xff] }
 0xf0c   :  { %6048 = vmatprep.mubr.f32.mxu1 %v15476_v31 }
 0xf0e   :  { %7330 = vmatpush1.bf16.msra.mxu1 %v7329_v15 }
 0xf0f   :  { %6878 = vmatmul.mubr.msk.f32.gmra.mrb[38].mxu1 %vm5815_vm1, %v5813_v0  ;;  %7332 = vmatprep.subr.bf16.mxu1 %v7331_v27  ;;  %v6087_v27 = vld [vmem:[#allocation6 + $0xd0] sm:$0xff] }
 0xf10   :  { %6054 = vmatprep.mubr.f32.mxu1 %v15476_v31  ;;  %v7333_v31 = vpack.c.bf16 %v6188_v42, %v6186_v20  ;;  %v6085_v20 = vld [vmem:[#allocation6 + $0xc0] sm:$0xff] }
 0xf11   :  { %v7361_v26 = vpack.c.bf16 %v6087_v27, %v6085_v20  ;;  %v6117_v20 = vld [vmem:[#allocation6 + $0x1c0] sm:$0xff]  ;;  %v6119_v27 = vld [vmem:[#allocation6 + $0x1d0] sm:$0xff] }
 0xf12   :  { %7334 = vmatpush1.bf16.msra.mxu1 %v7333_v31  ;;  %v6090_v31 = vld [vmem:[#allocation6 + $0xe8] sm:$0xff] }
 0xf13   :  { %6879 = vmatmul.mubr.msk.f32.gmra.mrb[40].mxu1 %vm5815_vm1, %v5814_v33  ;;  %7336 = vmatprep.subr.bf16.mxu1 %v7335_v32  ;;  %v6083_v33 = vld [vmem:[#allocation6 + $0xb0] sm:$0xff]  ;;  %v7363_v32 = vpack.c.bf16 %v6092_v11, %v6090_v31  ;;  %v6122_v11 = vld [vmem:[#allocation6 + $0x1e8] sm:$0xff] }
 0xf14   :  { %v7357_v15 = vpack.c.bf16 %v6083_v33, %v6081_v7  ;;  %v6115_v7 = vld [vmem:[#allocation6 + $0x1b0] sm:$0xff] }
 0xfa6   :  { %v14424_v61 = vpop.f32.mrb[8].mxu1  ;;  %v14426_v63 = vpop.f32.mrb[26].mxu0 }
 0xfa7   :  { %v14428_v23 = vpop.f32.mrb[9].mxu1  ;;  %v14430_v62 = vpop.f32.mrb[27].mxu0 }
 0xfaa   :  { %v14432_v37 = vpop.f32.mrb[10].mxu1  ;;  %v14434_v35 = vpop.f32.mrb[28].mxu0 }
 0xfab   :  { %v14436_v44 = vpop.f32.mrb[11].mxu1  ;;  %v14438_v29 = vpop.f32.mrb[29].mxu0 }
 0xfae   :  { %v5972_v54 = vpop.f32.mrb[12].mxu1  ;;  %v14440_v3 = vpop.f32.mrb[30].mxu0 }
 0xfaf   :  { %v5974_v4 = vpop.f32.mrb[13].mxu1  ;;  %v14442_v22 = vpop.f32.mrb[31].mxu0 }
 0xfb0   :  { %6254 = vmatprep.mubr.f32.mxu1 %v5974_v4  ;;  %v6095_v4 = vld [vmem:[#allocation6 + $0x110] sm:$0xff] }
 0xfb1   :  { %6255 = vmatmul.mubr.f32.vlgmr.msra.gmra.mrb[42].mxu1 %v5972_v54  ;;  %v7367_v54 = vpack.c.bf16 %v6096_v52, %v6094_v25  ;;  %v6121_v25 = vld [vmem:[#allocation6 + $0x1e0] sm:$0xff]  ;;  %v6123_v52 = vld [vmem:[#allocation6 + $0x1f0] sm:$0xff] }
 0xfb2   :  { %7338 = vmatpush1.bf16.msra.mxu1 %v7337_v12  ;;  %v5978_v8 = vpop.f32.mrb[14].mxu1  ;;  %v6093_v12 = vld [vmem:[#allocation6 + $0x100] sm:$0xff] }
 0xfb3   :  { %7340 = vmatprep.subr.bf16.mxu1 %v7339_v18  ;;  %v5980_v17 = vpop.f32.mrb[15].mxu1  ;;  %v6098_v18 = vld [vmem:[#allocation6 + $0x128] sm:$0xff]  ;;  %v7369_v1 = vpack.c.bf16 %v6095_v4, %v6093_v12  ;;  %v6384_v12 = vld [vmem:[#allocation6 + $0x418] sm:$0xff]  ;;  %v7397_v4 = vpack.c.bf16 %v6123_v52, %v6121_v25  ;;  %v6405_v25 = vld [vmem:[#allocation6 + $0x4c0] sm:$0xff] }
 0xfb4   :  { %6260 = vmatprep.mubr.f32.mxu1 %v5980_v17  ;;  %v7371_v46 = vpack.c.bf16 %v6100_v43, %v6098_v18  ;;  %v6101_v17 = vld [vmem:[#allocation6 + $0x140] sm:$0xff]  ;;  %v6407_v52 = vld [vmem:[#allocation6 + $0x4d0] sm:$0xff] }
 0xfb5   :  { %6261 = vmatmul.mubr.f32.gmra.mrb[44].mxu1 %v5978_v8  ;;  %v6102_v8 = vld [vmem:[#allocation6 + $0x148] sm:$0xff] }
 0xfb6   :  { %7342 = vmatpush1.bf16.msra.mxu1 %v7341_v10  ;;  %v5984_v47 = vpop.f32.mrb[16].mxu1  ;;  %v6099_v10 = vld [vmem:[#allocation6 + $0x130] sm:$0xff] }
 0xfb7   :  { %7344 = vmatprep.subr.bf16.mxu1 %v7343_v2  ;;  %v5986_v6 = vpop.f32.mrb[17].mxu1  ;;  %v6104_v2 = vld [vmem:[#allocation6 + $0x158] sm:$0xff]  ;;  %v7373_v5 = vpack.c.bf16 %v6099_v10, %v6097_v58  ;;  %v6386_v10 = vld [vmem:[#allocation6 + $0x428] sm:$0xff] }
 0xfb8   :  { %6266 = vmatprep.mubr.f32.mxu1 %v5986_v6  ;;  %v7375_v49 = vpack.c.bf16 %v6104_v2, %v6102_v8  ;;  %v6110_v6 = vld [vmem:[#allocation6 + $0x188] sm:$0xff]  ;;  %v6388_v8 = vld [vmem:[#allocation6 + $0x438] sm:$0xff] }
 0xfb9   :  { %6267 = vmatmul.mubr.f32.gmra.mrb[46].mxu1 %v5984_v47  ;;  %v7377_v47 = vpack.c.bf16 %v6103_v21, %v6101_v17  ;;  %v6385_v17 = vld [vmem:[#allocation6 + $0x420] sm:$0xff]  ;;  %v6387_v21 = vld [vmem:[#allocation6 + $0x430] sm:$0xff] }
 0xfba   :  { %7346 = vmatpush1.bf16.msra.mxu1 %v7345_v24  ;;  %v5990_v38 = vpop.f32.mrb[18].mxu1  ;;  %v6108_v24 = vld [vmem:[#allocation6 + $0x178] sm:$0xff] }
 0xfbb   :  { %7348 = vmatprep.subr.bf16.mxu1 %v7347_v41  ;;  %v5992_v40 = vpop.f32.mrb[19].mxu1  ;;  %v7379_v41 = vpack.c.bf16 %v6108_v24, %v6106_v34  ;;  %v6390_v34 = vld [vmem:[#allocation6 + $0x448] sm:$0xff]  ;;  %v6392_v24 = vld [vmem:[#allocation6 + $0x458] sm:$0xff] }
 0xfbc   :  { %6272 = vmatprep.mubr.f32.mxu1 %v5992_v40  ;;  %v6114_v40 = vld [vmem:[#allocation6 + $0x1a8] sm:$0xff]  ;;  %v7407_v39 = vpack.c.bf16 %v6392_v24, %v6390_v34  ;;  %v6417_v24 = vld [vmem:[#allocation6 + $0x520] sm:$0xff] }
 0xfbd   :  { %6273 = vmatmul.mubr.f32.gmra.mrb[48].mxu1 %v5990_v38  ;;  %v7383_v38 = vpack.c.bf16 %v6112_v56, %v6110_v6  ;;  %v6389_v6 = vld [vmem:[#allocation6 + $0x440] sm:$0xff]  ;;  %v6391_v56 = vld [vmem:[#allocation6 + $0x450] sm:$0xff] }
 0xfbe   :  { %7350 = vmatpush1.bf16.msra.mxu1 %v7349_v50  ;;  %v5996_v0 = vpop.f32.mrb[20].mxu1 }
 0xfbf   :  { %7352 = vmatprep.subr.bf16.mxu1 %v7351_v13  ;;  %v5998_v48 = vpop.f32.mrb[21].mxu1  ;;  %v6109_v13 = vld [vmem:[#allocation6 + $0x180] sm:$0xff] }
 0xfc0   :  { %6278 = vmatprep.mubr.f32.mxu1 %v5998_v48  ;;  %v7385_v59 = vpack.c.bf16 %v6111_v28, %v6109_v13  ;;  %v6118_v48 = vld [vmem:[#allocation6 + $0x1c8] sm:$0xff] }
 0xfc1   :  { %6279 = vmatmul.mubr.f32.gmra.mrb[50].mxu1 %v5996_v0  ;;  %v7387_v0 = vpack.c.bf16 %v6116_v57, %v6114_v40  ;;  %v6393_v40 = vld [vmem:[#allocation6 + $0x460] sm:$0xff]  ;;  %v6395_v57 = vld [vmem:[#allocation6 + $0x470] sm:$0xff] }
 0xfc2   :  { %7354 = vmatpush1.bf16.msra.mxu1 %v7353_v19  ;;  %6349 = vmatprep.mubr.f32.mxu1 %v14430_v62  ;;  %v14445_v60 = vpop.f32.mrb[22].mxu1  ;;  %v7365_v62 = vpack.c.bf16 %v6091_v14, %v6089_v30 }
 0xfc3   :  { %7356 = vmatprep.subr.bf16.mxu1 %v7355_v45  ;;  %v14447_v42 = vpop.f32.mrb[23].mxu1  ;;  %v6113_v45 = vld [vmem:[#allocation6 + $0x1a0] sm:$0xff] }
 0xfc4   :  { %v7389_v36 = vpack.c.bf16 %v6115_v7, %v6113_v45 }
 0xfc6   :  { %7358 = vmatpush1.bf16.msra.mxu1 %v7357_v15  ;;  %v14449_v50 = vpop.f32.mrb[24].mxu1 }
 0xfc7   :  { %7360 = vmatprep.subr.bf16.mxu1 %v7359_v16  ;;  %v14451_v9 = vpop.f32.mrb[25].mxu1  ;;  %v7391_v16 = vpack.c.bf16 %v6120_v53, %v6118_v48  ;;  %v6399_v48 = vld [vmem:[#allocation6 + $0x490] sm:$0xff] }
 0xfca   :  { %7362 = vmatpush1.bf16.msra.mxu1 %v7361_v26  ;;  %v14453_v19 = vpop.f32.mrb[26].mxu1  ;;  %v6124_v26 = vld [vmem:[#allocation6 + $0x1f8] sm:$0xff] }
 0xfcb   :  { %7364 = vmatprep.subr.bf16.mxu1 %v7363_v32  ;;  %v14455_v33 = vpop.f32.mrb[27].mxu1  ;;  %v7393_v32 = vpack.c.bf16 %v6119_v27, %v6117_v20  ;;  %v7395_v14 = vpack.c.bf16 %v6124_v26, %v6122_v11  ;;  %v6401_v27 = vld [vmem:[#allocation6 + $0x4a0] sm:$0xff]  ;;  %v6403_v11 = vld [vmem:[#allocation6 + $0x4b0] sm:$0xff]  ;;  %v6406_v26 = vld [vmem:[#allocation6 + $0x4c8] sm:$0xff] }
 0xfce   :  { %7366 = vmatpush1.bf16.msra.mxu1 %v7365_v62  ;;  %v14457_v15 = vpop.f32.mrb[28].mxu1 }
 0xfcf   :  { %7368 = vmatprep.subr.bf16.mxu1 %v7367_v54  ;;  %v14459_v31 = vpop.f32.mrb[29].mxu1  ;;  %v6382_v54 = vld [vmem:[#allocation6 + $0x408] sm:$0xff] }
 0xfd0   :  { %v7399_v43 = vpack.c.bf16 %v6384_v12, %v6382_v54  ;;  %v6410_v54 = vld [vmem:[#allocation6 + $0x4e8] sm:$0xff]  ;;  %v7425_v12 = vpack.c.bf16 %v6407_v52, %v6405_v25  ;;  %v6440_v25 = vld [vmem:[#allocation6 + $0x5d8] sm:$0xff] }
 0xfd2   :  { %7370 = vmatpush1.bf16.msra.mxu1 %v7369_v1  ;;  %v14461_v30 = vpop.f32.mrb[30].mxu1  ;;  %v6381_v1 = vld [vmem:[#allocation6 + $0x400] sm:$0xff] }
 0xfd3   :  { %7372 = vmatprep.subr.bf16.mxu1 %v7371_v46  ;;  %v14463_v62 = vpop.f32.mrb[31].mxu1  ;;  %v6383_v46 = vld [vmem:[#allocation6 + $0x410] sm:$0xff] }
 0xfd4   :  { %v7401_v2 = vpack.c.bf16 %v6383_v46, %v6381_v1  ;;  %v6411_v1 = vld [vmem:[#allocation6 + $0x4f0] sm:$0xff]  ;;  %v6414_v46 = vld [vmem:[#allocation6 + $0x508] sm:$0xff] }
 0xfd6   :  { %7374 = vmatpush1.bf16.msra.mxu1 %v7373_v5  ;;  %v14465_v18 = vpop.f32.mrb[32].mxu1 }
 0xfd7   :  { %7376 = vmatprep.subr.bf16.mxu1 %v7375_v49  ;;  %v14467_v58 = vpop.f32.mrb[33].mxu1  ;;  %v7403_v49 = vpack.c.bf16 %v6388_v8, %v6386_v10  ;;  %v6416_v10 = vld [vmem:[#allocation6 + $0x518] sm:$0xff] }
 0xfd8   :  { %v7431_v8 = vpack.c.bf16 %v6416_v10, %v6414_v46  ;;  %v6441_v10 = vld [vmem:[#allocation6 + $0x5e0] sm:$0xff] }
 0xfda   :  { %7378 = vmatpush1.bf16.msra.mxu1 %v7377_v47  ;;  %v14469_v5 = vpop.f32.mrb[34].mxu1 }
 0xfdb   :  { %7380 = vmatprep.subr.bf16.mxu1 %v7379_v41  ;;  %v14472_v47 = vpop.f32.mrb[35].mxu1  ;;  %v7405_v41 = vpack.c.bf16 %v6387_v21, %v6385_v17  ;;  %v6420_v17 = vld [vmem:[#allocation6 + $0x538] sm:$0xff] }
 0xfde   :  { %7382 = vmatpush1.bf16.msra.mxu1 %v7381_v55  ;;  %v14475_v51 = vpop.f32.mrb[36].mxu1  ;;  %v6394_v55 = vld [vmem:[#allocation6 + $0x468] sm:$0xff] }
 0xfdf   :  { %7384 = vmatprep.subr.bf16.mxu1 %v7383_v38  ;;  %v6396_v38 = vld [vmem:[#allocation6 + $0x478] sm:$0xff]  ;;  %v14478_v13 = vpop.f32.mrb[37].mxu1 }
 0xfe2   :  { %7386 = vmatpush1.bf16.msra.mxu1 %v7385_v59  ;;  %v14481_v28 = vpop.f32.mrb[38].mxu1  ;;  %v6398_v59 = vld [vmem:[#allocation6 + $0x488] sm:$0xff] }
 0xfe3   :  { %7388 = vmatprep.subr.bf16.mxu1 %v7387_v0  ;;  %v6400_v0 = vld [vmem:[#allocation6 + $0x498] sm:$0xff]  ;;  %v14484_v45 = vpop.f32.mrb[39].mxu1 }
 0xfe4   :  { %v7415_v7 = vpack.c.bf16 %v6400_v0, %v6398_v59  ;;  %v6425_v0 = vld [vmem:[#allocation6 + $0x560] sm:$0xff] }
 0xfe6   :  { %7390 = vmatpush1.bf16.msra.mxu1 %v7389_v36  ;;  %v14487_v53 = vpop.f32.mrb[40].mxu1  ;;  %v6402_v36 = vld [vmem:[#allocation6 + $0x4a8] sm:$0xff] }
 0xfe7   :  { %7392 = vmatprep.subr.bf16.mxu1 %v7391_v16  ;;  %v6404_v16 = vld [vmem:[#allocation6 + $0x4b8] sm:$0xff]  ;;  %v14490_v20 = vpop.f32.mrb[41].mxu1 }
 0xfea   :  { %7394 = vmatpush1.bf16.msra.mxu1 %v7393_v32  ;;  %v6408_v32 = vld [vmem:[#allocation6 + $0x4d8] sm:$0xff] }
 0xfeb   :  { %7396 = vmatprep.subr.bf16.mxu1 %v7395_v14  ;;  %v7421_v14 = vpack.c.bf16 %v6403_v11, %v6401_v27  ;;  %v6436_v27 = vld [vmem:[#allocation6 + $0x5b8] sm:$0xff] }
 0xfee   :  { %7398 = vmatpush1.bf16.msra.mxu1 %v7397_v4 }
 0xfef   :  { %7400 = vmatprep.subr.bf16.mxu1 %v7399_v43  ;;  %v6409_v43 = vld [vmem:[#allocation6 + $0x4e0] sm:$0xff] }
 0xff1   :  { %6350 = vmatmul.mubr.f32.vlgmr.msra.gmra.mrb[42].mxu1 %v14426_v63  ;;  %v7409_v63 = vpack.c.bf16 %v6391_v56, %v6389_v6  ;;  %v6424_v6 = vld [vmem:[#allocation6 + $0x558] sm:$0xff] }
 0xff2   :  { %7402 = vmatpush1.bf16.msra.mxu1 %v7401_v2  ;;  %6355 = vmatprep.mubr.f32.mxu1 %v14438_v29  ;;  %v7411_v29 = vpack.c.bf16 %v6396_v38, %v6394_v55  ;;  %v6413_v2 = vld [vmem:[#allocation6 + $0x500] sm:$0xff] }
 0xff3   :  { %7404 = vmatprep.subr.bf16.mxu1 %v7403_v49  ;;  %v6418_v49 = vld [vmem:[#allocation6 + $0x528] sm:$0xff]  ;;  %v6421_v38 = vld [vmem:[#allocation6 + $0x540] sm:$0xff] }
 0xff4   :  { %v7435_v34 = vpack.c.bf16 %v6420_v17, %v6418_v49  ;;  %v6551_v17 = vld [vmem:[#allocation6 + $0x600] sm:$0xff] }
 0xff5   :  { %6356 = vmatmul.mubr.f32.gmra.mrb[44].mxu1 %v14434_v35  ;;  %v7413_v35 = vpack.c.bf16 %v6395_v57, %v6393_v40  ;;  %v6428_v40 = vld [vmem:[#allocation6 + $0x578] sm:$0xff] }
 0xff6   :  { %7406 = vmatpush1.bf16.msra.mxu1 %v7405_v41  ;;  %6361 = vmatprep.mubr.f32.mxu1 %v14442_v22  ;;  %v6397_v22 = vld [vmem:[#allocation6 + $0x480] sm:$0xff]  ;;  %v6419_v41 = vld [vmem:[#allocation6 + $0x530] sm:$0xff] }
 0xff7   :  { %7408 = vmatprep.subr.bf16.mxu1 %v7407_v39  ;;  %v6422_v39 = vld [vmem:[#allocation6 + $0x548] sm:$0xff]  ;;  %v7437_v56 = vpack.c.bf16 %v6419_v41, %v6417_v24  ;;  %v6558_v24 = vld [vmem:[#allocation6 + $0x638] sm:$0xff] }
 0xff8   :  { %v7439_v55 = vpack.c.bf16 %v6424_v6, %v6422_v39  ;;  %v6555_v6 = vld [vmem:[#allocation6 + $0x620] sm:$0xff] }
 0xff9   :  { %6362 = vmatmul.mubr.f32.gmra.mrb[46].mxu1 %v14440_v3  ;;  %v7417_v3 = vpack.c.bf16 %v6399_v48, %v6397_v22  ;;  %v6432_v22 = vld [vmem:[#allocation6 + $0x598] sm:$0xff] }
 0xffa   :  { %6367 = vmatprep.mubr.f32.mxu1 %v14428_v23  ;;  %7410 = vmatpush1.bf16.msra.mxu1 %v7409_v63  ;;  %v7419_v23 = vpack.c.bf16 %v6404_v16, %v6402_v36  ;;  %v6423_v63 = vld [vmem:[#allocation6 + $0x550] sm:$0xff]  ;;  %v6429_v16 = vld [vmem:[#allocation6 + $0x580] sm:$0xff] }
 0xffb   :  { %7412 = vmatprep.subr.bf16.mxu1 %v7411_v29  ;;  %v6426_v29 = vld [vmem:[#allocation6 + $0x568] sm:$0xff]  ;;  %v7441_v57 = vpack.c.bf16 %v6423_v63, %v6421_v38  ;;  %v6562_v38 = vld [vmem:[#allocation6 + $0x658] sm:$0xff] }
 0xffc   :  { %v7443_v59 = vpack.c.bf16 %v6428_v40, %v6426_v29  ;;  %v6559_v40 = vld [vmem:[#allocation6 + $0x640] sm:$0xff] }
 0xffd   :  { %6368 = vmatmul.mubr.f32.gmra.mrb[48].mxu1 %v14424_v61  ;;  %v7423_v61 = vpack.c.bf16 %v6408_v32, %v6406_v26  ;;  %v6433_v32 = vld [vmem:[#allocation6 + $0x5a0] sm:$0xff] }
 0xffe   :  { %6373 = vmatprep.mubr.f32.mxu1 %v14436_v44  ;;  %7414 = vmatpush1.bf16.msra.mxu1 %v7413_v35  ;;  %v6412_v44 = vld [vmem:[#allocation6 + $0x4f8] sm:$0xff]  ;;  %v6427_v35 = vld [vmem:[#allocation6 + $0x570] sm:$0xff] }
 0xfff   :  { %7416 = vmatprep.subr.bf16.mxu1 %v7415_v7  ;;  %v7427_v4 = vpack.c.bf16 %v6412_v44, %v6410_v54  ;;  %v6430_v7 = vld [vmem:[#allocation6 + $0x588] sm:$0xff]  ;;  %v7445_v48 = vpack.c.bf16 %v6427_v35, %v6425_v0  ;;  %v6437_v44 = vld [vmem:[#allocation6 + $0x5c0] sm:$0xff]  ;;  %v6566_v0 = vld [vmem:[#allocation6 + $0x678] sm:$0xff] }
0x1000   :  { %v7447_v36 = vpack.c.bf16 %v6432_v22, %v6430_v7  ;;  %v6563_v22 = vld [vmem:[#allocation6 + $0x660] sm:$0xff] }
0x1001   :  { %6374 = vmatmul.mubr.f32.gmra.mrb[50].mxu1 %v14432_v37  ;;  %v7429_v37 = vpack.c.bf16 %v6411_v1, %v6409_v43  ;;  %v6444_v43 = vld [vmem:[#allocation6 + $0x5f8] sm:$0xff] }
0x1002   :  { %7418 = vmatpush1.bf16.msra.mxu1 %v7417_v3  ;;  %6509 = vmatprep.mubr.f32.mxu1 %v14447_v42  ;;  %v6415_v42 = vld [vmem:[#allocation6 + $0x510] sm:$0xff] }
0x1003   :  { %7420 = vmatprep.subr.bf16.mxu1 %v7419_v23  ;;  %v7433_v21 = vpack.c.bf16 %v6415_v42, %v6413_v2  ;;  %v6431_v3 = vld [vmem:[#allocation6 + $0x590] sm:$0xff]  ;;  %v6434_v23 = vld [vmem:[#allocation6 + $0x5a8] sm:$0xff]  ;;  %v6554_v2 = vld [vmem:[#allocation6 + $0x618] sm:$0xff] }
0x1004   :  { %v7449_v11 = vpack.c.bf16 %v6431_v3, %v6429_v16  ;;  %v7451_v26 = vpack.c.bf16 %v6436_v27, %v6434_v23  ;;  %v6567_v3 = vld [vmem:[#allocation6 + $0x680] sm:$0xff]  ;;  %v6572_v23 = vld [vmem:[#allocation6 + $0x6a8] sm:$0xff]  ;;  %v6574_v27 = vld [vmem:[#allocation6 + $0x6b8] sm:$0xff] }
0x1006   :  { %7422 = vmatpush1.bf16.msra.mxu1 %v7421_v14  ;;  %v6435_v14 = vld [vmem:[#allocation6 + $0x5b0] sm:$0xff] }
0x1007   :  { %7424 = vmatprep.subr.bf16.mxu1 %v7423_v61  ;;  %v6438_v61 = vld [vmem:[#allocation6 + $0x5c8] sm:$0xff]  ;;  %v7453_v52 = vpack.c.bf16 %v6435_v14, %v6433_v32  ;;  %v6578_v14 = vld [vmem:[#allocation6 + $0x6d8] sm:$0xff] }
0x1008   :  { %v7455_v54 = vpack.c.bf16 %v6440_v25, %v6438_v61  ;;  %v6576_v32 = vld [vmem:[#allocation6 + $0x6c8] sm:$0xff]  ;;  %v6575_v25 = vld [vmem:[#allocation6 + $0x6c0] sm:$0xff] }
0x1009   :  { %v7487_v61 = vpack.c.bf16 %v6578_v14, %v6576_v32  ;;  %v6614_v32 = vld [vmem:[#allocation6 + $0x7f8] sm:$0xff] }
0x100a   :  { %7426 = vmatpush1.bf16.msra.mxu1 %v7425_v12  ;;  %v6439_v12 = vld [vmem:[#allocation6 + $0x5d0] sm:$0xff] }
0x100b   :  { %7428 = vmatprep.subr.bf16.mxu1 %v7427_v4  ;;  %v6442_v4 = vld [vmem:[#allocation6 + $0x5e8] sm:$0xff]  ;;  %v7457_v1 = vpack.c.bf16 %v6439_v12, %v6437_v44  ;;  %v6579_v12 = vld [vmem:[#allocation6 + $0x6e0] sm:$0xff] }
0x100c   :  { %v7459_v46 = vpack.c.bf16 %v6444_v43, %v6442_v4  ;;  %v6581_v4 = vld [vmem:[#allocation6 + $0x6f0] sm:$0xff]  ;;  %v6584_v43 = vld [vmem:[#allocation6 + $0x708] sm:$0xff] }
0x100e   :  { %7430 = vmatpush1.bf16.msra.mxu1 %v7429_v37  ;;  %v6443_v37 = vld [vmem:[#allocation6 + $0x5f0] sm:$0xff] }
0x100f   :  { %7432 = vmatprep.subr.bf16.mxu1 %v7431_v8  ;;  %v6552_v8 = vld [vmem:[#allocation6 + $0x608] sm:$0xff]  ;;  %v7461_v42 = vpack.c.bf16 %v6443_v37, %v6441_v10  ;;  %v6583_v10 = vld [vmem:[#allocation6 + $0x700] sm:$0xff] }
0x1010   :  { %v7463_v49 = vpack.c.bf16 %v6554_v2, %v6552_v8  ;;  %v6588_v37 = vld [vmem:[#allocation6 + $0x728] sm:$0xff]  ;;  %v6590_v8 = vld [vmem:[#allocation6 + $0x738] sm:$0xff] }
0x1012   :  { %7434 = vmatpush1.bf16.msra.mxu1 %v7433_v21  ;;  %v6553_v21 = vld [vmem:[#allocation6 + $0x610] sm:$0xff] }
0x1013   :  { %7436 = vmatprep.subr.bf16.mxu1 %v7435_v34  ;;  %v6556_v34 = vld [vmem:[#allocation6 + $0x628] sm:$0xff]  ;;  %v7465_v41 = vpack.c.bf16 %v6553_v21, %v6551_v17  ;;  %v6589_v17 = vld [vmem:[#allocation6 + $0x730] sm:$0xff] }
0x1014   :  { %v7467_v39 = vpack.c.bf16 %v6558_v24, %v6556_v34  ;;  %v6592_v21 = vld [vmem:[#allocation6 + $0x748] sm:$0xff]  ;;  %v6594_v34 = vld [vmem:[#allocation6 + $0x758] sm:$0xff] }
0x1016   :  { %7438 = vmatpush1.bf16.msra.mxu1 %v7437_v56  ;;  %v6557_v56 = vld [vmem:[#allocation6 + $0x630] sm:$0xff] }
0x1017   :  { %7440 = vmatprep.subr.bf16.mxu1 %v7439_v55  ;;  %v6560_v55 = vld [vmem:[#allocation6 + $0x648] sm:$0xff]  ;;  %v7469_v63 = vpack.c.bf16 %v6557_v56, %v6555_v6  ;;  %v6593_v6 = vld [vmem:[#allocation6 + $0x750] sm:$0xff] }
0x1018   :  { %v7471_v29 = vpack.c.bf16 %v6562_v38, %v6560_v55  ;;  %v6596_v56 = vld [vmem:[#allocation6 + $0x768] sm:$0xff]  ;;  %v6598_v55 = vld [vmem:[#allocation6 + $0x778] sm:$0xff] }
0x101a   :  { %7442 = vmatpush1.bf16.msra.mxu1 %v7441_v57  ;;  %v6561_v57 = vld [vmem:[#allocation6 + $0x650] sm:$0xff] }
0x101b   :  { %7444 = vmatprep.subr.bf16.mxu1 %v7443_v59  ;;  %v6564_v59 = vld [vmem:[#allocation6 + $0x668] sm:$0xff]  ;;  %v7473_v35 = vpack.c.bf16 %v6561_v57, %v6559_v40  ;;  %v6597_v40 = vld [vmem:[#allocation6 + $0x770] sm:$0xff] }
0x101c   :  { %v7475_v7 = vpack.c.bf16 %v6566_v0, %v6564_v59  ;;  %v6600_v57 = vld [vmem:[#allocation6 + $0x788] sm:$0xff]  ;;  %v6602_v59 = vld [vmem:[#allocation6 + $0x798] sm:$0xff] }
0x101e   :  { %7446 = vmatpush1.bf16.msra.mxu1 %v7445_v48  ;;  %v6568_v48 = vld [vmem:[#allocation6 + $0x688] sm:$0xff] }
0x101f   :  { %7448 = vmatprep.subr.bf16.mxu1 %v7447_v36  ;;  %v6570_v36 = vld [vmem:[#allocation6 + $0x698] sm:$0xff] }
0x1020   :  { %v7479_v16 = vpack.c.bf16 %v6570_v36, %v6568_v48  ;;  %v6606_v48 = vld [vmem:[#allocation6 + $0x7b8] sm:$0xff] }
0x1022   :  { %7450 = vmatpush1.bf16.msra.mxu1 %v7449_v11  ;;  %v7483_v11 = vpack.c.bf16 %v6574_v27, %v6572_v23  ;;  %v6610_v23 = vld [vmem:[#allocation6 + $0x7d8] sm:$0xff] }
0x1023   :  { %7452 = vmatprep.subr.bf16.mxu1 %v7451_v26  ;;  %v6571_v26 = vld [vmem:[#allocation6 + $0x6a0] sm:$0xff] }
0x1026   :  { %7454 = vmatpush1.bf16.msra.mxu1 %v7453_v52  ;;  %v6580_v52 = vld [vmem:[#allocation6 + $0x6e8] sm:$0xff] }
0x1027   :  { %7456 = vmatprep.subr.bf16.mxu1 %v7455_v54  ;;  %v6582_v54 = vld [vmem:[#allocation6 + $0x6f8] sm:$0xff] }
0x1028   :  { %v7491_v44 = vpack.c.bf16 %v6582_v54, %v6580_v52 }
0x102a   :  { %7458 = vmatpush1.bf16.msra.mxu1 %v7457_v1  ;;  %v6586_v1 = vld [vmem:[#allocation6 + $0x718] sm:$0xff] }
0x102b   :  { %7460 = vmatprep.subr.bf16.mxu1 %v7459_v46  ;;  %v7495_v46 = vpack.c.bf16 %v6586_v1, %v6584_v43 }
0x102e   :  { %7462 = vmatpush1.bf16.msra.mxu1 %v7461_v42  ;;  %v7499_v42 = vpack.c.bf16 %v6590_v8, %v6588_v37 }
0x102f   :  { %7464 = vmatprep.subr.bf16.mxu1 %v7463_v49  ;;  %v6587_v49 = vld [vmem:[#allocation6 + $0x720] sm:$0xff] }
0x1030   :  { %v7501_v24 = vpack.c.bf16 %v6589_v17, %v6587_v49 }
0x1031   :  { %6510 = vmatmul.mubr.f32.vlgmr.msra.gmra.mrb[42].mxu1 %v14445_v60  ;;  %v6565_v60 = vld [vmem:[#allocation6 + $0x670] sm:$0xff] }
0x1032   :  { %7466 = vmatpush1.bf16.msra.mxu1 %v7465_v41  ;;  %6515 = vmatprep.mubr.f32.mxu1 %v14451_v9  ;;  %v7477_v9 = vpack.c.bf16 %v6565_v60, %v6563_v22  ;;  %v7503_v41 = vpack.c.bf16 %v6594_v34, %v6592_v21  ;;  %v6601_v22 = vld [vmem:[#allocation6 + $0x790] sm:$0xff]  ;;  %v6604_v60 = vld [vmem:[#allocation6 + $0x7a8] sm:$0xff] }
0x1033   :  { %7468 = vmatprep.subr.bf16.mxu1 %v7467_v39  ;;  %v6591_v39 = vld [vmem:[#allocation6 + $0x740] sm:$0xff] }
0x1034   :  { %v7505_v38 = vpack.c.bf16 %v6593_v6, %v6591_v39 }
0x1035   :  { %6516 = vmatmul.mubr.f32.gmra.mrb[44].mxu1 %v14449_v50  ;;  %v6569_v50 = vld [vmem:[#allocation6 + $0x690] sm:$0xff] }
0x1036   :  { %7470 = vmatpush1.bf16.msra.mxu1 %v7469_v63  ;;  %6521 = vmatprep.mubr.f32.mxu1 %v14455_v33  ;;  %v7481_v33 = vpack.c.bf16 %v6569_v50, %v6567_v3  ;;  %v7507_v63 = vpack.c.bf16 %v6598_v55, %v6596_v56  ;;  %v6605_v3 = vld [vmem:[#allocation6 + $0x7b0] sm:$0xff]  ;;  %v6608_v50 = vld [vmem:[#allocation6 + $0x7c8] sm:$0xff] }
0x1037   :  { %7472 = vmatprep.subr.bf16.mxu1 %v7471_v29  ;;  %v6595_v29 = vld [vmem:[#allocation6 + $0x760] sm:$0xff] }
0x1038   :  { %v7509_v0 = vpack.c.bf16 %v6597_v40, %v6595_v29 }
0x1039   :  { %6522 = vmatmul.mubr.f32.gmra.mrb[46].mxu1 %v14453_v19  ;;  %v6573_v19 = vld [vmem:[#allocation6 + $0x6b0] sm:$0xff] }
0x103a   :  { %7474 = vmatpush1.bf16.msra.mxu1 %v7473_v35  ;;  %6527 = vmatprep.mubr.f32.mxu1 %v14459_v31  ;;  %v7485_v31 = vpack.c.bf16 %v6573_v19, %v6571_v26  ;;  %v7511_v35 = vpack.c.bf16 %v6602_v59, %v6600_v57  ;;  %v6609_v26 = vld [vmem:[#allocation6 + $0x7d0] sm:$0xff]  ;;  %v6612_v19 = vld [vmem:[#allocation6 + $0x7e8] sm:$0xff] }
0x103b   :  { %7476 = vmatprep.subr.bf16.mxu1 %v7475_v7  ;;  %v6599_v7 = vld [vmem:[#allocation6 + $0x780] sm:$0xff] }
0x103c   :  { %v7513_v36 = vpack.c.bf16 %v6601_v22, %v6599_v7 }
0x103d   :  { %6528 = vmatmul.mubr.f32.gmra.mrb[48].mxu1 %v14457_v15  ;;  %v6577_v15 = vld [vmem:[#allocation6 + $0x6d0] sm:$0xff] }
0x103e   :  { %7478 = vmatpush1.bf16.msra.mxu1 %v7477_v9  ;;  %6533 = vmatprep.mubr.f32.mxu1 %v14463_v62  ;;  %v7489_v62 = vpack.c.bf16 %v6577_v15, %v6575_v25  ;;  %v7515_v9 = vpack.c.bf16 %v6606_v48, %v6604_v60  ;;  %v6613_v25 = vld [vmem:[#allocation6 + $0x7f0] sm:$0xff] }
0x103f   :  { %7480 = vmatprep.subr.bf16.mxu1 %v7479_v16  ;;  %v6603_v16 = vld [vmem:[#allocation6 + $0x7a0] sm:$0xff] }
0x1040   :  { %v7517_v27 = vpack.c.bf16 %v6605_v3, %v6603_v16 }
0x1041   :  { %6534 = vmatmul.mubr.f32.gmra.mrb[50].mxu1 %v14461_v30  ;;  %v7493_v30 = vpack.c.bf16 %v6581_v4, %v6579_v12 }
0x1042   :  { %7482 = vmatpush1.bf16.msra.mxu1 %v7481_v33  ;;  %6679 = vmatprep.mubr.f32.mxu1 %v14467_v58  ;;  %v6585_v58 = vld [vmem:[#allocation6 + $0x710] sm:$0xff]  ;;  %v7519_v33 = vpack.c.bf16 %v6610_v23, %v6608_v50 }
0x1043   :  { %7484 = vmatprep.subr.bf16.mxu1 %v7483_v11  ;;  %v7497_v2 = vpack.c.bf16 %v6585_v58, %v6583_v10  ;;  %v6607_v11 = vld [vmem:[#allocation6 + $0x7c0] sm:$0xff] }
0x1044   :  { %v7521_v14 = vpack.c.bf16 %v6609_v26, %v6607_v11 }
0x1046   :  { %7486 = vmatpush1.bf16.msra.mxu1 %v7485_v31  ;;  %v7523_v31 = vpack.c.bf16 %v6614_v32, %v6612_v19 }
0x1047   :  { %7488 = vmatprep.subr.bf16.mxu1 %v7487_v61  ;;  %v6611_v61 = vld [vmem:[#allocation6 + $0x7e0] sm:$0xff] }
0x1048   :  { %v7525_v15 = vpack.c.bf16 %v6613_v25, %v6611_v61 }
0x104a   :  { %7490 = vmatpush1.bf16.msra.mxu1 %v7489_v62 }
0x104b   :  { %7492 = vmatprep.subr.bf16.mxu1 %v7491_v44 }
0x104e   :  { %7494 = vmatpush1.bf16.msra.mxu1 %v7493_v30 }
0x104f   :  { %7496 = vmatprep.subr.bf16.mxu1 %v7495_v46 }
0x1052   :  { %7498 = vmatpush1.bf16.msra.mxu1 %v7497_v2 }
0x1053   :  { %7500 = vmatprep.subr.bf16.mxu1 %v7499_v42 }
0x1056   :  { %7502 = vmatpush1.bf16.msra.mxu1 %v7501_v24 }
0x1057   :  { %7504 = vmatprep.subr.bf16.mxu1 %v7503_v41 }
0x105a   :  { %7506 = vmatpush1.bf16.msra.mxu1 %v7505_v38 }
0x105b   :  { %7508 = vmatprep.subr.bf16.mxu1 %v7507_v63 }
0x105e   :  { %7510 = vmatpush1.bf16.msra.mxu1 %v7509_v0 }
0x105f   :  { %7512 = vmatprep.subr.bf16.mxu1 %v7511_v35 }
0x1062   :  { %7514 = vmatpush1.bf16.msra.mxu1 %v7513_v36 }
0x1063   :  { %7516 = vmatprep.subr.bf16.mxu1 %v7515_v9 }
0x1066   :  { %7518 = vmatpush1.bf16.msra.mxu1 %v7517_v27 }
0x1067   :  { %7520 = vmatprep.subr.bf16.mxu1 %v7519_v33 }
0x106a   :  { %7522 = vmatpush1.bf16.msra.mxu1 %v7521_v14 }
0x106b   :  { %7524 = vmatprep.subr.bf16.mxu1 %v7523_v31 }
0x106e   :  { %7526 = vmatpush1.bf16.msra.mxu1 %v7525_v15 }
0x1071   :  { %6680 = vmatmul.mubr.f32.vlgmr.msra.gmra.mrb[42].mxu1 %v14465_v18 }
0x1072   :  { %6685 = vmatprep.mubr.f32.mxu1 %v14472_v47 }
0x1075   :  { %6686 = vmatmul.mubr.f32.gmra.mrb[44].mxu1 %v14469_v5 }
0x1076   :  { %6691 = vmatprep.mubr.f32.mxu1 %v14478_v13 }
0x1079   :  { %6692 = vmatmul.mubr.f32.gmra.mrb[46].mxu1 %v14475_v51 }
0x107a   :  { %6697 = vmatprep.mubr.f32.mxu1 %v14484_v45 }
0x107d   :  { %6698 = vmatmul.mubr.f32.gmra.mrb[48].mxu1 %v14481_v28 }
0x107e   :  { %6703 = vmatprep.mubr.f32.mxu1 %v14490_v20 }
0x1081   :  { %6704 = vmatmul.mubr.f32.gmra.mrb[50].mxu1 %v14487_v53 }
0x1082   :  { %7982 = shalt.err (!%p7979_p7)
}
0x1083   :  { %s7983_s19 = scalar_lea.hbm %s14571_s15, 16 }
0x1084   :  { %p7984_p8 = scmp.ne.s32.totalorder %s14571_s15, %s7983_s19  ;;  %p7987_p9 = scmp.lt.u32.totalorder %s7983_s19, %s14571_s15 }
0x1086   :  { %p7989_p10 = pnand %p7987_p9, %p7984_p8 }
0x1088   :  { %7992 = shalt.err (!%p7989_p10)
}
0x1089   :  { %6793 = dma.vmem_to_hbm [thread:$0]  %s6791_s13, 16, %s14571_s15, [#allocation4]  }
0x108a   :  { %s6880_s22 = sld [smem:[#allocation11 + $0x3]]  ;;  %s15574_s2 = sld [smem:[#allocation37_spill]] }
0x1090   :  { %v6721_v18 = vstv %s6880_s22 }
0x1144   :  { %v6681_v5 = vpop.f32.mrb[42].mxu1 }
0x1145   :  { %v6722_v47 = vadd.f32 %v6721_v18, %v6681_v5  ;;  %v6683_v51 = vpop.f32.mrb[43].mxu1 }
0x1146   :  { %v6723_v13 = vadd.f32 %v6721_v18, %v6683_v51 }
0x1147   :  { %v6732_v28 = vmul.f32 0.5, %v6722_v47 }
0x1148   :  { %v6733_v45 = vmul.f32 0.5, %v6723_v13  ;;  %v6687_v53 = vpop.f32.mrb[44].mxu1 }
0x1149   :  { %7871 = vtanh.f32 %v6732_v28  ;;  %v6724_v20 = vadd.f32 %v6721_v18, %v6687_v53  ;;  %v6689_v52 = vpop.f32.mrb[45].mxu1 }
0x114a   :  { %7873 = vtanh.f32 %v6733_v45  ;;  %v6725_v54 = vadd.f32 %v6721_v18, %v6689_v52 }
0x114b   :  { %v6734_v62 = vmul.f32 0.5, %v6724_v20 }
0x114c   :  { %v6735_v44 = vmul.f32 0.5, %v6725_v54  ;;  %v6693_v12 = vpop.f32.mrb[46].mxu1 }
0x114d   :  { %7875 = vtanh.f32 %v6734_v62  ;;  %v6726_v4 = vadd.f32 %v6721_v18, %v6693_v12  ;;  %v6695_v43 = vpop.f32.mrb[47].mxu1 }
0x114e   :  { %7877 = vtanh.f32 %v6735_v44  ;;  %v6727_v1 = vadd.f32 %v6721_v18, %v6695_v43 }
0x114f   :  { %v6736_v30 = vmul.f32 0.5, %v6726_v4 }
0x1150   :  { %v6737_v46 = vmul.f32 0.5, %v6727_v1  ;;  %v6699_v10 = vpop.f32.mrb[48].mxu1 }
0x1151   :  { %7879 = vtanh.f32 %v6736_v30  ;;  %v6728_v58 = vadd.f32 %v6721_v18, %v6699_v10  ;;  %v6701_v37 = vpop.f32.mrb[49].mxu1 }
0x1152   :  { %7881 = vtanh.f32 %v6737_v46  ;;  %v6729_v8 = vadd.f32 %v6721_v18, %v6701_v37 }
0x1153   :  { %v7872_v2 = vpop.eup %7871  ;;  %v6738_v42 = vmul.f32 0.5, %v6728_v58 }
0x1154   :  { %v7874_v49 = vpop.eup %7873  ;;  %v6752_v17 = vadd.f32 1.0, %v7872_v2  ;;  %v6739_v21 = vmul.f32 0.5, %v6729_v8  ;;  %v6705_v34 = vpop.f32.mrb[50].mxu1 }
0x1155   :  { %v6753_v24 = vadd.f32 1.0, %v7874_v49  ;;  %7883 = vtanh.f32 %v6738_v42  ;;  %v6730_v41 = vadd.f32 %v6721_v18, %v6705_v34  ;;  %v6707_v39 = vpop.f32.mrb[51].mxu1 }
0x1156   :  { %v6762_v6 = vmul.f32 0.5, %v6752_v17  ;;  %7885 = vtanh.f32 %v6739_v21  ;;  %v6731_v56 = vadd.f32 %v6721_v18, %v6707_v39 }
0x1157   :  { %v7876_v55 = vpop.eup %7875  ;;  %v6763_v38 = vmul.f32 0.5, %v6753_v24  ;;  %v6740_v63 = vmul.f32 0.5, %v6730_v41 }
0x1158   :  { %v7878_v29 = vpop.eup %7877  ;;  %6772 = vst [vmem:[%s15574_s2] sm:$0xff] %v6762_v6  ;;  %v6754_v40 = vadd.f32 1.0, %v7876_v55  ;;  %v6741_v57 = vmul.f32 0.5, %v6731_v56 }
0x1159   :  { %6773 = vst [vmem:[%s15574_s2 + $0x8] sm:$0xff] %v6763_v38  ;;  %v6755_v59 = vadd.f32 1.0, %v7878_v29  ;;  %7887 = vtanh.f32 %v6740_v63 }
0x115a   :  { %v6764_v0 = vmul.f32 0.5, %v6754_v40  ;;  %7889 = vtanh.f32 %v6741_v57 }
0x115b   :  { %v7880_v35 = vpop.eup %7879  ;;  %v6765_v7 = vmul.f32 0.5, %v6755_v59 }
0x115c   :  { %v7882_v22 = vpop.eup %7881  ;;  %6774 = vst [vmem:[%s15574_s2 + $0x10] sm:$0xff] %v6764_v0  ;;  %v6756_v60 = vadd.f32 1.0, %v7880_v35 }
0x115d   :  { %6775 = vst [vmem:[%s15574_s2 + $0x18] sm:$0xff] %v6765_v7  ;;  %v6757_v48 = vadd.f32 1.0, %v7882_v22 }
0x115e   :  { %v6766_v36 = vmul.f32 0.5, %v6756_v60 }
0x115f   :  { %v7884_v9 = vpop.eup %7883  ;;  %v6767_v16 = vmul.f32 0.5, %v6757_v48 }
0x1160   :  { %v7886_v3 = vpop.eup %7885  ;;  %6776 = vst [vmem:[%s15574_s2 + $0x20] sm:$0xff] %v6766_v36  ;;  %v6758_v50 = vadd.f32 1.0, %v7884_v9 }
0x1161   :  { %6777 = vst [vmem:[%s15574_s2 + $0x28] sm:$0xff] %v6767_v16  ;;  %v6759_v23 = vadd.f32 1.0, %v7886_v3 }
0x1162   :  { %v6768_v27 = vmul.f32 0.5, %v6758_v50 }
0x1163   :  { %v7888_v33 = vpop.eup %7887  ;;  %v6769_v11 = vmul.f32 0.5, %v6759_v23 }
0x1164   :  { %v7890_v26 = vpop.eup %7889  ;;  %6778 = vst [vmem:[%s15574_s2 + $0x30] sm:$0xff] %v6768_v27  ;;  %v6760_v19 = vadd.f32 1.0, %v7888_v33 }
0x1165   :  { %6779 = vst [vmem:[%s15574_s2 + $0x38] sm:$0xff] %v6769_v11  ;;  %v6761_v32 = vadd.f32 1.0, %v7890_v26 }
0x1166   :  { %v6770_v14 = vmul.f32 0.5, %v6760_v19 }
0x1167   :  { %v6771_v31 = vmul.f32 0.5, %v6761_v32 }
0x1168   :  { %6780 = vst [vmem:[%s15574_s2 + $0x40] sm:$0xff] %v6770_v14 }
0x1169   :  { %6781 = vst [vmem:[%s15574_s2 + $0x48] sm:$0xff] %v6771_v31 }
0x116a   :  { %8001 = dma.done.wait [#allocation4], 16  }
0x116b   :  { %8002 = vsyncadd [#allocation4], 4294967280 }
0x116c   :  { %6799 = vsyncpa [#allocation3], 1 }
0x116d   :  { %6800 = vsyncpa [#allocation7], 1 }
0x116e   :  { %6801 = vsyncpa [#allocation4], 1 }
0x116f   :  { %6802 = vsyncpa [#allocation5], 1 }
0x1170   :  { %6803 = vsyncpa [#allocation10], 1 }

</bundles_post_ra>
